<compile_context>
chip_gen: v7x
topology: tpu7x:2x2x1
jax: 0.10.0
libtpu: 0.0.40
codegen_flags: <defaults>
</compile_context>

<pallas_src>
import math

import jax
import jax.numpy as jnp
from jax.experimental import pallas as pl
from jax.experimental.pallas import tpu as pltpu

# ---------------------------------------------------------------------------
# Module hyperparameters (fixed by the PyTorch module) + small test shapes
# ---------------------------------------------------------------------------
D_MODEL = 512
D_FF = 2048
NUM_HEADS = 8
D_K = D_MODEL // NUM_HEADS          # 64
EPS = 1e-6
NEG_INF = 1.0e9                     # PyTorch module uses -1 * 1e9

BATCH = 2
SEQ_LEN = 8


# ---------------------------------------------------------------------------
# Fused encoder-layer kernel: one invocation processes all B*S tokens.
# Refs: x (BS, D) f32, mask (BS, BS) f32, LN/bias params f32, weights bf16.
# ---------------------------------------------------------------------------
def _encoder_layer_kernel(
        x_ref, mask_ref,
        ln1_g_ref, ln1_b_ref,
        w_qkv_ref, b_qkv_ref,
        w_o_ref, b_o_ref,
        ln2_g_ref, ln2_b_ref,
        w_1_ref, b_1_ref,
        w_2_ref, b_2_ref,
        o_ref,
        attn_ref):                                            # VMEM scratch (BS, D) f32
    x = x_ref[...]                                            # (BS, D) f32

    # ---- LayerNorm 1 -------------------------------------------------------
    mu = jnp.mean(x, axis=-1, keepdims=True)
    var = jnp.mean(jnp.square(x - mu), axis=-1, keepdims=True)
    x1 = (x - mu) * jax.lax.rsqrt(var + EPS) * ln1_g_ref[...] + ln1_b_ref[...]

    # ---- fused Q/K/V projection: bf16 operands, f32 accumulation -----------
    # 1/sqrt(d_k) is already folded into the Q columns of w_qkv / b_qkv.
    qkv = (jnp.dot(x1.astype(jnp.bfloat16), w_qkv_ref[...],
                   preferred_element_type=jnp.float32)
           + b_qkv_ref[...])                                  # (BS, 3D) f32
    q = qkv[:, 0:D_MODEL]
    k = qkv[:, D_MODEL:2 * D_MODEL]
    v = qkv[:, 2 * D_MODEL:3 * D_MODEL]

    # Combined block-diagonal (same-batch) + key-padding mask over all BS keys.
    invalid = mask_ref[...] == 0.0                            # (BS, BS) bool

    # ---- multi-head attention over the full token slab ---------------------
    # TODO(synk): per-head 64-lane slices are lane-unaligned for odd heads; at
    # realistic S switch to a 128-lane-aligned / batched-head formulation.
    for h in range(NUM_HEADS):                                # static unroll (8)
        sl = slice(h * D_K, (h + 1) * D_K)
        qh, kh, vh = q[:, sl], k[:, sl], v[:, sl]             # (BS, D_K) f32
        s = jax.lax.dot_general(qh, kh, (((1,), (1,)), ((), ())),
                                preferred_element_type=jnp.float32)   # (BS, BS)
        s = jnp.where(invalid, -NEG_INF, s)
        m = jnp.max(s, axis=-1, keepdims=True)
        p = jnp.exp(s - m)
        p = p * pl.reciprocal(jnp.sum(p, axis=-1, keepdims=True), approx=False)
        attn_ref[:, sl] = jnp.dot(p, vh, preferred_element_type=jnp.float32)

    # ---- output projection + fused residual add ----------------------------
    y = (jnp.dot(attn_ref[...].astype(jnp.bfloat16), w_o_ref[...],
                 preferred_element_type=jnp.float32)
         + b_o_ref[...] + x)

    # ---- LayerNorm 2 -------------------------------------------------------
    mu2 = jnp.mean(y, axis=-1, keepdims=True)
    var2 = jnp.mean(jnp.square(y - mu2), axis=-1, keepdims=True)
    y2 = (y - mu2) * jax.lax.rsqrt(var2 + EPS) * ln2_g_ref[...] + ln2_b_ref[...]

    # ---- feed-forward (ReLU) + fused residual add ---------------------------
    h1 = jnp.maximum(
        jnp.dot(y2.astype(jnp.bfloat16), w_1_ref[...],
                preferred_element_type=jnp.float32)
        + b_1_ref[...], 0.0)                                  # (BS, D_FF) f32
    o_ref[...] = (jnp.dot(h1.astype(jnp.bfloat16), w_2_ref[...],
                          preferred_element_type=jnp.float32)
                  + b_2_ref[...] + y)


# ---------------------------------------------------------------------------
# Wrapper: single grid-less pallas_call for the whole layer.
# ---------------------------------------------------------------------------
def encoder_layer_forward(params, x, e_mask):
    B, S, D = x.shape
    BS = B * S
    x2d = x.reshape(BS, D).astype(jnp.float32)

    # Combined attention mask over the flattened B*S keys:
    #   valid[i, j] = (token i and token j are in the same batch) AND key j kept.
    key_valid = (e_mask.reshape(B, S) != 0).reshape(BS)                # (BS,)
    batch_ids = jnp.repeat(jnp.arange(B, dtype=jnp.int32), S)          # (BS,)
    same_batch = batch_ids[:, None] == batch_ids[None, :]              # (BS, BS)
    mask_f = (same_batch & key_valid[None, :]).astype(jnp.float32)     # (BS, BS)

    # Fold 1/sqrt(d_k) into the Q columns (exact: 1/8 is a power of two), so the
    # kernel needs no per-step scale multiply.  Done once in the wrapper (XLA),
    # outside the kernel hot path.
    q_scale = jnp.concatenate([
        jnp.full((D_MODEL,), 1.0 / math.sqrt(D_K), jnp.float32),
        jnp.ones((2 * D_MODEL,), jnp.float32)])
    w_qkv = (params["w_qkv"].astype(jnp.float32) * q_scale).astype(jnp.bfloat16)
    b_qkv = params["b_qkv"] * q_scale                                  # f32

    out2d = pl.pallas_call(
        _encoder_layer_kernel,
        out_shape=jax.ShapeDtypeStruct((BS, D), jnp.float32),
        # No grid: one invocation, full arrays resident in VMEM, weights fetched
        # from HBM exactly once, no double buffering, single TensorCore
        # (intentional for this weight-DMA-bound tiny-batch shape).
        scratch_shapes=[pltpu.VMEM((BS, D_MODEL), jnp.float32)],
    )(x2d, mask_f,
      params["ln1_g"], params["ln1_b"],
      w_qkv, b_qkv,
      params["w_o"], params["b_o"],
      params["ln2_g"], params["ln2_b"],
      params["w_1"], params["b_1"],
      params["w_2"], params["b_2"])

    return out2d.reshape(B, S, D)


# ---------------------------------------------------------------------------
# Parameter init (PyTorch-default-like uniform); weights stored as (in, out).
# Large matmul weights are stored in bfloat16 (per the perf review); biases and
# LayerNorm affine params stay float32.
# ---------------------------------------------------------------------------
def _uniform(key, shape, bound):
    return jax.random.uniform(key, shape, jnp.float32, -bound, bound)


def init_params(key):
    ks = jax.random.split(key, 8)
    bd = 1.0 / math.sqrt(D_MODEL)
    bf = 1.0 / math.sqrt(D_FF)
    return {
        "ln1_g": jnp.ones((1, D_MODEL), jnp.float32),
        "ln1_b": jnp.zeros((1, D_MODEL), jnp.float32),
        "w_qkv": _uniform(ks[0], (D_MODEL, 3 * D_MODEL), bd).astype(jnp.bfloat16),
        "b_qkv": _uniform(ks[1], (1, 3 * D_MODEL), bd),
        "w_o": _uniform(ks[2], (D_MODEL, D_MODEL), bd).astype(jnp.bfloat16),
        "b_o": _uniform(ks[3], (1, D_MODEL), bd),
        "ln2_g": jnp.ones((1, D_MODEL), jnp.float32),
        "ln2_b": jnp.zeros((1, D_MODEL), jnp.float32),
        "w_1": _uniform(ks[4], (D_MODEL, D_FF), bd).astype(jnp.bfloat16),
        "b_1": _uniform(ks[5], (1, D_FF), bd),
        "w_2": _uniform(ks[6], (D_FF, D_MODEL), bf).astype(jnp.bfloat16),
        "b_2": _uniform(ks[7], (1, D_MODEL), bf),
    }


# ---------------------------------------------------------------------------
# Pure-JAX reference (mirrors the PyTorch forward exactly, f32 math, weights
# upcast from their stored bf16 values) for validation.
# ---------------------------------------------------------------------------
def encoder_layer_reference(params, x, e_mask):
    hp = jax.lax.Precision.HIGHEST
    B, S, D = x.shape
    f32 = lambda t: t.astype(jnp.float32)

    def ln(g, b, t):
        mu = jnp.mean(t, axis=-1, keepdims=True)
        var = jnp.mean(jnp.square(t - mu), axis=-1, keepdims=True)
        return (t - mu) / jnp.sqrt(var + EPS) * g.reshape(-1) + b.reshape(-1)

    x1 = ln(params["ln1_g"], params["ln1_b"], x)
    qkv = (jnp.einsum("bsd,df->bsf", x1, f32(params["w_qkv"]), precision=hp)
           + params["b_qkv"].reshape(-1))
    q, k, v = jnp.split(qkv, 3, axis=-1)
    split = lambda t: t.reshape(B, S, NUM_HEADS, D_K).transpose(0, 2, 1, 3)
    q, k, v = split(q), split(k), split(v)
    scores = jnp.einsum("bhqd,bhkd->bhqk", q, k, precision=hp) / math.sqrt(D_K)
    scores = jnp.where(e_mask.reshape(B, 1, 1, S) == 0, -NEG_INF, scores)
    attn = jax.nn.softmax(scores, axis=-1)
    ctx = jnp.einsum("bhqk,bhkd->bhqd", attn, v, precision=hp)
    ctx = ctx.transpose(0, 2, 1, 3).reshape(B, S, D)
    x = x + (jnp.einsum("bsd,de->bse", ctx, f32(params["w_o"]), precision=hp)
             + params["b_o"].reshape(-1))
    x2 = ln(params["ln2_g"], params["ln2_b"], x)
    h = jax.nn.relu(jnp.einsum("bsd,df->bsf", x2, f32(params["w_1"]), precision=hp)
                    + params["b_1"].reshape(-1))
    x = x + (jnp.einsum("bsf,fd->bsd", h, f32(params["w_2"]), precision=hp)
             + params["b_2"].reshape(-1))
    return x


# ---------------------------------------------------------------------------
if __name__ == "__main__":
    key = jax.random.PRNGKey(0)
    kp, kx = jax.random.split(key)

    params = init_params(kp)
    x = jax.random.normal(kx, (BATCH, SEQ_LEN, D_MODEL), jnp.float32)
    # Padding mask (B, 1, S): batch 0 uses all positions, batch 1 pads last 2.
    lengths = jnp.array([SEQ_LEN, SEQ_LEN - 2], dtype=jnp.int32)
    e_mask = jnp.arange(SEQ_LEN)[None, None, :] < lengths[:, None, None]

    fwd = jax.jit(encoder_layer_forward)
    out = jax.block_until_ready(fwd(params, x, e_mask))

    assert out.shape == (BATCH, SEQ_LEN, D_MODEL)
    assert out.dtype == jnp.float32
    assert bool(jnp.all(jnp.isfinite(out)))

    ref = encoder_layer_reference(params, x, e_mask)
    max_err = float(jnp.max(jnp.abs(out - ref)))
    assert max_err < 2e-2, f"kernel vs reference max abs err {max_err}"

    print("KERNEL_OK")
</pallas_src>

<mosaic_0001>
module attributes {stable_mosaic.version = 11 : i64} {
  func.func @_encoder_layer_kernel(%arg0: memref<16x512xf32, #tpu.memory_space<vmem>>, %arg1: memref<16x16xf32, #tpu.memory_space<vmem>>, %arg2: memref<1x512xf32, #tpu.memory_space<vmem>>, %arg3: memref<1x512xf32, #tpu.memory_space<vmem>>, %arg4: memref<512x1536xbf16, #tpu.memory_space<vmem>>, %arg5: memref<1x1536xf32, #tpu.memory_space<vmem>>, %arg6: memref<512x512xbf16, #tpu.memory_space<vmem>>, %arg7: memref<1x512xf32, #tpu.memory_space<vmem>>, %arg8: memref<1x512xf32, #tpu.memory_space<vmem>>, %arg9: memref<1x512xf32, #tpu.memory_space<vmem>>, %arg10: memref<512x2048xbf16, #tpu.memory_space<vmem>>, %arg11: memref<1x2048xf32, #tpu.memory_space<vmem>>, %arg12: memref<2048x512xbf16, #tpu.memory_space<vmem>>, %arg13: memref<1x512xf32, #tpu.memory_space<vmem>>, %arg14: memref<16x512xf32, #tpu.memory_space<vmem>>, %arg15: memref<16x512xf32, #tpu.memory_space<vmem>>) attributes {dimension_semantics = [], scalar_prefetch = 0 : i64, scratch_operands = 1 : i64, tpu.core_type = #tpu.core_type<tc>} {
    %c0 = arith.constant 0 : index
    %c0_0 = arith.constant 0 : index
    %0 = vector.load %arg0[%c0, %c0_0] : memref<16x512xf32, #tpu.memory_space<vmem>>, vector<16x512xf32>
    %cst = arith.constant dense<0.000000e+00> : vector<16xf32>
    %1 = vector.multi_reduction <add>, %0, %cst [1] : vector<16x512xf32> to vector<16xf32>
    %2 = vector.shape_cast %1 : vector<16xf32> to vector<16x1xf32>
    %cst_1 = arith.constant 5.120000e+02 : f32
    %3 = vector.broadcast %cst_1 : f32 to vector<16x1xf32>
    %4 = arith.divf %2, %3 : vector<16x1xf32>
    %5 = vector.broadcast %4 : vector<16x1xf32> to vector<16x512xf32>
    %6 = arith.subf %0, %5 : vector<16x512xf32>
    %7 = arith.mulf %6, %6 : vector<16x512xf32>
    %cst_2 = arith.constant dense<0.000000e+00> : vector<16xf32>
    %8 = vector.multi_reduction <add>, %7, %cst_2 [1] : vector<16x512xf32> to vector<16xf32>
    %9 = vector.shape_cast %8 : vector<16xf32> to vector<16x1xf32>
    %cst_3 = arith.constant 5.120000e+02 : f32
    %10 = vector.broadcast %cst_3 : f32 to vector<16x1xf32>
    %11 = arith.divf %9, %10 : vector<16x1xf32>
    %12 = vector.broadcast %4 : vector<16x1xf32> to vector<16x512xf32>
    %13 = arith.subf %0, %12 : vector<16x512xf32>
    %cst_4 = arith.constant 9.99999997E-7 : f32
    %14 = vector.broadcast %cst_4 : f32 to vector<16x1xf32>
    %15 = arith.addf %11, %14 : vector<16x1xf32>
    %16 = math.rsqrt %15 : vector<16x1xf32>
    %17 = vector.broadcast %16 : vector<16x1xf32> to vector<16x512xf32>
    %18 = arith.mulf %13, %17 : vector<16x512xf32>
    %c0_5 = arith.constant 0 : index
    %c0_6 = arith.constant 0 : index
    %19 = vector.load %arg2[%c0_5, %c0_6] : memref<1x512xf32, #tpu.memory_space<vmem>>, vector<1x512xf32>
    %20 = vector.broadcast %19 : vector<1x512xf32> to vector<16x512xf32>
    %21 = arith.mulf %18, %20 : vector<16x512xf32>
    %c0_7 = arith.constant 0 : index
    %c0_8 = arith.constant 0 : index
    %22 = vector.load %arg3[%c0_7, %c0_8] : memref<1x512xf32, #tpu.memory_space<vmem>>, vector<1x512xf32>
    %23 = vector.broadcast %22 : vector<1x512xf32> to vector<16x512xf32>
    %24 = arith.addf %21, %23 : vector<16x512xf32>
    %25 = arith.truncf %24 : vector<16x512xf32> to vector<16x512xbf16>
    %c0_9 = arith.constant 0 : index
    %c0_10 = arith.constant 0 : index
    %26 = vector.load %arg4[%c0_9, %c0_10] : memref<512x1536xbf16, #tpu.memory_space<vmem>>, vector<512x1536xbf16>
    %cst_11 = arith.constant dense<0.000000e+00> : vector<16x1536xf32>
    %27 = tpu.matmul %25, %26, %cst_11 {dimension_numbers = #tpu.dot_dimension_numbers<[1], [0], [0], [1], [0, 0, 1, 1], [], []>} : vector<16x512xbf16>, vector<512x1536xbf16>, vector<16x1536xf32> -> vector<16x1536xf32>
    %c0_12 = arith.constant 0 : index
    %c0_13 = arith.constant 0 : index
    %28 = vector.load %arg5[%c0_12, %c0_13] : memref<1x1536xf32, #tpu.memory_space<vmem>>, vector<1x1536xf32>
    %29 = vector.broadcast %28 : vector<1x1536xf32> to vector<16x1536xf32>
    %30 = arith.addf %27, %29 : vector<16x1536xf32>
    %31 = vector.extract_strided_slice %30 {offsets = [0, 0], sizes = [16, 512], strides = [1, 1]} : vector<16x1536xf32> to vector<16x512xf32>
    %32 = vector.extract_strided_slice %30 {offsets = [0, 512], sizes = [16, 512], strides = [1, 1]} : vector<16x1536xf32> to vector<16x512xf32>
    %33 = vector.extract_strided_slice %30 {offsets = [0, 1024], sizes = [16, 512], strides = [1, 1]} : vector<16x1536xf32> to vector<16x512xf32>
    %c0_14 = arith.constant 0 : index
    %c0_15 = arith.constant 0 : index
    %34 = vector.load %arg1[%c0_14, %c0_15] : memref<16x16xf32, #tpu.memory_space<vmem>>, vector<16x16xf32>
    %cst_16 = arith.constant 0.000000e+00 : f32
    %35 = vector.broadcast %cst_16 : f32 to vector<16x16xf32>
    %36 = arith.cmpf oeq, %34, %35 : vector<16x16xf32>
    %37 = vector.extract_strided_slice %31 {offsets = [0, 0], sizes = [16, 64], strides = [1, 1]} : vector<16x512xf32> to vector<16x64xf32>
    %38 = vector.extract_strided_slice %32 {offsets = [0, 0], sizes = [16, 64], strides = [1, 1]} : vector<16x512xf32> to vector<16x64xf32>
    %39 = vector.extract_strided_slice %33 {offsets = [0, 0], sizes = [16, 64], strides = [1, 1]} : vector<16x512xf32> to vector<16x64xf32>
    %cst_17 = arith.constant dense<0.000000e+00> : vector<16x16xf32>
    %40 = tpu.matmul %37, %38, %cst_17 {dimension_numbers = #tpu.dot_dimension_numbers<[1], [1], [0], [0], [0, 0, 1, 0], [], []>} : vector<16x64xf32>, vector<16x64xf32>, vector<16x16xf32> -> vector<16x16xf32>
    %cst_18 = arith.constant -1.000000e+09 : f32
    %41 = vector.broadcast %cst_18 : f32 to vector<16x16xf32>
    %42 = arith.select %36, %41, %40 : vector<16x16xi1>, vector<16x16xf32>
    %cst_19 = arith.constant dense<0xFF800000> : vector<16xf32>
    %43 = vector.multi_reduction <maximumf>, %42, %cst_19 [1] : vector<16x16xf32> to vector<16xf32>
    %44 = vector.shape_cast %43 : vector<16xf32> to vector<16x1xf32>
    %45 = vector.broadcast %44 : vector<16x1xf32> to vector<16x16xf32>
    %46 = arith.subf %42, %45 : vector<16x16xf32>
    %47 = math.exp %46 : vector<16x16xf32>
    %cst_20 = arith.constant dense<0.000000e+00> : vector<16xf32>
    %48 = vector.multi_reduction <add>, %47, %cst_20 [1] : vector<16x16xf32> to vector<16xf32>
    %49 = vector.shape_cast %48 : vector<16xf32> to vector<16x1xf32>
    %50 = tpu.reciprocal %49 : vector<16x1xf32> -> vector<16x1xf32>
    %51 = vector.broadcast %50 : vector<16x1xf32> to vector<16x16xf32>
    %52 = arith.mulf %47, %51 : vector<16x16xf32>
    %cst_21 = arith.constant dense<0.000000e+00> : vector<16x64xf32>
    %53 = tpu.matmul %52, %39, %cst_21 {dimension_numbers = #tpu.dot_dimension_numbers<[1], [0], [0], [1], [0, 0, 1, 1], [], []>} : vector<16x16xf32>, vector<16x64xf32>, vector<16x64xf32> -> vector<16x64xf32>
    %c0_22 = arith.constant 0 : index
    %c0_23 = arith.constant 0 : index
    %54 = vector.load %arg15[%c0_22, %c0_23] : memref<16x512xf32, #tpu.memory_space<vmem>>, vector<16x64xf32>
    tpu.vector_store %arg15[%c0_22, %c0_23], %53 {strides = array<i32>} : memref<16x512xf32, #tpu.memory_space<vmem>>, vector<16x64xf32>,
    %55 = vector.extract_strided_slice %31 {offsets = [0, 64], sizes = [16, 64], strides = [1, 1]} : vector<16x512xf32> to vector<16x64xf32>
    %56 = vector.extract_strided_slice %32 {offsets = [0, 64], sizes = [16, 64], strides = [1, 1]} : vector<16x512xf32> to vector<16x64xf32>
    %57 = vector.extract_strided_slice %33 {offsets = [0, 64], sizes = [16, 64], strides = [1, 1]} : vector<16x512xf32> to vector<16x64xf32>
    %cst_24 = arith.constant dense<0.000000e+00> : vector<16x16xf32>
    %58 = tpu.matmul %55, %56, %cst_24 {dimension_numbers = #tpu.dot_dimension_numbers<[1], [1], [0], [0], [0, 0, 1, 0], [], []>} : vector<16x64xf32>, vector<16x64xf32>, vector<16x16xf32> -> vector<16x16xf32>
    %cst_25 = arith.constant -1.000000e+09 : f32
    %59 = vector.broadcast %cst_25 : f32 to vector<16x16xf32>
    %60 = arith.select %36, %59, %58 : vector<16x16xi1>, vector<16x16xf32>
    %cst_26 = arith.constant dense<0xFF800000> : vector<16xf32>
    %61 = vector.multi_reduction <maximumf>, %60, %cst_26 [1] : vector<16x16xf32> to vector<16xf32>
    %62 = vector.shape_cast %61 : vector<16xf32> to vector<16x1xf32>
    %63 = vector.broadcast %62 : vector<16x1xf32> to vector<16x16xf32>
    %64 = arith.subf %60, %63 : vector<16x16xf32>
    %65 = math.exp %64 : vector<16x16xf32>
    %cst_27 = arith.constant dense<0.000000e+00> : vector<16xf32>
    %66 = vector.multi_reduction <add>, %65, %cst_27 [1] : vector<16x16xf32> to vector<16xf32>
    %67 = vector.shape_cast %66 : vector<16xf32> to vector<16x1xf32>
    %68 = tpu.reciprocal %67 : vector<16x1xf32> -> vector<16x1xf32>
    %69 = vector.broadcast %68 : vector<16x1xf32> to vector<16x16xf32>
    %70 = arith.mulf %65, %69 : vector<16x16xf32>
    %cst_28 = arith.constant dense<0.000000e+00> : vector<16x64xf32>
    %71 = tpu.matmul %70, %57, %cst_28 {dimension_numbers = #tpu.dot_dimension_numbers<[1], [0], [0], [1], [0, 0, 1, 1], [], []>} : vector<16x16xf32>, vector<16x64xf32>, vector<16x64xf32> -> vector<16x64xf32>
    %c0_29 = arith.constant 0 : index
    %c64 = arith.constant 64 : index
    %72 = vector.load %arg15[%c0_29, %c64] : memref<16x512xf32, #tpu.memory_space<vmem>>, vector<16x64xf32>
    tpu.vector_store %arg15[%c0_29, %c64], %71 {strides = array<i32>} : memref<16x512xf32, #tpu.memory_space<vmem>>, vector<16x64xf32>,
    %73 = vector.extract_strided_slice %31 {offsets = [0, 128], sizes = [16, 64], strides = [1, 1]} : vector<16x512xf32> to vector<16x64xf32>
    %74 = vector.extract_strided_slice %32 {offsets = [0, 128], sizes = [16, 64], strides = [1, 1]} : vector<16x512xf32> to vector<16x64xf32>
    %75 = vector.extract_strided_slice %33 {offsets = [0, 128], sizes = [16, 64], strides = [1, 1]} : vector<16x512xf32> to vector<16x64xf32>
    %cst_30 = arith.constant dense<0.000000e+00> : vector<16x16xf32>
    %76 = tpu.matmul %73, %74, %cst_30 {dimension_numbers = #tpu.dot_dimension_numbers<[1], [1], [0], [0], [0, 0, 1, 0], [], []>} : vector<16x64xf32>, vector<16x64xf32>, vector<16x16xf32> -> vector<16x16xf32>
    %cst_31 = arith.constant -1.000000e+09 : f32
    %77 = vector.broadcast %cst_31 : f32 to vector<16x16xf32>
    %78 = arith.select %36, %77, %76 : vector<16x16xi1>, vector<16x16xf32>
    %cst_32 = arith.constant dense<0xFF800000> : vector<16xf32>
    %79 = vector.multi_reduction <maximumf>, %78, %cst_32 [1] : vector<16x16xf32> to vector<16xf32>
    %80 = vector.shape_cast %79 : vector<16xf32> to vector<16x1xf32>
    %81 = vector.broadcast %80 : vector<16x1xf32> to vector<16x16xf32>
    %82 = arith.subf %78, %81 : vector<16x16xf32>
    %83 = math.exp %82 : vector<16x16xf32>
    %cst_33 = arith.constant dense<0.000000e+00> : vector<16xf32>
    %84 = vector.multi_reduction <add>, %83, %cst_33 [1] : vector<16x16xf32> to vector<16xf32>
    %85 = vector.shape_cast %84 : vector<16xf32> to vector<16x1xf32>
    %86 = tpu.reciprocal %85 : vector<16x1xf32> -> vector<16x1xf32>
    %87 = vector.broadcast %86 : vector<16x1xf32> to vector<16x16xf32>
    %88 = arith.mulf %83, %87 : vector<16x16xf32>
    %cst_34 = arith.constant dense<0.000000e+00> : vector<16x64xf32>
    %89 = tpu.matmul %88, %75, %cst_34 {dimension_numbers = #tpu.dot_dimension_numbers<[1], [0], [0], [1], [0, 0, 1, 1], [], []>} : vector<16x16xf32>, vector<16x64xf32>, vector<16x64xf32> -> vector<16x64xf32>
    %c0_35 = arith.constant 0 : index
    %c128 = arith.constant 128 : index
    %90 = vector.load %arg15[%c0_35, %c128] : memref<16x512xf32, #tpu.memory_space<vmem>>, vector<16x64xf32>
    tpu.vector_store %arg15[%c0_35, %c128], %89 {strides = array<i32>} : memref<16x512xf32, #tpu.memory_space<vmem>>, vector<16x64xf32>,
    %91 = vector.extract_strided_slice %31 {offsets = [0, 192], sizes = [16, 64], strides = [1, 1]} : vector<16x512xf32> to vector<16x64xf32>
    %92 = vector.extract_strided_slice %32 {offsets = [0, 192], sizes = [16, 64], strides = [1, 1]} : vector<16x512xf32> to vector<16x64xf32>
    %93 = vector.extract_strided_slice %33 {offsets = [0, 192], sizes = [16, 64], strides = [1, 1]} : vector<16x512xf32> to vector<16x64xf32>
    %cst_36 = arith.constant dense<0.000000e+00> : vector<16x16xf32>
    %94 = tpu.matmul %91, %92, %cst_36 {dimension_numbers = #tpu.dot_dimension_numbers<[1], [1], [0], [0], [0, 0, 1, 0], [], []>} : vector<16x64xf32>, vector<16x64xf32>, vector<16x16xf32> -> vector<16x16xf32>
    %cst_37 = arith.constant -1.000000e+09 : f32
    %95 = vector.broadcast %cst_37 : f32 to vector<16x16xf32>
    %96 = arith.select %36, %95, %94 : vector<16x16xi1>, vector<16x16xf32>
    %cst_38 = arith.constant dense<0xFF800000> : vector<16xf32>
    %97 = vector.multi_reduction <maximumf>, %96, %cst_38 [1] : vector<16x16xf32> to vector<16xf32>
    %98 = vector.shape_cast %97 : vector<16xf32> to vector<16x1xf32>
    %99 = vector.broadcast %98 : vector<16x1xf32> to vector<16x16xf32>
    %100 = arith.subf %96, %99 : vector<16x16xf32>
    %101 = math.exp %100 : vector<16x16xf32>
    %cst_39 = arith.constant dense<0.000000e+00> : vector<16xf32>
    %102 = vector.multi_reduction <add>, %101, %cst_39 [1] : vector<16x16xf32> to vector<16xf32>
    %103 = vector.shape_cast %102 : vector<16xf32> to vector<16x1xf32>
    %104 = tpu.reciprocal %103 : vector<16x1xf32> -> vector<16x1xf32>
    %105 = vector.broadcast %104 : vector<16x1xf32> to vector<16x16xf32>
    %106 = arith.mulf %101, %105 : vector<16x16xf32>
    %cst_40 = arith.constant dense<0.000000e+00> : vector<16x64xf32>
    %107 = tpu.matmul %106, %93, %cst_40 {dimension_numbers = #tpu.dot_dimension_numbers<[1], [0], [0], [1], [0, 0, 1, 1], [], []>} : vector<16x16xf32>, vector<16x64xf32>, vector<16x64xf32> -> vector<16x64xf32>
    %c0_41 = arith.constant 0 : index
    %c192 = arith.constant 192 : index
    %108 = vector.load %arg15[%c0_41, %c192] : memref<16x512xf32, #tpu.memory_space<vmem>>, vector<16x64xf32>
    tpu.vector_store %arg15[%c0_41, %c192], %107 {strides = array<i32>} : memref<16x512xf32, #tpu.memory_space<vmem>>, vector<16x64xf32>,
    %109 = vector.extract_strided_slice %31 {offsets = [0, 256], sizes = [16, 64], strides = [1, 1]} : vector<16x512xf32> to vector<16x64xf32>
    %110 = vector.extract_strided_slice %32 {offsets = [0, 256], sizes = [16, 64], strides = [1, 1]} : vector<16x512xf32> to vector<16x64xf32>
    %111 = vector.extract_strided_slice %33 {offsets = [0, 256], sizes = [16, 64], strides = [1, 1]} : vector<16x512xf32> to vector<16x64xf32>
    %cst_42 = arith.constant dense<0.000000e+00> : vector<16x16xf32>
    %112 = tpu.matmul %109, %110, %cst_42 {dimension_numbers = #tpu.dot_dimension_numbers<[1], [1], [0], [0], [0, 0, 1, 0], [], []>} : vector<16x64xf32>, vector<16x64xf32>, vector<16x16xf32> -> vector<16x16xf32>
    %cst_43 = arith.constant -1.000000e+09 : f32
    %113 = vector.broadcast %cst_43 : f32 to vector<16x16xf32>
    %114 = arith.select %36, %113, %112 : vector<16x16xi1>, vector<16x16xf32>
    %cst_44 = arith.constant dense<0xFF800000> : vector<16xf32>
    %115 = vector.multi_reduction <maximumf>, %114, %cst_44 [1] : vector<16x16xf32> to vector<16xf32>
    %116 = vector.shape_cast %115 : vector<16xf32> to vector<16x1xf32>
    %117 = vector.broadcast %116 : vector<16x1xf32> to vector<16x16xf32>
    %118 = arith.subf %114, %117 : vector<16x16xf32>
    %119 = math.exp %118 : vector<16x16xf32>
    %cst_45 = arith.constant dense<0.000000e+00> : vector<16xf32>
    %120 = vector.multi_reduction <add>, %119, %cst_45 [1] : vector<16x16xf32> to vector<16xf32>
    %121 = vector.shape_cast %120 : vector<16xf32> to vector<16x1xf32>
    %122 = tpu.reciprocal %121 : vector<16x1xf32> -> vector<16x1xf32>
    %123 = vector.broadcast %122 : vector<16x1xf32> to vector<16x16xf32>
    %124 = arith.mulf %119, %123 : vector<16x16xf32>
    %cst_46 = arith.constant dense<0.000000e+00> : vector<16x64xf32>
    %125 = tpu.matmul %124, %111, %cst_46 {dimension_numbers = #tpu.dot_dimension_numbers<[1], [0], [0], [1], [0, 0, 1, 1], [], []>} : vector<16x16xf32>, vector<16x64xf32>, vector<16x64xf32> -> vector<16x64xf32>
    %c0_47 = arith.constant 0 : index
    %c256 = arith.constant 256 : index
    %126 = vector.load %arg15[%c0_47, %c256] : memref<16x512xf32, #tpu.memory_space<vmem>>, vector<16x64xf32>
    tpu.vector_store %arg15[%c0_47, %c256], %125 {strides = array<i32>} : memref<16x512xf32, #tpu.memory_space<vmem>>, vector<16x64xf32>,
    %127 = vector.extract_strided_slice %31 {offsets = [0, 320], sizes = [16, 64], strides = [1, 1]} : vector<16x512xf32> to vector<16x64xf32>
    %128 = vector.extract_strided_slice %32 {offsets = [0, 320], sizes = [16, 64], strides = [1, 1]} : vector<16x512xf32> to vector<16x64xf32>
    %129 = vector.extract_strided_slice %33 {offsets = [0, 320], sizes = [16, 64], strides = [1, 1]} : vector<16x512xf32> to vector<16x64xf32>
    %cst_48 = arith.constant dense<0.000000e+00> : vector<16x16xf32>
    %130 = tpu.matmul %127, %128, %cst_48 {dimension_numbers = #tpu.dot_dimension_numbers<[1], [1], [0], [0], [0, 0, 1, 0], [], []>} : vector<16x64xf32>, vector<16x64xf32>, vector<16x16xf32> -> vector<16x16xf32>
    %cst_49 = arith.constant -1.000000e+09 : f32
    %131 = vector.broadcast %cst_49 : f32 to vector<16x16xf32>
    %132 = arith.select %36, %131, %130 : vector<16x16xi1>, vector<16x16xf32>
    %cst_50 = arith.constant dense<0xFF800000> : vector<16xf32>
    %133 = vector.multi_reduction <maximumf>, %132, %cst_50 [1] : vector<16x16xf32> to vector<16xf32>
    %134 = vector.shape_cast %133 : vector<16xf32> to vector<16x1xf32>
    %135 = vector.broadcast %134 : vector<16x1xf32> to vector<16x16xf32>
    %136 = arith.subf %132, %135 : vector<16x16xf32>
    %137 = math.exp %136 : vector<16x16xf32>
    %cst_51 = arith.constant dense<0.000000e+00> : vector<16xf32>
    %138 = vector.multi_reduction <add>, %137, %cst_51 [1] : vector<16x16xf32> to vector<16xf32>
    %139 = vector.shape_cast %138 : vector<16xf32> to vector<16x1xf32>
    %140 = tpu.reciprocal %139 : vector<16x1xf32> -> vector<16x1xf32>
    %141 = vector.broadcast %140 : vector<16x1xf32> to vector<16x16xf32>
    %142 = arith.mulf %137, %141 : vector<16x16xf32>
    %cst_52 = arith.constant dense<0.000000e+00> : vector<16x64xf32>
    %143 = tpu.matmul %142, %129, %cst_52 {dimension_numbers = #tpu.dot_dimension_numbers<[1], [0], [0], [1], [0, 0, 1, 1], [], []>} : vector<16x16xf32>, vector<16x64xf32>, vector<16x64xf32> -> vector<16x64xf32>
    %c0_53 = arith.constant 0 : index
    %c320 = arith.constant 320 : index
    %144 = vector.load %arg15[%c0_53, %c320] : memref<16x512xf32, #tpu.memory_space<vmem>>, vector<16x64xf32>
    tpu.vector_store %arg15[%c0_53, %c320], %143 {strides = array<i32>} : memref<16x512xf32, #tpu.memory_space<vmem>>, vector<16x64xf32>,
    %145 = vector.extract_strided_slice %31 {offsets = [0, 384], sizes = [16, 64], strides = [1, 1]} : vector<16x512xf32> to vector<16x64xf32>
    %146 = vector.extract_strided_slice %32 {offsets = [0, 384], sizes = [16, 64], strides = [1, 1]} : vector<16x512xf32> to vector<16x64xf32>
    %147 = vector.extract_strided_slice %33 {offsets = [0, 384], sizes = [16, 64], strides = [1, 1]} : vector<16x512xf32> to vector<16x64xf32>
    %cst_54 = arith.constant dense<0.000000e+00> : vector<16x16xf32>
    %148 = tpu.matmul %145, %146, %cst_54 {dimension_numbers = #tpu.dot_dimension_numbers<[1], [1], [0], [0], [0, 0, 1, 0], [], []>} : vector<16x64xf32>, vector<16x64xf32>, vector<16x16xf32> -> vector<16x16xf32>
    %cst_55 = arith.constant -1.000000e+09 : f32
    %149 = vector.broadcast %cst_55 : f32 to vector<16x16xf32>
    %150 = arith.select %36, %149, %148 : vector<16x16xi1>, vector<16x16xf32>
    %cst_56 = arith.constant dense<0xFF800000> : vector<16xf32>
    %151 = vector.multi_reduction <maximumf>, %150, %cst_56 [1] : vector<16x16xf32> to vector<16xf32>
    %152 = vector.shape_cast %151 : vector<16xf32> to vector<16x1xf32>
    %153 = vector.broadcast %152 : vector<16x1xf32> to vector<16x16xf32>
    %154 = arith.subf %150, %153 : vector<16x16xf32>
    %155 = math.exp %154 : vector<16x16xf32>
    %cst_57 = arith.constant dense<0.000000e+00> : vector<16xf32>
    %156 = vector.multi_reduction <add>, %155, %cst_57 [1] : vector<16x16xf32> to vector<16xf32>
    %157 = vector.shape_cast %156 : vector<16xf32> to vector<16x1xf32>
    %158 = tpu.reciprocal %157 : vector<16x1xf32> -> vector<16x1xf32>
    %159 = vector.broadcast %158 : vector<16x1xf32> to vector<16x16xf32>
    %160 = arith.mulf %155, %159 : vector<16x16xf32>
    %cst_58 = arith.constant dense<0.000000e+00> : vector<16x64xf32>
    %161 = tpu.matmul %160, %147, %cst_58 {dimension_numbers = #tpu.dot_dimension_numbers<[1], [0], [0], [1], [0, 0, 1, 1], [], []>} : vector<16x16xf32>, vector<16x64xf32>, vector<16x64xf32> -> vector<16x64xf32>
    %c0_59 = arith.constant 0 : index
    %c384 = arith.constant 384 : index
    %162 = vector.load %arg15[%c0_59, %c384] : memref<16x512xf32, #tpu.memory_space<vmem>>, vector<16x64xf32>
    tpu.vector_store %arg15[%c0_59, %c384], %161 {strides = array<i32>} : memref<16x512xf32, #tpu.memory_space<vmem>>, vector<16x64xf32>,
    %163 = vector.extract_strided_slice %31 {offsets = [0, 448], sizes = [16, 64], strides = [1, 1]} : vector<16x512xf32> to vector<16x64xf32>
    %164 = vector.extract_strided_slice %32 {offsets = [0, 448], sizes = [16, 64], strides = [1, 1]} : vector<16x512xf32> to vector<16x64xf32>
    %165 = vector.extract_strided_slice %33 {offsets = [0, 448], sizes = [16, 64], strides = [1, 1]} : vector<16x512xf32> to vector<16x64xf32>
    %cst_60 = arith.constant dense<0.000000e+00> : vector<16x16xf32>
    %166 = tpu.matmul %163, %164, %cst_60 {dimension_numbers = #tpu.dot_dimension_numbers<[1], [1], [0], [0], [0, 0, 1, 0], [], []>} : vector<16x64xf32>, vector<16x64xf32>, vector<16x16xf32> -> vector<16x16xf32>
    %cst_61 = arith.constant -1.000000e+09 : f32
    %167 = vector.broadcast %cst_61 : f32 to vector<16x16xf32>
    %168 = arith.select %36, %167, %166 : vector<16x16xi1>, vector<16x16xf32>
    %cst_62 = arith.constant dense<0xFF800000> : vector<16xf32>
    %169 = vector.multi_reduction <maximumf>, %168, %cst_62 [1] : vector<16x16xf32> to vector<16xf32>
    %170 = vector.shape_cast %169 : vector<16xf32> to vector<16x1xf32>
    %171 = vector.broadcast %170 : vector<16x1xf32> to vector<16x16xf32>
    %172 = arith.subf %168, %171 : vector<16x16xf32>
    %173 = math.exp %172 : vector<16x16xf32>
    %cst_63 = arith.constant dense<0.000000e+00> : vector<16xf32>
    %174 = vector.multi_reduction <add>, %173, %cst_63 [1] : vector<16x16xf32> to vector<16xf32>
    %175 = vector.shape_cast %174 : vector<16xf32> to vector<16x1xf32>
    %176 = tpu.reciprocal %175 : vector<16x1xf32> -> vector<16x1xf32>
    %177 = vector.broadcast %176 : vector<16x1xf32> to vector<16x16xf32>
    %178 = arith.mulf %173, %177 : vector<16x16xf32>
    %cst_64 = arith.constant dense<0.000000e+00> : vector<16x64xf32>
    %179 = tpu.matmul %178, %165, %cst_64 {dimension_numbers = #tpu.dot_dimension_numbers<[1], [0], [0], [1], [0, 0, 1, 1], [], []>} : vector<16x16xf32>, vector<16x64xf32>, vector<16x64xf32> -> vector<16x64xf32>
    %c0_65 = arith.constant 0 : index
    %c448 = arith.constant 448 : index
    %180 = vector.load %arg15[%c0_65, %c448] : memref<16x512xf32, #tpu.memory_space<vmem>>, vector<16x64xf32>
    tpu.vector_store %arg15[%c0_65, %c448], %179 {strides = array<i32>} : memref<16x512xf32, #tpu.memory_space<vmem>>, vector<16x64xf32>,
    %c0_66 = arith.constant 0 : index
    %c0_67 = arith.constant 0 : index
    %181 = vector.load %arg15[%c0_66, %c0_67] : memref<16x512xf32, #tpu.memory_space<vmem>>, vector<16x512xf32>
    %182 = arith.truncf %181 : vector<16x512xf32> to vector<16x512xbf16>
    %c0_68 = arith.constant 0 : index
    %c0_69 = arith.constant 0 : index
    %183 = vector.load %arg6[%c0_68, %c0_69] : memref<512x512xbf16, #tpu.memory_space<vmem>>, vector<512x512xbf16>
    %cst_70 = arith.constant dense<0.000000e+00> : vector<16x512xf32>
    %184 = tpu.matmul %182, %183, %cst_70 {dimension_numbers = #tpu.dot_dimension_numbers<[1], [0], [0], [1], [0, 0, 1, 1], [], []>} : vector<16x512xbf16>, vector<512x512xbf16>, vector<16x512xf32> -> vector<16x512xf32>
    %c0_71 = arith.constant 0 : index
    %c0_72 = arith.constant 0 : index
    %185 = vector.load %arg7[%c0_71, %c0_72] : memref<1x512xf32, #tpu.memory_space<vmem>>, vector<1x512xf32>
    %186 = vector.broadcast %185 : vector<1x512xf32> to vector<16x512xf32>
    %187 = arith.addf %184, %186 : vector<16x512xf32>
    %188 = arith.addf %187, %0 : vector<16x512xf32>
    %cst_73 = arith.constant dense<0.000000e+00> : vector<16xf32>
    %189 = vector.multi_reduction <add>, %188, %cst_73 [1] : vector<16x512xf32> to vector<16xf32>
    %190 = vector.shape_cast %189 : vector<16xf32> to vector<16x1xf32>
    %cst_74 = arith.constant 5.120000e+02 : f32
    %191 = vector.broadcast %cst_74 : f32 to vector<16x1xf32>
    %192 = arith.divf %190, %191 : vector<16x1xf32>
    %193 = vector.broadcast %192 : vector<16x1xf32> to vector<16x512xf32>
    %194 = arith.subf %188, %193 : vector<16x512xf32>
    %195 = arith.mulf %194, %194 : vector<16x512xf32>
    %cst_75 = arith.constant dense<0.000000e+00> : vector<16xf32>
    %196 = vector.multi_reduction <add>, %195, %cst_75 [1] : vector<16x512xf32> to vector<16xf32>
    %197 = vector.shape_cast %196 : vector<16xf32> to vector<16x1xf32>
    %cst_76 = arith.constant 5.120000e+02 : f32
    %198 = vector.broadcast %cst_76 : f32 to vector<16x1xf32>
    %199 = arith.divf %197, %198 : vector<16x1xf32>
    %200 = vector.broadcast %192 : vector<16x1xf32> to vector<16x512xf32>
    %201 = arith.subf %188, %200 : vector<16x512xf32>
    %cst_77 = arith.constant 9.99999997E-7 : f32
    %202 = vector.broadcast %cst_77 : f32 to vector<16x1xf32>
    %203 = arith.addf %199, %202 : vector<16x1xf32>
    %204 = math.rsqrt %203 : vector<16x1xf32>
    %205 = vector.broadcast %204 : vector<16x1xf32> to vector<16x512xf32>
    %206 = arith.mulf %201, %205 : vector<16x512xf32>
    %c0_78 = arith.constant 0 : index
    %c0_79 = arith.constant 0 : index
    %207 = vector.load %arg8[%c0_78, %c0_79] : memref<1x512xf32, #tpu.memory_space<vmem>>, vector<1x512xf32>
    %208 = vector.broadcast %207 : vector<1x512xf32> to vector<16x512xf32>
    %209 = arith.mulf %206, %208 : vector<16x512xf32>
    %c0_80 = arith.constant 0 : index
    %c0_81 = arith.constant 0 : index
    %210 = vector.load %arg9[%c0_80, %c0_81] : memref<1x512xf32, #tpu.memory_space<vmem>>, vector<1x512xf32>
    %211 = vector.broadcast %210 : vector<1x512xf32> to vector<16x512xf32>
    %212 = arith.addf %209, %211 : vector<16x512xf32>
    %213 = arith.truncf %212 : vector<16x512xf32> to vector<16x512xbf16>
    %c0_82 = arith.constant 0 : index
    %c0_83 = arith.constant 0 : index
    %214 = vector.load %arg10[%c0_82, %c0_83] : memref<512x2048xbf16, #tpu.memory_space<vmem>>, vector<512x2048xbf16>
    %cst_84 = arith.constant dense<0.000000e+00> : vector<16x2048xf32>
    %215 = tpu.matmul %213, %214, %cst_84 {dimension_numbers = #tpu.dot_dimension_numbers<[1], [0], [0], [1], [0, 0, 1, 1], [], []>} : vector<16x512xbf16>, vector<512x2048xbf16>, vector<16x2048xf32> -> vector<16x2048xf32>
    %c0_85 = arith.constant 0 : index
    %c0_86 = arith.constant 0 : index
    %216 = vector.load %arg11[%c0_85, %c0_86] : memref<1x2048xf32, #tpu.memory_space<vmem>>, vector<1x2048xf32>
    %217 = vector.broadcast %216 : vector<1x2048xf32> to vector<16x2048xf32>
    %218 = arith.addf %215, %217 : vector<16x2048xf32>
    %cst_87 = arith.constant 0.000000e+00 : f32
    %219 = vector.broadcast %cst_87 : f32 to vector<16x2048xf32>
    %220 = arith.maximumf %218, %219 : vector<16x2048xf32>
    %221 = arith.truncf %220 : vector<16x2048xf32> to vector<16x2048xbf16>
    %c0_88 = arith.constant 0 : index
    %c0_89 = arith.constant 0 : index
    %222 = vector.load %arg12[%c0_88, %c0_89] : memref<2048x512xbf16, #tpu.memory_space<vmem>>, vector<2048x512xbf16>
    %cst_90 = arith.constant dense<0.000000e+00> : vector<16x512xf32>
    %223 = tpu.matmul %221, %222, %cst_90 {dimension_numbers = #tpu.dot_dimension_numbers<[1], [0], [0], [1], [0, 0, 1, 1], [], []>} : vector<16x2048xbf16>, vector<2048x512xbf16>, vector<16x512xf32> -> vector<16x512xf32>
    %c0_91 = arith.constant 0 : index
    %c0_92 = arith.constant 0 : index
    %224 = vector.load %arg13[%c0_91, %c0_92] : memref<1x512xf32, #tpu.memory_space<vmem>>, vector<1x512xf32>
    %225 = vector.broadcast %224 : vector<1x512xf32> to vector<16x512xf32>
    %226 = arith.addf %223, %225 : vector<16x512xf32>
    %227 = arith.addf %226, %188 : vector<16x512xf32>
    %c0_93 = arith.constant 0 : index
    %c0_94 = arith.constant 0 : index
    %228 = vector.load %arg14[%c0_93, %c0_94] : memref<16x512xf32, #tpu.memory_space<vmem>>, vector<16x512xf32>
    tpu.vector_store %arg14[%c0_93, %c0_94], %227 {strides = array<i32>} : memref<16x512xf32, #tpu.memory_space<vmem>>, vector<16x512xf32>,
    return
  }
}

</mosaic_0001>

<bundles_post_ra>
// kernel: eq.8
= control target key start
LH: loop header
LB: loop body
LE: loop exit
PB: predicated region body
PF: predicated region fallthrough
CT: control target
= control target key end

     0   :  { %vm7_vm0 = vcmask 64512   ;;  %vm13_vm1 = vcmask 130112   ;;  %s39_s0 = inlined_call_operand.vmem [shape: s32[2,8], index: 0, kind: input, shape index: {}]   ;;  %s40_s1 = inlined_call_operand.vmem [shape: s32[16], index: 1, kind: output, shape index: {}]  }
   0x1   :  { %v4_v0 = vld [vmem:[%s39_s0] sm:$0x3]  ;;  %s22_s0 = smov 8  }
   0x2   :  { %5 = vst [vmem:[#allocation1] sm:$0x3] %v4_v0 }
   0x9   :  { %v10_v1 = vld [vmem:[#allocation1 + $0x1] sm:$0x1]   ;;  %v6_v2 = vld [vmem:[#allocation1] sm:$0x1]  }
   0xa   :  { %11 = vrot.lane.b32.xlu0 %v10_v1, %s22_s0  ;;  %8 = vst.msk [vmem:[#allocation0] sm:$0x1] %vm7_vm0, %v6_v2  }
  0x7c   :  { %v12_v3 = vpop.permute.xlu0 %11  }
  0x7d   :  { %14 = vst.msk [vmem:[#allocation0] sm:$0x1] %vm13_vm1, %v12_v3  }
  0x84   :  { %v18_v4 = vld [vmem:[#allocation0] sm:$0x1] }
  0x85   :  { %20 = vst [vmem:[%s40_s1] sm:$0x1] %v18_v4 }

// kernel: mul.9
= control target key start
LH: loop header
LB: loop body
LE: loop exit
PB: predicated region body
PF: predicated region fallthrough
CT: control target
= control target key end

     0   :  { %3 = vsyncpa [#allocation1], 0  ;;  %s280_s0 = inlined_call_operand.hbm [shape: f32[1,1536], index: 0, kind: input, shape index: {}]   ;;  %s281_s1 = inlined_call_operand.hbm [shape: f32[1,1536], index: 1, kind: input, shape index: {}]   ;;  %s282_s2 = inlined_call_operand.vmem [shape: f32[1,1536], index: 2, kind: output, shape index: {}]  }
   0x1   :  { %4 = vsyncpa [#allocation3], 0  ;;  %s203_s9 = smov [#allocation0]   ;;  %s204_s11 = smov [#allocation2]  }
   0x2   :  { %s9_s10 = sshll.u32 %s203_s9, 4  ;;  %s17_s12 = sshll.u32 %s204_s11, 4  ;;  %s10_s10 = int_to_ptr.vmem [resolvable:$true] %s9_s10  ;;  %s18_s12 = int_to_ptr.vmem [resolvable:$true] %s17_s12 }
   0x3   :  { %s155_s15 = scalar_lea.hbm %s280_s0, 192 }
   0x4   :  { %p156_p0 = scmp.ne.s32.totalorder %s280_s0, %s155_s15  ;;  %p159_p1 = scmp.lt.u32.totalorder %s155_s15, %s280_s0 }
   0x6   :  { %p161_p2 = pnand %p159_p1, %p156_p0 }
   0x8   :  { %164 = shalt.err (!%p161_p2)
}
   0x9   :  { %s165_s20 = scalar_lea.vmem %s10_s10, 192  ;;  %p170_p4 = scmp.lt.s32.totalorder %s10_s10, %s10_s10 }
   0xa   :  { %p166_p3 = scmp.ne.s32.totalorder %s10_s10, %s165_s20  ;;  %p171_p5 = scmp.lt.s32.totalorder %s165_s20, %s165_s20 }
   0xc   :  { %p172_p6 = por %p171_p5, %p170_p4 }
   0xe   :  { %p173_p7 = pnand %p172_p6, %p166_p3 }
  0x10   :  { %176 = shalt.err (!%p173_p7)
}
  0x11   :  { %12 = dma.hbm_to_vmem [thread:$0]  %s280_s0, 192, %s10_s10, [#allocation1]  }
  0x12   :  { %s177_s24 = scalar_lea.hbm %s281_s1, 192 }
  0x13   :  { %p178_p8 = scmp.ne.s32.totalorder %s281_s1, %s177_s24  ;;  %p181_p9 = scmp.lt.u32.totalorder %s177_s24, %s281_s1 }
  0x15   :  { %p183_p10 = pnand %p181_p9, %p178_p8 }
  0x17   :  { %186 = shalt.err (!%p183_p10)
}
  0x18   :  { %s187_s29 = scalar_lea.vmem %s18_s12, 192  ;;  %p192_p12 = scmp.lt.s32.totalorder %s18_s12, %s18_s12 }
  0x19   :  { %p188_p11 = scmp.ne.s32.totalorder %s18_s12, %s187_s29  ;;  %p193_p13 = scmp.lt.s32.totalorder %s187_s29, %s187_s29 }
  0x1b   :  { %p194_p0 = por %p193_p13, %p192_p12 }
  0x1d   :  { %p195_p1 = pnand %p194_p0, %p188_p11 }
  0x1f   :  { %198 = shalt.err (!%p195_p1)
}
  0x20   :  { %20 = dma.hbm_to_vmem [thread:$0]  %s281_s1, 192, %s18_s12, [#allocation3]  }
  0x21   :  { %199 = dma.done.wait [#allocation1], 192  }
  0x22   :  { %200 = vsyncadd [#allocation1], 4294967104 }
  0x23   :  { %201 = dma.done.wait [#allocation3], 192  }
  0x24   :  { %202 = vsyncadd [#allocation3], 4294967104  ;;  %v23_v0 = vld [vmem:[#allocation0] sm:$0x1]  ;;  %v24_v1 = vld [vmem:[#allocation2] sm:$0x1] }
  0x25   :  { %v31_v2 = vld [vmem:[#allocation0 + $0x1] sm:$0x1]  ;;  %v27_v3 = vmul.f32 %v24_v1, %v23_v0  ;;  %v33_v4 = vld [vmem:[#allocation2 + $0x1] sm:$0x1]  ;;  %v41_v5 = vld [vmem:[#allocation0 + $0x2] sm:$0x1] }
  0x26   :  { %v43_v6 = vld [vmem:[#allocation2 + $0x2] sm:$0x1]  ;;  %v36_v7 = vmul.f32 %v33_v4, %v31_v2  ;;  %v51_v9 = vld [vmem:[#allocation0 + $0x3] sm:$0x1]  ;;  %v53_v10 = vld [vmem:[#allocation2 + $0x3] sm:$0x1] }
  0x27   :  { %v46_v8 = vmul.f32 %v43_v6, %v41_v5  ;;  %v61_v11 = vld [vmem:[#allocation0 + $0x4] sm:$0x1]  ;;  %29 = vst [vmem:[%s282_s2] sm:$0x1] %v27_v3  ;;  %v56_v12 = vmul.f32 %v53_v10, %v51_v9  ;;  %v63_v13 = vld [vmem:[#allocation2 + $0x4] sm:$0x1] }
  0x28   :  { %v71_v14 = vld [vmem:[#allocation0 + $0x5] sm:$0x1]  ;;  %v73_v15 = vld [vmem:[#allocation2 + $0x5] sm:$0x1]  ;;  %142 = vst [vmem:[%s282_s2 + $0x1] sm:$0x1] %v36_v7  ;;  %v66_v16 = vmul.f32 %v63_v13, %v61_v11 }
  0x29   :  { %143 = vst [vmem:[%s282_s2 + $0x2] sm:$0x1] %v46_v8  ;;  %v76_v17 = vmul.f32 %v73_v15, %v71_v14  ;;  %v81_v18 = vld [vmem:[#allocation0 + $0x6] sm:$0x1]  ;;  %v83_v19 = vld [vmem:[#allocation2 + $0x6] sm:$0x1] }
  0x2a   :  { %v91_v20 = vld [vmem:[#allocation0 + $0x7] sm:$0x1]  ;;  %144 = vst [vmem:[%s282_s2 + $0x3] sm:$0x1] %v56_v12  ;;  %v86_v21 = vmul.f32 %v83_v19, %v81_v18  ;;  %v93_v22 = vld [vmem:[#allocation2 + $0x7] sm:$0x1] }
  0x2b   :  { %v101_v23 = vld [vmem:[#allocation0 + $0x8] sm:$0x1]  ;;  %v103_v24 = vld [vmem:[#allocation2 + $0x8] sm:$0x1]  ;;  %145 = vst [vmem:[%s282_s2 + $0x4] sm:$0x1] %v66_v16  ;;  %v96_v25 = vmul.f32 %v93_v22, %v91_v20 }
  0x2c   :  { %146 = vst [vmem:[%s282_s2 + $0x5] sm:$0x1] %v76_v17  ;;  %v106_v26 = vmul.f32 %v103_v24, %v101_v23  ;;  %v111_v27 = vld [vmem:[#allocation0 + $0x9] sm:$0x1]  ;;  %v113_v28 = vld [vmem:[#allocation2 + $0x9] sm:$0x1] }
  0x2d   :  { %v121_v29 = vld [vmem:[#allocation0 + $0xa] sm:$0x1]  ;;  %147 = vst [vmem:[%s282_s2 + $0x6] sm:$0x1] %v86_v21  ;;  %v116_v30 = vmul.f32 %v113_v28, %v111_v27  ;;  %v123_v31 = vld [vmem:[#allocation2 + $0xa] sm:$0x1] }
  0x2e   :  { %v131_v32 = vld [vmem:[#allocation0 + $0xb] sm:$0x1]  ;;  %v133_v33 = vld [vmem:[#allocation2 + $0xb] sm:$0x1]  ;;  %148 = vst [vmem:[%s282_s2 + $0x7] sm:$0x1] %v96_v25  ;;  %v126_v34 = vmul.f32 %v123_v31, %v121_v29 }
  0x2f   :  { %149 = vst [vmem:[%s282_s2 + $0x8] sm:$0x1] %v106_v26  ;;  %v136_v35 = vmul.f32 %v133_v33, %v131_v32  ;;  %150 = vst [vmem:[%s282_s2 + $0x9] sm:$0x1] %v116_v30 }
  0x30   :  { %151 = vst [vmem:[%s282_s2 + $0xa] sm:$0x1] %v126_v34 }
  0x31   :  { %152 = vst [vmem:[%s282_s2 + $0xb] sm:$0x1] %v136_v35 }
  0x32   :  { %140 = vsyncpa [#allocation1], 1 }
  0x33   :  { %141 = vsyncpa [#allocation3], 1 }

// kernel: encoder_layer_forward.1
= control target key start
LH: loop header
LB: loop body
LE: loop exit
PB: predicated region body
PF: predicated region fallthrough
CT: control target
= control target key end

     0   :  { %19 = vsyncpa [#allocation4], 0  ;;  %s21271_s0 = inlined_call_operand.vmem [shape: f32[16,512], index: 0, kind: input, shape index: {}]   ;;  %s21272_s1 = inlined_call_operand.vmem [shape: f32[16,16], index: 1, kind: input, shape index: {}]   ;;  %s21273_s2 = inlined_call_operand.vmem [shape: f32[1,512], index: 2, kind: input, shape index: {}]   ;;  %s21274_s3 = inlined_call_operand.vmem [shape: f32[1,512], index: 3, kind: input, shape index: {}]   ;;  %s21275_s4 = inlined_call_operand.vmem [shape: bf16[512,1536], index: 4, kind: input, shape index: {}]   ;;  %s21276_s5 = inlined_call_operand.vmem [shape: f32[1,1536], index: 5, kind: input, shape index: {}]   ;;  %s21277_s6 = inlined_call_operand.vmem [shape: bf16[512,512], index: 6, kind: input, shape index: {}]   ;;  %s21278_s7 = inlined_call_operand.vmem [shape: f32[1,512], index: 7, kind: input, shape index: {}]   ;;  %s21279_s8 = inlined_call_operand.vmem [shape: f32[1,512], index: 8, kind: input, shape index: {}]   ;;  %s21280_s9 = inlined_call_operand.vmem [shape: f32[1,512], index: 9, kind: input, shape index: {}]   ;;  %s21281_s10 = inlined_call_operand.vmem [shape: bf16[512,2048], index: 10, kind: input, shape index: {}]   ;;  %s21282_s11 = inlined_call_operand.vmem [shape: f32[1,2048], index: 11, kind: input, shape index: {}]   ;;  %s21283_s12 = inlined_call_operand.hbm [shape: bf16[2048,512], index: 12, kind: input, shape index: {}]   ;;  %s21284_s13 = inlined_call_operand.vmem [shape: f32[1,512], index: 13, kind: input, shape index: {}]   ;;  %s21285_s14 = inlined_call_operand.hbm [shape: f32[16,512], index: 14, kind: output, shape index: {}]  }
   0x1   :  { %20 = vsyncpa [#allocation5], 0  ;;  %s17262_s29 = smov [#allocation3]   ;;  %s17214_s17 = scalar_lea.hbm %s21283_s12, 65536 }
   0x2   :  { %s50_s30 = sshll.u32 %s17262_s29, 4  ;;  %p17215_p0 = scmp.ne.s32.totalorder %s21283_s12, %s17214_s17  ;;  %s51_s30 = int_to_ptr.vmem [resolvable:$true] %s50_s30 }
   0x3   :  { %p17218_p1 = scmp.lt.u32.totalorder %s17214_s17, %s21283_s12 }
   0x5   :  { %p17220_p2 = pnand %p17218_p1, %p17215_p0 }
   0x7   :  { %17223 = shalt.err (!%p17220_p2)
}
   0x8   :  { %s17224_s22 = scalar_lea.vmem %s51_s30, 65536  ;;  %p17229_p4 = scmp.lt.s32.totalorder %s51_s30, %s51_s30 }
   0x9   :  { %p17225_p3 = scmp.ne.s32.totalorder %s51_s30, %s17224_s22  ;;  %p17230_p5 = scmp.lt.s32.totalorder %s17224_s22, %s17224_s22 }
   0xb   :  { %p17231_p6 = por %p17230_p5, %p17229_p4 }
   0xd   :  { %p17232_p7 = pnand %p17231_p6, %p17225_p3 }
   0xf   :  { %17235 = shalt.err (!%p17232_p7)
}
  0x10   :  { %s17263_s23 = smov 256   ;;  %s17264_s24 = smov 16  }
  0x11   :  { %56 = dma.hbm_to_vmem [thread:$0]  %s21283_s12, 65536, %s51_s30, [#allocation4], %s17263_s23, %s17263_s23, %s17264_s24  }
  0x12   :  { %17258 = dma.done.wait [#allocation4], 65536  }
  0x13   :  { %17259 = vsyncadd [#allocation4], 4294901760  ;;  %v17359_v0 = vld [vmem:[%s21271_s0] sm:$0xff]  ;;  %v17364_v1 = vld [vmem:[%s21271_s0 + $0x8] sm:$0xff]  ;;  %s17265_s28 = smov 64   ;;  %vm3075_vm0 = vcmask 523264  }
  0x14   :  { %v17369_v2 = vld [vmem:[%s21271_s0 + $0x10] sm:$0xff]  ;;  %v17374_v3 = vld [vmem:[%s21271_s0 + $0x18] sm:$0xff]  ;;  %v70_v4 = vadd.f32 %v17364_v1, %v17359_v0  ;;  %v66_v5 = vld [vmem:[%s21271_s0 + $0x20] sm:$0xff]  ;;  %vm3165_vm4 = vcmask 130048   ;;  %vm3483_vm5 = vcmask 1048064  }
  0x15   :  { %v67_v6 = vld [vmem:[%s21271_s0 + $0x28] sm:$0xff]  ;;  %v68_v7 = vld [vmem:[%s21271_s0 + $0x30] sm:$0xff]  ;;  %v69_v8 = vld [vmem:[%s21271_s0 + $0x38] sm:$0xff] }
  0x16   :  { %v75_v9 = vadd.f32 %v67_v6, %v66_v5  ;;  %v71_v10 = vadd.f32 %v70_v4, %v17369_v2  ;;  %v15594_v14 = vld [vmem:[%s21275_s4 + $0x4] ss:$48 sps:$4 sm:$0xff]   ;;  %v15596_v15 = vld [vmem:[%s21275_s4 + $0xc] ss:$48 sps:$4 sm:$0xff]   ;;  %v15598_v16 = vld [vmem:[%s21275_s4] ss:$48 sps:$4 sm:$0xff]  }
  0x17   :  { %v15599_v17 = vld [vmem:[%s21275_s4 + $0x8] ss:$48 sps:$4 sm:$0xff]   ;;  %v15600_v18 = vld [vmem:[%s21275_s4 + $0x64] ss:$48 sps:$4 sm:$0xff]   ;;  %v15602_v19 = vld [vmem:[%s21275_s4 + $0x6c] ss:$48 sps:$4 sm:$0xff]   ;;  %2555 = vmatprep.subr.bf16.mxu0 %v15594_v14  ;;  %2641 = vmatprep.subr.bf16.mxu1 %v15596_v15 }
  0x18   :  { %v76_v11 = vadd.f32 %v75_v9, %v68_v7  ;;  %v72_v12 = vadd.f32 %v71_v10, %v17374_v3  ;;  %2556 = vmatpush1.bf16.msra.mxu0 %v15598_v16  ;;  %2642 = vmatpush1.bf16.msra.mxu1 %v15599_v17  ;;  %v15604_v20 = vld [vmem:[%s21275_s4 + $0x60] ss:$48 sps:$4 sm:$0xff]   ;;  %v15605_v21 = vld [vmem:[%s21275_s4 + $0x68] ss:$48 sps:$4 sm:$0xff]   ;;  %v15606_v22 = vld [vmem:[%s21275_s4 + $0xc4] ss:$48 sps:$4 sm:$0xff]  }
  0x19   :  { %2557 = vmatprep.subr.bf16.mxu0 %v15600_v18  ;;  %2643 = vmatprep.subr.bf16.mxu1 %v15602_v19  ;;  %v15608_v23 = vld [vmem:[%s21275_s4 + $0xcc] ss:$48 sps:$4 sm:$0xff]   ;;  %v15610_v24 = vld [vmem:[%s21275_s4 + $0xc0] ss:$48 sps:$4 sm:$0xff]   ;;  %v15611_v25 = vld [vmem:[%s21275_s4 + $0xc8] ss:$48 sps:$4 sm:$0xff]  }
  0x1a   :  { %73 = vadd.xlane.f32.xlu0 %v72_v12  ;;  %v77_v13 = vadd.f32 %v76_v11, %v69_v8  ;;  %v15612_v26 = vld [vmem:[%s21275_s4 + $0x124] ss:$48 sps:$4 sm:$0xff]   ;;  %v15614_v27 = vld [vmem:[%s21275_s4 + $0x12c] ss:$48 sps:$4 sm:$0xff]   ;;  %v15616_v28 = vld [vmem:[%s21275_s4 + $0x120] ss:$48 sps:$4 sm:$0xff]  }
  0x1b   :  { %v15617_v29 = vld [vmem:[%s21275_s4 + $0x128] ss:$48 sps:$4 sm:$0xff]   ;;  %v15618_v30 = vld [vmem:[%s21275_s4 + $0x184] ss:$48 sps:$4 sm:$0xff]   ;;  %v15620_v31 = vld [vmem:[%s21275_s4 + $0x18c] ss:$48 sps:$4 sm:$0xff]  }
  0x1c   :  { %2558 = vmatpush1.bf16.msra.mxu0 %v15604_v20  ;;  %2644 = vmatpush1.bf16.msra.mxu1 %v15605_v21  ;;  %v15622_v32 = vld [vmem:[%s21275_s4 + $0x180] ss:$48 sps:$4 sm:$0xff]   ;;  %v15623_v33 = vld [vmem:[%s21275_s4 + $0x188] ss:$48 sps:$4 sm:$0xff]   ;;  %v15624_v34 = vld [vmem:[%s21275_s4 + $0x1e4] ss:$48 sps:$4 sm:$0xff]  }
  0x1d   :  { %2559 = vmatprep.subr.bf16.mxu0 %v15606_v22  ;;  %2645 = vmatprep.subr.bf16.mxu1 %v15608_v23  ;;  %v15626_v35 = vld [vmem:[%s21275_s4 + $0x1ec] ss:$48 sps:$4 sm:$0xff]   ;;  %v15628_v36 = vld [vmem:[%s21275_s4 + $0x1e0] ss:$48 sps:$4 sm:$0xff]   ;;  %v15629_v37 = vld [vmem:[%s21275_s4 + $0x1e8] ss:$48 sps:$4 sm:$0xff]  }
  0x1e   :  { %78 = vadd.xlane.f32.xlu0 %v77_v13  ;;  %v15630_v38 = vld [vmem:[%s21275_s4 + $0x244] ss:$48 sps:$4 sm:$0xff]   ;;  %v15632_v39 = vld [vmem:[%s21275_s4 + $0x24c] ss:$48 sps:$4 sm:$0xff]   ;;  %v15634_v40 = vld [vmem:[%s21275_s4 + $0x240] ss:$48 sps:$4 sm:$0xff]  }
  0x1f   :  { %v15635_v41 = vld [vmem:[%s21275_s4 + $0x248] ss:$48 sps:$4 sm:$0xff]   ;;  %v15636_v42 = vld [vmem:[%s21275_s4 + $0x2a4] ss:$48 sps:$4 sm:$0xff]   ;;  %v15638_v43 = vld [vmem:[%s21275_s4 + $0x2ac] ss:$48 sps:$4 sm:$0xff]  }
  0x20   :  { %2560 = vmatpush1.bf16.msra.mxu0 %v15610_v24  ;;  %2646 = vmatpush1.bf16.msra.mxu1 %v15611_v25  ;;  %v15640_v44 = vld [vmem:[%s21275_s4 + $0x2a0] ss:$48 sps:$4 sm:$0xff]   ;;  %v15641_v45 = vld [vmem:[%s21275_s4 + $0x2a8] ss:$48 sps:$4 sm:$0xff]   ;;  %v15642_v46 = vld [vmem:[%s21275_s4 + $0x304] ss:$48 sps:$4 sm:$0xff]  }
  0x21   :  { %2561 = vmatprep.subr.bf16.mxu0 %v15612_v26  ;;  %2647 = vmatprep.subr.bf16.mxu1 %v15614_v27  ;;  %v15644_v47 = vld [vmem:[%s21275_s4 + $0x30c] ss:$48 sps:$4 sm:$0xff]   ;;  %v15646_v48 = vld [vmem:[%s21275_s4 + $0x300] ss:$48 sps:$4 sm:$0xff]   ;;  %v15647_v49 = vld [vmem:[%s21275_s4 + $0x308] ss:$48 sps:$4 sm:$0xff]  }
  0x22   :  { %v15648_v50 = vld [vmem:[%s21275_s4 + $0x364] ss:$48 sps:$4 sm:$0xff]   ;;  %v15650_v51 = vld [vmem:[%s21275_s4 + $0x36c] ss:$48 sps:$4 sm:$0xff]   ;;  %v15652_v18 = vld [vmem:[%s21275_s4 + $0x360] ss:$48 sps:$4 sm:$0xff]  }
  0x23   :  { %v17202_v63 = vld [vmem:[%s21271_s0 + $0x20] sm:$0xff]  ;;  %v17204_v4 = vld [vmem:[%s21271_s0 + $0x30] sm:$0xff]  ;;  %v17205_v8 = vld [vmem:[%s21271_s0 + $0x38] sm:$0xff] }
  0x24   :  { %2562 = vmatpush1.bf16.msra.mxu0 %v15616_v28  ;;  %2648 = vmatpush1.bf16.msra.mxu1 %v15617_v29  ;;  %v15653_v19 = vld [vmem:[%s21275_s4 + $0x368] ss:$48 sps:$4 sm:$0xff]   ;;  %v15654_v20 = vld [vmem:[%s21275_s4 + $0x3c4] ss:$48 sps:$4 sm:$0xff]   ;;  %v15656_v21 = vld [vmem:[%s21275_s4 + $0x3cc] ss:$48 sps:$4 sm:$0xff]  }
  0x25   :  { %2563 = vmatprep.subr.bf16.mxu0 %v15618_v30  ;;  %2649 = vmatprep.subr.bf16.mxu1 %v15620_v31  ;;  %v15658_v22 = vld [vmem:[%s21275_s4 + $0x3c0] ss:$48 sps:$4 sm:$0xff]   ;;  %v15659_v23 = vld [vmem:[%s21275_s4 + $0x3c8] ss:$48 sps:$4 sm:$0xff]   ;;  %v15660_v24 = vld [vmem:[%s21275_s4 + $0x424] ss:$48 sps:$4 sm:$0xff]  }
  0x26   :  { %v15662_v25 = vld [vmem:[%s21275_s4 + $0x42c] ss:$48 sps:$4 sm:$0xff]   ;;  %v15664_v26 = vld [vmem:[%s21275_s4 + $0x420] ss:$48 sps:$4 sm:$0xff]   ;;  %v15665_v27 = vld [vmem:[%s21275_s4 + $0x428] ss:$48 sps:$4 sm:$0xff]  }
  0x27   :  { %v15666_v28 = vld [vmem:[%s21275_s4 + $0x484] ss:$48 sps:$4 sm:$0xff]   ;;  %v15668_v29 = vld [vmem:[%s21275_s4 + $0x48c] ss:$48 sps:$4 sm:$0xff]   ;;  %v15670_v30 = vld [vmem:[%s21275_s4 + $0x480] ss:$48 sps:$4 sm:$0xff]  }
  0x28   :  { %2564 = vmatpush1.bf16.msra.mxu0 %v15622_v32  ;;  %2650 = vmatpush1.bf16.msra.mxu1 %v15623_v33  ;;  %v15671_v31 = vld [vmem:[%s21275_s4 + $0x488] ss:$48 sps:$4 sm:$0xff]   ;;  %v15672_v32 = vld [vmem:[%s21275_s4 + $0x4e4] ss:$48 sps:$4 sm:$0xff]   ;;  %v15674_v33 = vld [vmem:[%s21275_s4 + $0x4ec] ss:$48 sps:$4 sm:$0xff]  }
  0x29   :  { %2565 = vmatprep.subr.bf16.mxu0 %v15624_v34  ;;  %2651 = vmatprep.subr.bf16.mxu1 %v15626_v35  ;;  %v15676_v34 = vld [vmem:[%s21275_s4 + $0x4e0] ss:$48 sps:$4 sm:$0xff]   ;;  %v15677_v35 = vld [vmem:[%s21275_s4 + $0x4e8] ss:$48 sps:$4 sm:$0xff]   ;;  %vm18734_vm1 = vmpackc.low %vm3075_vm0, %vm3075_vm0 }
  0x2c   :  { %2566 = vmatpush1.bf16.msra.mxu0 %v15628_v36  ;;  %2652 = vmatpush1.bf16.msra.mxu1 %v15629_v37  ;;  %v15678_v36 = vld [vmem:[%s21275_s4 + $0x544] ss:$48 sps:$4 sm:$0xff]   ;;  %v15680_v37 = vld [vmem:[%s21275_s4 + $0x54c] ss:$48 sps:$4 sm:$0xff]  }
  0x2d   :  { %2567 = vmatprep.subr.bf16.mxu0 %v15630_v38  ;;  %2653 = vmatprep.subr.bf16.mxu1 %v15632_v39  ;;  %v15682_v38 = vld [vmem:[%s21275_s4 + $0x540] ss:$48 sps:$4 sm:$0xff]   ;;  %v15683_v39 = vld [vmem:[%s21275_s4 + $0x548] ss:$48 sps:$4 sm:$0xff]  }
  0x30   :  { %2568 = vmatpush1.bf16.msra.mxu0 %v15634_v40  ;;  %2654 = vmatpush1.bf16.msra.mxu1 %v15635_v41  ;;  %v15684_v40 = vld [vmem:[%s21275_s4 + $0x5a4] ss:$48 sps:$4 sm:$0xff]   ;;  %v15686_v41 = vld [vmem:[%s21275_s4 + $0x5ac] ss:$48 sps:$4 sm:$0xff]  }
  0x31   :  { %2569 = vmatprep.subr.bf16.mxu0 %v15636_v42  ;;  %2655 = vmatprep.subr.bf16.mxu1 %v15638_v43  ;;  %v15688_v42 = vld [vmem:[%s21275_s4 + $0x5a0] ss:$48 sps:$4 sm:$0xff]   ;;  %v15689_v43 = vld [vmem:[%s21275_s4 + $0x5a8] ss:$48 sps:$4 sm:$0xff]  }
  0x34   :  { %2570 = vmatpush1.bf16.msra.mxu0 %v15640_v44  ;;  %2656 = vmatpush1.bf16.msra.mxu1 %v15641_v45  ;;  %v15692_v44 = vld [vmem:[%s21275_s4 + $0x604] ss:$48 sps:$4 sm:$0xff]   ;;  %v15695_v45 = vld [vmem:[%s21275_s4 + $0x60c] ss:$48 sps:$4 sm:$0xff]  }
  0x35   :  { %2571 = vmatprep.subr.bf16.mxu0 %v15642_v46  ;;  %2657 = vmatprep.subr.bf16.mxu1 %v15644_v47 }
  0x38   :  { %2572 = vmatpush1.bf16.msra.mxu0 %v15646_v48  ;;  %2658 = vmatpush1.bf16.msra.mxu1 %v15647_v49  ;;  %v125_v48 = vlaneseq }
  0x39   :  { %2573 = vmatprep.subr.bf16.mxu0 %v15648_v50  ;;  %2659 = vmatprep.subr.bf16.mxu1 %v15650_v51 }
  0x3c   :  { %2574 = vmatpush1.bf16.msra.mxu0 %v15652_v18  ;;  %2660 = vmatpush1.bf16.msra.mxu1 %v15653_v19 }
  0x3d   :  { %2575 = vmatprep.subr.bf16.mxu0 %v15654_v20  ;;  %2661 = vmatprep.subr.bf16.mxu1 %v15656_v21 }
  0x40   :  { %2576 = vmatpush1.bf16.msra.mxu0 %v15658_v22  ;;  %2662 = vmatpush1.bf16.msra.mxu1 %v15659_v23 }
  0x41   :  { %2577 = vmatprep.subr.bf16.mxu0 %v15660_v24  ;;  %2663 = vmatprep.subr.bf16.mxu1 %v15662_v25 }
  0x44   :  { %2578 = vmatpush1.bf16.msra.mxu0 %v15664_v26  ;;  %2664 = vmatpush1.bf16.msra.mxu1 %v15665_v27 }
  0x45   :  { %2579 = vmatprep.subr.bf16.mxu0 %v15666_v28  ;;  %2665 = vmatprep.subr.bf16.mxu1 %v15668_v29 }
  0x48   :  { %2580 = vmatpush1.bf16.msra.mxu0 %v15670_v30  ;;  %2666 = vmatpush1.bf16.msra.mxu1 %v15671_v31 }
  0x49   :  { %2581 = vmatprep.subr.bf16.mxu0 %v15672_v32  ;;  %2667 = vmatprep.subr.bf16.mxu1 %v15674_v33  ;;  %v15698_v33 = vld [vmem:[%s21275_s4 + $0x664] ss:$48 sps:$4 sm:$0xff]  }
  0x4c   :  { %2582 = vmatpush1.bf16.msra.mxu0 %v15676_v34  ;;  %2668 = vmatpush1.bf16.msra.mxu1 %v15677_v35 }
  0x4d   :  { %2583 = vmatprep.subr.bf16.mxu0 %v15678_v36  ;;  %2669 = vmatprep.subr.bf16.mxu1 %v15680_v37  ;;  %v15696_v36 = vld [vmem:[%s21275_s4 + $0x660] ss:$48 sps:$4 sm:$0xff]   ;;  %v15699_v37 = vld [vmem:[%s21275_s4 + $0x668] ss:$48 sps:$4 sm:$0xff]  }
  0x50   :  { %2584 = vmatpush1.bf16.msra.mxu0 %v15682_v38  ;;  %2670 = vmatpush1.bf16.msra.mxu1 %v15683_v39  ;;  %v15701_v38 = vld [vmem:[%s21275_s4 + $0x66c] ss:$48 sps:$4 sm:$0xff]  }
  0x51   :  { %2585 = vmatprep.subr.bf16.mxu0 %v15684_v40  ;;  %2671 = vmatprep.subr.bf16.mxu1 %v15686_v41  ;;  %v15704_v40 = vld [vmem:[%s21275_s4 + $0x6c4] ss:$48 sps:$4 sm:$0xff]   ;;  %v15707_v41 = vld [vmem:[%s21275_s4 + $0x6cc] ss:$48 sps:$4 sm:$0xff]  }
  0x54   :  { %2586 = vmatpush1.bf16.msra.mxu0 %v15688_v42  ;;  %2672 = vmatpush1.bf16.msra.mxu1 %v15689_v43  ;;  %v15702_v42 = vld [vmem:[%s21275_s4 + $0x6c0] ss:$48 sps:$4 sm:$0xff]   ;;  %v15705_v43 = vld [vmem:[%s21275_s4 + $0x6c8] ss:$48 sps:$4 sm:$0xff]  }
  0x55   :  { %2598 = vmatprep.subr.bf16.mxu0 %v15692_v44  ;;  %2684 = vmatprep.subr.bf16.mxu1 %v15695_v45  ;;  %v15710_v44 = vld [vmem:[%s21275_s4 + $0x724] ss:$48 sps:$4 sm:$0xff]   ;;  %v15713_v45 = vld [vmem:[%s21275_s4 + $0x72c] ss:$48 sps:$4 sm:$0xff]  }
  0xa7   :  { %v74_v52 = vpop.xlane.xlu0 %73 }
  0xa8   :  { %v81_v53 = vmul.f32 0.001953125, %v74_v52  ;;  %v17638_v52 = vshrl.u32 %v125_v48, 7  ;;  %v15716_v48 = vld [vmem:[%s21275_s4 + $0x784] ss:$48 sps:$4 sm:$0xff]  }
  0xaa   :  { %v17507_v54 = vsub.f32 %v17359_v0, %v81_v53  ;;  %v17510_v55 = vsub.f32 %v17364_v1, %v81_v53  ;;  %v17513_v56 = vsub.f32 %v17369_v2, %v81_v53  ;;  %v17516_v58 = vsub.f32 %v17374_v3, %v81_v53  ;;  %v17203_v1 = vld [vmem:[%s21271_s0 + $0x28] sm:$0xff] }
  0xab   :  { %v79_v57 = vpop.xlane.xlu0 %78 }
  0xac   :  { %v82_v59 = vmul.f32 0.001953125, %v79_v57  ;;  %v91_v60 = vmul.f32 %v17507_v54, %v17507_v54  ;;  %v92_v61 = vmul.f32 %v17510_v55, %v17510_v55  ;;  %v93_v62 = vmul.f32 %v17513_v56, %v17513_v56 }
  0xad   :  { %v94_v6 = vmul.f32 %v17516_v58, %v17516_v58  ;;  %v17641_v57 = vsub.s32 2, %v17638_v52 }
  0xae   :  { %v17527_v0 = vsub.f32 %v17202_v63, %v82_v59  ;;  %v17532_v2 = vsub.f32 %v17203_v1, %v82_v59  ;;  %v99_v3 = vadd.f32 %v92_v61, %v91_v60  ;;  %v17537_v5 = vsub.f32 %v17204_v4, %v82_v59  ;;  %v153_v61 = vld [vmem:[%s21274_s3] sm:$0xf] }
  0xaf   :  { %v17544_v9 = vsub.f32 %v17205_v8, %v82_v59  ;;  %v123_v59 = vld [vmem:[%s21273_s2] sm:$0xf]  ;;  %v17647_v60 = vsub.s32 1, %v17638_v52  ;;  %v17658_v4 = vsub.s32 3, %v17638_v52 }
  0xb0   :  { %v100_v7 = vadd.f32 %v99_v3, %v93_v62  ;;  %v95_v10 = vmul.f32 %v17527_v0, %v17527_v0  ;;  %v96_v11 = vmul.f32 %v17532_v2, %v17532_v2  ;;  %v97_v13 = vmul.f32 %v17537_v5, %v17537_v5 }
  0xb1   :  { %v98_v15 = vmul.f32 %v17544_v9, %v17544_v9  ;;  %v17653_v62 = vsub.s32 0, %v17638_v52  ;;  %v136_v63 = vrot.slane %v123_v59, %v17641_v57  ;;  %v132_v3 = vrot.slane %v123_v59, %v17647_v60 }
  0xb2   :  { %v101_v12 = vadd.f32 %v100_v7, %v94_v6  ;;  %v104_v14 = vadd.f32 %v96_v11, %v95_v10  ;;  %v166_v11 = vrot.slane %v153_v61, %v17641_v57  ;;  %v170_v26 = vrot.slane %v153_v61, %v17658_v4 }
  0xb3   :  { %v128_v8 = vrot.slane %v123_v59, %v17653_v62 }
  0xb4   :  { %102 = vadd.xlane.f32.xlu1 %v101_v12  ;;  %v105_v16 = vadd.f32 %v104_v14, %v97_v13  ;;  %v162_v14 = vrot.slane %v153_v61, %v17647_v60 }
  0xb6   :  { %v106_v17 = vadd.f32 %v105_v16, %v98_v15  ;;  %v158_v15 = vrot.slane %v153_v61, %v17653_v62  ;;  %v15720_v61 = vld [vmem:[%s21275_s4 + $0x7e0] ss:$48 sps:$4 sm:$0xff]  }
  0xb8   :  { %107 = vadd.xlane.f32.xlu1 %v106_v17  ;;  %v140_v17 = vrot.slane %v123_v59, %v17658_v4  ;;  %v15725_v59 = vld [vmem:[%s21275_s4 + $0x7ec] ss:$48 sps:$4 sm:$0xff]  }
 0x141   :  { %v103_v46 = vpop.xlane.xlu1 %102 }
 0x142   :  { %v109_v47 = vmul.f32 0.001953125, %v103_v46  ;;  %v15708_v46 = vld [vmem:[%s21275_s4 + $0x720] ss:$48 sps:$4 sm:$0xff]  }
 0x144   :  { %v111_v49 = vadd.f32 1e-06, %v109_v47  ;;  %v15711_v47 = vld [vmem:[%s21275_s4 + $0x728] ss:$48 sps:$4 sm:$0xff]  }
 0x145   :  { %v108_v50 = vpop.xlane.xlu1 %107 }
 0x146   :  { %17130 = vrsqrt.f32 %v111_v49  ;;  %v110_v51 = vmul.f32 0.001953125, %v108_v50  ;;  %v15719_v49 = vld [vmem:[%s21275_s4 + $0x78c] ss:$48 sps:$4 sm:$0xff]   ;;  %v15714_v50 = vld [vmem:[%s21275_s4 + $0x780] ss:$48 sps:$4 sm:$0xff]  }
 0x148   :  { %v112_v53 = vadd.f32 1e-06, %v110_v51  ;;  %v15717_v51 = vld [vmem:[%s21275_s4 + $0x788] ss:$48 sps:$4 sm:$0xff]  }
 0x14a   :  { %17132 = vrsqrt.f32 %v112_v53  ;;  %v15722_v53 = vld [vmem:[%s21275_s4 + $0x7e4] ss:$48 sps:$4 sm:$0xff]  }
 0x150   :  { %v17131_v1 = vpop.eup %17130 }
 0x151   :  { %v116_v6 = vmul.f32 %v17131_v1, %v17510_v55  ;;  %v115_v7 = vmul.f32 %v17131_v1, %v17507_v54  ;;  %v117_v10 = vmul.f32 %v17131_v1, %v17513_v56  ;;  %v118_v16 = vmul.f32 %v17131_v1, %v17516_v58  ;;  %v15728_v1 = vld [vmem:[%s21275_s4 + $0x844] ss:$48 sps:$4 sm:$0xff]  }
 0x153   :  { %v147_v12 = vmul.f32 %v136_v63, %v117_v10  ;;  %v146_v18 = vmul.f32 %v132_v3, %v116_v6  ;;  %v145_v19 = vmul.f32 %v128_v8, %v115_v7  ;;  %v148_v24 = vmul.f32 %v140_v17, %v118_v16  ;;  %v15726_v6 = vld [vmem:[%s21275_s4 + $0x840] ss:$48 sps:$4 sm:$0xff]   ;;  %v15729_v7 = vld [vmem:[%s21275_s4 + $0x848] ss:$48 sps:$4 sm:$0xff]   ;;  %v15737_v10 = vld [vmem:[%s21275_s4 + $0x8ac] ss:$48 sps:$4 sm:$0xff]  }
 0x154   :  { %v17133_v13 = vpop.eup %17132  ;;  %v15741_v16 = vld [vmem:[%s21275_s4 + $0x908] ss:$48 sps:$4 sm:$0xff]  }
 0x155   :  { %v120_v55 = vmul.f32 %v17133_v13, %v17532_v2  ;;  %v119_v54 = vmul.f32 %v17133_v13, %v17527_v0  ;;  %v122_v56 = vmul.f32 %v17133_v13, %v17544_v9  ;;  %v121_v20 = vmul.f32 %v17133_v13, %v17537_v5  ;;  %v15690_v2 = vld [vmem:[%s21275_s4 + $0x600] ss:$48 sps:$4 sm:$0xff]   ;;  %v15693_v0 = vld [vmem:[%s21275_s4 + $0x608] ss:$48 sps:$4 sm:$0xff]   ;;  %v15740_v13 = vld [vmem:[%s21275_s4 + $0x904] ss:$48 sps:$4 sm:$0xff]  }
 0x156   :  { %v177_v21 = vadd.f32 %v166_v11, %v147_v12  ;;  %v176_v27 = vadd.f32 %v162_v14, %v146_v18  ;;  %v175_v9 = vadd.f32 %v158_v15, %v145_v19  ;;  %v178_v34 = vadd.f32 %v170_v26, %v148_v24  ;;  %v15735_v12 = vld [vmem:[%s21275_s4 + $0x8a8] ss:$48 sps:$4 sm:$0xff]   ;;  %v15744_v18 = vld [vmem:[%s21275_s4 + $0x960] ss:$48 sps:$4 sm:$0xff]   ;;  %v15752_v19 = vld [vmem:[%s21275_s4 + $0x9c4] ss:$48 sps:$4 sm:$0xff]  }
 0x157   :  { %v150_v22 = vmul.f32 %v132_v3, %v120_v55  ;;  %v149_v23 = vmul.f32 %v128_v8, %v119_v54  ;;  %v152_v25 = vmul.f32 %v140_v17, %v122_v56  ;;  %v151_v58 = vmul.f32 %v136_v63, %v121_v20  ;;  %v15723_v63 = vld [vmem:[%s21275_s4 + $0x7e8] ss:$48 sps:$4 sm:$0xff]   ;;  %v15731_v3 = vld [vmem:[%s21275_s4 + $0x84c] ss:$48 sps:$4 sm:$0xff]   ;;  %v15734_v8 = vld [vmem:[%s21275_s4 + $0x8a4] ss:$48 sps:$4 sm:$0xff]  }
 0x158   :  { %v15746_v17 = vld [vmem:[%s21275_s4 + $0x964] ss:$48 sps:$4 sm:$0xff]   ;;  %v15749_v55 = vld [vmem:[%s21275_s4 + $0x96c] ss:$48 sps:$4 sm:$0xff]   ;;  %v15747_v54 = vld [vmem:[%s21275_s4 + $0x968] ss:$48 sps:$4 sm:$0xff]  }
 0x159   :  { %v180_v28 = vadd.f32 %v162_v14, %v150_v22  ;;  %v179_v5 = vadd.f32 %v158_v15, %v149_v23  ;;  %v182_v29 = vadd.f32 %v170_v26, %v152_v25  ;;  %v181_v30 = vadd.f32 %v166_v11, %v151_v58  ;;  %v15732_v11 = vld [vmem:[%s21275_s4 + $0x8a0] ss:$48 sps:$4 sm:$0xff]   ;;  %v15743_v14 = vld [vmem:[%s21275_s4 + $0x90c] ss:$48 sps:$4 sm:$0xff]   ;;  %v15758_v22 = vld [vmem:[%s21275_s4 + $0xa24] ss:$48 sps:$4 sm:$0xff]  }
 0x15a   :  { %v15738_v15 = vld [vmem:[%s21275_s4 + $0x900] ss:$48 sps:$4 sm:$0xff]   ;;  %v15755_v56 = vld [vmem:[%s21275_s4 + $0x9cc] ss:$48 sps:$4 sm:$0xff]   ;;  %v15759_v25 = vld [vmem:[%s21275_s4 + $0xa28] ss:$48 sps:$4 sm:$0xff]  }
 0x15b   :  { %v17680_v31 = vpack.c.bf16 %v180_v28, %v176_v27  ;;  %v17682_v32 = vpack.c.bf16 %v179_v5, %v175_v9  ;;  %v17687_v35 = vpack.c.bf16 %v181_v30, %v177_v21  ;;  %v17702_v39 = vpack.c.bf16 %v182_v29, %v178_v34  ;;  %v15750_v20 = vld [vmem:[%s21275_s4 + $0x9c0] ss:$48 sps:$4 sm:$0xff]   ;;  %v15753_v21 = vld [vmem:[%s21275_s4 + $0x9c8] ss:$48 sps:$4 sm:$0xff]   ;;  %v15761_v23 = vld [vmem:[%s21275_s4 + $0xa2c] ss:$48 sps:$4 sm:$0xff]  }
 0x15c   :  { %v15756_v24 = vld [vmem:[%s21275_s4 + $0xa20] ss:$48 sps:$4 sm:$0xff]   ;;  %v15764_v26 = vld [vmem:[%s21275_s4 + $0xa84] ss:$48 sps:$4 sm:$0xff]   ;;  %v15767_v58 = vld [vmem:[%s21275_s4 + $0xa8c] ss:$48 sps:$4 sm:$0xff]  }
 0x15d   :  { %2587 = vmatprep.mubr.bf16.mxu0 %v17680_v31  ;;  %2673 = vmatprep.mubr.bf16.mxu1 %v17680_v31  ;;  %v15762_v27 = vld [vmem:[%s21275_s4 + $0xa80] ss:$48 sps:$4 sm:$0xff]   ;;  %v15765_v28 = vld [vmem:[%s21275_s4 + $0xa88] ss:$48 sps:$4 sm:$0xff]   ;;  %v15776_v29 = vld [vmem:[%s21275_s4 + $0xb44] ss:$48 sps:$4 sm:$0xff]  }
 0x15e   :  { %2588 = vmatmul.mubr.bf16.vlgmr.msra.gmra.mrb[0].mxu0 %v17682_v32  ;;  %2674 = vmatmul.mubr.bf16.vlgmr.msra.gmra.mrb[0].mxu1 %v17682_v32  ;;  %v15768_v9 = vld [vmem:[%s21275_s4 + $0xae0] ss:$48 sps:$4 sm:$0xff]   ;;  %v15771_v5 = vld [vmem:[%s21275_s4 + $0xae8] ss:$48 sps:$4 sm:$0xff]   ;;  %v15779_v30 = vld [vmem:[%s21275_s4 + $0xb4c] ss:$48 sps:$4 sm:$0xff]  }
 0x15f   :  { %2599 = vmatpush1.bf16.msra.mxu0 %v15690_v2  ;;  %2685 = vmatpush1.bf16.msra.mxu1 %v15693_v0  ;;  %v15770_v2 = vld [vmem:[%s21275_s4 + $0xae4] ss:$48 sps:$4 sm:$0xff]   ;;  %v15773_v0 = vld [vmem:[%s21275_s4 + $0xaec] ss:$48 sps:$4 sm:$0xff]   ;;  %v15777_v34 = vld [vmem:[%s21275_s4 + $0xb48] ss:$48 sps:$4 sm:$0xff]  }
 0x160   :  { %2630 = vmatprep.mubr.bf16.mxu0 %v17702_v39  ;;  %2716 = vmatprep.mubr.bf16.mxu1 %v17702_v39 }
 0x161   :  { %2600 = vmatprep.subr.bf16.mxu0 %v15698_v33  ;;  %2686 = vmatprep.subr.bf16.mxu1 %v15701_v38  ;;  %v15774_v33 = vld [vmem:[%s21275_s4 + $0xb40] ss:$48 sps:$4 sm:$0xff]  }
 0x162   :  { %v15780_v38 = vld [vmem:[%s21275_s4 + $0xba0] ss:$48 sps:$4 sm:$0xff]  }
 0x163   :  { %2601 = vmatpush1.bf16.msra.mxu0 %v15696_v36  ;;  %2687 = vmatpush1.bf16.msra.mxu1 %v15699_v37  ;;  %v15782_v36 = vld [vmem:[%s21275_s4 + $0xba4] ss:$48 sps:$4 sm:$0xff]   ;;  %v15785_v37 = vld [vmem:[%s21275_s4 + $0xbac] ss:$48 sps:$4 sm:$0xff]  }
 0x164   :  { %2602 = vmatprep.subr.bf16.mxu0 %v15704_v40  ;;  %2688 = vmatprep.subr.bf16.mxu1 %v15707_v41  ;;  %v15783_v40 = vld [vmem:[%s21275_s4 + $0xba8] ss:$48 sps:$4 sm:$0xff]   ;;  %v15788_v41 = vld [vmem:[%s21275_s4 + $0x14] ss:$48 sps:$4 sm:$0xff]  }
 0x167   :  { %2603 = vmatpush1.bf16.msra.mxu0 %v15702_v42  ;;  %2689 = vmatpush1.bf16.msra.mxu1 %v15705_v43  ;;  %v15791_v42 = vld [vmem:[%s21275_s4 + $0x1c] ss:$48 sps:$4 sm:$0xff]   ;;  %v15786_v43 = vld [vmem:[%s21275_s4 + $0x10] ss:$48 sps:$4 sm:$0xff]  }
 0x168   :  { %2604 = vmatprep.subr.bf16.mxu0 %v15710_v44  ;;  %2690 = vmatprep.subr.bf16.mxu1 %v15713_v45  ;;  %v15789_v44 = vld [vmem:[%s21275_s4 + $0x18] ss:$48 sps:$4 sm:$0xff]   ;;  %v15794_v45 = vld [vmem:[%s21275_s4 + $0x74] ss:$48 sps:$4 sm:$0xff]  }
 0x16b   :  { %2605 = vmatpush1.bf16.msra.mxu0 %v15708_v46  ;;  %2691 = vmatpush1.bf16.msra.mxu1 %v15711_v47  ;;  %v15797_v46 = vld [vmem:[%s21275_s4 + $0x7c] ss:$48 sps:$4 sm:$0xff]   ;;  %v15792_v47 = vld [vmem:[%s21275_s4 + $0x70] ss:$48 sps:$4 sm:$0xff]  }
 0x16c   :  { %2606 = vmatprep.subr.bf16.mxu0 %v15716_v48  ;;  %2692 = vmatprep.subr.bf16.mxu1 %v15719_v49  ;;  %v15795_v48 = vld [vmem:[%s21275_s4 + $0x78] ss:$48 sps:$4 sm:$0xff]   ;;  %v15800_v49 = vld [vmem:[%s21275_s4 + $0xd4] ss:$48 sps:$4 sm:$0xff]  }
 0x16f   :  { %2607 = vmatpush1.bf16.msra.mxu0 %v15714_v50  ;;  %2693 = vmatpush1.bf16.msra.mxu1 %v15717_v51  ;;  %v15803_v50 = vld [vmem:[%s21275_s4 + $0xdc] ss:$48 sps:$4 sm:$0xff]   ;;  %v15798_v51 = vld [vmem:[%s21275_s4 + $0xd0] ss:$48 sps:$4 sm:$0xff]  }
 0x170   :  { %2608 = vmatprep.subr.bf16.mxu0 %v15722_v53  ;;  %2694 = vmatprep.subr.bf16.mxu1 %v15725_v59  ;;  %v15801_v53 = vld [vmem:[%s21275_s4 + $0xd8] ss:$48 sps:$4 sm:$0xff]   ;;  %v15806_v59 = vld [vmem:[%s21275_s4 + $0x134] ss:$48 sps:$4 sm:$0xff]  }
 0x173   :  { %2609 = vmatpush1.bf16.msra.mxu0 %v15720_v61  ;;  %2695 = vmatpush1.bf16.msra.mxu1 %v15723_v63  ;;  %v15804_v61 = vld [vmem:[%s21275_s4 + $0x130] ss:$48 sps:$4 sm:$0xff]   ;;  %v15809_v63 = vld [vmem:[%s21275_s4 + $0x13c] ss:$48 sps:$4 sm:$0xff]  }
 0x174   :  { %2610 = vmatprep.subr.bf16.mxu0 %v15728_v1  ;;  %2696 = vmatprep.subr.bf16.mxu1 %v15731_v3  ;;  %v15807_v1 = vld [vmem:[%s21275_s4 + $0x138] ss:$48 sps:$4 sm:$0xff]   ;;  %v15812_v3 = vld [vmem:[%s21275_s4 + $0x194] ss:$48 sps:$4 sm:$0xff]  }
 0x177   :  { %2611 = vmatpush1.bf16.msra.mxu0 %v15726_v6  ;;  %2697 = vmatpush1.bf16.msra.mxu1 %v15729_v7  ;;  %v15810_v6 = vld [vmem:[%s21275_s4 + $0x190] ss:$48 sps:$4 sm:$0xff]   ;;  %v15815_v7 = vld [vmem:[%s21275_s4 + $0x19c] ss:$48 sps:$4 sm:$0xff]  }
 0x178   :  { %2612 = vmatprep.subr.bf16.mxu0 %v15734_v8  ;;  %2698 = vmatprep.subr.bf16.mxu1 %v15737_v10  ;;  %v15813_v8 = vld [vmem:[%s21275_s4 + $0x198] ss:$48 sps:$4 sm:$0xff]   ;;  %v15818_v10 = vld [vmem:[%s21275_s4 + $0x1f4] ss:$48 sps:$4 sm:$0xff]  }
 0x17b   :  { %2613 = vmatpush1.bf16.msra.mxu0 %v15732_v11  ;;  %2699 = vmatpush1.bf16.msra.mxu1 %v15735_v12  ;;  %v15816_v11 = vld [vmem:[%s21275_s4 + $0x1f0] ss:$48 sps:$4 sm:$0xff]   ;;  %v15821_v12 = vld [vmem:[%s21275_s4 + $0x1fc] ss:$48 sps:$4 sm:$0xff]  }
 0x17c   :  { %2614 = vmatprep.subr.bf16.mxu0 %v15740_v13  ;;  %2700 = vmatprep.subr.bf16.mxu1 %v15743_v14  ;;  %v15819_v13 = vld [vmem:[%s21275_s4 + $0x1f8] ss:$48 sps:$4 sm:$0xff]   ;;  %v15824_v14 = vld [vmem:[%s21275_s4 + $0x254] ss:$48 sps:$4 sm:$0xff]  }
 0x17f   :  { %2615 = vmatpush1.bf16.msra.mxu0 %v15738_v15  ;;  %2701 = vmatpush1.bf16.msra.mxu1 %v15741_v16  ;;  %v15822_v15 = vld [vmem:[%s21275_s4 + $0x250] ss:$48 sps:$4 sm:$0xff]   ;;  %v15827_v16 = vld [vmem:[%s21275_s4 + $0x25c] ss:$48 sps:$4 sm:$0xff]  }
 0x180   :  { %2616 = vmatprep.subr.bf16.mxu0 %v15746_v17  ;;  %2702 = vmatprep.subr.bf16.mxu1 %v15749_v55  ;;  %v15825_v17 = vld [vmem:[%s21275_s4 + $0x258] ss:$48 sps:$4 sm:$0xff]   ;;  %v15830_v55 = vld [vmem:[%s21275_s4 + $0x2b4] ss:$48 sps:$4 sm:$0xff]  }
 0x183   :  { %2617 = vmatpush1.bf16.msra.mxu0 %v15744_v18  ;;  %2703 = vmatpush1.bf16.msra.mxu1 %v15747_v54  ;;  %v15828_v18 = vld [vmem:[%s21275_s4 + $0x2b0] ss:$48 sps:$4 sm:$0xff]   ;;  %v15833_v54 = vld [vmem:[%s21275_s4 + $0x2bc] ss:$48 sps:$4 sm:$0xff]  }
 0x184   :  { %2618 = vmatprep.subr.bf16.mxu0 %v15752_v19  ;;  %2704 = vmatprep.subr.bf16.mxu1 %v15755_v56  ;;  %v15831_v19 = vld [vmem:[%s21275_s4 + $0x2b8] ss:$48 sps:$4 sm:$0xff]   ;;  %v15836_v56 = vld [vmem:[%s21275_s4 + $0x314] ss:$48 sps:$4 sm:$0xff]  }
 0x187   :  { %2619 = vmatpush1.bf16.msra.mxu0 %v15750_v20  ;;  %2705 = vmatpush1.bf16.msra.mxu1 %v15753_v21  ;;  %v15834_v20 = vld [vmem:[%s21275_s4 + $0x310] ss:$48 sps:$4 sm:$0xff]   ;;  %v15839_v21 = vld [vmem:[%s21275_s4 + $0x31c] ss:$48 sps:$4 sm:$0xff]  }
 0x188   :  { %2620 = vmatprep.subr.bf16.mxu0 %v15758_v22  ;;  %2706 = vmatprep.subr.bf16.mxu1 %v15761_v23  ;;  %v15837_v22 = vld [vmem:[%s21275_s4 + $0x318] ss:$48 sps:$4 sm:$0xff]   ;;  %v15842_v23 = vld [vmem:[%s21275_s4 + $0x374] ss:$48 sps:$4 sm:$0xff]  }
 0x18b   :  { %2621 = vmatpush1.bf16.msra.mxu0 %v15756_v24  ;;  %2707 = vmatpush1.bf16.msra.mxu1 %v15759_v25  ;;  %v15840_v24 = vld [vmem:[%s21275_s4 + $0x370] ss:$48 sps:$4 sm:$0xff]   ;;  %v15845_v25 = vld [vmem:[%s21275_s4 + $0x37c] ss:$48 sps:$4 sm:$0xff]  }
 0x18c   :  { %2622 = vmatprep.subr.bf16.mxu0 %v15764_v26  ;;  %2708 = vmatprep.subr.bf16.mxu1 %v15767_v58  ;;  %v15843_v26 = vld [vmem:[%s21275_s4 + $0x378] ss:$48 sps:$4 sm:$0xff]   ;;  %v15848_v58 = vld [vmem:[%s21275_s4 + $0x3d4] ss:$48 sps:$4 sm:$0xff]  }
 0x18f   :  { %2623 = vmatpush1.bf16.msra.mxu0 %v15762_v27  ;;  %2709 = vmatpush1.bf16.msra.mxu1 %v15765_v28  ;;  %v15846_v27 = vld [vmem:[%s21275_s4 + $0x3d0] ss:$48 sps:$4 sm:$0xff]   ;;  %v15851_v28 = vld [vmem:[%s21275_s4 + $0x3dc] ss:$48 sps:$4 sm:$0xff]  }
 0x190   :  { %2624 = vmatprep.subr.bf16.mxu0 %v15770_v2  ;;  %2710 = vmatprep.subr.bf16.mxu1 %v15773_v0  ;;  %v15849_v2 = vld [vmem:[%s21275_s4 + $0x3d8] ss:$48 sps:$4 sm:$0xff]   ;;  %v15854_v0 = vld [vmem:[%s21275_s4 + $0x434] ss:$48 sps:$4 sm:$0xff]  }
 0x193   :  { %2625 = vmatpush1.bf16.msra.mxu0 %v15768_v9  ;;  %2711 = vmatpush1.bf16.msra.mxu1 %v15771_v5  ;;  %v15852_v9 = vld [vmem:[%s21275_s4 + $0x430] ss:$48 sps:$4 sm:$0xff]   ;;  %v15857_v5 = vld [vmem:[%s21275_s4 + $0x43c] ss:$48 sps:$4 sm:$0xff]  }
 0x194   :  { %2626 = vmatprep.subr.bf16.mxu0 %v15776_v29  ;;  %2712 = vmatprep.subr.bf16.mxu1 %v15779_v30  ;;  %v15855_v29 = vld [vmem:[%s21275_s4 + $0x438] ss:$48 sps:$4 sm:$0xff]   ;;  %v15860_v30 = vld [vmem:[%s21275_s4 + $0x494] ss:$48 sps:$4 sm:$0xff]  }
 0x197   :  { %2627 = vmatpush1.bf16.msra.mxu0 %v15774_v33  ;;  %2713 = vmatpush1.bf16.msra.mxu1 %v15777_v34  ;;  %v15858_v33 = vld [vmem:[%s21275_s4 + $0x490] ss:$48 sps:$4 sm:$0xff]   ;;  %v15863_v34 = vld [vmem:[%s21275_s4 + $0x49c] ss:$48 sps:$4 sm:$0xff]  }
 0x198   :  { %2628 = vmatprep.subr.bf16.mxu0 %v15782_v36  ;;  %2714 = vmatprep.subr.bf16.mxu1 %v15785_v37  ;;  %v15861_v36 = vld [vmem:[%s21275_s4 + $0x498] ss:$48 sps:$4 sm:$0xff]   ;;  %v15866_v37 = vld [vmem:[%s21275_s4 + $0x4f4] ss:$48 sps:$4 sm:$0xff]  }
 0x19b   :  { %2629 = vmatpush1.bf16.msra.mxu0 %v15780_v38  ;;  %2715 = vmatpush1.bf16.msra.mxu1 %v15783_v40  ;;  %v15864_v38 = vld [vmem:[%s21275_s4 + $0x4f0] ss:$48 sps:$4 sm:$0xff]   ;;  %v15869_v40 = vld [vmem:[%s21275_s4 + $0x4fc] ss:$48 sps:$4 sm:$0xff]  }
 0x19c   :  { %2727 = vmatprep.subr.bf16.mxu0 %v15788_v41  ;;  %2813 = vmatprep.subr.bf16.mxu1 %v15791_v42  ;;  %v15867_v41 = vld [vmem:[%s21275_s4 + $0x4f8] ss:$48 sps:$4 sm:$0xff]   ;;  %v15872_v42 = vld [vmem:[%s21275_s4 + $0x554] ss:$48 sps:$4 sm:$0xff]  }
 0x19e   :  { %2631 = vmatmul.mubr.bf16.vlgmr.msra.gmra.mrb[0].mxu0 %v17687_v35  ;;  %2717 = vmatmul.mubr.bf16.vlgmr.msra.gmra.mrb[0].mxu1 %v17687_v35 }
 0x19f   :  { %2728 = vmatpush1.bf16.msra.mxu0 %v15786_v43  ;;  %2759 = vmatprep.mubr.bf16.mxu0 %v17680_v31  ;;  %v15870_v43 = vld [vmem:[%s21275_s4 + $0x550] ss:$48 sps:$4 sm:$0xff]  }
 0x1a0   :  { %2814 = vmatpush1.bf16.msra.mxu1 %v15789_v44  ;;  %2845 = vmatprep.mubr.bf16.mxu1 %v17680_v31  ;;  %v15875_v44 = vld [vmem:[%s21275_s4 + $0x55c] ss:$48 sps:$4 sm:$0xff]  }
 0x1a1   :  { %2729 = vmatprep.subr.bf16.mxu0 %v15794_v45  ;;  %2815 = vmatprep.subr.bf16.mxu1 %v15797_v46  ;;  %v15873_v45 = vld [vmem:[%s21275_s4 + $0x558] ss:$48 sps:$4 sm:$0xff]   ;;  %v15878_v46 = vld [vmem:[%s21275_s4 + $0x5b4] ss:$48 sps:$4 sm:$0xff]  }
 0x1a3   :  { %2730 = vmatpush1.bf16.msra.mxu0 %v15792_v47  ;;  %v15881_v47 = vld [vmem:[%s21275_s4 + $0x5bc] ss:$48 sps:$4 sm:$0xff]  }
 0x1a4   :  { %2816 = vmatpush1.bf16.msra.mxu1 %v15795_v48  ;;  %2731 = vmatprep.subr.bf16.mxu0 %v15800_v49  ;;  %v15876_v48 = vld [vmem:[%s21275_s4 + $0x5b0] ss:$48 sps:$4 sm:$0xff]   ;;  %v15879_v49 = vld [vmem:[%s21275_s4 + $0x5b8] ss:$48 sps:$4 sm:$0xff]  }
 0x1a5   :  { %2817 = vmatprep.subr.bf16.mxu1 %v15803_v50  ;;  %v15884_v50 = vld [vmem:[%s21275_s4 + $0x614] ss:$48 sps:$4 sm:$0xff]  }
 0x1a7   :  { %2732 = vmatpush1.bf16.msra.mxu0 %v15798_v51  ;;  %v15887_v51 = vld [vmem:[%s21275_s4 + $0x61c] ss:$48 sps:$4 sm:$0xff]  }
 0x1a8   :  { %2818 = vmatpush1.bf16.msra.mxu1 %v15801_v53  ;;  %2733 = vmatprep.subr.bf16.mxu0 %v15806_v59  ;;  %v15882_v53 = vld [vmem:[%s21275_s4 + $0x610] ss:$48 sps:$4 sm:$0xff]   ;;  %v15885_v59 = vld [vmem:[%s21275_s4 + $0x618] ss:$48 sps:$4 sm:$0xff]  }
 0x1a9   :  { %2819 = vmatprep.subr.bf16.mxu1 %v15809_v63  ;;  %v15893_v63 = vld [vmem:[%s21275_s4 + $0x67c] ss:$48 sps:$4 sm:$0xff]  }
 0x1ab   :  { %2734 = vmatpush1.bf16.msra.mxu0 %v15804_v61  ;;  %v15890_v61 = vld [vmem:[%s21275_s4 + $0x674] ss:$48 sps:$4 sm:$0xff]  }
 0x1ac   :  { %2820 = vmatpush1.bf16.msra.mxu1 %v15807_v1  ;;  %2735 = vmatprep.subr.bf16.mxu0 %v15812_v3  ;;  %v15888_v1 = vld [vmem:[%s21275_s4 + $0x670] ss:$48 sps:$4 sm:$0xff]   ;;  %v15891_v3 = vld [vmem:[%s21275_s4 + $0x678] ss:$48 sps:$4 sm:$0xff]  }
 0x1ad   :  { %2821 = vmatprep.subr.bf16.mxu1 %v15815_v7  ;;  %v15899_v7 = vld [vmem:[%s21275_s4 + $0x6dc] ss:$48 sps:$4 sm:$0xff]  }
 0x1af   :  { %2736 = vmatpush1.bf16.msra.mxu0 %v15810_v6  ;;  %v15896_v6 = vld [vmem:[%s21275_s4 + $0x6d4] ss:$48 sps:$4 sm:$0xff]  }
 0x1b0   :  { %2822 = vmatpush1.bf16.msra.mxu1 %v15813_v8  ;;  %2737 = vmatprep.subr.bf16.mxu0 %v15818_v10  ;;  %v15894_v8 = vld [vmem:[%s21275_s4 + $0x6d0] ss:$48 sps:$4 sm:$0xff]   ;;  %v15897_v10 = vld [vmem:[%s21275_s4 + $0x6d8] ss:$48 sps:$4 sm:$0xff]  }
 0x1b1   :  { %2823 = vmatprep.subr.bf16.mxu1 %v15821_v12  ;;  %v15905_v12 = vld [vmem:[%s21275_s4 + $0x73c] ss:$48 sps:$4 sm:$0xff]  }
 0x1b3   :  { %2738 = vmatpush1.bf16.msra.mxu0 %v15816_v11  ;;  %v15902_v11 = vld [vmem:[%s21275_s4 + $0x734] ss:$48 sps:$4 sm:$0xff]  }
 0x1b4   :  { %2824 = vmatpush1.bf16.msra.mxu1 %v15819_v13  ;;  %2739 = vmatprep.subr.bf16.mxu0 %v15824_v14  ;;  %v15900_v13 = vld [vmem:[%s21275_s4 + $0x730] ss:$48 sps:$4 sm:$0xff]   ;;  %v15903_v14 = vld [vmem:[%s21275_s4 + $0x738] ss:$48 sps:$4 sm:$0xff]  }
 0x1b5   :  { %2825 = vmatprep.subr.bf16.mxu1 %v15827_v16  ;;  %v15911_v16 = vld [vmem:[%s21275_s4 + $0x79c] ss:$48 sps:$4 sm:$0xff]  }
 0x1b7   :  { %2740 = vmatpush1.bf16.msra.mxu0 %v15822_v15  ;;  %v15908_v15 = vld [vmem:[%s21275_s4 + $0x794] ss:$48 sps:$4 sm:$0xff]  }
 0x1b8   :  { %2826 = vmatpush1.bf16.msra.mxu1 %v15825_v17  ;;  %2741 = vmatprep.subr.bf16.mxu0 %v15830_v55  ;;  %v15906_v17 = vld [vmem:[%s21275_s4 + $0x790] ss:$48 sps:$4 sm:$0xff]   ;;  %v15909_v55 = vld [vmem:[%s21275_s4 + $0x798] ss:$48 sps:$4 sm:$0xff]  }
 0x1b9   :  { %2827 = vmatprep.subr.bf16.mxu1 %v15833_v54  ;;  %v15917_v54 = vld [vmem:[%s21275_s4 + $0x7fc] ss:$48 sps:$4 sm:$0xff]  }
 0x1bb   :  { %2742 = vmatpush1.bf16.msra.mxu0 %v15828_v18  ;;  %v15914_v18 = vld [vmem:[%s21275_s4 + $0x7f4] ss:$48 sps:$4 sm:$0xff]  }
 0x1bc   :  { %2828 = vmatpush1.bf16.msra.mxu1 %v15831_v19  ;;  %2743 = vmatprep.subr.bf16.mxu0 %v15836_v56  ;;  %v15912_v19 = vld [vmem:[%s21275_s4 + $0x7f0] ss:$48 sps:$4 sm:$0xff]   ;;  %v15915_v56 = vld [vmem:[%s21275_s4 + $0x7f8] ss:$48 sps:$4 sm:$0xff]  }
 0x1bd   :  { %2829 = vmatprep.subr.bf16.mxu1 %v15839_v21  ;;  %v15923_v21 = vld [vmem:[%s21275_s4 + $0x85c] ss:$48 sps:$4 sm:$0xff]  }
 0x1bf   :  { %2744 = vmatpush1.bf16.msra.mxu0 %v15834_v20  ;;  %v15920_v20 = vld [vmem:[%s21275_s4 + $0x854] ss:$48 sps:$4 sm:$0xff]  }
 0x1c0   :  { %2830 = vmatpush1.bf16.msra.mxu1 %v15837_v22  ;;  %2745 = vmatprep.subr.bf16.mxu0 %v15842_v23  ;;  %v15918_v22 = vld [vmem:[%s21275_s4 + $0x850] ss:$48 sps:$4 sm:$0xff]   ;;  %v15921_v23 = vld [vmem:[%s21275_s4 + $0x858] ss:$48 sps:$4 sm:$0xff]  }
 0x1c1   :  { %2831 = vmatprep.subr.bf16.mxu1 %v15845_v25  ;;  %v15929_v25 = vld [vmem:[%s21275_s4 + $0x8bc] ss:$48 sps:$4 sm:$0xff]  }
 0x1c3   :  { %2746 = vmatpush1.bf16.msra.mxu0 %v15840_v24  ;;  %v15926_v24 = vld [vmem:[%s21275_s4 + $0x8b4] ss:$48 sps:$4 sm:$0xff]  }
 0x1c4   :  { %2832 = vmatpush1.bf16.msra.mxu1 %v15843_v26  ;;  %2747 = vmatprep.subr.bf16.mxu0 %v15848_v58  ;;  %v15924_v26 = vld [vmem:[%s21275_s4 + $0x8b0] ss:$48 sps:$4 sm:$0xff]   ;;  %v15927_v58 = vld [vmem:[%s21275_s4 + $0x8b8] ss:$48 sps:$4 sm:$0xff]  }
 0x1c5   :  { %2833 = vmatprep.subr.bf16.mxu1 %v15851_v28  ;;  %v15935_v28 = vld [vmem:[%s21275_s4 + $0x91c] ss:$48 sps:$4 sm:$0xff]  }
 0x1c7   :  { %2748 = vmatpush1.bf16.msra.mxu0 %v15846_v27  ;;  %v15932_v27 = vld [vmem:[%s21275_s4 + $0x914] ss:$48 sps:$4 sm:$0xff]  }
 0x1c8   :  { %2834 = vmatpush1.bf16.msra.mxu1 %v15849_v2  ;;  %2749 = vmatprep.subr.bf16.mxu0 %v15854_v0  ;;  %v15930_v2 = vld [vmem:[%s21275_s4 + $0x910] ss:$48 sps:$4 sm:$0xff]   ;;  %v15933_v0 = vld [vmem:[%s21275_s4 + $0x918] ss:$48 sps:$4 sm:$0xff]  }
 0x1c9   :  { %2835 = vmatprep.subr.bf16.mxu1 %v15857_v5  ;;  %v15941_v5 = vld [vmem:[%s21275_s4 + $0x97c] ss:$48 sps:$4 sm:$0xff]  }
 0x1cb   :  { %2750 = vmatpush1.bf16.msra.mxu0 %v15852_v9  ;;  %v15938_v9 = vld [vmem:[%s21275_s4 + $0x974] ss:$48 sps:$4 sm:$0xff]  }
 0x1cc   :  { %2836 = vmatpush1.bf16.msra.mxu1 %v15855_v29  ;;  %2751 = vmatprep.subr.bf16.mxu0 %v15860_v30  ;;  %v15936_v29 = vld [vmem:[%s21275_s4 + $0x970] ss:$48 sps:$4 sm:$0xff]   ;;  %v15939_v30 = vld [vmem:[%s21275_s4 + $0x978] ss:$48 sps:$4 sm:$0xff]  }
 0x1cd   :  { %2837 = vmatprep.subr.bf16.mxu1 %v15863_v34  ;;  %v15947_v34 = vld [vmem:[%s21275_s4 + $0x9dc] ss:$48 sps:$4 sm:$0xff]  }
 0x1cf   :  { %2752 = vmatpush1.bf16.msra.mxu0 %v15858_v33  ;;  %v15944_v33 = vld [vmem:[%s21275_s4 + $0x9d4] ss:$48 sps:$4 sm:$0xff]  }
 0x1d0   :  { %2838 = vmatpush1.bf16.msra.mxu1 %v15861_v36  ;;  %2753 = vmatprep.subr.bf16.mxu0 %v15866_v37  ;;  %v15942_v36 = vld [vmem:[%s21275_s4 + $0x9d0] ss:$48 sps:$4 sm:$0xff]   ;;  %v15945_v37 = vld [vmem:[%s21275_s4 + $0x9d8] ss:$48 sps:$4 sm:$0xff]  }
 0x1d1   :  { %2839 = vmatprep.subr.bf16.mxu1 %v15869_v40  ;;  %v15953_v40 = vld [vmem:[%s21275_s4 + $0xa3c] ss:$48 sps:$4 sm:$0xff]  }
 0x1d3   :  { %2754 = vmatpush1.bf16.msra.mxu0 %v15864_v38  ;;  %v15950_v38 = vld [vmem:[%s21275_s4 + $0xa34] ss:$48 sps:$4 sm:$0xff]  }
 0x1d4   :  { %2840 = vmatpush1.bf16.msra.mxu1 %v15867_v41  ;;  %2755 = vmatprep.subr.bf16.mxu0 %v15872_v42  ;;  %v15948_v41 = vld [vmem:[%s21275_s4 + $0xa30] ss:$48 sps:$4 sm:$0xff]   ;;  %v15951_v42 = vld [vmem:[%s21275_s4 + $0xa38] ss:$48 sps:$4 sm:$0xff]  }
 0x1d5   :  { %2841 = vmatprep.subr.bf16.mxu1 %v15875_v44  ;;  %v15959_v44 = vld [vmem:[%s21275_s4 + $0xa9c] ss:$48 sps:$4 sm:$0xff]  }
 0x1d7   :  { %2756 = vmatpush1.bf16.msra.mxu0 %v15870_v43  ;;  %v15956_v43 = vld [vmem:[%s21275_s4 + $0xa94] ss:$48 sps:$4 sm:$0xff]  }
 0x1d8   :  { %2842 = vmatpush1.bf16.msra.mxu1 %v15873_v45  ;;  %2757 = vmatprep.subr.bf16.mxu0 %v15878_v46  ;;  %v15954_v45 = vld [vmem:[%s21275_s4 + $0xa90] ss:$48 sps:$4 sm:$0xff]   ;;  %v15957_v46 = vld [vmem:[%s21275_s4 + $0xa98] ss:$48 sps:$4 sm:$0xff]  }
 0x1d9   :  { %2843 = vmatprep.subr.bf16.mxu1 %v15881_v47  ;;  %v15962_v47 = vld [vmem:[%s21275_s4 + $0xaf4] ss:$48 sps:$4 sm:$0xff]  }
 0x1db   :  { %2758 = vmatpush1.bf16.msra.mxu0 %v15876_v48  ;;  %v15965_v48 = vld [vmem:[%s21275_s4 + $0xafc] ss:$48 sps:$4 sm:$0xff]  }
 0x1dc   :  { %2844 = vmatpush1.bf16.msra.mxu1 %v15879_v49  ;;  %2770 = vmatprep.subr.bf16.mxu0 %v15884_v50  ;;  %v15960_v49 = vld [vmem:[%s21275_s4 + $0xaf0] ss:$48 sps:$4 sm:$0xff]   ;;  %v15963_v50 = vld [vmem:[%s21275_s4 + $0xaf8] ss:$48 sps:$4 sm:$0xff]  }
 0x1dd   :  { %2856 = vmatprep.subr.bf16.mxu1 %v15887_v51  ;;  %v15968_v51 = vld [vmem:[%s21275_s4 + $0xb54] ss:$48 sps:$4 sm:$0xff]  }
 0x1de   :  { %2760 = vmatmul.mubr.bf16.vlgmr.msra.gmra.mrb[4].mxu0 %v17682_v32 }
 0x1df   :  { %2846 = vmatmul.mubr.bf16.vlgmr.msra.gmra.mrb[4].mxu1 %v17682_v32  ;;  %2771 = vmatpush1.bf16.msra.mxu0 %v15882_v53  ;;  %v15971_v53 = vld [vmem:[%s21275_s4 + $0xb5c] ss:$48 sps:$4 sm:$0xff]  }
 0x1e0   :  { %2802 = vmatprep.mubr.bf16.mxu0 %v17702_v39  ;;  %2857 = vmatpush1.bf16.msra.mxu1 %v15885_v59  ;;  %v15966_v59 = vld [vmem:[%s21275_s4 + $0xb50] ss:$48 sps:$4 sm:$0xff]  }
 0x1e1   :  { %2888 = vmatprep.mubr.bf16.mxu1 %v17702_v39  ;;  %2772 = vmatprep.subr.bf16.mxu0 %v15890_v61  ;;  %v15969_v61 = vld [vmem:[%s21275_s4 + $0xb58] ss:$48 sps:$4 sm:$0xff]  }
 0x1e2   :  { %2858 = vmatprep.subr.bf16.mxu1 %v15893_v63  ;;  %v15974_v63 = vld [vmem:[%s21275_s4 + $0xbb4] ss:$48 sps:$4 sm:$0xff]  }
 0x1e3   :  { %2773 = vmatpush1.bf16.msra.mxu0 %v15888_v1  ;;  %v15977_v1 = vld [vmem:[%s21275_s4 + $0xbbc] ss:$48 sps:$4 sm:$0xff]  }
 0x1e4   :  { %2859 = vmatpush1.bf16.msra.mxu1 %v15891_v3  ;;  %2774 = vmatprep.subr.bf16.mxu0 %v15896_v6  ;;  %v15972_v3 = vld [vmem:[%s21275_s4 + $0xbb0] ss:$48 sps:$4 sm:$0xff]   ;;  %v15975_v6 = vld [vmem:[%s21275_s4 + $0xbb8] ss:$48 sps:$4 sm:$0xff]  }
 0x1e5   :  { %2860 = vmatprep.subr.bf16.mxu1 %v15899_v7  ;;  %v15980_v7 = vld [vmem:[%s21275_s4 + $0x24] ss:$48 sps:$4 sm:$0xff]  }
 0x1e7   :  { %2775 = vmatpush1.bf16.msra.mxu0 %v15894_v8  ;;  %v15983_v8 = vld [vmem:[%s21275_s4 + $0x2c] ss:$48 sps:$4 sm:$0xff]  }
 0x1e8   :  { %2861 = vmatpush1.bf16.msra.mxu1 %v15897_v10  ;;  %2776 = vmatprep.subr.bf16.mxu0 %v15902_v11  ;;  %v15978_v10 = vld [vmem:[%s21275_s4 + $0x20] ss:$48 sps:$4 sm:$0xff]   ;;  %v15981_v11 = vld [vmem:[%s21275_s4 + $0x28] ss:$48 sps:$4 sm:$0xff]  }
 0x1e9   :  { %2862 = vmatprep.subr.bf16.mxu1 %v15905_v12  ;;  %v15986_v12 = vld [vmem:[%s21275_s4 + $0x84] ss:$48 sps:$4 sm:$0xff]  }
 0x1eb   :  { %2777 = vmatpush1.bf16.msra.mxu0 %v15900_v13  ;;  %v15989_v13 = vld [vmem:[%s21275_s4 + $0x8c] ss:$48 sps:$4 sm:$0xff]  }
 0x1ec   :  { %2863 = vmatpush1.bf16.msra.mxu1 %v15903_v14  ;;  %2778 = vmatprep.subr.bf16.mxu0 %v15908_v15  ;;  %v15984_v14 = vld [vmem:[%s21275_s4 + $0x80] ss:$48 sps:$4 sm:$0xff]   ;;  %v15987_v15 = vld [vmem:[%s21275_s4 + $0x88] ss:$48 sps:$4 sm:$0xff]  }
 0x1ed   :  { %2864 = vmatprep.subr.bf16.mxu1 %v15911_v16  ;;  %v15992_v16 = vld [vmem:[%s21275_s4 + $0xe4] ss:$48 sps:$4 sm:$0xff]  }
 0x1ef   :  { %2779 = vmatpush1.bf16.msra.mxu0 %v15906_v17  ;;  %v15995_v17 = vld [vmem:[%s21275_s4 + $0xec] ss:$48 sps:$4 sm:$0xff]  }
 0x1f0   :  { %2865 = vmatpush1.bf16.msra.mxu1 %v15909_v55  ;;  %2780 = vmatprep.subr.bf16.mxu0 %v15914_v18  ;;  %v15990_v55 = vld [vmem:[%s21275_s4 + $0xe0] ss:$48 sps:$4 sm:$0xff]   ;;  %v15993_v18 = vld [vmem:[%s21275_s4 + $0xe8] ss:$48 sps:$4 sm:$0xff]  }
 0x1f1   :  { %2866 = vmatprep.subr.bf16.mxu1 %v15917_v54  ;;  %v16001_v54 = vld [vmem:[%s21275_s4 + $0x14c] ss:$48 sps:$4 sm:$0xff]  }
 0x1f3   :  { %2781 = vmatpush1.bf16.msra.mxu0 %v15912_v19  ;;  %v15996_v19 = vld [vmem:[%s21275_s4 + $0x140] ss:$48 sps:$4 sm:$0xff]  }
 0x1f4   :  { %2867 = vmatpush1.bf16.msra.mxu1 %v15915_v56  ;;  %2782 = vmatprep.subr.bf16.mxu0 %v15920_v20  ;;  %v15999_v56 = vld [vmem:[%s21275_s4 + $0x148] ss:$48 sps:$4 sm:$0xff]   ;;  %v16004_v20 = vld [vmem:[%s21275_s4 + $0x1a4] ss:$48 sps:$4 sm:$0xff]  }
 0x1f5   :  { %2868 = vmatprep.subr.bf16.mxu1 %v15923_v21  ;;  %v16007_v21 = vld [vmem:[%s21275_s4 + $0x1ac] ss:$48 sps:$4 sm:$0xff]  }
 0x1f7   :  { %2783 = vmatpush1.bf16.msra.mxu0 %v15918_v22  ;;  %v16002_v22 = vld [vmem:[%s21275_s4 + $0x1a0] ss:$48 sps:$4 sm:$0xff]  }
 0x1f8   :  { %2869 = vmatpush1.bf16.msra.mxu1 %v15921_v23  ;;  %2784 = vmatprep.subr.bf16.mxu0 %v15926_v24  ;;  %v16005_v23 = vld [vmem:[%s21275_s4 + $0x1a8] ss:$48 sps:$4 sm:$0xff]   ;;  %v16010_v24 = vld [vmem:[%s21275_s4 + $0x204] ss:$48 sps:$4 sm:$0xff]  }
 0x1f9   :  { %2870 = vmatprep.subr.bf16.mxu1 %v15929_v25  ;;  %v16013_v25 = vld [vmem:[%s21275_s4 + $0x20c] ss:$48 sps:$4 sm:$0xff]  }
 0x1fb   :  { %2785 = vmatpush1.bf16.msra.mxu0 %v15924_v26  ;;  %v16008_v26 = vld [vmem:[%s21275_s4 + $0x200] ss:$48 sps:$4 sm:$0xff]  }
 0x1fc   :  { %2871 = vmatpush1.bf16.msra.mxu1 %v15927_v58  ;;  %2786 = vmatprep.subr.bf16.mxu0 %v15932_v27  ;;  %v16011_v58 = vld [vmem:[%s21275_s4 + $0x208] ss:$48 sps:$4 sm:$0xff]   ;;  %v16016_v27 = vld [vmem:[%s21275_s4 + $0x264] ss:$48 sps:$4 sm:$0xff]  }
 0x1fd   :  { %2872 = vmatprep.subr.bf16.mxu1 %v15935_v28  ;;  %v16019_v28 = vld [vmem:[%s21275_s4 + $0x26c] ss:$48 sps:$4 sm:$0xff]  }
 0x1ff   :  { %2787 = vmatpush1.bf16.msra.mxu0 %v15930_v2  ;;  %v16014_v2 = vld [vmem:[%s21275_s4 + $0x260] ss:$48 sps:$4 sm:$0xff]  }
 0x200   :  { %2873 = vmatpush1.bf16.msra.mxu1 %v15933_v0  ;;  %2788 = vmatprep.subr.bf16.mxu0 %v15938_v9  ;;  %v16017_v0 = vld [vmem:[%s21275_s4 + $0x268] ss:$48 sps:$4 sm:$0xff]   ;;  %v16022_v9 = vld [vmem:[%s21275_s4 + $0x2c4] ss:$48 sps:$4 sm:$0xff]  }
 0x201   :  { %2874 = vmatprep.subr.bf16.mxu1 %v15941_v5  ;;  %v16025_v5 = vld [vmem:[%s21275_s4 + $0x2cc] ss:$48 sps:$4 sm:$0xff]  }
 0x203   :  { %2789 = vmatpush1.bf16.msra.mxu0 %v15936_v29  ;;  %v16020_v29 = vld [vmem:[%s21275_s4 + $0x2c0] ss:$48 sps:$4 sm:$0xff]  }
 0x204   :  { %2875 = vmatpush1.bf16.msra.mxu1 %v15939_v30  ;;  %2790 = vmatprep.subr.bf16.mxu0 %v15944_v33  ;;  %v16023_v30 = vld [vmem:[%s21275_s4 + $0x2c8] ss:$48 sps:$4 sm:$0xff]   ;;  %v16028_v33 = vld [vmem:[%s21275_s4 + $0x324] ss:$48 sps:$4 sm:$0xff]  }
 0x205   :  { %2876 = vmatprep.subr.bf16.mxu1 %v15947_v34  ;;  %v16031_v34 = vld [vmem:[%s21275_s4 + $0x32c] ss:$48 sps:$4 sm:$0xff]  }
 0x207   :  { %2791 = vmatpush1.bf16.msra.mxu0 %v15942_v36  ;;  %v16026_v36 = vld [vmem:[%s21275_s4 + $0x320] ss:$48 sps:$4 sm:$0xff]  }
 0x208   :  { %2877 = vmatpush1.bf16.msra.mxu1 %v15945_v37  ;;  %2792 = vmatprep.subr.bf16.mxu0 %v15950_v38  ;;  %v16029_v37 = vld [vmem:[%s21275_s4 + $0x328] ss:$48 sps:$4 sm:$0xff]   ;;  %v16034_v38 = vld [vmem:[%s21275_s4 + $0x384] ss:$48 sps:$4 sm:$0xff]  }
 0x209   :  { %2878 = vmatprep.subr.bf16.mxu1 %v15953_v40  ;;  %v16037_v40 = vld [vmem:[%s21275_s4 + $0x38c] ss:$48 sps:$4 sm:$0xff]  }
 0x20b   :  { %2793 = vmatpush1.bf16.msra.mxu0 %v15948_v41  ;;  %v16032_v41 = vld [vmem:[%s21275_s4 + $0x380] ss:$48 sps:$4 sm:$0xff]  }
 0x20c   :  { %2879 = vmatpush1.bf16.msra.mxu1 %v15951_v42  ;;  %2794 = vmatprep.subr.bf16.mxu0 %v15956_v43  ;;  %v16035_v42 = vld [vmem:[%s21275_s4 + $0x388] ss:$48 sps:$4 sm:$0xff]   ;;  %v16040_v43 = vld [vmem:[%s21275_s4 + $0x3e4] ss:$48 sps:$4 sm:$0xff]  }
 0x20d   :  { %2880 = vmatprep.subr.bf16.mxu1 %v15959_v44  ;;  %v16043_v44 = vld [vmem:[%s21275_s4 + $0x3ec] ss:$48 sps:$4 sm:$0xff]  }
 0x20f   :  { %2795 = vmatpush1.bf16.msra.mxu0 %v15954_v45  ;;  %v16038_v45 = vld [vmem:[%s21275_s4 + $0x3e0] ss:$48 sps:$4 sm:$0xff]  }
 0x210   :  { %2881 = vmatpush1.bf16.msra.mxu1 %v15957_v46  ;;  %2796 = vmatprep.subr.bf16.mxu0 %v15962_v47  ;;  %v16041_v46 = vld [vmem:[%s21275_s4 + $0x3e8] ss:$48 sps:$4 sm:$0xff]   ;;  %v16046_v47 = vld [vmem:[%s21275_s4 + $0x444] ss:$48 sps:$4 sm:$0xff]  }
 0x211   :  { %2882 = vmatprep.subr.bf16.mxu1 %v15965_v48  ;;  %v16049_v48 = vld [vmem:[%s21275_s4 + $0x44c] ss:$48 sps:$4 sm:$0xff]  }
 0x213   :  { %2797 = vmatpush1.bf16.msra.mxu0 %v15960_v49  ;;  %v16044_v49 = vld [vmem:[%s21275_s4 + $0x440] ss:$48 sps:$4 sm:$0xff]  }
 0x214   :  { %2883 = vmatpush1.bf16.msra.mxu1 %v15963_v50  ;;  %2798 = vmatprep.subr.bf16.mxu0 %v15968_v51  ;;  %v16047_v50 = vld [vmem:[%s21275_s4 + $0x448] ss:$48 sps:$4 sm:$0xff]   ;;  %v16052_v51 = vld [vmem:[%s21275_s4 + $0x4a4] ss:$48 sps:$4 sm:$0xff]  }
 0x215   :  { %2884 = vmatprep.subr.bf16.mxu1 %v15971_v53  ;;  %v16055_v53 = vld [vmem:[%s21275_s4 + $0x4ac] ss:$48 sps:$4 sm:$0xff]  }
 0x217   :  { %2799 = vmatpush1.bf16.msra.mxu0 %v15966_v59  ;;  %v16050_v59 = vld [vmem:[%s21275_s4 + $0x4a0] ss:$48 sps:$4 sm:$0xff]  }
 0x218   :  { %2885 = vmatpush1.bf16.msra.mxu1 %v15969_v61  ;;  %2800 = vmatprep.subr.bf16.mxu0 %v15974_v63  ;;  %v16053_v61 = vld [vmem:[%s21275_s4 + $0x4a8] ss:$48 sps:$4 sm:$0xff]   ;;  %v16058_v63 = vld [vmem:[%s21275_s4 + $0x504] ss:$48 sps:$4 sm:$0xff]  }
 0x219   :  { %2886 = vmatprep.subr.bf16.mxu1 %v15977_v1  ;;  %v16061_v1 = vld [vmem:[%s21275_s4 + $0x50c] ss:$48 sps:$4 sm:$0xff]  }
 0x21b   :  { %2801 = vmatpush1.bf16.msra.mxu0 %v15972_v3  ;;  %v16056_v3 = vld [vmem:[%s21275_s4 + $0x500] ss:$48 sps:$4 sm:$0xff]  }
 0x21c   :  { %2887 = vmatpush1.bf16.msra.mxu1 %v15975_v6  ;;  %2899 = vmatprep.subr.bf16.mxu0 %v15980_v7  ;;  %v16059_v6 = vld [vmem:[%s21275_s4 + $0x508] ss:$48 sps:$4 sm:$0xff]   ;;  %v16064_v7 = vld [vmem:[%s21275_s4 + $0x564] ss:$48 sps:$4 sm:$0xff]  }
 0x21d   :  { %2985 = vmatprep.subr.bf16.mxu1 %v15983_v8  ;;  %v16067_v8 = vld [vmem:[%s21275_s4 + $0x56c] ss:$48 sps:$4 sm:$0xff]  }
 0x21e   :  { %2803 = vmatmul.mubr.bf16.vlgmr.msra.gmra.mrb[4].mxu0 %v17687_v35 }
 0x21f   :  { %2889 = vmatmul.mubr.bf16.vlgmr.msra.gmra.mrb[4].mxu1 %v17687_v35  ;;  %2900 = vmatpush1.bf16.msra.mxu0 %v15978_v10  ;;  %v16062_v10 = vld [vmem:[%s21275_s4 + $0x560] ss:$48 sps:$4 sm:$0xff]  }
 0x220   :  { %2931 = vmatprep.mubr.bf16.mxu0 %v17680_v31  ;;  %2986 = vmatpush1.bf16.msra.mxu1 %v15981_v11  ;;  %v16065_v11 = vld [vmem:[%s21275_s4 + $0x568] ss:$48 sps:$4 sm:$0xff]  }
 0x221   :  { %3017 = vmatprep.mubr.bf16.mxu1 %v17680_v31  ;;  %2901 = vmatprep.subr.bf16.mxu0 %v15986_v12  ;;  %v15998_v31 = vld [vmem:[%s21275_s4 + $0x144] ss:$48 sps:$4 sm:$0xff]  }
 0x222   :  { %2987 = vmatprep.subr.bf16.mxu1 %v15989_v13  ;;  %v16070_v12 = vld [vmem:[%s21275_s4 + $0x5c4] ss:$48 sps:$4 sm:$0xff]   ;;  %v16073_v13 = vld [vmem:[%s21275_s4 + $0x5cc] ss:$48 sps:$4 sm:$0xff]  }
 0x223   :  { %2902 = vmatpush1.bf16.msra.mxu0 %v15984_v14  ;;  %v16068_v14 = vld [vmem:[%s21275_s4 + $0x5c0] ss:$48 sps:$4 sm:$0xff]  }
 0x224   :  { %2988 = vmatpush1.bf16.msra.mxu1 %v15987_v15  ;;  %2903 = vmatprep.subr.bf16.mxu0 %v15992_v16  ;;  %v16071_v15 = vld [vmem:[%s21275_s4 + $0x5c8] ss:$48 sps:$4 sm:$0xff]   ;;  %v16076_v16 = vld [vmem:[%s21275_s4 + $0x624] ss:$48 sps:$4 sm:$0xff]  }
 0x225   :  { %2989 = vmatprep.subr.bf16.mxu1 %v15995_v17  ;;  %v16079_v17 = vld [vmem:[%s21275_s4 + $0x62c] ss:$48 sps:$4 sm:$0xff]  }
 0x227   :  { %2904 = vmatpush1.bf16.msra.mxu0 %v15990_v55  ;;  %v16074_v55 = vld [vmem:[%s21275_s4 + $0x620] ss:$48 sps:$4 sm:$0xff]  }
 0x228   :  { %2990 = vmatpush1.bf16.msra.mxu1 %v15993_v18  ;;  %2905 = vmatprep.subr.bf16.mxu0 %v15998_v31  ;;  %v16077_v18 = vld [vmem:[%s21275_s4 + $0x628] ss:$48 sps:$4 sm:$0xff]   ;;  %v16082_v31 = vld [vmem:[%s21275_s4 + $0x684] ss:$48 sps:$4 sm:$0xff]  }
 0x229   :  { %2991 = vmatprep.subr.bf16.mxu1 %v16001_v54  ;;  %v16085_v54 = vld [vmem:[%s21275_s4 + $0x68c] ss:$48 sps:$4 sm:$0xff]  }
 0x22b   :  { %2906 = vmatpush1.bf16.msra.mxu0 %v15996_v19  ;;  %v16080_v19 = vld [vmem:[%s21275_s4 + $0x680] ss:$48 sps:$4 sm:$0xff]  }
 0x22c   :  { %2992 = vmatpush1.bf16.msra.mxu1 %v15999_v56  ;;  %2907 = vmatprep.subr.bf16.mxu0 %v16004_v20  ;;  %v16083_v56 = vld [vmem:[%s21275_s4 + $0x688] ss:$48 sps:$4 sm:$0xff]   ;;  %v16088_v20 = vld [vmem:[%s21275_s4 + $0x6e4] ss:$48 sps:$4 sm:$0xff]  }
 0x22d   :  { %2993 = vmatprep.subr.bf16.mxu1 %v16007_v21  ;;  %v16086_v21 = vld [vmem:[%s21275_s4 + $0x6e0] ss:$48 sps:$4 sm:$0xff]  }
 0x22f   :  { %2908 = vmatpush1.bf16.msra.mxu0 %v16002_v22  ;;  %v16089_v22 = vld [vmem:[%s21275_s4 + $0x6e8] ss:$48 sps:$4 sm:$0xff]  }
 0x230   :  { %2994 = vmatpush1.bf16.msra.mxu1 %v16005_v23  ;;  %2909 = vmatprep.subr.bf16.mxu0 %v16010_v24  ;;  %v16097_v23 = vld [vmem:[%s21275_s4 + $0x74c] ss:$48 sps:$4 sm:$0xff]   ;;  %v16092_v24 = vld [vmem:[%s21275_s4 + $0x740] ss:$48 sps:$4 sm:$0xff]  }
 0x231   :  { %2995 = vmatprep.subr.bf16.mxu1 %v16013_v25  ;;  %v16095_v25 = vld [vmem:[%s21275_s4 + $0x748] ss:$48 sps:$4 sm:$0xff]  }
 0x233   :  { %2910 = vmatpush1.bf16.msra.mxu0 %v16008_v26  ;;  %v16100_v26 = vld [vmem:[%s21275_s4 + $0x7a4] ss:$48 sps:$4 sm:$0xff]  }
 0x234   :  { %2996 = vmatpush1.bf16.msra.mxu1 %v16011_v58  ;;  %2911 = vmatprep.subr.bf16.mxu0 %v16016_v27  ;;  %v16103_v58 = vld [vmem:[%s21275_s4 + $0x7ac] ss:$48 sps:$4 sm:$0xff]   ;;  %v16098_v27 = vld [vmem:[%s21275_s4 + $0x7a0] ss:$48 sps:$4 sm:$0xff]  }
 0x235   :  { %2997 = vmatprep.subr.bf16.mxu1 %v16019_v28  ;;  %v18526_v28 = vld [vmem:[%s21276_s5] sm:$0xff] }
 0x237   :  { %2912 = vmatpush1.bf16.msra.mxu0 %v16014_v2  ;;  %v16101_v2 = vld [vmem:[%s21275_s4 + $0x7a8] ss:$48 sps:$4 sm:$0xff]  }
 0x238   :  { %2998 = vmatpush1.bf16.msra.mxu1 %v16017_v0  ;;  %2913 = vmatprep.subr.bf16.mxu0 %v16022_v9  ;;  %v16106_v0 = vld [vmem:[%s21275_s4 + $0x804] ss:$48 sps:$4 sm:$0xff]   ;;  %v16109_v9 = vld [vmem:[%s21275_s4 + $0x80c] ss:$48 sps:$4 sm:$0xff]  }
 0x239   :  { %2999 = vmatprep.subr.bf16.mxu1 %v16025_v5  ;;  %v578_v5 = vrot.slane %v18526_v28, %v17653_v62 }
 0x23b   :  { %2914 = vmatpush1.bf16.msra.mxu0 %v16020_v29  ;;  %v18541_v29 = vrot.slane %v18526_v28, %v17641_v57 }
 0x23c   :  { %3000 = vmatpush1.bf16.msra.mxu1 %v16023_v30  ;;  %2915 = vmatprep.subr.bf16.mxu0 %v16028_v33  ;;  %v18545_v30 = vrot.slane %v18526_v28, %v17647_v60  ;;  %v18549_v33 = vrot.slane %v18526_v28, %v17658_v4 }
 0x23d   :  { %3001 = vmatprep.subr.bf16.mxu1 %v16031_v34  ;;  %v16104_v34 = vld [vmem:[%s21275_s4 + $0x800] ss:$48 sps:$4 sm:$0xff]  }
 0x23f   :  { %2916 = vmatpush1.bf16.msra.mxu0 %v16026_v36  ;;  %v16107_v36 = vld [vmem:[%s21275_s4 + $0x808] ss:$48 sps:$4 sm:$0xff]  }
 0x240   :  { %3002 = vmatpush1.bf16.msra.mxu1 %v16029_v37  ;;  %2917 = vmatprep.subr.bf16.mxu0 %v16034_v38 }
 0x241   :  { %3003 = vmatprep.subr.bf16.mxu1 %v16037_v40  ;;  %v16112_v40 = vld [vmem:[%s21275_s4 + $0x864] ss:$48 sps:$4 sm:$0xff]  }
 0x243   :  { %2918 = vmatpush1.bf16.msra.mxu0 %v16032_v41  ;;  %v16115_v41 = vld [vmem:[%s21275_s4 + $0x86c] ss:$48 sps:$4 sm:$0xff]  }
 0x244   :  { %3004 = vmatpush1.bf16.msra.mxu1 %v16035_v42  ;;  %2919 = vmatprep.subr.bf16.mxu0 %v16040_v43 }
 0x245   :  { %3005 = vmatprep.subr.bf16.mxu1 %v16043_v44 }
 0x247   :  { %2920 = vmatpush1.bf16.msra.mxu0 %v16038_v45 }
 0x248   :  { %3006 = vmatpush1.bf16.msra.mxu1 %v16041_v46  ;;  %2921 = vmatprep.subr.bf16.mxu0 %v16046_v47 }
 0x249   :  { %3007 = vmatprep.subr.bf16.mxu1 %v16049_v48 }
 0x24b   :  { %2922 = vmatpush1.bf16.msra.mxu0 %v16044_v49 }
 0x24c   :  { %3008 = vmatpush1.bf16.msra.mxu1 %v16047_v50  ;;  %2923 = vmatprep.subr.bf16.mxu0 %v16052_v51  ;;  %v16110_v50 = vld [vmem:[%s21275_s4 + $0x860] ss:$48 sps:$4 sm:$0xff]  }
 0x24d   :  { %3009 = vmatprep.subr.bf16.mxu1 %v16055_v53 }
 0x24f   :  { %2924 = vmatpush1.bf16.msra.mxu0 %v16050_v59  ;;  %v16113_v59 = vld [vmem:[%s21275_s4 + $0x868] ss:$48 sps:$4 sm:$0xff]  }
 0x250   :  { %3010 = vmatpush1.bf16.msra.mxu1 %v16053_v61  ;;  %2925 = vmatprep.subr.bf16.mxu0 %v16058_v63  ;;  %v16118_v61 = vld [vmem:[%s21275_s4 + $0x8c4] ss:$48 sps:$4 sm:$0xff]   ;;  %v16121_v63 = vld [vmem:[%s21275_s4 + $0x8cc] ss:$48 sps:$4 sm:$0xff]  }
 0x251   :  { %3011 = vmatprep.subr.bf16.mxu1 %v16061_v1 }
 0x253   :  { %2926 = vmatpush1.bf16.msra.mxu0 %v16056_v3  ;;  %v16116_v3 = vld [vmem:[%s21275_s4 + $0x8c0] ss:$48 sps:$4 sm:$0xff]  }
 0x254   :  { %3012 = vmatpush1.bf16.msra.mxu1 %v16059_v6  ;;  %2927 = vmatprep.subr.bf16.mxu0 %v16064_v7  ;;  %v16119_v6 = vld [vmem:[%s21275_s4 + $0x8c8] ss:$48 sps:$4 sm:$0xff]   ;;  %v16124_v7 = vld [vmem:[%s21275_s4 + $0x924] ss:$48 sps:$4 sm:$0xff]  }
 0x255   :  { %3013 = vmatprep.subr.bf16.mxu1 %v16067_v8  ;;  %v16127_v8 = vld [vmem:[%s21275_s4 + $0x92c] ss:$48 sps:$4 sm:$0xff]  }
 0x257   :  { %2928 = vmatpush1.bf16.msra.mxu0 %v16062_v10  ;;  %v16122_v10 = vld [vmem:[%s21275_s4 + $0x920] ss:$48 sps:$4 sm:$0xff]  }
 0x258   :  { %3014 = vmatpush1.bf16.msra.mxu1 %v16065_v11  ;;  %2929 = vmatprep.subr.bf16.mxu0 %v16070_v12  ;;  %v16125_v11 = vld [vmem:[%s21275_s4 + $0x928] ss:$48 sps:$4 sm:$0xff]   ;;  %v16130_v12 = vld [vmem:[%s21275_s4 + $0x984] ss:$48 sps:$4 sm:$0xff]  }
 0x259   :  { %3015 = vmatprep.subr.bf16.mxu1 %v16073_v13  ;;  %v16133_v13 = vld [vmem:[%s21275_s4 + $0x98c] ss:$48 sps:$4 sm:$0xff]  }
 0x25b   :  { %2930 = vmatpush1.bf16.msra.mxu0 %v16068_v14  ;;  %v16128_v14 = vld [vmem:[%s21275_s4 + $0x980] ss:$48 sps:$4 sm:$0xff]  }
 0x25c   :  { %3016 = vmatpush1.bf16.msra.mxu1 %v16071_v15  ;;  %2942 = vmatprep.subr.bf16.mxu0 %v16076_v16  ;;  %v16131_v15 = vld [vmem:[%s21275_s4 + $0x988] ss:$48 sps:$4 sm:$0xff]   ;;  %v16136_v16 = vld [vmem:[%s21275_s4 + $0x9e4] ss:$48 sps:$4 sm:$0xff]  }
 0x25d   :  { %3028 = vmatprep.subr.bf16.mxu1 %v16079_v17  ;;  %v16139_v17 = vld [vmem:[%s21275_s4 + $0x9ec] ss:$48 sps:$4 sm:$0xff]  }
 0x25e   :  { %2932 = vmatmul.mubr.bf16.vlgmr.msra.gmra.mrb[8].mxu0 %v17682_v32 }
 0x25f   :  { %3018 = vmatmul.mubr.bf16.vlgmr.msra.gmra.mrb[8].mxu1 %v17682_v32  ;;  %2943 = vmatpush1.bf16.msra.mxu0 %v16074_v55  ;;  %v16091_v32 = vld [vmem:[%s21275_s4 + $0x6ec] ss:$48 sps:$4 sm:$0xff]   ;;  %v16134_v55 = vld [vmem:[%s21275_s4 + $0x9e0] ss:$48 sps:$4 sm:$0xff]  }
 0x260   :  { %2974 = vmatprep.mubr.bf16.mxu0 %v17702_v39  ;;  %3029 = vmatpush1.bf16.msra.mxu1 %v16077_v18  ;;  %v16137_v18 = vld [vmem:[%s21275_s4 + $0x9e8] ss:$48 sps:$4 sm:$0xff]  }
 0x261   :  { %3060 = vmatprep.mubr.bf16.mxu1 %v17702_v39  ;;  %2944 = vmatprep.subr.bf16.mxu0 %v16082_v31  ;;  %v16094_v39 = vld [vmem:[%s21275_s4 + $0x744] ss:$48 sps:$4 sm:$0xff]  }
 0x262   :  { %3030 = vmatprep.subr.bf16.mxu1 %v16085_v54  ;;  %v16142_v31 = vld [vmem:[%s21275_s4 + $0xa44] ss:$48 sps:$4 sm:$0xff]   ;;  %v16145_v54 = vld [vmem:[%s21275_s4 + $0xa4c] ss:$48 sps:$4 sm:$0xff]  }
 0x263   :  { %2945 = vmatpush1.bf16.msra.mxu0 %v16080_v19  ;;  %v16140_v19 = vld [vmem:[%s21275_s4 + $0xa40] ss:$48 sps:$4 sm:$0xff]  }
 0x264   :  { %3031 = vmatpush1.bf16.msra.mxu1 %v16083_v56  ;;  %2946 = vmatprep.subr.bf16.mxu0 %v16088_v20  ;;  %v16143_v56 = vld [vmem:[%s21275_s4 + $0xa48] ss:$48 sps:$4 sm:$0xff]   ;;  %v16148_v20 = vld [vmem:[%s21275_s4 + $0xaa4] ss:$48 sps:$4 sm:$0xff]  }
 0x265   :  { %3032 = vmatprep.subr.bf16.mxu1 %v16091_v32  ;;  %v16151_v32 = vld [vmem:[%s21275_s4 + $0xaac] ss:$48 sps:$4 sm:$0xff]  }
 0x267   :  { %2947 = vmatpush1.bf16.msra.mxu0 %v16086_v21  ;;  %v16146_v21 = vld [vmem:[%s21275_s4 + $0xaa0] ss:$48 sps:$4 sm:$0xff]  }
 0x268   :  { %3033 = vmatpush1.bf16.msra.mxu1 %v16089_v22  ;;  %2948 = vmatprep.subr.bf16.mxu0 %v16094_v39  ;;  %v16149_v22 = vld [vmem:[%s21275_s4 + $0xaa8] ss:$48 sps:$4 sm:$0xff]   ;;  %v16154_v39 = vld [vmem:[%s21275_s4 + $0xb04] ss:$48 sps:$4 sm:$0xff]  }
 0x269   :  { %3034 = vmatprep.subr.bf16.mxu1 %v16097_v23  ;;  %v16157_v23 = vld [vmem:[%s21275_s4 + $0xb0c] ss:$48 sps:$4 sm:$0xff]  }
 0x26b   :  { %2949 = vmatpush1.bf16.msra.mxu0 %v16092_v24  ;;  %v16152_v24 = vld [vmem:[%s21275_s4 + $0xb00] ss:$48 sps:$4 sm:$0xff]  }
 0x26c   :  { %3035 = vmatpush1.bf16.msra.mxu1 %v16095_v25  ;;  %2950 = vmatprep.subr.bf16.mxu0 %v16100_v26  ;;  %v16155_v25 = vld [vmem:[%s21275_s4 + $0xb08] ss:$48 sps:$4 sm:$0xff]   ;;  %v16160_v26 = vld [vmem:[%s21275_s4 + $0xb64] ss:$48 sps:$4 sm:$0xff]  }
 0x26d   :  { %3036 = vmatprep.subr.bf16.mxu1 %v16103_v58  ;;  %v16163_v58 = vld [vmem:[%s21275_s4 + $0xb6c] ss:$48 sps:$4 sm:$0xff]  }
 0x26f   :  { %2951 = vmatpush1.bf16.msra.mxu0 %v16098_v27  ;;  %v16158_v27 = vld [vmem:[%s21275_s4 + $0xb60] ss:$48 sps:$4 sm:$0xff]  }
 0x270   :  { %3037 = vmatpush1.bf16.msra.mxu1 %v16101_v2  ;;  %2952 = vmatprep.subr.bf16.mxu0 %v16106_v0  ;;  %v16161_v2 = vld [vmem:[%s21275_s4 + $0xb68] ss:$48 sps:$4 sm:$0xff]   ;;  %v16166_v0 = vld [vmem:[%s21275_s4 + $0xbc4] ss:$48 sps:$4 sm:$0xff]  }
 0x271   :  { %v2632_v37 = vpop.f32.mrb[0].mxu0  ;;  %v2718_v38 = vpop.f32.mrb[0].mxu1  ;;  %3038 = vmatprep.subr.bf16.mxu1 %v16109_v9  ;;  %v16169_v9 = vld [vmem:[%s21275_s4 + $0xbcc] ss:$48 sps:$4 sm:$0xff]  }
 0x272   :  { %v18563_v42 = vadd.f32 %v2632_v37, %v578_v5  ;;  %v18566_v43 = vadd.f32 %v2718_v38, %v18541_v29  ;;  %v2634_v44 = vpop.f32.mrb[1].mxu0  ;;  %v2720_v45 = vpop.f32.mrb[1].mxu1  ;;  %v18708_v37 = vsub.s32 6, %v17638_v52  ;;  %v18711_v38 = vsub.s32 5, %v17638_v52 }
 0x273   :  { %v18569_v46 = vadd.f32 %v2634_v44, %v18545_v30  ;;  %v18572_v47 = vadd.f32 %v2720_v45, %v18549_v33  ;;  %v2636_v48 = vpop.f32.mrb[2].mxu0  ;;  %v18574_v49 = vpop.f32.mrb[2].mxu1  ;;  %2953 = vmatpush1.bf16.msra.mxu0 %v16104_v34  ;;  %v16167_v34 = vld [vmem:[%s21275_s4 + $0xbc8] ss:$48 sps:$4 sm:$0xff]  }
 0x274   :  { %3039 = vmatpush1.bf16.msra.mxu1 %v16107_v36  ;;  %v18579_v51 = vpop.f32.mrb[3].mxu0  ;;  %v18581_v53 = vpop.f32.mrb[3].mxu1  ;;  %3271 = vrot.lane.b32.xlu1 %v18563_v42, %s17265_s28  ;;  %v18594_v1 = vadd.f32 %v2636_v48, %v578_v5  ;;  %v16164_v5 = vld [vmem:[%s21275_s4 + $0xbc0] ss:$48 sps:$4 sm:$0xff]   ;;  %v18705_v36 = vsub.s32 4, %v17638_v52 }
 0x275   :  { %2954 = vmatprep.subr.bf16.mxu0 %v16112_v40  ;;  %3040 = vmatprep.subr.bf16.mxu1 %v16115_v41  ;;  %v18714_v40 = vsub.s32 7, %v17638_v52 }
 0x276   :  { %v594_v41 = vrot.slane %v18526_v28, %v18705_v36 }
 0x277   :  { %2955 = vmatpush1.bf16.msra.mxu0 %v16110_v50  ;;  %v606_v50 = vrot.slane %v18526_v28, %v18714_v40 }
 0x278   :  { %3041 = vmatpush1.bf16.msra.mxu1 %v16113_v59  ;;  %3273 = vrot.lane.b32.xlu1 %v18594_v1, %s17265_s28 }
 0x279   :  { %2956 = vmatprep.subr.bf16.mxu0 %v16118_v61  ;;  %3042 = vmatprep.subr.bf16.mxu1 %v16121_v63 }
 0x27b   :  { %2957 = vmatpush1.bf16.msra.mxu0 %v16116_v3 }
 0x27c   :  { %3043 = vmatpush1.bf16.msra.mxu1 %v16119_v6  ;;  %2958 = vmatprep.subr.bf16.mxu0 %v16124_v7 }
 0x27d   :  { %3044 = vmatprep.subr.bf16.mxu1 %v16127_v8 }
 0x27f   :  { %2959 = vmatpush1.bf16.msra.mxu0 %v16122_v10 }
 0x280   :  { %3045 = vmatpush1.bf16.msra.mxu1 %v16125_v11  ;;  %2960 = vmatprep.subr.bf16.mxu0 %v16130_v12 }
 0x281   :  { %3046 = vmatprep.subr.bf16.mxu1 %v16133_v13 }
 0x283   :  { %2961 = vmatpush1.bf16.msra.mxu0 %v16128_v14 }
 0x284   :  { %3047 = vmatpush1.bf16.msra.mxu1 %v16131_v15  ;;  %2962 = vmatprep.subr.bf16.mxu0 %v16136_v16 }
 0x285   :  { %3048 = vmatprep.subr.bf16.mxu1 %v16139_v17 }
 0x287   :  { %2963 = vmatpush1.bf16.msra.mxu0 %v16134_v55 }
 0x288   :  { %3049 = vmatpush1.bf16.msra.mxu1 %v16137_v18  ;;  %2964 = vmatprep.subr.bf16.mxu0 %v16142_v31 }
 0x289   :  { %3050 = vmatprep.subr.bf16.mxu1 %v16145_v54 }
 0x28b   :  { %2965 = vmatpush1.bf16.msra.mxu0 %v16140_v19 }
 0x28c   :  { %3051 = vmatpush1.bf16.msra.mxu1 %v16143_v56  ;;  %2966 = vmatprep.subr.bf16.mxu0 %v16148_v20 }
 0x28d   :  { %3052 = vmatprep.subr.bf16.mxu1 %v16151_v32 }
 0x28f   :  { %2967 = vmatpush1.bf16.msra.mxu0 %v16146_v21 }
 0x290   :  { %3053 = vmatpush1.bf16.msra.mxu1 %v16149_v22  ;;  %2968 = vmatprep.subr.bf16.mxu0 %v16154_v39  ;;  %v572_v22 = vld [vmem:[%s21276_s5 + $0x8] sm:$0xf] }
 0x291   :  { %3054 = vmatprep.subr.bf16.mxu1 %v16157_v23  ;;  %v618_v23 = vrot.slane %v572_v22, %v17641_v57 }
 0x293   :  { %2969 = vmatpush1.bf16.msra.mxu0 %v16152_v24  ;;  %v622_v24 = vrot.slane %v572_v22, %v17658_v4 }
 0x294   :  { %3055 = vmatpush1.bf16.msra.mxu1 %v16155_v25  ;;  %2970 = vmatprep.subr.bf16.mxu0 %v16160_v26  ;;  %v614_v26 = vrot.slane %v572_v22, %v17647_v60 }
 0x295   :  { %3056 = vmatprep.subr.bf16.mxu1 %v16163_v58 }
 0x297   :  { %2971 = vmatpush1.bf16.msra.mxu0 %v16158_v27 }
 0x298   :  { %3057 = vmatpush1.bf16.msra.mxu1 %v16161_v2  ;;  %2972 = vmatprep.subr.bf16.mxu0 %v16166_v0 }
 0x299   :  { %3058 = vmatprep.subr.bf16.mxu1 %v16169_v9 }
 0x29b   :  { %2973 = vmatpush1.bf16.msra.mxu0 %v16164_v5 }
 0x29c   :  { %3059 = vmatpush1.bf16.msra.mxu1 %v16167_v34 }
 0x29e   :  { %2975 = vmatmul.mubr.bf16.vlgmr.msra.gmra.mrb[8].mxu0 %v17687_v35 }
 0x29f   :  { %3061 = vmatmul.mubr.bf16.vlgmr.msra.gmra.mrb[8].mxu1 %v17687_v35  ;;  %15167 = vmatprep.mubr.msk.f32.mxu0 %vm3075_vm0, %v18563_v42  ;;  %v602_v35 = vrot.slane %v18526_v28, %v18708_v37  ;;  %v598_v42 = vrot.slane %v18526_v28, %v18711_v38 }
 0x2e6   :  { %v3272_v56 = vpop.permute.xlu1 %3271 }
 0x2f1   :  { %v2804_v44 = vpop.f32.mrb[4].mxu0 }
 0x2f2   :  { %v2890_v45 = vpop.f32.mrb[4].mxu1  ;;  %v2806_v48 = vpop.f32.mrb[5].mxu0  ;;  %v15363_v63 = vadd.f32 %v2804_v44, %v594_v41 }
 0x2f3   :  { %v2892_v59 = vpop.f32.mrb[5].mxu1  ;;  %v2808_v61 = vpop.f32.mrb[6].mxu0  ;;  %v18724_v7 = vadd.f32 %v2890_v45, %v602_v35  ;;  %v18726_v8 = vadd.f32 %v2806_v48, %v598_v42 }
 0x2f4   :  { %v15365_v52 = vadd.f32 %v2808_v61, %v594_v41  ;;  %v2894_v3 = vpop.f32.mrb[6].mxu1  ;;  %v2810_v6 = vpop.f32.mrb[7].mxu0  ;;  %v18738_v28 = vadd.f32 %v2892_v59, %v606_v50 }
 0x2f5   :  { %v18728_v10 = vadd.f32 %v2894_v3, %v602_v35  ;;  %v18730_v11 = vadd.f32 %v2810_v6, %v598_v42  ;;  %v2896_v12 = vpop.f32.mrb[7].mxu1  ;;  %v3274_v59 = vpop.permute.xlu1 %3273 }
 0x2f6   :  { %v15554_v14 = vpack.i.bf16 %v15365_v52, %v15363_v63  ;;  %v15275_v15 = vpack.c.bf16 %v15365_v52, %v15363_v63  ;;  %v18740_v16 = vadd.f32 %v2896_v12, %v606_v50 }
 0x2f7   :  { %v15574_v17 = vpack.i.bf16 %v18728_v10, %v18724_v7  ;;  %v18746_v55 = vpack.c.bf16 %v18728_v10, %v18724_v7  ;;  %v15564_v18 = vpack.i.bf16 %v18730_v11, %v18726_v8  ;;  %v18752_v31 = vpack.c.bf16 %v18730_v11, %v18726_v8 }
 0x2f8   :  { %v15584_v54 = vpack.i.bf16 %v18740_v16, %v18738_v28  ;;  %v18758_v19 = vpack.c.bf16 %v18740_v16, %v18738_v28  ;;  %15555 = vrot.lane.b32.xlu0 %v15554_v14, %s17265_s28  ;;  %15277 = vmatprep.subr.msk.bf16.mxu0 %vm18734_vm1, %v15275_v15 }
 0x2f9   :  { %15280 = vmatpush3.bf16.xpose.msk.msra.mxu0 %vm18734_vm1, %v15275_v15 }
 0x300   :  { %15168 = vmatmul.mubr.msk.f32.vlgmr.msra.gmra.mrb[12].mxu0 %vm3075_vm0, %v18594_v1  ;;  %v610_v1 = vrot.slane %v572_v22, %v17653_v62 }
 0x301   :  { %15181 = vmatprep.mubr.msk.f32.mxu0 %vm3075_vm0, %v3272_v56 }
 0x36a   :  { %v15556_v20 = vpop.permute.xlu0 %15555 }
 0x36b   :  { %v15558_v32 = vunpack.i.h.bf16 %v15556_v20  ;;  %v15557_v21 = vunpack.i.l.bf16 %v15556_v20  ;;  %v18819_v20 = vld [vmem:[%s21272_s1 + $0x8] sm:$0xff] }
 0x36c   :  { %vm3074_vm2 = vcmp.eq.f32.partialorder %v18819_v20, 0.0  ;;  %v16172_v20 = vld [vmem:[%s21277_s6 + $0xc] ss:$16 sps:$4 sm:$0xff]  }
 0x36d   :  { %v15285_v39 = vpack.c.bf16 %v15558_v32, %v15557_v21  ;;  %v18824_v32 = vld [vmem:[%s21272_s1] sm:$0xff] }
 0x36e   :  { %vm3073_vm3 = vcmp.eq.f32.partialorder %v18824_v32, 0.0  ;;  %v16175_v32 = vld [vmem:[%s21277_s6 + $0x2c] ss:$16 sps:$4 sm:$0xff]  }
 0x36f   :  { %15287 = vmatprep.subr.msk.bf16.mxu0 %vm18734_vm1, %v15285_v39 }
 0x370   :  { %15290 = vmatpush3.bf16.xpose.msk.msra.mxu0 %vm18734_vm1, %v15285_v39 }
 0x371   :  { %v2976_v25 = vpop.f32.mrb[8].mxu0 }
 0x372   :  { %v3062_v58 = vpop.f32.mrb[8].mxu1  ;;  %v2978_v27 = vpop.f32.mrb[9].mxu0  ;;  %v18781_v5 = vadd.f32 %v2976_v25, %v610_v1 }
 0x373   :  { %v18779_v2 = vadd.f32 %v3062_v58, %v618_v23  ;;  %v3064_v0 = vpop.f32.mrb[9].mxu1  ;;  %v2980_v9 = vpop.f32.mrb[10].mxu0  ;;  %v18787_v42 = vadd.f32 %v2978_v27, %v614_v26 }
 0x374   :  { %v18783_v34 = vadd.f32 %v3064_v0, %v622_v24  ;;  %v18785_v41 = vadd.f32 %v2980_v9, %v610_v1  ;;  %v3066_v44 = vpop.f32.mrb[10].mxu1  ;;  %v2982_v35 = vpop.f32.mrb[11].mxu0 }
 0x375   :  { %v18789_v45 = vadd.f32 %v3066_v44, %v618_v23  ;;  %v18791_v48 = vadd.f32 %v2982_v35, %v614_v26  ;;  %v3068_v50 = vpop.f32.mrb[11].mxu1 }
 0x376   :  { %v15559_v61 = vpack.i.bf16 %v18785_v41, %v18781_v5  ;;  %v15281_v63 = vpack.c.bf16 %v18785_v41, %v18781_v5  ;;  %v18797_v52 = vadd.f32 %v3068_v50, %v622_v24 }
 0x377   :  { %v15579_v3 = vpack.i.bf16 %v18789_v45, %v18779_v2  ;;  %v18803_v6 = vpack.c.bf16 %v18789_v45, %v18779_v2  ;;  %v15569_v12 = vpack.i.bf16 %v18791_v48, %v18787_v42  ;;  %v15301_v14 = vpack.c.bf16 %v18791_v48, %v18787_v42  ;;  %15182 = vmatmul.mubr.msk.f32.vlgmr.msra.gmra.mrb[14].mxu0 %vm3075_vm0, %v3274_v59 }
 0x378   :  { %v15589_v15 = vpack.i.bf16 %v18797_v52, %v18783_v34  ;;  %v18814_v56 = vpack.c.bf16 %v18797_v52, %v18783_v34  ;;  %15282 = vmatprep.subr.bf16.mxu1 %v15281_v63  ;;  %v16206_v34 = vld [vmem:[%s21277_s6 + $0x188] ss:$16 sps:$4 sm:$0xff]   ;;  %v16214_v52 = vld [vmem:[%s21277_s6 + $0x1ac] ss:$16 sps:$4 sm:$0xff]  }
 0x379   :  { %15284 = vmatpush3.bf16.msra.mxu1 %v15281_v63  ;;  %15302 = vmatprep.subr.bf16.mxu0 %v15301_v14 }
 0x37a   :  { %15304 = vmatpush3.bf16.msra.mxu0 %v15301_v14 }
 0x3d3   :  { %v15169_v21 = vpop.f32.mrb[12].mxu0 }
 0x3d4   :  { %v3164_v22 = vsel %vm3074_vm2, -1e+09, %v15169_v21  ;;  %v3154_v39 = vpop.f32.mrb[13].mxu0 }
 0x3d5   :  { %v3163_v23 = vsel %vm3073_vm3, -1e+09, %v3154_v39  ;;  %v3169_v1 = vsel %vm3165_vm4, %v3164_v22, -inf }
 0x3d6   :  { %3170 = vmax.xlane.f32.xlu0 %v3169_v1  ;;  %v3166_v24 = vsel %vm3165_vm4, %v3163_v23, -inf }
 0x3d7   :  { %3167 = vmax.xlane.f32.xlu1 %v3166_v24 }
 0x44a   :  { %v15183_v25 = vpop.f32.mrb[14].mxu0 }
 0x44b   :  { %v3353_v26 = vpop.f32.mrb[15].mxu0  ;;  %v3363_v0 = vsel %vm3074_vm2, -1e+09, %v15183_v25 }
 0x44c   :  { %v3362_v58 = vsel %vm3073_vm3, -1e+09, %v3353_v26  ;;  %v3367_v9 = vsel %vm3165_vm4, %v3363_v0, -inf }
 0x44d   :  { %v3364_v27 = vsel %vm3165_vm4, %v3362_v58, -inf }
 0x44e   :  { %3365 = vmax.xlane.f32.xlu0 %v3364_v27 }
 0x452   :  { %3368 = vmax.xlane.f32.xlu0 %v3367_v9 }
 0x463   :  { %v3171_v5 = vpop.xlane.xlu0 %3170 }
 0x464   :  { %v3173_v41 = vsub.f32 %v3164_v22, %v3171_v5  ;;  %v3168_v44 = vpop.xlane.xlu1 %3167 }
 0x465   :  { %v3172_v35 = vsub.f32 %v3163_v23, %v3168_v44 }
 0x466   :  { %v3176_v50 = vmul.f32 1.442695, %v3173_v41 }
 0x467   :  { %v3174_v59 = vmul.f32 1.442695, %v3172_v35 }
 0x468   :  { %17134 = vpow2.f32 %v3176_v50 }
 0x469   :  { %17136 = vpow2.f32 %v3174_v59 }
 0x472   :  { %v17135_v63 = vpop.eup %17134 }
 0x473   :  { %v17137_v14 = vpop.eup %17136  ;;  %v3181_v21 = vsel %vm3165_vm4, %v17135_v63, 0.0 }
 0x474   :  { %3182 = vadd.xlane.f32.xlu0 %v3181_v21  ;;  %v3178_v39 = vsel %vm3165_vm4, %v17137_v14, 0.0 }
 0x475   :  { %3179 = vadd.xlane.f32.xlu1 %v3178_v39 }
 0x4db   :  { %v3366_v1 = vpop.xlane.xlu0 %3365 }
 0x4dc   :  { %v3370_v24 = vsub.f32 %v3362_v58, %v3366_v1 }
 0x4de   :  { %v3372_v25 = vmul.f32 1.442695, %v3370_v24 }
 0x4df   :  { %v3369_v26 = vpop.xlane.xlu0 %3368 }
 0x4e0   :  { %17138 = vpow2.f32 %v3372_v25  ;;  %v3371_v22 = vsub.f32 %v3363_v0, %v3369_v26  ;;  %v15358_v0 = vadd.f32 %v18579_v51, %v18545_v30 }
 0x4e2   :  { %v3374_v27 = vmul.f32 1.442695, %v3371_v22 }
 0x4e4   :  { %17140 = vpow2.f32 %v3374_v27 }
 0x4ea   :  { %v17139_v23 = vpop.eup %17138 }
 0x4eb   :  { %v3376_v9 = vsel %vm3165_vm4, %v17139_v23, 0.0 }
 0x4ec   :  { %3377 = vadd.xlane.f32.xlu1 %v3376_v9 }
 0x4ee   :  { %v17141_v5 = vpop.eup %17140 }
 0x4ef   :  { %v3379_v41 = vsel %vm3165_vm4, %v17141_v5, 0.0 }
 0x4f0   :  { %3380 = vadd.xlane.f32.xlu0 %v3379_v41 }
 0x4fd   :  { %15560 = vrot.lane.b32.xlu1 %v15559_v61, %s17265_s28 }
 0x501   :  { %v3183_v44 = vpop.xlane.xlu0 %3182  ;;  %15565 = vrot.lane.b32.xlu1 %v15564_v18, %s17265_s28 }
 0x502   :  { %17142 = vrcp.f32 %v3183_v44  ;;  %v3180_v58 = vpop.xlane.xlu1 %3179 }
 0x503   :  { %17144 = vrcp.f32 %v3180_v58 }
 0x505   :  { %3682 = vrot.lane.b32.xlu1 %v15358_v0, %s17265_s28 }
 0x50c   :  { %v17143_v35 = vpop.eup %17142 }
 0x50d   :  { %v17145_v50 = vpop.eup %17144  ;;  %v3187_v21 = vmul.f32 %v17143_v35, %v17135_v63 }
 0x50e   :  { %v3186_v59 = vmul.f32 %v17145_v50, %v17137_v14 }
 0x510   :  { %15174 = vmatprep.mubr.msk.f32.mxu1 %vm3165_vm4, %v3186_v59 }
 0x511   :  { %15175 = vmatmul.mubr.msk.f32.vlgmr.msra.gmra.mrb[12].mxu1 %vm3165_vm4, %v3187_v21 }
 0x579   :  { %v3378_v61 = vpop.xlane.xlu1 %3377 }
 0x57a   :  { %17146 = vrcp.f32 %v3378_v61 }
 0x57d   :  { %v3381_v8 = vpop.xlane.xlu0 %3380  ;;  %v15561_v11 = vpop.permute.xlu1 %15560 }
 0x57e   :  { %17148 = vrcp.f32 %v3381_v8  ;;  %v15563_v18 = vunpack.i.h.bf16 %v15561_v11  ;;  %v15562_v39 = vunpack.i.l.bf16 %v15561_v11 }
 0x580   :  { %v15291_v1 = vpack.c.bf16 %v15563_v18, %v15562_v39 }
 0x581   :  { %v15566_v30 = vpop.permute.xlu1 %15565 }
 0x582   :  { %v15568_v51 = vunpack.i.h.bf16 %v15566_v30  ;;  %v15567_v24 = vunpack.i.l.bf16 %v15566_v30  ;;  %15292 = vmatprep.subr.bf16.mxu1 %v15291_v1 }
 0x583   :  { %15294 = vmatpush3.bf16.msra.mxu1 %v15291_v1 }
 0x584   :  { %v17147_v25 = vpop.eup %17146  ;;  %v15305_v14 = vpack.c.bf16 %v15568_v51, %v15567_v24  ;;  %15297 = vmatprep.subr.msk.bf16.mxu1 %vm18734_vm1, %v18752_v31 }
 0x585   :  { %v3384_v63 = vmul.f32 %v17147_v25, %v17139_v23 }
 0x586   :  { %15307 = vmatprep.subr.msk.bf16.mxu0 %vm18734_vm1, %v15305_v14 }
 0x587   :  { %15188 = vmatprep.mubr.msk.f32.mxu1 %vm3165_vm4, %v3384_v63 }
 0x588   :  { %v17149_v26 = vpop.eup %17148 }
 0x589   :  { %v3385_v22 = vmul.f32 %v17149_v26, %v17141_v5 }
 0x58b   :  { %15189 = vmatmul.mubr.msk.f32.vlgmr.msra.gmra.mrb[14].mxu1 %vm3165_vm4, %v3385_v22 }
 0x58c   :  { %15300 = vmatpush3.bf16.xpose.msk.msra.mxu1 %vm18734_vm1, %v18752_v31  ;;  %15195 = vmatprep.mubr.msk.f32.mxu1 %vm3075_vm0, %v18569_v46 }
 0x593   :  { %15196 = vmatmul.mubr.msk.f32.vlgmr.msra.gmra.mrb[16].mxu1 %vm3075_vm0, %v15358_v0 }
 0x5e4   :  { %v15176_v27 = vpop.f32.mrb[12].mxu1 }
 0x5e5   :  { %3270 = vst.msk [vmem:[#allocation2 + $0x20] sm:$0xff] %vm3075_vm0, %v15176_v27  ;;  %v3260_v23 = vpop.f32.mrb[13].mxu1 }
 0x5e6   :  { %3269 = vst.msk [vmem:[#allocation2] sm:$0xff] %vm3075_vm0, %v3260_v23 }
 0x65e   :  { %v18869_v9 = vpop.f32.mrb[14].mxu1 }
 0x65f   :  { %v18871_v5 = vpop.f32.mrb[15].mxu1 }
 0x666   :  { %v15197_v41 = vpop.f32.mrb[16].mxu1 }
 0x667   :  { %v3564_v44 = vpop.f32.mrb[17].mxu1  ;;  %v3574_v0 = vsel %vm3074_vm2, -1e+09, %v15197_v41 }
 0x668   :  { %v3573_v31 = vsel %vm3073_vm3, -1e+09, %v3564_v44  ;;  %v3578_v35 = vsel %vm3165_vm4, %v3574_v0, -inf }
 0x669   :  { %v3575_v58 = vsel %vm3165_vm4, %v3573_v31, -inf }
 0x66a   :  { %3576 = vmax.xlane.f32.xlu0 %v3575_v58 }
 0x66e   :  { %3579 = vmax.xlane.f32.xlu0 %v3578_v35 }
 0x6f7   :  { %v3577_v50 = vpop.xlane.xlu0 %3576 }
 0x6f8   :  { %v3581_v59 = vsub.f32 %v3573_v31, %v3577_v50 }
 0x6fa   :  { %v3583_v21 = vmul.f32 1.442695, %v3581_v59 }
 0x6fb   :  { %v3580_v61 = vpop.xlane.xlu0 %3579 }
 0x6fc   :  { %17150 = vpow2.f32 %v3583_v21  ;;  %v3582_v8 = vsub.f32 %v3574_v0, %v3580_v61 }
 0x6fe   :  { %v3585_v11 = vmul.f32 1.442695, %v3582_v8 }
 0x700   :  { %17152 = vpow2.f32 %v3585_v11 }
 0x706   :  { %v17151_v18 = vpop.eup %17150 }
 0x707   :  { %v3587_v39 = vsel %vm3165_vm4, %v17151_v18, 0.0 }
 0x708   :  { %3588 = vadd.xlane.f32.xlu0 %v3587_v39 }
 0x70a   :  { %v17153_v1 = vpop.eup %17152 }
 0x70b   :  { %v3590_v30 = vsel %vm3165_vm4, %v17153_v1, 0.0 }
 0x70c   :  { %3591 = vadd.xlane.f32.xlu0 %v3590_v30  ;;  %v15361_v30 = vadd.f32 %v18574_v49, %v18541_v29 }
 0x722   :  { %3680 = vrot.lane.b32.xlu0 %v18569_v46, %s17265_s28  ;;  %v3683_v46 = vpop.permute.xlu1 %3682 }
 0x795   :  { %v3589_v51 = vpop.xlane.xlu0 %3588 }
 0x796   :  { %17154 = vrcp.f32 %v3589_v51 }
 0x799   :  { %v3592_v24 = vpop.xlane.xlu0 %3591 }
 0x79a   :  { %17156 = vrcp.f32 %v3592_v24 }
 0x79d   :  { %v3681_v27 = vpop.permute.xlu0 %3680 }
 0x7a0   :  { %v17155_v25 = vpop.eup %17154 }
 0x7a1   :  { %v3595_v63 = vmul.f32 %v17155_v25, %v17151_v18 }
 0x7a3   :  { %15202 = vmatprep.mubr.msk.f32.mxu0 %vm3165_vm4, %v3595_v63 }
 0x7a4   :  { %v17157_v26 = vpop.eup %17156 }
 0x7a5   :  { %v3596_v22 = vmul.f32 %v17157_v26, %v17153_v1 }
 0x7a7   :  { %15203 = vmatmul.mubr.msk.f32.vlgmr.msra.gmra.mrb[16].mxu0 %vm3165_vm4, %v3596_v22 }
 0x7a8   :  { %15310 = vmatpush3.bf16.xpose.msk.msra.mxu0 %vm18734_vm1, %v15305_v14  ;;  %15209 = vmatprep.mubr.msk.f32.mxu0 %vm3075_vm0, %v3681_v27 }
 0x7a9   :  { %15322 = vmatprep.subr.bf16.mxu0 %v18803_v6 }
 0x7af   :  { %15210 = vmatmul.mubr.msk.f32.vlgmr.msra.gmra.mrb[18].mxu0 %vm3075_vm0, %v3683_v46 }
 0x7b0   :  { %15324 = vmatpush3.bf16.msra.mxu0 %v18803_v6 }
 0x87a   :  { %v15204_v23 = vpop.f32.mrb[16].mxu0 }
 0x87b   :  { %3679 = vst.msk [vmem:[#allocation2 + $0x28] sm:$0xff] %vm3075_vm0, %v15204_v23  ;;  %v3669_v41 = vpop.f32.mrb[17].mxu0 }
 0x87c   :  { %3678 = vst.msk [vmem:[#allocation2 + $0x8] sm:$0xff] %vm3075_vm0, %v3669_v41 }
 0x882   :  { %v15211_v44 = vpop.f32.mrb[18].mxu0 }
 0x883   :  { %v3772_v31 = vsel %vm3074_vm2, -1e+09, %v15211_v44  ;;  %v3762_v14 = vpop.f32.mrb[19].mxu0 }
 0x884   :  { %v3771_v58 = vsel %vm3073_vm3, -1e+09, %v3762_v14  ;;  %v3776_v0 = vsel %vm3165_vm4, %v3772_v31, -inf }
 0x885   :  { %3777 = vmax.xlane.f32.xlu0 %v3776_v0  ;;  %v3773_v35 = vsel %vm3165_vm4, %v3771_v58, -inf }
 0x886   :  { %3774 = vmax.xlane.f32.xlu1 %v3773_v35 }
 0x912   :  { %v3778_v6 = vpop.xlane.xlu0 %3777 }
 0x913   :  { %v3780_v50 = vsub.f32 %v3772_v31, %v3778_v6  ;;  %v3775_v59 = vpop.xlane.xlu1 %3774 }
 0x914   :  { %v3779_v21 = vsub.f32 %v3771_v58, %v3775_v59 }
 0x915   :  { %v3783_v61 = vmul.f32 1.442695, %v3780_v50 }
 0x916   :  { %v3781_v8 = vmul.f32 1.442695, %v3779_v21 }
 0x917   :  { %17158 = vpow2.f32 %v3783_v61 }
 0x918   :  { %17160 = vpow2.f32 %v3781_v8 }
 0x921   :  { %v17159_v11 = vpop.eup %17158 }
 0x922   :  { %v3788_v18 = vsel %vm3165_vm4, %v17159_v11, 0.0  ;;  %v17161_v39 = vpop.eup %17160 }
 0x923   :  { %3789 = vadd.xlane.f32.xlu1 %v3788_v18  ;;  %v3785_v1 = vsel %vm3165_vm4, %v17161_v39, 0.0 }
 0x927   :  { %3786 = vadd.xlane.f32.xlu1 %v3785_v1 }
 0x938   :  { %15570 = vrot.lane.b32.xlu1 %v15569_v12, %s17265_s28 }
 0x93c   :  { %15575 = vrot.lane.b32.xlu1 %v15574_v17, %s17265_s28 }
 0x940   :  { %4090 = vrot.lane.b32.xlu1 %v15361_v30, %s17265_s28 }
 0x9b0   :  { %v3790_v51 = vpop.xlane.xlu1 %3789 }
 0x9b1   :  { %17162 = vrcp.f32 %v3790_v51 }
 0x9b4   :  { %v3787_v24 = vpop.xlane.xlu1 %3786 }
 0x9b5   :  { %17164 = vrcp.f32 %v3787_v24 }
 0x9b8   :  { %v15571_v25 = vpop.permute.xlu1 %15570 }
 0x9b9   :  { %v15573_v63 = vunpack.i.h.bf16 %v15571_v25  ;;  %v15572_v26 = vunpack.i.l.bf16 %v15571_v25 }
 0x9bb   :  { %v15311_v22 = vpack.c.bf16 %v15573_v63, %v15572_v26  ;;  %v17163_v27 = vpop.eup %17162 }
 0x9bc   :  { %v15576_v42 = vpop.permute.xlu1 %15575  ;;  %v3794_v49 = vmul.f32 %v17163_v27, %v17159_v11 }
 0x9bd   :  { %v15578_v48 = vunpack.i.h.bf16 %v15576_v42  ;;  %v15577_v12 = vunpack.i.l.bf16 %v15576_v42  ;;  %15312 = vmatprep.subr.bf16.mxu1 %v15311_v22 }
 0x9be   :  { %15314 = vmatpush3.bf16.msra.mxu1 %v15311_v22 }
 0x9bf   :  { %v17165_v7 = vpop.eup %17164  ;;  %v15325_v10 = vpack.c.bf16 %v15578_v48, %v15577_v12  ;;  %15317 = vmatprep.subr.msk.bf16.mxu1 %vm18734_vm1, %v18746_v55 }
 0x9c0   :  { %v3793_v29 = vmul.f32 %v17165_v7, %v17161_v39 }
 0x9c1   :  { %15327 = vmatprep.subr.msk.bf16.mxu0 %vm18734_vm1, %v15325_v10 }
 0x9c2   :  { %15216 = vmatprep.mubr.msk.f32.mxu1 %vm3165_vm4, %v3793_v29 }
 0x9c3   :  { %15217 = vmatmul.mubr.msk.f32.vlgmr.msra.gmra.mrb[18].mxu1 %vm3165_vm4, %v3794_v49 }
 0x9c4   :  { %15223 = vmatprep.mubr.msk.f32.mxu1 %vm3075_vm0, %v18566_v43 }
 0x9c7   :  { %15320 = vmatpush3.bf16.xpose.msk.msra.mxu1 %vm18734_vm1, %v18746_v55 }
 0x9ce   :  { %15224 = vmatmul.mubr.msk.f32.vlgmr.msra.gmra.mrb[20].mxu1 %vm3075_vm0, %v15361_v30 }
 0xa96   :  { %v18925_v17 = vpop.f32.mrb[18].mxu1 }
 0xa97   :  { %v18927_v46 = vpop.f32.mrb[19].mxu1 }
 0xaa1   :  { %v15225_v23 = vpop.f32.mrb[20].mxu1 }
 0xaa2   :  { %v3972_v41 = vpop.f32.mrb[21].mxu1  ;;  %v3982_v14 = vsel %vm3074_vm2, -1e+09, %v15225_v23 }
 0xaa3   :  { %v3981_v44 = vsel %vm3073_vm3, -1e+09, %v3972_v41  ;;  %v3986_v58 = vsel %vm3165_vm4, %v3982_v14, -inf }
 0xaa4   :  { %v3983_v31 = vsel %vm3165_vm4, %v3981_v44, -inf }
 0xaa5   :  { %3984 = vmax.xlane.f32.xlu0 %v3983_v31 }
 0xaa9   :  { %3987 = vmax.xlane.f32.xlu0 %v3986_v58 }
 0xb32   :  { %v3985_v55 = vpop.xlane.xlu0 %3984 }
 0xb33   :  { %v3989_v0 = vsub.f32 %v3981_v44, %v3985_v55  ;;  %v15362_v55 = vadd.f32 %v18581_v53, %v18549_v33 }
 0xb35   :  { %v3991_v35 = vmul.f32 1.442695, %v3989_v0 }
 0xb36   :  { %v3988_v6 = vpop.xlane.xlu0 %3987 }
 0xb37   :  { %17166 = vpow2.f32 %v3991_v35  ;;  %v3990_v50 = vsub.f32 %v3982_v14, %v3988_v6 }
 0xb39   :  { %v3993_v59 = vmul.f32 1.442695, %v3990_v50 }
 0xb3b   :  { %17168 = vpow2.f32 %v3993_v59 }
 0xb41   :  { %v17167_v21 = vpop.eup %17166 }
 0xb42   :  { %v3995_v61 = vsel %vm3165_vm4, %v17167_v21, 0.0 }
 0xb43   :  { %3996 = vadd.xlane.f32.xlu0 %v3995_v61 }
 0xb45   :  { %v17169_v8 = vpop.eup %17168 }
 0xb46   :  { %v3998_v11 = vsel %vm3165_vm4, %v17169_v8, 0.0 }
 0xb47   :  { %3999 = vadd.xlane.f32.xlu0 %v3998_v11 }
 0xb5d   :  { %4088 = vrot.lane.b32.xlu0 %v18566_v43, %s17265_s28  ;;  %v4091_v43 = vpop.permute.xlu1 %4090 }
 0xbd0   :  { %v3997_v18 = vpop.xlane.xlu0 %3996 }
 0xbd1   :  { %17170 = vrcp.f32 %v3997_v18 }
 0xbd4   :  { %v4000_v39 = vpop.xlane.xlu0 %3999 }
 0xbd5   :  { %17172 = vrcp.f32 %v4000_v39 }
 0xbd8   :  { %v4089_v25 = vpop.permute.xlu0 %4088 }
 0xbdb   :  { %v17171_v1 = vpop.eup %17170 }
 0xbdc   :  { %v4003_v30 = vmul.f32 %v17171_v1, %v17167_v21 }
 0xbde   :  { %15230 = vmatprep.mubr.msk.f32.mxu0 %vm3165_vm4, %v4003_v30 }
 0xbdf   :  { %v17173_v51 = vpop.eup %17172 }
 0xbe0   :  { %v4004_v24 = vmul.f32 %v17173_v51, %v17169_v8 }
 0xbe2   :  { %15231 = vmatmul.mubr.msk.f32.vlgmr.msra.gmra.mrb[20].mxu0 %vm3165_vm4, %v4004_v24 }
 0xbe3   :  { %15330 = vmatpush3.bf16.xpose.msk.msra.mxu0 %vm18734_vm1, %v15325_v10  ;;  %15237 = vmatprep.mubr.msk.f32.mxu0 %vm3075_vm0, %v4089_v25 }
 0xbe4   :  { %15342 = vmatprep.subr.bf16.mxu0 %v18814_v56 }
 0xbea   :  { %15238 = vmatmul.mubr.msk.f32.vlgmr.msra.gmra.mrb[22].mxu0 %vm3075_vm0, %v4091_v43 }
 0xbeb   :  { %15344 = vmatpush3.bf16.msra.mxu0 %v18814_v56 }
 0xcb5   :  { %v15232_v63 = vpop.f32.mrb[20].mxu0 }
 0xcb6   :  { %4087 = vst.msk [vmem:[#allocation2 + $0x30] sm:$0xff] %vm3075_vm0, %v15232_v63  ;;  %v4077_v26 = vpop.f32.mrb[21].mxu0 }
 0xcb7   :  { %4086 = vst.msk [vmem:[#allocation2 + $0x10] sm:$0xff] %vm3075_vm0, %v4077_v26 }
 0xcbd   :  { %v15239_v22 = vpop.f32.mrb[22].mxu0 }
 0xcbe   :  { %v4180_v42 = vsel %vm3074_vm2, -1e+09, %v15239_v22  ;;  %v4170_v48 = vpop.f32.mrb[23].mxu0 }
 0xcbf   :  { %v4179_v12 = vsel %vm3073_vm3, -1e+09, %v4170_v48  ;;  %v4184_v27 = vsel %vm3165_vm4, %v4180_v42, -inf }
 0xcc0   :  { %4185 = vmax.xlane.f32.xlu0 %v4184_v27  ;;  %v4181_v7 = vsel %vm3165_vm4, %v4179_v12, -inf }
 0xcc1   :  { %4182 = vmax.xlane.f32.xlu1 %v4181_v7 }
 0xd4d   :  { %v4186_v56 = vpop.xlane.xlu0 %4185 }
 0xd4e   :  { %v4188_v10 = vsub.f32 %v4180_v42, %v4186_v56  ;;  %v4183_v29 = vpop.xlane.xlu1 %4182 }
 0xd4f   :  { %v4187_v49 = vsub.f32 %v4179_v12, %v4183_v29 }
 0xd50   :  { %v4191_v23 = vmul.f32 1.442695, %v4188_v10 }
 0xd51   :  { %v4189_v41 = vmul.f32 1.442695, %v4187_v49 }
 0xd52   :  { %17174 = vpow2.f32 %v4191_v23 }
 0xd53   :  { %17176 = vpow2.f32 %v4189_v41 }
 0xd5c   :  { %v17175_v44 = vpop.eup %17174 }
 0xd5d   :  { %v4196_v31 = vsel %vm3165_vm4, %v17175_v44, 0.0  ;;  %v17177_v14 = vpop.eup %17176 }
 0xd5e   :  { %4197 = vadd.xlane.f32.xlu1 %v4196_v31  ;;  %v4193_v58 = vsel %vm3165_vm4, %v17177_v14, 0.0 }
 0xd62   :  { %4194 = vadd.xlane.f32.xlu1 %v4193_v58 }
 0xd73   :  { %15580 = vrot.lane.b32.xlu1 %v15579_v3, %s17265_s28 }
 0xd77   :  { %15585 = vrot.lane.b32.xlu1 %v15584_v54, %s17265_s28 }
 0xd7b   :  { %4498 = vrot.lane.b32.xlu1 %v15362_v55, %s17265_s28 }
 0xdeb   :  { %v4198_v0 = vpop.xlane.xlu1 %4197 }
 0xdec   :  { %17178 = vrcp.f32 %v4198_v0 }
 0xdef   :  { %v4195_v35 = vpop.xlane.xlu1 %4194 }
 0xdf0   :  { %17180 = vrcp.f32 %v4195_v35  ;;  %v16170_v35 = vld [vmem:[%s21277_s6 + $0x8] ss:$16 sps:$4 sm:$0xff]  }
 0xdf3   :  { %v15581_v6 = vpop.permute.xlu1 %15580 }
 0xdf4   :  { %v15583_v50 = vunpack.i.h.bf16 %v15581_v6  ;;  %v15582_v59 = vunpack.i.l.bf16 %v15581_v6  ;;  %v16173_v6 = vld [vmem:[%s21277_s6 + $0x28] ss:$16 sps:$4 sm:$0xff]  }
 0xdf6   :  { %v15331_v21 = vpack.c.bf16 %v15583_v50, %v15582_v59  ;;  %v17179_v61 = vpop.eup %17178  ;;  %v16176_v50 = vld [vmem:[%s21277_s6 + $0x48] ss:$16 sps:$4 sm:$0xff]   ;;  %v16181_v59 = vld [vmem:[%s21277_s6 + $0x6c] ss:$16 sps:$4 sm:$0xff]  }
 0xdf7   :  { %v15586_v2 = vpop.permute.xlu1 %15585  ;;  %v4202_v53 = vmul.f32 %v17179_v61, %v17175_v44  ;;  %v16185_v61 = vld [vmem:[%s21277_s6 + $0xa8] ss:$16 sps:$4 sm:$0xff]  }
 0xdf8   :  { %v15588_v45 = vunpack.i.h.bf16 %v15586_v2  ;;  %v15587_v3 = vunpack.i.l.bf16 %v15586_v2  ;;  %15332 = vmatprep.subr.bf16.mxu1 %v15331_v21  ;;  %v16184_v2 = vld [vmem:[%s21277_s6 + $0x8c] ss:$16 sps:$4 sm:$0xff]  }
 0xdf9   :  { %15334 = vmatpush3.bf16.msra.mxu1 %v15331_v21  ;;  %v16179_v21 = vld [vmem:[%s21277_s6 + $0x68] ss:$16 sps:$4 sm:$0xff]  }
 0xdfa   :  { %v17181_v28 = vpop.eup %17180  ;;  %v15345_v16 = vpack.c.bf16 %v15588_v45, %v15587_v3  ;;  %15337 = vmatprep.subr.msk.bf16.mxu1 %vm18734_vm1, %v18758_v19  ;;  %v16182_v45 = vld [vmem:[%s21277_s6 + $0x88] ss:$16 sps:$4 sm:$0xff]   ;;  %v16187_v3 = vld [vmem:[%s21277_s6 + $0xac] ss:$16 sps:$4 sm:$0xff]  }
 0xdfb   :  { %v4201_v33 = vmul.f32 %v17181_v28, %v17177_v14  ;;  %v4499_v41 = vpop.permute.xlu1 %4498  ;;  %v16190_v28 = vld [vmem:[%s21277_s6 + $0xcc] ss:$16 sps:$4 sm:$0xff]  }
 0xdfc   :  { %15347 = vmatprep.subr.msk.bf16.mxu0 %vm18734_vm1, %v15345_v16 }
 0xdfd   :  { %15244 = vmatprep.mubr.msk.f32.mxu1 %vm3165_vm4, %v4201_v33  ;;  %v16193_v33 = vld [vmem:[%s21277_s6 + $0xec] ss:$16 sps:$4 sm:$0xff]  }
 0xdfe   :  { %15245 = vmatmul.mubr.msk.f32.vlgmr.msra.gmra.mrb[22].mxu1 %vm3165_vm4, %v4202_v53  ;;  %v16191_v53 = vld [vmem:[%s21277_s6 + $0xe8] ss:$16 sps:$4 sm:$0xff]  }
 0xdff   :  { %15251 = vmatprep.mubr.msk.f32.mxu1 %vm3075_vm0, %v18572_v47 }
 0xe02   :  { %15340 = vmatpush3.bf16.xpose.msk.msra.mxu1 %vm18734_vm1, %v18758_v19 }
 0xe09   :  { %15252 = vmatmul.mubr.msk.f32.vlgmr.msra.gmra.mrb[24].mxu1 %vm3075_vm0, %v15362_v55 }
 0xed1   :  { %v18981_v54 = vpop.f32.mrb[22].mxu1 }
 0xed2   :  { %v18983_v8 = vpop.f32.mrb[23].mxu1 }
 0xedc   :  { %v15253_v11 = vpop.f32.mrb[24].mxu1 }
 0xedd   :  { %v4380_v18 = vpop.f32.mrb[25].mxu1  ;;  %v4390_v30 = vsel %vm3074_vm2, -1e+09, %v15253_v11  ;;  %v16196_v11 = vld [vmem:[%s21277_s6 + $0x10c] ss:$16 sps:$4 sm:$0xff]  }
 0xede   :  { %v4389_v39 = vsel %vm3073_vm3, -1e+09, %v4380_v18  ;;  %v4394_v51 = vsel %vm3165_vm4, %v4390_v30, -inf  ;;  %v16194_v18 = vld [vmem:[%s21277_s6 + $0x108] ss:$16 sps:$4 sm:$0xff]  }
 0xedf   :  { %v4391_v1 = vsel %vm3165_vm4, %v4389_v39, -inf }
 0xee0   :  { %4392 = vmax.xlane.f32.xlu0 %v4391_v1 }
 0xee4   :  { %4395 = vmax.xlane.f32.xlu0 %v4394_v51 }
 0xf6d   :  { %v4393_v19 = vpop.xlane.xlu0 %4392 }
 0xf6e   :  { %v4397_v24 = vsub.f32 %v4389_v39, %v4393_v19 }
 0xf70   :  { %v4399_v25 = vmul.f32 1.442695, %v4397_v24 }
 0xf71   :  { %v4396_v43 = vpop.xlane.xlu0 %4395 }
 0xf72   :  { %17182 = vpow2.f32 %v4399_v25  ;;  %v4398_v63 = vsub.f32 %v4390_v30, %v4396_v43 }
 0xf74   :  { %v4401_v26 = vmul.f32 1.442695, %v4398_v63 }
 0xf76   :  { %17184 = vpow2.f32 %v4401_v26 }
 0xf7c   :  { %v17183_v22 = vpop.eup %17182 }
 0xf7d   :  { %v4403_v42 = vsel %vm3165_vm4, %v17183_v22, 0.0 }
 0xf7e   :  { %4404 = vadd.xlane.f32.xlu0 %v4403_v42  ;;  %v16199_v42 = vld [vmem:[%s21277_s6 + $0x12c] ss:$16 sps:$4 sm:$0xff]  }
 0xf80   :  { %v17185_v48 = vpop.eup %17184 }
 0xf81   :  { %v4406_v12 = vsel %vm3165_vm4, %v17185_v48, 0.0 }
 0xf82   :  { %4407 = vadd.xlane.f32.xlu0 %v4406_v12  ;;  %v16202_v12 = vld [vmem:[%s21277_s6 + $0x14c] ss:$16 sps:$4 sm:$0xff]  }
 0xf98   :  { %4496 = vrot.lane.b32.xlu0 %v18572_v47, %s17265_s28 }
0x100b   :  { %v4405_v27 = vpop.xlane.xlu0 %4404 }
0x100c   :  { %17186 = vrcp.f32 %v4405_v27  ;;  %v16200_v27 = vld [vmem:[%s21277_s6 + $0x148] ss:$16 sps:$4 sm:$0xff]  }
0x100f   :  { %v4408_v7 = vpop.xlane.xlu0 %4407 }
0x1010   :  { %17188 = vrcp.f32 %v4408_v7  ;;  %v16205_v7 = vld [vmem:[%s21277_s6 + $0x16c] ss:$16 sps:$4 sm:$0xff]  }
0x1013   :  { %v4497_v23 = vpop.permute.xlu0 %4496 }
0x1016   :  { %v17187_v56 = vpop.eup %17186 }
0x1017   :  { %v4411_v10 = vmul.f32 %v17187_v56, %v17183_v22  ;;  %v16203_v56 = vld [vmem:[%s21277_s6 + $0x168] ss:$16 sps:$4 sm:$0xff]  }
0x1019   :  { %15258 = vmatprep.mubr.msk.f32.mxu0 %vm3165_vm4, %v4411_v10  ;;  %v16208_v10 = vld [vmem:[%s21277_s6 + $0x18c] ss:$16 sps:$4 sm:$0xff]  }
0x101a   :  { %v17189_v29 = vpop.eup %17188 }
0x101b   :  { %v4412_v49 = vmul.f32 %v17189_v29, %v17185_v48  ;;  %v16197_v48 = vld [vmem:[%s21277_s6 + $0x128] ss:$16 sps:$4 sm:$0xff]   ;;  %v16226_v29 = vld [vmem:[%s21277_s6 + $0x1ec] ss:$16 sps:$4 sm:$0xff]  }
0x101d   :  { %15259 = vmatmul.mubr.msk.f32.vlgmr.msra.gmra.mrb[24].mxu0 %vm3165_vm4, %v4412_v49 }
0x101e   :  { %15350 = vmatpush3.bf16.xpose.msk.msra.mxu0 %vm18734_vm1, %v15345_v16  ;;  %15265 = vmatprep.mubr.msk.f32.mxu0 %vm3075_vm0, %v4497_v23  ;;  %v16188_v16 = vld [vmem:[%s21277_s6 + $0xc8] ss:$16 sps:$4 sm:$0xff]  }
0x101f   :  { %5598 = vmatprep.subr.bf16.mxu0 %v16172_v20  ;;  %v16209_v20 = vld [vmem:[%s21277_s6] ss:$16 sps:$4 sm:$0xff]  }
0x1025   :  { %15266 = vmatmul.mubr.msk.f32.vlgmr.msra.gmra.mrb[26].mxu0 %vm3075_vm0, %v4499_v41 }
0x1026   :  { %5599 = vmatpush1.bf16.msra.mxu0 %v16170_v35 }
0x1027   :  { %5600 = vmatprep.subr.bf16.mxu0 %v16175_v32 }
0x102a   :  { %5601 = vmatpush1.bf16.msra.mxu0 %v16173_v6  ;;  %v16217_v6 = vld [vmem:[%s21277_s6 + $0x24] ss:$16 sps:$4 sm:$0xff]  }
0x10f0   :  { %v15260_v47 = vpop.f32.mrb[24].mxu0 }
0x10f1   :  { %4495 = vst.msk [vmem:[#allocation2 + $0x38] sm:$0xff] %vm3075_vm0, %v15260_v47  ;;  %v4485_v44 = vpop.f32.mrb[25].mxu0 }
0x10f2   :  { %4494 = vst.msk [vmem:[#allocation2 + $0x18] sm:$0xff] %vm3075_vm0, %v4485_v44 }
0x10f8   :  { %v15267_v31 = vpop.f32.mrb[26].mxu0 }
0x10f9   :  { %v4588_v14 = vsel %vm3074_vm2, -1e+09, %v15267_v31  ;;  %v4578_v58 = vpop.f32.mrb[27].mxu0 }
0x10fa   :  { %v4587_v13 = vsel %vm3073_vm3, -1e+09, %v4578_v58  ;;  %v4592_v55 = vsel %vm3165_vm4, %v4588_v14, -inf }
0x10fb   :  { %4593 = vmax.xlane.f32.xlu0 %v4592_v55  ;;  %v4589_v0 = vsel %vm3165_vm4, %v4587_v13, -inf }
0x10fc   :  { %4590 = vmax.xlane.f32.xlu1 %v4589_v0 }
0x1111   :  { %3886 = vrot.lane.b32.xlu0 %v18927_v46, %s17265_s28  ;;  %v16178_v46 = vld [vmem:[%s21277_s6 + $0x4c] ss:$16 sps:$4 sm:$0xff]  }
0x1112   :  { %5602 = vmatprep.subr.bf16.mxu0 %v16178_v46 }
0x1113   :  { %5603 = vmatpush1.bf16.msra.mxu0 %v16176_v50  ;;  %v16215_v50 = vld [vmem:[%s21277_s6 + $0x20] ss:$16 sps:$4 sm:$0xff]  }
0x1114   :  { %5604 = vmatprep.subr.bf16.mxu0 %v16181_v59 }
0x1117   :  { %5605 = vmatpush1.bf16.msra.mxu0 %v16179_v21 }
0x1118   :  { %5606 = vmatprep.subr.bf16.mxu0 %v16184_v2 }
0x111b   :  { %5607 = vmatpush1.bf16.msra.mxu0 %v16182_v45  ;;  %v16223_v45 = vld [vmem:[%s21277_s6 + $0x44] ss:$16 sps:$4 sm:$0xff]  }
0x111c   :  { %5608 = vmatprep.subr.bf16.mxu0 %v16187_v3  ;;  %v16221_v3 = vld [vmem:[%s21277_s6 + $0x40] ss:$16 sps:$4 sm:$0xff]  }
0x111f   :  { %5609 = vmatpush1.bf16.msra.mxu0 %v16185_v61  ;;  %v16229_v61 = vld [vmem:[%s21277_s6 + $0x64] ss:$16 sps:$4 sm:$0xff]  }
0x1120   :  { %5610 = vmatprep.subr.bf16.mxu0 %v16190_v28  ;;  %v16227_v28 = vld [vmem:[%s21277_s6 + $0x60] ss:$16 sps:$4 sm:$0xff]  }
0x1123   :  { %5611 = vmatpush1.bf16.msra.mxu0 %v16188_v16 }
0x1124   :  { %5612 = vmatprep.subr.bf16.mxu0 %v16193_v33 }
0x1127   :  { %5613 = vmatpush1.bf16.msra.mxu0 %v16191_v53 }
0x1128   :  { %5614 = vmatprep.subr.bf16.mxu0 %v16196_v11  ;;  %v16232_v11 = vld [vmem:[%s21277_s6 + $0x84] ss:$16 sps:$4 sm:$0xff]  }
0x112b   :  { %5615 = vmatpush1.bf16.msra.mxu0 %v16194_v18  ;;  %v16230_v18 = vld [vmem:[%s21277_s6 + $0x80] ss:$16 sps:$4 sm:$0xff]  }
0x112c   :  { %5616 = vmatprep.subr.bf16.mxu0 %v16199_v42  ;;  %v16248_v42 = vld [vmem:[%s21277_s6 + $0x140] ss:$16 sps:$4 sm:$0xff]  }
0x112f   :  { %5617 = vmatpush1.bf16.msra.mxu0 %v16197_v48  ;;  %v16253_v48 = vld [vmem:[%s21277_s6 + $0x164] ss:$16 sps:$4 sm:$0xff]  }
0x1130   :  { %5618 = vmatprep.subr.bf16.mxu0 %v16202_v12  ;;  %v16251_v12 = vld [vmem:[%s21277_s6 + $0x160] ss:$16 sps:$4 sm:$0xff]  }
0x1133   :  { %5619 = vmatpush1.bf16.msra.mxu0 %v16200_v27  ;;  %v16256_v27 = vld [vmem:[%s21277_s6 + $0x184] ss:$16 sps:$4 sm:$0xff]  }
0x1134   :  { %5620 = vmatprep.subr.bf16.mxu0 %v16205_v7  ;;  %v16254_v7 = vld [vmem:[%s21277_s6 + $0x180] ss:$16 sps:$4 sm:$0xff]  }
0x1137   :  { %5621 = vmatpush1.bf16.msra.mxu0 %v16203_v56  ;;  %v16259_v56 = vld [vmem:[%s21277_s6 + $0x1a4] ss:$16 sps:$4 sm:$0xff]  }
0x1138   :  { %5622 = vmatprep.subr.bf16.mxu0 %v16208_v10  ;;  %v16257_v10 = vld [vmem:[%s21277_s6 + $0x1a0] ss:$16 sps:$4 sm:$0xff]  }
0x113b   :  { %5623 = vmatpush1.bf16.msra.mxu0 %v16206_v34  ;;  %v16262_v34 = vld [vmem:[%s21277_s6 + $0x1c4] ss:$16 sps:$4 sm:$0xff]  }
0x113c   :  { %5624 = vmatprep.subr.bf16.mxu0 %v16214_v52  ;;  %v16260_v52 = vld [vmem:[%s21277_s6 + $0x1c0] ss:$16 sps:$4 sm:$0xff]  }
0x1188   :  { %v4594_v39 = vpop.xlane.xlu0 %4593 }
0x1189   :  { %v4596_v1 = vsub.f32 %v4588_v14, %v4594_v39  ;;  %v4591_v30 = vpop.xlane.xlu1 %4590  ;;  %v16211_v14 = vld [vmem:[%s21277_s6 + $0x4] ss:$16 sps:$4 sm:$0xff]  }
0x118a   :  { %v4595_v51 = vsub.f32 %v4587_v13, %v4591_v30  ;;  %v16235_v39 = vld [vmem:[%s21277_s6 + $0xa4] ss:$16 sps:$4 sm:$0xff]  }
0x118b   :  { %v4599_v19 = vmul.f32 1.442695, %v4596_v1  ;;  %v16233_v1 = vld [vmem:[%s21277_s6 + $0xa0] ss:$16 sps:$4 sm:$0xff]   ;;  %v16238_v30 = vld [vmem:[%s21277_s6 + $0xc4] ss:$16 sps:$4 sm:$0xff]  }
0x118c   :  { %v4597_v24 = vmul.f32 1.442695, %v4595_v51  ;;  %v3887_v25 = vpop.permute.xlu0 %3886  ;;  %v16236_v51 = vld [vmem:[%s21277_s6 + $0xc0] ss:$16 sps:$4 sm:$0xff]  }
0x118d   :  { %17190 = vpow2.f32 %v4599_v19  ;;  %3892 = vst.msk [vmem:[#allocation2 + $0x8] sm:$0xff] %vm3483_vm5, %v3887_v25  ;;  %v16241_v19 = vld [vmem:[%s21277_s6 + $0xe4] ss:$16 sps:$4 sm:$0xff]  }
0x118e   :  { %17192 = vpow2.f32 %v4597_v24  ;;  %v16239_v24 = vld [vmem:[%s21277_s6 + $0xe0] ss:$16 sps:$4 sm:$0xff]   ;;  %v16244_v25 = vld [vmem:[%s21277_s6 + $0x104] ss:$16 sps:$4 sm:$0xff]  }
0x1194   :  { %v4711_v59 = vld [vmem:[#allocation2 + $0x8] sm:$0xff] }
0x1197   :  { %v17191_v43 = vpop.eup %17190 }
0x1198   :  { %v4604_v63 = vsel %vm3165_vm4, %v17191_v43, 0.0  ;;  %v17193_v26 = vpop.eup %17192 }
0x1199   :  { %4605 = vadd.xlane.f32.xlu1 %v4604_v63  ;;  %v4601_v22 = vsel %vm3165_vm4, %v17193_v26, 0.0  ;;  %v16247_v63 = vld [vmem:[%s21277_s6 + $0x124] ss:$16 sps:$4 sm:$0xff]  }
0x119d   :  { %4602 = vadd.xlane.f32.xlu1 %v4601_v22  ;;  %v16250_v22 = vld [vmem:[%s21277_s6 + $0x144] ss:$16 sps:$4 sm:$0xff]  }
0x11ae   :  { %15590 = vrot.lane.b32.xlu1 %v15589_v15, %s17265_s28  ;;  %v16212_v15 = vld [vmem:[%s21277_s6 + $0x1a8] ss:$16 sps:$4 sm:$0xff]  }
0x11af   :  { %5625 = vmatpush1.bf16.msra.mxu0 %v16212_v15  ;;  %v16265_v15 = vld [vmem:[%s21277_s6 + $0x1e4] ss:$16 sps:$4 sm:$0xff]  }
0x11b2   :  { %3888 = vrot.lane.b32.xlu1 %v18925_v17, %s17265_s28  ;;  %v16220_v17 = vld [vmem:[%s21277_s6 + $0x1cc] ss:$16 sps:$4 sm:$0xff]  }
0x11b3   :  { %5626 = vmatprep.subr.bf16.mxu0 %v16220_v17  ;;  %v16263_v17 = vld [vmem:[%s21277_s6 + $0x1e0] ss:$16 sps:$4 sm:$0xff]  }
0x11b6   :  { %3477 = vrot.lane.b32.xlu1 %v18871_v5, %s17265_s28  ;;  %v16218_v5 = vld [vmem:[%s21277_s6 + $0x1c8] ss:$16 sps:$4 sm:$0xff]  }
0x11b7   :  { %5627 = vmatpush1.bf16.msra.mxu0 %v16218_v5  ;;  %v16266_v5 = vld [vmem:[%s21277_s6 + $0x200] ss:$16 sps:$4 sm:$0xff]  }
0x11b8   :  { %5628 = vmatprep.subr.bf16.mxu0 %v16226_v29  ;;  %v16268_v29 = vld [vmem:[%s21277_s6 + $0x204] ss:$16 sps:$4 sm:$0xff]  }
0x11ba   :  { %3479 = vrot.lane.b32.xlu1 %v18869_v9, %s17265_s28  ;;  %v16224_v9 = vld [vmem:[%s21277_s6 + $0x1e8] ss:$16 sps:$4 sm:$0xff]  }
0x11bb   :  { %5629 = vmatpush1.bf16.msra.mxu0 %v16224_v9  ;;  %v16269_v9 = vld [vmem:[%s21277_s6 + $0x208] ss:$16 sps:$4 sm:$0xff]  }
0x1226   :  { %v4606_v49 = vpop.xlane.xlu1 %4605 }
0x1227   :  { %17194 = vrcp.f32 %v4606_v49  ;;  %v16271_v49 = vld [vmem:[%s21277_s6 + $0x20c] ss:$16 sps:$4 sm:$0xff]  }
0x1228   :  { %5641 = vmatprep.subr.bf16.mxu0 %v16271_v49  ;;  %v16352_v49 = vld [vmem:[%s21277_s6 + $0x3c4] ss:$16 sps:$4 sm:$0xff]  }
0x122a   :  { %v4603_v23 = vpop.xlane.xlu1 %4602 }
0x122b   :  { %17196 = vrcp.f32 %v4603_v23  ;;  %v16274_v23 = vld [vmem:[%s21277_s6 + $0x224] ss:$16 sps:$4 sm:$0xff]  }
0x122e   :  { %v15591_v41 = vpop.permute.xlu1 %15590 }
0x122f   :  { %v15593_v47 = vunpack.i.h.bf16 %v15591_v41  ;;  %v15592_v44 = vunpack.i.l.bf16 %v15591_v41  ;;  %v16277_v41 = vld [vmem:[%s21277_s6 + $0x22c] ss:$16 sps:$4 sm:$0xff]  }
0x1231   :  { %v15351_v31 = vpack.c.bf16 %v15593_v47, %v15592_v44  ;;  %v17195_v13 = vpop.eup %17194  ;;  %v16272_v47 = vld [vmem:[%s21277_s6 + $0x220] ss:$16 sps:$4 sm:$0xff]   ;;  %v16275_v44 = vld [vmem:[%s21277_s6 + $0x228] ss:$16 sps:$4 sm:$0xff]  }
0x1232   :  { %v3889_v58 = vpop.permute.xlu1 %3888  ;;  %v4610_v32 = vmul.f32 %v17195_v13, %v17191_v43  ;;  %v16242_v43 = vld [vmem:[%s21277_s6 + $0x100] ss:$16 sps:$4 sm:$0xff]   ;;  %v16281_v13 = vld [vmem:[%s21277_s6 + $0x248] ss:$16 sps:$4 sm:$0xff]  }
0x1233   :  { %3893 = vst.msk [vmem:[#allocation2 + $0x28] sm:$0xff] %vm3483_vm5, %v3889_v58  ;;  %15352 = vmatprep.subr.bf16.mxu1 %v15351_v31  ;;  %v16278_v58 = vld [vmem:[%s21277_s6 + $0x240] ss:$16 sps:$4 sm:$0xff]  }
0x1234   :  { %15354 = vmatpush3.bf16.msra.mxu1 %v15351_v31  ;;  %v16280_v31 = vld [vmem:[%s21277_s6 + $0x244] ss:$16 sps:$4 sm:$0xff]  }
0x1235   :  { %v17197_v55 = vpop.eup %17196  ;;  %5512 = vmatprep.subr.bf16.mxu1 %v16211_v14  ;;  %v16283_v14 = vld [vmem:[%s21277_s6 + $0x24c] ss:$16 sps:$4 sm:$0xff]  }
0x1236   :  { %v3478_v0 = vpop.permute.xlu1 %3477  ;;  %v4609_v35 = vmul.f32 %v17197_v55, %v17193_v26  ;;  %v16245_v26 = vld [vmem:[%s21277_s6 + $0x120] ss:$16 sps:$4 sm:$0xff]   ;;  %v16286_v55 = vld [vmem:[%s21277_s6 + $0x264] ss:$16 sps:$4 sm:$0xff]  }
0x1237   :  { %3484 = vst.msk [vmem:[#allocation2] sm:$0xff] %vm3483_vm5, %v3478_v0  ;;  %v16289_v0 = vld [vmem:[%s21277_s6 + $0x26c] ss:$16 sps:$4 sm:$0xff]  }
0x1238   :  { %15272 = vmatprep.mubr.msk.f32.mxu1 %vm3165_vm4, %v4609_v35  ;;  %v16284_v35 = vld [vmem:[%s21277_s6 + $0x260] ss:$16 sps:$4 sm:$0xff]  }
0x1239   :  { %15273 = vmatmul.mubr.msk.f32.vlgmr.msra.gmra.mrb[26].mxu1 %vm3165_vm4, %v4610_v32  ;;  %v16292_v32 = vld [vmem:[%s21277_s6 + $0x284] ss:$16 sps:$4 sm:$0xff]  }
0x123a   :  { %5513 = vmatpush1.bf16.msra.mxu1 %v16209_v20  ;;  %v3480_v46 = vpop.permute.xlu1 %3479  ;;  %v4715_v21 = vld [vmem:[#allocation2 + $0x28] sm:$0xff] }
0x123b   :  { %3485 = vst.msk [vmem:[#allocation2 + $0x20] sm:$0xff] %vm3483_vm5, %v3480_v46  ;;  %5514 = vmatprep.subr.bf16.mxu1 %v16217_v6  ;;  %v4719_v2 = vpack.c.bf16 %v4715_v21, %v4711_v59  ;;  %v16287_v20 = vld [vmem:[%s21277_s6 + $0x268] ss:$16 sps:$4 sm:$0xff]   ;;  %v16295_v6 = vld [vmem:[%s21277_s6 + $0x28c] ss:$16 sps:$4 sm:$0xff]  }
0x123c   :  { %v16290_v46 = vld [vmem:[%s21277_s6 + $0x280] ss:$16 sps:$4 sm:$0xff]   ;;  %v16298_v59 = vld [vmem:[%s21277_s6 + $0x2a4] ss:$16 sps:$4 sm:$0xff]   ;;  %v16301_v21 = vld [vmem:[%s21277_s6 + $0x2ac] ss:$16 sps:$4 sm:$0xff]  }
0x123d   :  { %5544 = vmatprep.mubr.bf16.mxu1 %v4719_v2  ;;  %5630 = vmatprep.mubr.bf16.mxu0 %v4719_v2  ;;  %v16296_v2 = vld [vmem:[%s21277_s6 + $0x2a0] ss:$16 sps:$4 sm:$0xff]  }
0x123e   :  { %5515 = vmatpush1.bf16.msra.mxu1 %v16215_v50  ;;  %v4710_v16 = vld [vmem:[#allocation2] sm:$0xff]  ;;  %v16293_v50 = vld [vmem:[%s21277_s6 + $0x288] ss:$16 sps:$4 sm:$0xff]  }
0x123f   :  { %5516 = vmatprep.subr.bf16.mxu1 %v16223_v45  ;;  %v16299_v45 = vld [vmem:[%s21277_s6 + $0x2a8] ss:$16 sps:$4 sm:$0xff]  }
0x1242   :  { %5517 = vmatpush1.bf16.msra.mxu1 %v16221_v3  ;;  %v4714_v33 = vld [vmem:[#allocation2 + $0x20] sm:$0xff] }
0x1243   :  { %5518 = vmatprep.subr.bf16.mxu1 %v16229_v61  ;;  %v4718_v53 = vpack.c.bf16 %v4714_v33, %v4710_v16  ;;  %v16304_v3 = vld [vmem:[%s21277_s6 + $0x2c4] ss:$16 sps:$4 sm:$0xff]   ;;  %v16307_v61 = vld [vmem:[%s21277_s6 + $0x2cc] ss:$16 sps:$4 sm:$0xff]   ;;  %v16305_v16 = vld [vmem:[%s21277_s6 + $0x2c8] ss:$16 sps:$4 sm:$0xff]  }
0x1244   :  { %v16310_v33 = vld [vmem:[%s21277_s6 + $0x2e4] ss:$16 sps:$4 sm:$0xff]  }
0x1245   :  { %5631 = vmatmul.mubr.bf16.vlgmr.msra.gmra.mrb[28].mxu0 %v4718_v53 }
0x1246   :  { %5519 = vmatpush1.bf16.msra.mxu1 %v16227_v28  ;;  %5642 = vmatpush1.bf16.msra.mxu0 %v16269_v9  ;;  %v16302_v28 = vld [vmem:[%s21277_s6 + $0x2c0] ss:$16 sps:$4 sm:$0xff]  }
0x1247   :  { %5520 = vmatprep.subr.bf16.mxu1 %v16232_v11  ;;  %5643 = vmatprep.subr.bf16.mxu0 %v16277_v41  ;;  %v16308_v11 = vld [vmem:[%s21277_s6 + $0x2e0] ss:$16 sps:$4 sm:$0xff]   ;;  %v16355_v41 = vld [vmem:[%s21277_s6 + $0x3cc] ss:$16 sps:$4 sm:$0xff]  }
0x1248   :  { %v16350_v9 = vld [vmem:[%s21277_s6 + $0x3c0] ss:$16 sps:$4 sm:$0xff]  }
0x124a   :  { %5521 = vmatpush1.bf16.msra.mxu1 %v16230_v18  ;;  %5644 = vmatpush1.bf16.msra.mxu0 %v16275_v44  ;;  %v16311_v18 = vld [vmem:[%s21277_s6 + $0x2e8] ss:$16 sps:$4 sm:$0xff]   ;;  %v16356_v44 = vld [vmem:[%s21277_s6 + $0x3e0] ss:$16 sps:$4 sm:$0xff]  }
0x124b   :  { %5522 = vmatprep.subr.bf16.mxu1 %v16235_v39  ;;  %5645 = vmatprep.subr.bf16.mxu0 %v16283_v14  ;;  %v16316_v39 = vld [vmem:[%s21277_s6 + $0x304] ss:$16 sps:$4 sm:$0xff]   ;;  %v16359_v14 = vld [vmem:[%s21277_s6 + $0x3e8] ss:$16 sps:$4 sm:$0xff]  }
0x124e   :  { %5523 = vmatpush1.bf16.msra.mxu1 %v16233_v1  ;;  %5646 = vmatpush1.bf16.msra.mxu0 %v16281_v13  ;;  %v16319_v1 = vld [vmem:[%s21277_s6 + $0x30c] ss:$16 sps:$4 sm:$0xff]  }
0x124f   :  { %5524 = vmatprep.subr.bf16.mxu1 %v16238_v30  ;;  %5647 = vmatprep.subr.bf16.mxu0 %v16289_v0  ;;  %v16314_v30 = vld [vmem:[%s21277_s6 + $0x300] ss:$16 sps:$4 sm:$0xff]  }
0x1252   :  { %5525 = vmatpush1.bf16.msra.mxu1 %v16236_v51  ;;  %5648 = vmatpush1.bf16.msra.mxu0 %v16287_v20  ;;  %v16317_v51 = vld [vmem:[%s21277_s6 + $0x308] ss:$16 sps:$4 sm:$0xff]  }
0x1253   :  { %5526 = vmatprep.subr.bf16.mxu1 %v16241_v19  ;;  %5649 = vmatprep.subr.bf16.mxu0 %v16295_v6  ;;  %v16322_v19 = vld [vmem:[%s21277_s6 + $0x324] ss:$16 sps:$4 sm:$0xff]  }
0x1256   :  { %5527 = vmatpush1.bf16.msra.mxu1 %v16239_v24  ;;  %5650 = vmatpush1.bf16.msra.mxu0 %v16293_v50  ;;  %v16325_v24 = vld [vmem:[%s21277_s6 + $0x32c] ss:$16 sps:$4 sm:$0xff]  }
0x1257   :  { %5528 = vmatprep.subr.bf16.mxu1 %v16244_v25  ;;  %5651 = vmatprep.subr.bf16.mxu0 %v16301_v21  ;;  %v16320_v25 = vld [vmem:[%s21277_s6 + $0x320] ss:$16 sps:$4 sm:$0xff]  }
0x125a   :  { %5529 = vmatpush1.bf16.msra.mxu1 %v16242_v43  ;;  %5652 = vmatpush1.bf16.msra.mxu0 %v16299_v45  ;;  %v16323_v43 = vld [vmem:[%s21277_s6 + $0x328] ss:$16 sps:$4 sm:$0xff]  }
0x125b   :  { %5530 = vmatprep.subr.bf16.mxu1 %v16247_v63  ;;  %5653 = vmatprep.subr.bf16.mxu0 %v16307_v61  ;;  %v16328_v63 = vld [vmem:[%s21277_s6 + $0x344] ss:$16 sps:$4 sm:$0xff]  }
0x125e   :  { %5531 = vmatpush1.bf16.msra.mxu1 %v16245_v26  ;;  %5654 = vmatpush1.bf16.msra.mxu0 %v16305_v16  ;;  %v16331_v26 = vld [vmem:[%s21277_s6 + $0x34c] ss:$16 sps:$4 sm:$0xff]  }
0x125f   :  { %5532 = vmatprep.subr.bf16.mxu1 %v16250_v22  ;;  %v16326_v22 = vld [vmem:[%s21277_s6 + $0x340] ss:$16 sps:$4 sm:$0xff]  }
0x1262   :  { %5533 = vmatpush1.bf16.msra.mxu1 %v16248_v42  ;;  %v16329_v42 = vld [vmem:[%s21277_s6 + $0x348] ss:$16 sps:$4 sm:$0xff]  }
0x1263   :  { %5534 = vmatprep.subr.bf16.mxu1 %v16253_v48  ;;  %v16334_v48 = vld [vmem:[%s21277_s6 + $0x364] ss:$16 sps:$4 sm:$0xff]  }
0x1266   :  { %5535 = vmatpush1.bf16.msra.mxu1 %v16251_v12  ;;  %v16337_v12 = vld [vmem:[%s21277_s6 + $0x36c] ss:$16 sps:$4 sm:$0xff]  }
0x1267   :  { %5536 = vmatprep.subr.bf16.mxu1 %v16256_v27  ;;  %v16332_v27 = vld [vmem:[%s21277_s6 + $0x360] ss:$16 sps:$4 sm:$0xff]  }
0x126a   :  { %5537 = vmatpush1.bf16.msra.mxu1 %v16254_v7  ;;  %v16335_v7 = vld [vmem:[%s21277_s6 + $0x368] ss:$16 sps:$4 sm:$0xff]  }
0x126b   :  { %5538 = vmatprep.subr.bf16.mxu1 %v16259_v56  ;;  %v16340_v56 = vld [vmem:[%s21277_s6 + $0x384] ss:$16 sps:$4 sm:$0xff]  }
0x126e   :  { %5539 = vmatpush1.bf16.msra.mxu1 %v16257_v10  ;;  %v16343_v10 = vld [vmem:[%s21277_s6 + $0x38c] ss:$16 sps:$4 sm:$0xff]  }
0x126f   :  { %5540 = vmatprep.subr.bf16.mxu1 %v16262_v34  ;;  %v16338_v34 = vld [vmem:[%s21277_s6 + $0x380] ss:$16 sps:$4 sm:$0xff]  }
0x1272   :  { %5541 = vmatpush1.bf16.msra.mxu1 %v16260_v52  ;;  %v16341_v52 = vld [vmem:[%s21277_s6 + $0x388] ss:$16 sps:$4 sm:$0xff]  }
0x1273   :  { %5542 = vmatprep.subr.bf16.mxu1 %v16265_v15  ;;  %v16344_v15 = vld [vmem:[%s21277_s6 + $0x3a0] ss:$16 sps:$4 sm:$0xff]  }
0x1276   :  { %5543 = vmatpush1.bf16.msra.mxu1 %v16263_v17  ;;  %v16346_v17 = vld [vmem:[%s21277_s6 + $0x3a4] ss:$16 sps:$4 sm:$0xff]  }
0x1277   :  { %5555 = vmatprep.subr.bf16.mxu1 %v16268_v29  ;;  %v16349_v29 = vld [vmem:[%s21277_s6 + $0x3ac] ss:$16 sps:$4 sm:$0xff]  }
0x1279   :  { %5545 = vmatmul.mubr.bf16.vlgmr.msra.gmra.mrb[28].mxu1 %v4718_v53  ;;  %v16313_v53 = vld [vmem:[%s21277_s6 + $0x2ec] ss:$16 sps:$4 sm:$0xff]  }
0x127a   :  { %5556 = vmatpush1.bf16.msra.mxu1 %v16266_v5  ;;  %5655 = vmatprep.subr.bf16.mxu0 %v16313_v53  ;;  %v16347_v5 = vld [vmem:[%s21277_s6 + $0x3a8] ss:$16 sps:$4 sm:$0xff]  }
0x127b   :  { %5557 = vmatprep.subr.bf16.mxu1 %v16274_v23  ;;  %5656 = vmatpush1.bf16.msra.mxu0 %v16311_v18  ;;  %v16353_v23 = vld [vmem:[%s21277_s6 + $0x3c8] ss:$16 sps:$4 sm:$0xff]  }
0x127c   :  { %5657 = vmatprep.subr.bf16.mxu0 %v16319_v1 }
0x127e   :  { %5558 = vmatpush1.bf16.msra.mxu1 %v16272_v47  ;;  %v16358_v47 = vld [vmem:[%s21277_s6 + $0x3e4] ss:$16 sps:$4 sm:$0xff]  }
0x127f   :  { %5559 = vmatprep.subr.bf16.mxu1 %v16280_v31  ;;  %5658 = vmatpush1.bf16.msra.mxu0 %v16317_v51  ;;  %v16361_v31 = vld [vmem:[%s21277_s6 + $0x3ec] ss:$16 sps:$4 sm:$0xff]  }
0x1280   :  { %5659 = vmatprep.subr.bf16.mxu0 %v16325_v24 }
0x1282   :  { %5560 = vmatpush1.bf16.msra.mxu1 %v16278_v58 }
0x1283   :  { %5561 = vmatprep.subr.bf16.mxu1 %v16286_v55  ;;  %5660 = vmatpush1.bf16.msra.mxu0 %v16323_v43  ;;  %v17207_v43 = vld [vmem:[%s21271_s0 + $0x8] sm:$0xff] }
0x1284   :  { %5661 = vmatprep.subr.bf16.mxu0 %v16331_v26 }
0x1286   :  { %5562 = vmatpush1.bf16.msra.mxu1 %v16284_v35 }
0x1287   :  { %5563 = vmatprep.subr.bf16.mxu1 %v16292_v32  ;;  %5662 = vmatpush1.bf16.msra.mxu0 %v16329_v42 }
0x1288   :  { %5663 = vmatprep.subr.bf16.mxu0 %v16337_v12 }
0x128a   :  { %5564 = vmatpush1.bf16.msra.mxu1 %v16290_v46 }
0x128b   :  { %5565 = vmatprep.subr.bf16.mxu1 %v16298_v59  ;;  %5664 = vmatpush1.bf16.msra.mxu0 %v16335_v7  ;;  %v4850_v59 = vld [vmem:[%s21278_s7] sm:$0xf] }
0x128c   :  { %5665 = vmatprep.subr.bf16.mxu0 %v16343_v10  ;;  %v4855_v21 = vrot.slane %v4850_v59, %v17653_v62  ;;  %v4859_v45 = vrot.slane %v4850_v59, %v17647_v60 }
0x128e   :  { %5566 = vmatpush1.bf16.msra.mxu1 %v16296_v2  ;;  %v4863_v2 = vrot.slane %v4850_v59, %v17641_v57 }
0x128f   :  { %5567 = vmatprep.subr.bf16.mxu1 %v16304_v3  ;;  %5666 = vmatpush1.bf16.msra.mxu0 %v16341_v52 }
0x1290   :  { %5667 = vmatprep.subr.bf16.mxu0 %v16349_v29 }
0x1292   :  { %5568 = vmatpush1.bf16.msra.mxu1 %v16302_v28  ;;  %v4867_v28 = vrot.slane %v4850_v59, %v17658_v4  ;;  %v5840_v59 = vld [vmem:[%s21281_s10 + $0x100] sm:$0xff] }
0x1293   :  { %5569 = vmatprep.subr.bf16.mxu1 %v16310_v33  ;;  %5668 = vmatpush1.bf16.msra.mxu0 %v16347_v5  ;;  %v17212_v5 = vld [vmem:[%s21271_s0 + $0x30] sm:$0xff] }
0x1294   :  { %5669 = vmatprep.subr.bf16.mxu0 %v16355_v41 }
0x1296   :  { %5570 = vmatpush1.bf16.msra.mxu1 %v16308_v11 }
0x1297   :  { %5571 = vmatprep.subr.bf16.mxu1 %v16316_v39  ;;  %5670 = vmatpush1.bf16.msra.mxu0 %v16353_v23  ;;  %v17213_v23 = vld [vmem:[%s21271_s0 + $0x38] sm:$0xff] }
0x1298   :  { %5671 = vmatprep.subr.bf16.mxu0 %v16361_v31 }
0x129a   :  { %5572 = vmatpush1.bf16.msra.mxu1 %v16314_v30  ;;  %v17206_v30 = vld [vmem:[%s21271_s0] sm:$0xff] }
0x129b   :  { %5573 = vmatprep.subr.bf16.mxu1 %v16322_v19  ;;  %5672 = vmatpush1.bf16.msra.mxu0 %v16359_v14  ;;  %v5808_v14 = vld [vmem:[%s21281_s10] sm:$0xff] }
0x129e   :  { %5574 = vmatpush1.bf16.msra.mxu1 %v16320_v25 }
0x129f   :  { %5575 = vmatprep.subr.bf16.mxu1 %v16328_v63 }
0x12a2   :  { %5576 = vmatpush1.bf16.msra.mxu1 %v16326_v22 }
0x12a3   :  { %5577 = vmatprep.subr.bf16.mxu1 %v16334_v48  ;;  %v17208_v48 = vld [vmem:[%s21271_s0 + $0x20] sm:$0xff] }
0x12a6   :  { %5578 = vmatpush1.bf16.msra.mxu1 %v16332_v27  ;;  %v17209_v27 = vld [vmem:[%s21271_s0 + $0x10] sm:$0xff] }
0x12a7   :  { %5579 = vmatprep.subr.bf16.mxu1 %v16340_v56  ;;  %v17210_v56 = vld [vmem:[%s21271_s0 + $0x28] sm:$0xff] }
0x12aa   :  { %5580 = vmatpush1.bf16.msra.mxu1 %v16338_v34 }
0x12ab   :  { %5581 = vmatprep.subr.bf16.mxu1 %v16346_v17 }
0x12ae   :  { %5582 = vmatpush1.bf16.msra.mxu1 %v16344_v15  ;;  %v17211_v15 = vld [vmem:[%s21271_s0 + $0x18] sm:$0xff] }
0x12af   :  { %5583 = vmatprep.subr.bf16.mxu1 %v16352_v49 }
0x12b2   :  { %5584 = vmatpush1.bf16.msra.mxu1 %v16350_v9 }
0x12b3   :  { %5585 = vmatprep.subr.bf16.mxu1 %v16358_v47 }
0x12b6   :  { %5586 = vmatpush1.bf16.msra.mxu1 %v16356_v44 }
0x130c   :  { %v15274_v58 = vpop.f32.mrb[26].mxu1 }
0x130d   :  { %4704 = vrot.lane.b32.xlu1 %v15274_v58, %s17265_s28  ;;  %v4691_v13 = vpop.f32.mrb[27].mxu1  ;;  %v5816_v58 = vld [vmem:[%s21281_s10 + $0x40] sm:$0xff] }
0x130e   :  { %4702 = vrot.lane.b32.xlu0 %v4691_v13, %s17265_s28  ;;  %v5809_v13 = vld [vmem:[%s21281_s10 + $0x8] sm:$0xff] }
0x1311   :  { %4296 = vrot.lane.b32.xlu1 %v18981_v54, %s17265_s28 }
0x1312   :  { %4294 = vrot.lane.b32.xlu0 %v18983_v8, %s17265_s28 }
0x137f   :  { %v4705_v55 = vpop.permute.xlu1 %4704 }
0x1380   :  { %4709 = vst.msk [vmem:[#allocation2 + $0x38] sm:$0xff] %vm3483_vm5, %v4705_v55  ;;  %v4703_v0 = vpop.permute.xlu0 %4702  ;;  %v14075_v55 = vcombine.low %v5808_v14, %v5816_v58 }
0x1381   :  { %4708 = vst.msk [vmem:[#allocation2 + $0x18] sm:$0xff] %vm3483_vm5, %v4703_v0  ;;  %v14076_v0 = vcombine.high %v5808_v14, %v5816_v58  ;;  %v5905_v14 = vld [vmem:[%s21281_s10 + $0x308] sm:$0xff] }
0x1382   :  { %v5913_v58 = vld [vmem:[%s21281_s10 + $0x348] sm:$0xff] }
0x1383   :  { %v4297_v35 = vpop.permute.xlu1 %4296  ;;  %8964 = vmatprep.subr.bf16.mxu1 %v14076_v0 }
0x1384   :  { %4301 = vst.msk [vmem:[#allocation2 + $0x30] sm:$0xff] %vm3483_vm5, %v4297_v35  ;;  %v4295_v20 = vpop.permute.xlu0 %4294  ;;  %v5817_v35 = vld [vmem:[%s21281_s10 + $0x48] sm:$0xff] }
0x1385   :  { %4300 = vst.msk [vmem:[#allocation2 + $0x10] sm:$0xff] %vm3483_vm5, %v4295_v20  ;;  %v5824_v20 = vld [vmem:[%s21281_s10 + $0x80] sm:$0xff] }
0x1387   :  { %v4717_v32 = vld [vmem:[#allocation2 + $0x38] sm:$0xff] }
0x1388   :  { %v4713_v6 = vld [vmem:[#allocation2 + $0x18] sm:$0xff] }
0x1389   :  { %v4721_v46 = vpack.c.bf16 %v4717_v32, %v4713_v6  ;;  %v5832_v32 = vld [vmem:[%s21281_s10 + $0xc0] sm:$0xff]  ;;  %v14077_v6 = vcombine.low %v5809_v13, %v5817_v35 }
0x138b   :  { %5587 = vmatprep.mubr.bf16.mxu1 %v4721_v46  ;;  %5673 = vmatprep.mubr.bf16.mxu0 %v4721_v46  ;;  %v4716_v54 = vld [vmem:[#allocation2 + $0x30] sm:$0xff]  ;;  %v14078_v46 = vcombine.high %v5809_v13, %v5817_v35  ;;  %v14174_v35 = vcombine.high %v5905_v14, %v5913_v58 }
0x138c   :  { %v4712_v50 = vld [vmem:[#allocation2 + $0x10] sm:$0xff] }
0x138d   :  { %v4720_v8 = vpack.c.bf16 %v4716_v54, %v4712_v50  ;;  %v14092_v54 = vcombine.high %v5824_v20, %v5832_v32  ;;  %v5825_v50 = vld [vmem:[%s21281_s10 + $0x88] sm:$0xff]  ;;  %9050 = vmatprep.subr.bf16.mxu0 %v14078_v46 }
0x138e   :  { %v5929_v46 = vld [vmem:[%s21281_s10 + $0x3c8] sm:$0xff] }
0x138f   :  { %5588 = vmatmul.mubr.bf16.vlgmr.msra.gmra.mrb[28].mxu1 %v4720_v8  ;;  %5674 = vmatmul.mubr.bf16.vlgmr.msra.gmra.mrb[28].mxu0 %v4720_v8  ;;  %v5833_v8 = vld [vmem:[%s21281_s10 + $0xc8] sm:$0xff] }
0x1390   :  { %8965 = vmatpush1.bf16.msra.mxu1 %v14075_v55  ;;  %9051 = vmatpush1.bf16.msra.mxu0 %v14077_v6  ;;  %v5921_v6 = vld [vmem:[%s21281_s10 + $0x388] sm:$0xff] }
0x1391   :  { %8966 = vmatprep.subr.bf16.mxu1 %v14092_v54 }
0x1462   :  { %v5589_v3 = vpop.f32.mrb[28].mxu1  ;;  %v5675_v61 = vpop.f32.mrb[28].mxu0 }
0x1463   :  { %v15379_v16 = vadd.f32 %v5589_v3, %v4855_v21  ;;  %v5591_v33 = vpop.f32.mrb[29].mxu1  ;;  %v5677_v53 = vpop.f32.mrb[29].mxu0  ;;  %v15383_v11 = vadd.f32 %v5675_v61, %v4863_v2  ;;  %v5849_v3 = vld [vmem:[%s21281_s10 + $0x148] sm:$0xff]  ;;  %v14091_v61 = vcombine.low %v5824_v20, %v5832_v32  ;;  %v5920_v20 = vld [vmem:[%s21281_s10 + $0x380] sm:$0xff] }
0x1464   :  { %v15380_v18 = vadd.f32 %v5591_v33, %v4859_v45  ;;  %v5593_v39 = vpop.f32.mrb[30].mxu1  ;;  %v5679_v1 = vpop.f32.mrb[30].mxu0  ;;  %v15384_v26 = vadd.f32 %v5677_v53, %v4867_v28  ;;  %v5856_v53 = vld [vmem:[%s21281_s10 + $0x180] sm:$0xff] }
0x1465   :  { %v19433_v51 = vadd.f32 %v17206_v30, %v15379_v16  ;;  %v15381_v19 = vadd.f32 %v5593_v39, %v4855_v21  ;;  %v5595_v24 = vpop.f32.mrb[31].mxu1  ;;  %v5681_v25 = vpop.f32.mrb[31].mxu0  ;;  %v15385_v22 = vadd.f32 %v5679_v1, %v4863_v2  ;;  %v19448_v7 = vadd.f32 %v17209_v27, %v15383_v11  ;;  %v5848_v2 = vld [vmem:[%s21281_s10 + $0x140] sm:$0xff]  ;;  %v5865_v39 = vld [vmem:[%s21281_s10 + $0x1c8] sm:$0xff]  ;;  %8967 = vmatpush1.bf16.msra.mxu1 %v14091_v61 }
0x1466   :  { %v19438_v63 = vadd.f32 %v17207_v43, %v15380_v18  ;;  %v15382_v42 = vadd.f32 %v5595_v24, %v4859_v45  ;;  %v15386_v34 = vadd.f32 %v5681_v25, %v4867_v28  ;;  %v19460_v17 = vadd.f32 %v17211_v15, %v15384_v26  ;;  %v5841_v45 = vld [vmem:[%s21281_s10 + $0x108] sm:$0xff]  ;;  %v5864_v11 = vld [vmem:[%s21281_s10 + $0x1c0] sm:$0xff] }
0x1467   :  { %v19443_v12 = vadd.f32 %v17208_v48, %v15381_v19  ;;  %v19465_v29 = vadd.f32 %v17212_v5, %v15385_v22  ;;  %v14094_v21 = vcombine.high %v5825_v50, %v5833_v8  ;;  %v14093_v28 = vcombine.low %v5825_v50, %v5833_v8  ;;  %v5857_v18 = vld [vmem:[%s21281_s10 + $0x188] sm:$0xff]  ;;  %v5872_v25 = vld [vmem:[%s21281_s10 + $0x200] sm:$0xff] }
0x1468   :  { %v19453_v10 = vadd.f32 %v17210_v56, %v15382_v42  ;;  %v5692_v52 = vadd.f32 %v19438_v63, %v19433_v51  ;;  %v19473_v41 = vadd.f32 %v17213_v23, %v15386_v34  ;;  %v14108_v16 = vcombine.high %v5840_v59, %v5848_v2  ;;  %v5880_v43 = vld [vmem:[%s21281_s10 + $0x240] sm:$0xff]  ;;  %v5873_v26 = vld [vmem:[%s21281_s10 + $0x208] sm:$0xff] }
0x1469   :  { %9052 = vmatprep.subr.bf16.mxu0 %v14094_v21  ;;  %v14110_v33 = vcombine.high %v5841_v45, %v5849_v3  ;;  %v14107_v1 = vcombine.low %v5840_v59, %v5848_v2  ;;  %v14109_v30 = vcombine.low %v5841_v45, %v5849_v3  ;;  %v14124_v19 = vcombine.high %v5856_v53, %v5864_v11  ;;  %v5881_v22 = vld [vmem:[%s21281_s10 + $0x248] sm:$0xff]  ;;  %v5888_v34 = vld [vmem:[%s21281_s10 + $0x280] sm:$0xff] }
0x146a   :  { %v5693_v9 = vadd.f32 %v5692_v52, %v19448_v7  ;;  %v5697_v49 = vadd.f32 %v19453_v10, %v19443_v12  ;;  %9053 = vmatpush1.bf16.msra.mxu0 %v14093_v28  ;;  %8968 = vmatprep.subr.bf16.mxu1 %v14108_v16  ;;  %v14126_v24 = vcombine.high %v5857_v18, %v5865_v39  ;;  %v5896_v52 = vld [vmem:[%s21281_s10 + $0x2c0] sm:$0xff]  ;;  %v5889_v15 = vld [vmem:[%s21281_s10 + $0x288] sm:$0xff] }
0x146b   :  { %9054 = vmatprep.subr.bf16.mxu0 %v14110_v33  ;;  %8969 = vmatpush1.bf16.msra.mxu1 %v14107_v1  ;;  %v14123_v42 = vcombine.low %v5856_v53, %v5864_v11  ;;  %v14125_v48 = vcombine.low %v5857_v18, %v5865_v39  ;;  %v14140_v27 = vcombine.high %v5872_v25, %v5880_v43  ;;  %v5897_v5 = vld [vmem:[%s21281_s10 + $0x2c8] sm:$0xff]  ;;  %v5928_v32 = vld [vmem:[%s21281_s10 + $0x3c0] sm:$0xff] }
0x146c   :  { %v5694_v47 = vadd.f32 %v5693_v9, %v19460_v17  ;;  %v5698_v44 = vadd.f32 %v5697_v49, %v19465_v29  ;;  %8970 = vmatprep.subr.bf16.mxu1 %v14124_v19  ;;  %v14142_v56 = vcombine.high %v5873_v26, %v5881_v22  ;;  %v14139_v9 = vcombine.low %v5872_v25, %v5880_v43  ;;  %v5936_v21 = vld [vmem:[%s21281_s10 + $0x400] sm:$0xff]  ;;  %v5937_v45 = vld [vmem:[%s21281_s10 + $0x408] sm:$0xff] }
0x146d   :  { %v14141_v49 = vcombine.low %v5873_v26, %v5881_v22  ;;  %v14156_v23 = vcombine.high %v5888_v34, %v5896_v52  ;;  %v14155_v13 = vcombine.low %v5888_v34, %v5896_v52  ;;  %v14157_v55 = vcombine.low %v5889_v15, %v5897_v5  ;;  %v5944_v2 = vld [vmem:[%s21281_s10 + $0x440] sm:$0xff]  ;;  %v5945_v3 = vld [vmem:[%s21281_s10 + $0x448] sm:$0xff] }
0x146e   :  { %5695 = vadd.xlane.f32.xlu0 %v5694_v47  ;;  %v5699_v31 = vadd.f32 %v5698_v44, %v19473_v41  ;;  %9055 = vmatpush1.bf16.msra.mxu0 %v14109_v30  ;;  %v14158_v47 = vcombine.high %v5889_v15, %v5897_v5  ;;  %v5904_v44 = vld [vmem:[%s21281_s10 + $0x300] sm:$0xff]  ;;  %v14173_v50 = vcombine.low %v5905_v14, %v5913_v58  ;;  %v5953_v18 = vld [vmem:[%s21281_s10 + $0x488] sm:$0xff] }
0x146f   :  { %9056 = vmatprep.subr.bf16.mxu0 %v14126_v24  ;;  %8971 = vmatpush1.bf16.msra.mxu1 %v14123_v42  ;;  %v14188_v8 = vcombine.high %v5920_v20, %v5928_v32  ;;  %v14190_v59 = vcombine.high %v5921_v6, %v5929_v46  ;;  %v14187_v61 = vcombine.low %v5920_v20, %v5928_v32  ;;  %v5952_v53 = vld [vmem:[%s21281_s10 + $0x480] sm:$0xff]  ;;  %v5961_v39 = vld [vmem:[%s21281_s10 + $0x4c8] sm:$0xff] }
0x1470   :  { %5700 = vadd.xlane.f32.xlu1 %v5699_v31  ;;  %8972 = vmatprep.subr.bf16.mxu1 %v14140_v27  ;;  %v5912_v31 = vld [vmem:[%s21281_s10 + $0x340] sm:$0xff]  ;;  %v14189_v28 = vcombine.low %v5921_v6, %v5929_v46  ;;  %v14204_v16 = vcombine.high %v5936_v21, %v5944_v2  ;;  %v14206_v33 = vcombine.high %v5937_v45, %v5945_v3 }
0x1471   :  { %v14172_v0 = vcombine.high %v5904_v44, %v5912_v31  ;;  %v14171_v54 = vcombine.low %v5904_v44, %v5912_v31  ;;  %v5960_v11 = vld [vmem:[%s21281_s10 + $0x4c0] sm:$0xff]  ;;  %v14203_v1 = vcombine.low %v5936_v21, %v5944_v2  ;;  %v14205_v30 = vcombine.low %v5937_v45, %v5945_v3  ;;  %v5977_v21 = vld [vmem:[%s21281_s10 + $0x548] sm:$0xff] }
0x1472   :  { %9057 = vmatpush1.bf16.msra.mxu0 %v14125_v48  ;;  %v14220_v19 = vcombine.high %v5952_v53, %v5960_v11  ;;  %v14222_v24 = vcombine.high %v5953_v18, %v5961_v39  ;;  %v14219_v25 = vcombine.low %v5952_v53, %v5960_v11  ;;  %v14221_v43 = vcombine.low %v5953_v18, %v5961_v39  ;;  %v5993_v53 = vld [vmem:[%s21281_s10 + $0x5c8] sm:$0xff] }
0x1473   :  { %9058 = vmatprep.subr.bf16.mxu0 %v14142_v56  ;;  %8973 = vmatpush1.bf16.msra.mxu1 %v14139_v9 }
0x1474   :  { %8974 = vmatprep.subr.bf16.mxu1 %v14156_v23 }
0x1476   :  { %9059 = vmatpush1.bf16.msra.mxu0 %v14141_v49 }
0x1477   :  { %9060 = vmatprep.subr.bf16.mxu0 %v14158_v47  ;;  %8975 = vmatpush1.bf16.msra.mxu1 %v14155_v13 }
0x1478   :  { %8976 = vmatprep.subr.bf16.mxu1 %v14172_v0 }
0x147a   :  { %9061 = vmatpush1.bf16.msra.mxu0 %v14157_v55 }
0x147b   :  { %9062 = vmatprep.subr.bf16.mxu0 %v14174_v35  ;;  %8977 = vmatpush1.bf16.msra.mxu1 %v14171_v54  ;;  %v5968_v54 = vld [vmem:[%s21281_s10 + $0x500] sm:$0xff] }
0x147c   :  { %8978 = vmatprep.subr.bf16.mxu1 %v14188_v8  ;;  %v5969_v8 = vld [vmem:[%s21281_s10 + $0x508] sm:$0xff] }
0x147d   :  { %v14237_v45 = vcombine.low %v5969_v8, %v5977_v21  ;;  %v14238_v3 = vcombine.high %v5969_v8, %v5977_v21 }
0x147e   :  { %9063 = vmatpush1.bf16.msra.mxu0 %v14173_v50  ;;  %v5976_v50 = vld [vmem:[%s21281_s10 + $0x540] sm:$0xff] }
0x147f   :  { %9064 = vmatprep.subr.bf16.mxu0 %v14190_v59  ;;  %8979 = vmatpush1.bf16.msra.mxu1 %v14187_v61  ;;  %v14236_v59 = vcombine.high %v5968_v54, %v5976_v50  ;;  %v14235_v2 = vcombine.low %v5968_v54, %v5976_v50  ;;  %v5984_v61 = vld [vmem:[%s21281_s10 + $0x580] sm:$0xff]  ;;  %v6049_v54 = vld [vmem:[%s21281_s10 + $0x788] sm:$0xff] }
0x1480   :  { %8980 = vmatprep.subr.bf16.mxu1 %v14204_v16  ;;  %v5985_v16 = vld [vmem:[%s21281_s10 + $0x588] sm:$0xff] }
0x1481   :  { %v14253_v18 = vcombine.low %v5985_v16, %v5993_v53  ;;  %v14254_v39 = vcombine.high %v5985_v16, %v5993_v53  ;;  %v6057_v50 = vld [vmem:[%s21281_s10 + $0x7c8] sm:$0xff] }
0x1482   :  { %9065 = vmatpush1.bf16.msra.mxu0 %v14189_v28  ;;  %v5992_v28 = vld [vmem:[%s21281_s10 + $0x5c0] sm:$0xff]  ;;  %v19723_v16 = vld [vmem:[%s21281_s10 + $0x808] sm:$0xff] }
0x1483   :  { %9066 = vmatprep.subr.bf16.mxu0 %v14206_v33  ;;  %8981 = vmatpush1.bf16.msra.mxu1 %v14203_v1  ;;  %v14252_v33 = vcombine.high %v5984_v61, %v5992_v28  ;;  %v14251_v11 = vcombine.low %v5984_v61, %v5992_v28  ;;  %v6000_v1 = vld [vmem:[%s21281_s10 + $0x600] sm:$0xff]  ;;  %v19730_v53 = vld [vmem:[%s21281_s10 + $0x848] sm:$0xff] }
0x1484   :  { %8982 = vmatprep.subr.bf16.mxu1 %v14220_v19  ;;  %v6001_v19 = vld [vmem:[%s21281_s10 + $0x608] sm:$0xff]  ;;  %v19713_v61 = vld [vmem:[%s21281_s10 + $0x800] sm:$0xff] }
0x1485   :  { %v19718_v28 = vld [vmem:[%s21281_s10 + $0x840] sm:$0xff] }
0x1486   :  { %9067 = vmatpush1.bf16.msra.mxu0 %v14205_v30  ;;  %v6008_v30 = vld [vmem:[%s21281_s10 + $0x640] sm:$0xff] }
0x1487   :  { %9068 = vmatprep.subr.bf16.mxu0 %v14222_v24  ;;  %8983 = vmatpush1.bf16.msra.mxu1 %v14219_v25  ;;  %v14267_v24 = vcombine.low %v6000_v1, %v6008_v30  ;;  %v14268_v25 = vcombine.high %v6000_v1, %v6008_v30 }
0x1488   :  { %8984 = vmatprep.subr.bf16.mxu1 %v14236_v59 }
0x148a   :  { %9069 = vmatpush1.bf16.msra.mxu0 %v14221_v43  ;;  %v6009_v43 = vld [vmem:[%s21281_s10 + $0x648] sm:$0xff] }
0x148b   :  { %9070 = vmatprep.subr.bf16.mxu0 %v14238_v3  ;;  %8985 = vmatpush1.bf16.msra.mxu1 %v14235_v2  ;;  %v14318_v2 = vcombine.high %v6049_v54, %v6057_v50  ;;  %v14317_v3 = vcombine.low %v6049_v54, %v6057_v50 }
0x148c   :  { %8986 = vmatprep.subr.bf16.mxu1 %v14252_v33  ;;  %v14332_v33 = vcombine.high %v19713_v61, %v19718_v28 }
0x148e   :  { %9071 = vmatpush1.bf16.msra.mxu0 %v14237_v45 }
0x148f   :  { %9072 = vmatprep.subr.bf16.mxu0 %v14254_v39  ;;  %8987 = vmatpush1.bf16.msra.mxu1 %v14251_v11  ;;  %v14331_v11 = vcombine.low %v19713_v61, %v19718_v28  ;;  %v14334_v39 = vcombine.high %v19723_v16, %v19730_v53  ;;  %v6120_v61 = vld [vmem:[%s21281_s10 + $0x9c0] sm:$0xff]  ;;  %v6113_v28 = vld [vmem:[%s21281_s10 + $0x988] sm:$0xff] }
0x1490   :  { %8988 = vmatprep.subr.bf16.mxu1 %v14268_v25 }
0x1492   :  { %9073 = vmatpush1.bf16.msra.mxu0 %v14253_v18  ;;  %v14333_v18 = vcombine.low %v19723_v16, %v19730_v53  ;;  %v6121_v16 = vld [vmem:[%s21281_s10 + $0x9c8] sm:$0xff] }
0x1493   :  { %8989 = vmatpush1.bf16.msra.mxu1 %v14267_v24 }
0x14fb   :  { %v5696_v26 = vpop.xlane.xlu0 %5695 }
0x14fc   :  { %v5702_v22 = vmul.f32 0.001953125, %v5696_v26  ;;  %v6016_v26 = vld [vmem:[%s21281_s10 + $0x680] sm:$0xff] }
0x14fd   :  { %v5701_v42 = vpop.xlane.xlu1 %5700 }
0x14fe   :  { %v19599_v48 = vsub.f32 %v19433_v51, %v5702_v22  ;;  %v19602_v27 = vsub.f32 %v19438_v63, %v5702_v22  ;;  %v5703_v56 = vmul.f32 0.001953125, %v5701_v42  ;;  %v19605_v34 = vsub.f32 %v19448_v7, %v5702_v22 }
0x14ff   :  { %v19608_v52 = vsub.f32 %v19460_v17, %v5702_v22  ;;  %v6024_v22 = vld [vmem:[%s21281_s10 + $0x6c0] sm:$0xff]  ;;  %v14269_v42 = vcombine.low %v6001_v19, %v6009_v43 }
0x1500   :  { %v19611_v15 = vsub.f32 %v19443_v12, %v5703_v56  ;;  %v19614_v5 = vsub.f32 %v19453_v10, %v5703_v56  ;;  %v5712_v9 = vmul.f32 %v19599_v48, %v19599_v48  ;;  %v5713_v49 = vmul.f32 %v19602_v27, %v19602_v27 }
0x1501   :  { %v19621_v23 = vsub.f32 %v19465_v29, %v5703_v56  ;;  %v5714_v47 = vmul.f32 %v19605_v34, %v19605_v34  ;;  %v5715_v58 = vmul.f32 %v19608_v52, %v19608_v52  ;;  %v19632_v55 = vsub.f32 %v19473_v41, %v5703_v56 }
0x1502   :  { %v5720_v44 = vadd.f32 %v5713_v49, %v5712_v9  ;;  %v5716_v31 = vmul.f32 %v19611_v15, %v19611_v15  ;;  %v5717_v14 = vmul.f32 %v19614_v5, %v19614_v5  ;;  %v14270_v56 = vcombine.high %v6001_v19, %v6009_v43  ;;  %v6017_v49 = vld [vmem:[%s21281_s10 + $0x688] sm:$0xff] }
0x1503   :  { %v5718_v0 = vmul.f32 %v19621_v23, %v19621_v23  ;;  %v5719_v6 = vmul.f32 %v19632_v55, %v19632_v55  ;;  %v14284_v9 = vcombine.high %v6016_v26, %v6024_v22 }
0x1504   :  { %v5721_v13 = vadd.f32 %v5720_v44, %v5714_v47  ;;  %v5725_v35 = vadd.f32 %v5717_v14, %v5716_v31  ;;  %v6025_v47 = vld [vmem:[%s21281_s10 + $0x6c8] sm:$0xff]  ;;  %v6032_v31 = vld [vmem:[%s21281_s10 + $0x700] sm:$0xff]  ;;  %9074 = vmatprep.subr.bf16.mxu0 %v14270_v56 }
0x1505   :  { %v14286_v44 = vcombine.high %v6017_v49, %v6025_v47  ;;  %v6040_v14 = vld [vmem:[%s21281_s10 + $0x740] sm:$0xff]  ;;  %9075 = vmatpush1.bf16.msra.mxu0 %v14269_v42  ;;  %8990 = vmatprep.subr.bf16.mxu1 %v14284_v9 }
0x1506   :  { %v5722_v20 = vadd.f32 %v5721_v13, %v5715_v58  ;;  %v5726_v32 = vadd.f32 %v5725_v35, %v5718_v0  ;;  %v6033_v58 = vld [vmem:[%s21281_s10 + $0x708] sm:$0xff]  ;;  %v14283_v0 = vcombine.low %v6016_v26, %v6024_v22  ;;  %v14285_v35 = vcombine.low %v6017_v49, %v6025_v47  ;;  %v5744_v26 = vld [vmem:[%s21279_s8] sm:$0xf] }
0x1507   :  { %v6041_v13 = vld [vmem:[%s21281_s10 + $0x748] sm:$0xff]  ;;  %9076 = vmatprep.subr.bf16.mxu0 %v14286_v44  ;;  %v14299_v8 = vcombine.low %v6032_v31, %v6040_v14  ;;  %v5774_v22 = vld [vmem:[%s21280_s9] sm:$0xf]  ;;  %v5757_v42 = vrot.slane %v5744_v26, %v17641_v57  ;;  %v5753_v9 = vrot.slane %v5744_v26, %v17647_v60  ;;  %v5749_v44 = vrot.slane %v5744_v26, %v17653_v62 }
0x1508   :  { %5723 = vadd.xlane.f32.xlu0 %v5722_v20  ;;  %v5727_v46 = vadd.f32 %v5726_v32, %v5719_v6  ;;  %v14300_v20 = vcombine.high %v6032_v31, %v6040_v14  ;;  %v14302_v32 = vcombine.high %v6033_v58, %v6041_v13  ;;  %v6048_v6 = vld [vmem:[%s21281_s10 + $0x780] sm:$0xff]  ;;  %8991 = vmatpush1.bf16.msra.mxu1 %v14283_v0 }
0x1509   :  { %9077 = vmatpush1.bf16.msra.mxu0 %v14285_v35  ;;  %v14301_v59 = vcombine.low %v6033_v58, %v6041_v13  ;;  %v5787_v14 = vrot.slane %v5774_v22, %v17641_v57  ;;  %v5783_v0 = vrot.slane %v5774_v22, %v17647_v60  ;;  %v5779_v35 = vrot.slane %v5774_v22, %v17653_v62 }
0x150a   :  { %8992 = vmatprep.subr.bf16.mxu1 %v14300_v20  ;;  %9078 = vmatprep.subr.bf16.mxu0 %v14302_v32  ;;  %v5761_v32 = vrot.slane %v5744_v26, %v17658_v4  ;;  %v6096_v26 = vld [vmem:[%s21281_s10 + $0x900] sm:$0xff] }
0x150c   :  { %5728 = vadd.xlane.f32.xlu0 %v5727_v46  ;;  %v6056_v46 = vld [vmem:[%s21281_s10 + $0x7c0] sm:$0xff]  ;;  %8993 = vmatpush1.bf16.msra.mxu1 %v14299_v8 }
0x150d   :  { %v14316_v21 = vcombine.high %v6048_v6, %v6056_v46  ;;  %v14315_v45 = vcombine.low %v6048_v6, %v6056_v46  ;;  %9079 = vmatpush1.bf16.msra.mxu0 %v14301_v59 }
0x150e   :  { %9080 = vmatprep.subr.bf16.mxu0 %v14318_v2 }
0x150f   :  { %8994 = vmatprep.subr.bf16.mxu1 %v14316_v21 }
0x1510   :  { %8995 = vmatpush1.bf16.msra.mxu1 %v14315_v45  ;;  %v5791_v45 = vrot.slane %v5774_v22, %v17658_v4 }
0x1511   :  { %9081 = vmatpush1.bf16.msra.mxu0 %v14317_v3  ;;  %9007 = vmatprep.subr.bf16.mxu1 %v14332_v33 }
0x1512   :  { %9093 = vmatprep.subr.bf16.mxu0 %v14334_v39 }
0x1595   :  { %v5724_v1 = vpop.xlane.xlu0 %5723 }
0x1596   :  { %v5730_v30 = vmul.f32 0.001953125, %v5724_v1 }
0x1598   :  { %v5732_v19 = vadd.f32 1e-06, %v5730_v30  ;;  %v6089_v30 = vld [vmem:[%s21281_s10 + $0x8c8] sm:$0xff] }
0x1599   :  { %v5729_v24 = vpop.xlane.xlu0 %5728 }
0x159a   :  { %17198 = vrsqrt.f32 %v5732_v19  ;;  %v5731_v25 = vmul.f32 0.001953125, %v5729_v24 }
0x159c   :  { %v5733_v43 = vadd.f32 1e-06, %v5731_v25 }
0x159e   :  { %17200 = vrsqrt.f32 %v5733_v43 }
0x15a4   :  { %v17199_v56 = vpop.eup %17198 }
0x15a5   :  { %v5737_v49 = vmul.f32 %v17199_v56, %v19602_v27  ;;  %v5736_v47 = vmul.f32 %v17199_v56, %v19599_v48  ;;  %v5738_v31 = vmul.f32 %v17199_v56, %v19605_v34  ;;  %v5739_v20 = vmul.f32 %v17199_v56, %v19608_v52 }
0x15a7   :  { %v5768_v58 = vmul.f32 %v5757_v42, %v5738_v31  ;;  %v5767_v6 = vmul.f32 %v5753_v9, %v5737_v49  ;;  %v5766_v46 = vmul.f32 %v5749_v44, %v5736_v47  ;;  %v5769_v21 = vmul.f32 %v5761_v32, %v5739_v20  ;;  %v6097_v49 = vld [vmem:[%s21281_s10 + $0x908] sm:$0xff]  ;;  %v6128_v20 = vld [vmem:[%s21281_s10 + $0xa00] sm:$0xff] }
0x15a8   :  { %v17201_v13 = vpop.eup %17200  ;;  %v6105_v47 = vld [vmem:[%s21281_s10 + $0x948] sm:$0xff] }
0x15a9   :  { %v5741_v27 = vmul.f32 %v17201_v13, %v19614_v5  ;;  %v5740_v48 = vmul.f32 %v17201_v13, %v19611_v15  ;;  %v5743_v34 = vmul.f32 %v17201_v13, %v19632_v55  ;;  %v5742_v54 = vmul.f32 %v17201_v13, %v19621_v23  ;;  %v6080_v15 = vld [vmem:[%s21281_s10 + $0x880] sm:$0xff]  ;;  %v6081_v55 = vld [vmem:[%s21281_s10 + $0x888] sm:$0xff] }
0x15aa   :  { %v5798_v50 = vadd.f32 %v5787_v14, %v5768_v58  ;;  %v5797_v3 = vadd.f32 %v5783_v0, %v5767_v6  ;;  %v5796_v39 = vadd.f32 %v5779_v35, %v5766_v46  ;;  %v6088_v23 = vld [vmem:[%s21281_s10 + $0x8c0] sm:$0xff]  ;;  %v5799_v43 = vadd.f32 %v5791_v45, %v5769_v21  ;;  %v6137_v6 = vld [vmem:[%s21281_s10 + $0xa48] sm:$0xff] }
0x15ab   :  { %v5771_v8 = vmul.f32 %v5753_v9, %v5741_v27  ;;  %v5770_v59 = vmul.f32 %v5749_v44, %v5740_v48  ;;  %v5773_v2 = vmul.f32 %v5761_v32, %v5743_v34  ;;  %v5772_v52 = vmul.f32 %v5757_v42, %v5742_v54  ;;  %v6104_v9 = vld [vmem:[%s21281_s10 + $0x940] sm:$0xff]  ;;  %v6129_v27 = vld [vmem:[%s21281_s10 + $0xa08] sm:$0xff] }
0x15ac   :  { %v14348_v42 = vcombine.high %v6080_v15, %v6088_v23  ;;  %v14350_v56 = vcombine.high %v6081_v55, %v6089_v30  ;;  %v14347_v31 = vcombine.low %v6080_v15, %v6088_v23  ;;  %v14364_v58 = vcombine.high %v6096_v26, %v6104_v9  ;;  %v6136_v32 = vld [vmem:[%s21281_s10 + $0xa40] sm:$0xff]  ;;  %v6153_v21 = vld [vmem:[%s21281_s10 + $0xac8] sm:$0xff] }
0x15ad   :  { %v5801_v33 = vadd.f32 %v5783_v0, %v5771_v8  ;;  %v5800_v5 = vadd.f32 %v5779_v35, %v5770_v59  ;;  %v5803_v1 = vadd.f32 %v5791_v45, %v5773_v2  ;;  %v5802_v19 = vadd.f32 %v5787_v14, %v5772_v52  ;;  %v6112_v0 = vld [vmem:[%s21281_s10 + $0x980] sm:$0xff]  ;;  %v6145_v59 = vld [vmem:[%s21281_s10 + $0xa88] sm:$0xff] }
0x15ae   :  { %v14349_v14 = vcombine.low %v6081_v55, %v6089_v30  ;;  %v14366_v13 = vcombine.high %v6097_v49, %v6105_v47  ;;  %v14363_v53 = vcombine.low %v6096_v26, %v6104_v9  ;;  %v14382_v35 = vcombine.high %v6113_v28, %v6121_v16  ;;  %v6152_v8 = vld [vmem:[%s21281_s10 + $0xac0] sm:$0xff]  ;;  %v6169_v15 = vld [vmem:[%s21281_s10 + $0xb48] sm:$0xff] }
0x15af   :  { %v19772_v24 = vpack.c.bf16 %v5801_v33, %v5797_v3  ;;  %v19774_v25 = vpack.c.bf16 %v5800_v5, %v5796_v39  ;;  %v19779_v22 = vpack.c.bf16 %v5802_v19, %v5798_v50  ;;  %v19794_v44 = vpack.c.bf16 %v5803_v1, %v5799_v43  ;;  %v6144_v50 = vld [vmem:[%s21281_s10 + $0xa80] sm:$0xff]  ;;  %v6161_v5 = vld [vmem:[%s21281_s10 + $0xb08] sm:$0xff] }
0x15b0   :  { %v14379_v48 = vcombine.low %v6112_v0, %v6120_v61  ;;  %v14381_v46 = vcombine.low %v6113_v28, %v6121_v16  ;;  %v14396_v34 = vcombine.high %v6128_v20, %v6136_v32  ;;  %v14398_v54 = vcombine.high %v6129_v27, %v6137_v6  ;;  %v6160_v33 = vld [vmem:[%s21281_s10 + $0xb00] sm:$0xff]  ;;  %v6177_v26 = vld [vmem:[%s21281_s10 + $0xb88] sm:$0xff] }
0x15b1   :  { %8996 = vmatprep.mubr.bf16.mxu1 %v19772_v24  ;;  %9082 = vmatprep.mubr.bf16.mxu0 %v19772_v24  ;;  %v14395_v2 = vcombine.low %v6128_v20, %v6136_v32  ;;  %v14397_v45 = vcombine.low %v6129_v27, %v6137_v6  ;;  %v14412_v52 = vcombine.high %v6144_v50, %v6152_v8  ;;  %v6168_v39 = vld [vmem:[%s21281_s10 + $0xb40] sm:$0xff] }
0x15b2   :  { %8997 = vmatmul.mubr.bf16.vlgmr.msra.gmra.mrb[32].mxu1 %v19774_v25  ;;  %9083 = vmatmul.mubr.bf16.vlgmr.msra.gmra.mrb[32].mxu0 %v19774_v25  ;;  %v14414_v3 = vcombine.high %v6145_v59, %v6153_v21  ;;  %v14411_v1 = vcombine.low %v6144_v50, %v6152_v8  ;;  %v14413_v23 = vcombine.low %v6145_v59, %v6153_v21  ;;  %v6176_v19 = vld [vmem:[%s21281_s10 + $0xb80] sm:$0xff] }
0x15b3   :  { %9008 = vmatpush1.bf16.msra.mxu1 %v14331_v11  ;;  %9094 = vmatpush1.bf16.msra.mxu0 %v14333_v18  ;;  %v14365_v11 = vcombine.low %v6097_v49, %v6105_v47  ;;  %v14380_v18 = vcombine.high %v6112_v0, %v6120_v61  ;;  %v14428_v55 = vcombine.high %v6160_v33, %v6168_v39  ;;  %v6184_v43 = vld [vmem:[%s21281_s10 + $0xbc0] sm:$0xff] }
0x15b4   :  { %9039 = vmatprep.mubr.bf16.mxu1 %v19794_v44  ;;  %9125 = vmatprep.mubr.bf16.mxu0 %v19794_v44  ;;  %v14430_v30 = vcombine.high %v6161_v5, %v6169_v15  ;;  %v14429_v9 = vcombine.low %v6161_v5, %v6169_v15  ;;  %v14444_v49 = vcombine.high %v6176_v19, %v6184_v43 }
0x15b5   :  { %9009 = vmatprep.subr.bf16.mxu1 %v14348_v42  ;;  %9095 = vmatprep.subr.bf16.mxu0 %v14350_v56  ;;  %v6185_v42 = vld [vmem:[%s21281_s10 + $0xbc8] sm:$0xff]  ;;  %v14427_v56 = vcombine.low %v6160_v33, %v6168_v39  ;;  %v14443_v0 = vcombine.low %v6176_v19, %v6184_v43 }
0x15b6   :  { %v14446_v47 = vcombine.high %v6177_v26, %v6185_v42  ;;  %v14445_v61 = vcombine.low %v6177_v26, %v6185_v42 }
0x15b7   :  { %9010 = vmatpush1.bf16.msra.mxu1 %v14347_v31  ;;  %9096 = vmatpush1.bf16.msra.mxu0 %v14349_v14  ;;  %v6192_v31 = vld [vmem:[%s21281_s10 + $0xc00] sm:$0xff] }
0x15b8   :  { %9011 = vmatprep.subr.bf16.mxu1 %v14364_v58  ;;  %9097 = vmatprep.subr.bf16.mxu0 %v14366_v13  ;;  %v6200_v14 = vld [vmem:[%s21281_s10 + $0xc40] sm:$0xff]  ;;  %v6193_v58 = vld [vmem:[%s21281_s10 + $0xc08] sm:$0xff] }
0x15b9   :  { %v6201_v13 = vld [vmem:[%s21281_s10 + $0xc48] sm:$0xff]  ;;  %v14460_v28 = vcombine.high %v6192_v31, %v6200_v14  ;;  %v14459_v20 = vcombine.low %v6192_v31, %v6200_v14 }
0x15ba   :  { %v14462_v16 = vcombine.high %v6193_v58, %v6201_v13  ;;  %v14461_v32 = vcombine.low %v6193_v58, %v6201_v13 }
0x15bb   :  { %9012 = vmatpush1.bf16.msra.mxu1 %v14363_v53  ;;  %9098 = vmatpush1.bf16.msra.mxu0 %v14365_v11  ;;  %v6208_v53 = vld [vmem:[%s21281_s10 + $0xc80] sm:$0xff] }
0x15bc   :  { %9013 = vmatprep.subr.bf16.mxu1 %v14380_v18  ;;  %9099 = vmatprep.subr.bf16.mxu0 %v14382_v35  ;;  %v6216_v11 = vld [vmem:[%s21281_s10 + $0xcc0] sm:$0xff]  ;;  %v6209_v18 = vld [vmem:[%s21281_s10 + $0xc88] sm:$0xff] }
0x15bd   :  { %v6217_v35 = vld [vmem:[%s21281_s10 + $0xcc8] sm:$0xff]  ;;  %v14476_v27 = vcombine.high %v6208_v53, %v6216_v11  ;;  %v14475_v50 = vcombine.low %v6208_v53, %v6216_v11 }
0x15be   :  { %v14478_v6 = vcombine.high %v6209_v18, %v6217_v35  ;;  %v14477_v8 = vcombine.low %v6209_v18, %v6217_v35 }
0x15bf   :  { %9014 = vmatpush1.bf16.msra.mxu1 %v14379_v48  ;;  %9100 = vmatpush1.bf16.msra.mxu0 %v14381_v46  ;;  %v6224_v48 = vld [vmem:[%s21281_s10 + $0xd00] sm:$0xff] }
0x15c0   :  { %9015 = vmatprep.subr.bf16.mxu1 %v14396_v34  ;;  %9101 = vmatprep.subr.bf16.mxu0 %v14398_v54  ;;  %v6232_v46 = vld [vmem:[%s21281_s10 + $0xd40] sm:$0xff]  ;;  %v6225_v34 = vld [vmem:[%s21281_s10 + $0xd08] sm:$0xff] }
0x15c1   :  { %v6233_v54 = vld [vmem:[%s21281_s10 + $0xd48] sm:$0xff]  ;;  %v14492_v59 = vcombine.high %v6224_v48, %v6232_v46  ;;  %v14491_v33 = vcombine.low %v6224_v48, %v6232_v46 }
0x15c2   :  { %v14494_v21 = vcombine.high %v6225_v34, %v6233_v54  ;;  %v14493_v39 = vcombine.low %v6225_v34, %v6233_v54 }
0x15c3   :  { %9016 = vmatpush1.bf16.msra.mxu1 %v14395_v2  ;;  %9102 = vmatpush1.bf16.msra.mxu0 %v14397_v45  ;;  %v6240_v2 = vld [vmem:[%s21281_s10 + $0xd80] sm:$0xff] }
0x15c4   :  { %9017 = vmatprep.subr.bf16.mxu1 %v14412_v52  ;;  %9103 = vmatprep.subr.bf16.mxu0 %v14414_v3  ;;  %v6248_v45 = vld [vmem:[%s21281_s10 + $0xdc0] sm:$0xff]  ;;  %v6241_v52 = vld [vmem:[%s21281_s10 + $0xd88] sm:$0xff] }
0x15c5   :  { %v6249_v3 = vld [vmem:[%s21281_s10 + $0xdc8] sm:$0xff]  ;;  %v14508_v5 = vcombine.high %v6240_v2, %v6248_v45  ;;  %v14507_v19 = vcombine.low %v6240_v2, %v6248_v45 }
0x15c6   :  { %v14510_v15 = vcombine.high %v6241_v52, %v6249_v3  ;;  %v14509_v43 = vcombine.low %v6241_v52, %v6249_v3 }
0x15c7   :  { %9018 = vmatpush1.bf16.msra.mxu1 %v14411_v1  ;;  %9104 = vmatpush1.bf16.msra.mxu0 %v14413_v23  ;;  %v6256_v1 = vld [vmem:[%s21281_s10 + $0xe00] sm:$0xff] }
0x15c8   :  { %9019 = vmatprep.subr.bf16.mxu1 %v14428_v55  ;;  %9105 = vmatprep.subr.bf16.mxu0 %v14430_v30  ;;  %v6264_v23 = vld [vmem:[%s21281_s10 + $0xe40] sm:$0xff]  ;;  %v6257_v55 = vld [vmem:[%s21281_s10 + $0xe08] sm:$0xff] }
0x15c9   :  { %v6265_v30 = vld [vmem:[%s21281_s10 + $0xe48] sm:$0xff]  ;;  %v14524_v26 = vcombine.high %v6256_v1, %v6264_v23  ;;  %v14523_v31 = vcombine.low %v6256_v1, %v6264_v23 }
0x15ca   :  { %v14526_v42 = vcombine.high %v6257_v55, %v6265_v30  ;;  %v14525_v14 = vcombine.low %v6257_v55, %v6265_v30 }
0x15cb   :  { %9020 = vmatpush1.bf16.msra.mxu1 %v14427_v56  ;;  %9106 = vmatpush1.bf16.msra.mxu0 %v14429_v9  ;;  %v6272_v56 = vld [vmem:[%s21281_s10 + $0xe80] sm:$0xff] }
0x15cc   :  { %9021 = vmatprep.subr.bf16.mxu1 %v14444_v49  ;;  %9107 = vmatprep.subr.bf16.mxu0 %v14446_v47  ;;  %v6280_v9 = vld [vmem:[%s21281_s10 + $0xec0] sm:$0xff]  ;;  %v6273_v49 = vld [vmem:[%s21281_s10 + $0xe88] sm:$0xff] }
0x15cd   :  { %v6281_v47 = vld [vmem:[%s21281_s10 + $0xec8] sm:$0xff]  ;;  %v14540_v58 = vcombine.high %v6272_v56, %v6280_v9  ;;  %v14539_v53 = vcombine.low %v6272_v56, %v6280_v9 }
0x15ce   :  { %v14542_v13 = vcombine.high %v6273_v49, %v6281_v47  ;;  %v14541_v11 = vcombine.low %v6273_v49, %v6281_v47 }
0x15cf   :  { %9022 = vmatpush1.bf16.msra.mxu1 %v14443_v0  ;;  %9108 = vmatpush1.bf16.msra.mxu0 %v14445_v61  ;;  %v6288_v0 = vld [vmem:[%s21281_s10 + $0xf00] sm:$0xff] }
0x15d0   :  { %9023 = vmatprep.subr.bf16.mxu1 %v14460_v28  ;;  %9109 = vmatprep.subr.bf16.mxu0 %v14462_v16  ;;  %v6296_v61 = vld [vmem:[%s21281_s10 + $0xf40] sm:$0xff]  ;;  %v6289_v28 = vld [vmem:[%s21281_s10 + $0xf08] sm:$0xff] }
0x15d1   :  { %v6297_v16 = vld [vmem:[%s21281_s10 + $0xf48] sm:$0xff]  ;;  %v14556_v18 = vcombine.high %v6288_v0, %v6296_v61  ;;  %v14555_v48 = vcombine.low %v6288_v0, %v6296_v61 }
0x15d2   :  { %v14558_v35 = vcombine.high %v6289_v28, %v6297_v16  ;;  %v14557_v46 = vcombine.low %v6289_v28, %v6297_v16 }
0x15d3   :  { %9024 = vmatpush1.bf16.msra.mxu1 %v14459_v20  ;;  %9110 = vmatpush1.bf16.msra.mxu0 %v14461_v32  ;;  %v6304_v20 = vld [vmem:[%s21281_s10 + $0xf80] sm:$0xff] }
0x15d4   :  { %9025 = vmatprep.subr.bf16.mxu1 %v14476_v27  ;;  %9111 = vmatprep.subr.bf16.mxu0 %v14478_v6  ;;  %v6312_v32 = vld [vmem:[%s21281_s10 + $0xfc0] sm:$0xff]  ;;  %v6305_v27 = vld [vmem:[%s21281_s10 + $0xf88] sm:$0xff] }
0x15d5   :  { %v6313_v6 = vld [vmem:[%s21281_s10 + $0xfc8] sm:$0xff]  ;;  %v14572_v34 = vcombine.high %v6304_v20, %v6312_v32  ;;  %v14571_v2 = vcombine.low %v6304_v20, %v6312_v32 }
0x15d6   :  { %v14574_v54 = vcombine.high %v6305_v27, %v6313_v6  ;;  %v14573_v45 = vcombine.low %v6305_v27, %v6313_v6 }
0x15d7   :  { %9026 = vmatpush1.bf16.msra.mxu1 %v14475_v50  ;;  %9112 = vmatpush1.bf16.msra.mxu0 %v14477_v8  ;;  %v5810_v50 = vld [vmem:[%s21281_s10 + $0x10] sm:$0xff] }
0x15d8   :  { %9027 = vmatprep.subr.bf16.mxu1 %v14492_v59  ;;  %9113 = vmatprep.subr.bf16.mxu0 %v14494_v21  ;;  %v5818_v8 = vld [vmem:[%s21281_s10 + $0x50] sm:$0xff]  ;;  %v5811_v59 = vld [vmem:[%s21281_s10 + $0x18] sm:$0xff] }
0x15d9   :  { %v5819_v21 = vld [vmem:[%s21281_s10 + $0x58] sm:$0xff]  ;;  %v14080_v52 = vcombine.high %v5810_v50, %v5818_v8  ;;  %v14079_v1 = vcombine.low %v5810_v50, %v5818_v8 }
0x15da   :  { %v14082_v3 = vcombine.high %v5811_v59, %v5819_v21  ;;  %v14081_v23 = vcombine.low %v5811_v59, %v5819_v21 }
0x15db   :  { %9028 = vmatpush1.bf16.msra.mxu1 %v14491_v33  ;;  %9114 = vmatpush1.bf16.msra.mxu0 %v14493_v39  ;;  %v5826_v33 = vld [vmem:[%s21281_s10 + $0x90] sm:$0xff] }
0x15dc   :  { %9029 = vmatprep.subr.bf16.mxu1 %v14508_v5  ;;  %9115 = vmatprep.subr.bf16.mxu0 %v14510_v15  ;;  %v5834_v39 = vld [vmem:[%s21281_s10 + $0xd0] sm:$0xff]  ;;  %v5827_v5 = vld [vmem:[%s21281_s10 + $0x98] sm:$0xff] }
0x15dd   :  { %v5835_v15 = vld [vmem:[%s21281_s10 + $0xd8] sm:$0xff]  ;;  %v14096_v55 = vcombine.high %v5826_v33, %v5834_v39  ;;  %v14095_v56 = vcombine.low %v5826_v33, %v5834_v39 }
0x15de   :  { %v14098_v30 = vcombine.high %v5827_v5, %v5835_v15  ;;  %v14097_v9 = vcombine.low %v5827_v5, %v5835_v15 }
0x15df   :  { %9030 = vmatpush1.bf16.msra.mxu1 %v14507_v19  ;;  %9116 = vmatpush1.bf16.msra.mxu0 %v14509_v43  ;;  %v5842_v19 = vld [vmem:[%s21281_s10 + $0x110] sm:$0xff] }
0x15e0   :  { %9031 = vmatprep.subr.bf16.mxu1 %v14524_v26  ;;  %9117 = vmatprep.subr.bf16.mxu0 %v14526_v42  ;;  %v5850_v43 = vld [vmem:[%s21281_s10 + $0x150] sm:$0xff]  ;;  %v5843_v26 = vld [vmem:[%s21281_s10 + $0x118] sm:$0xff] }
0x15e1   :  { %v5851_v42 = vld [vmem:[%s21281_s10 + $0x158] sm:$0xff]  ;;  %v14112_v49 = vcombine.high %v5842_v19, %v5850_v43  ;;  %v14111_v0 = vcombine.low %v5842_v19, %v5850_v43 }
0x15e2   :  { %v14114_v47 = vcombine.high %v5843_v26, %v5851_v42  ;;  %v14113_v61 = vcombine.low %v5843_v26, %v5851_v42 }
0x15e3   :  { %9032 = vmatpush1.bf16.msra.mxu1 %v14523_v31  ;;  %9118 = vmatpush1.bf16.msra.mxu0 %v14525_v14  ;;  %v5858_v31 = vld [vmem:[%s21281_s10 + $0x190] sm:$0xff] }
0x15e4   :  { %9033 = vmatprep.subr.bf16.mxu1 %v14540_v58  ;;  %9119 = vmatprep.subr.bf16.mxu0 %v14542_v13  ;;  %v5866_v14 = vld [vmem:[%s21281_s10 + $0x1d0] sm:$0xff]  ;;  %v5859_v58 = vld [vmem:[%s21281_s10 + $0x198] sm:$0xff] }
0x15e5   :  { %v5867_v13 = vld [vmem:[%s21281_s10 + $0x1d8] sm:$0xff]  ;;  %v14128_v28 = vcombine.high %v5858_v31, %v5866_v14  ;;  %v14127_v20 = vcombine.low %v5858_v31, %v5866_v14 }
0x15e6   :  { %v14130_v16 = vcombine.high %v5859_v58, %v5867_v13  ;;  %v14129_v32 = vcombine.low %v5859_v58, %v5867_v13 }
0x15e7   :  { %9034 = vmatpush1.bf16.msra.mxu1 %v14539_v53  ;;  %9120 = vmatpush1.bf16.msra.mxu0 %v14541_v11  ;;  %v5874_v53 = vld [vmem:[%s21281_s10 + $0x210] sm:$0xff] }
0x15e8   :  { %9035 = vmatprep.subr.bf16.mxu1 %v14556_v18  ;;  %9121 = vmatprep.subr.bf16.mxu0 %v14558_v35  ;;  %v5882_v11 = vld [vmem:[%s21281_s10 + $0x250] sm:$0xff]  ;;  %v5875_v18 = vld [vmem:[%s21281_s10 + $0x218] sm:$0xff] }
0x15e9   :  { %v5883_v35 = vld [vmem:[%s21281_s10 + $0x258] sm:$0xff]  ;;  %v14144_v27 = vcombine.high %v5874_v53, %v5882_v11  ;;  %v14143_v50 = vcombine.low %v5874_v53, %v5882_v11 }
0x15ea   :  { %v14146_v6 = vcombine.high %v5875_v18, %v5883_v35  ;;  %v14145_v8 = vcombine.low %v5875_v18, %v5883_v35 }
0x15eb   :  { %9036 = vmatpush1.bf16.msra.mxu1 %v14555_v48  ;;  %9122 = vmatpush1.bf16.msra.mxu0 %v14557_v46  ;;  %v5890_v48 = vld [vmem:[%s21281_s10 + $0x290] sm:$0xff] }
0x15ec   :  { %9037 = vmatprep.subr.bf16.mxu1 %v14572_v34  ;;  %9123 = vmatprep.subr.bf16.mxu0 %v14574_v54  ;;  %v5898_v46 = vld [vmem:[%s21281_s10 + $0x2d0] sm:$0xff]  ;;  %v5891_v34 = vld [vmem:[%s21281_s10 + $0x298] sm:$0xff] }
0x15ed   :  { %v5899_v54 = vld [vmem:[%s21281_s10 + $0x2d8] sm:$0xff]  ;;  %v14160_v59 = vcombine.high %v5890_v48, %v5898_v46  ;;  %v14159_v33 = vcombine.low %v5890_v48, %v5898_v46 }
0x15ee   :  { %v14162_v21 = vcombine.high %v5891_v34, %v5899_v54  ;;  %v14161_v39 = vcombine.low %v5891_v34, %v5899_v54 }
0x15ef   :  { %9038 = vmatpush1.bf16.msra.mxu1 %v14571_v2  ;;  %9124 = vmatpush1.bf16.msra.mxu0 %v14573_v45  ;;  %v5906_v2 = vld [vmem:[%s21281_s10 + $0x310] sm:$0xff] }
0x15f0   :  { %9136 = vmatprep.subr.bf16.mxu1 %v14080_v52  ;;  %9222 = vmatprep.subr.bf16.mxu0 %v14082_v3  ;;  %v5914_v45 = vld [vmem:[%s21281_s10 + $0x350] sm:$0xff]  ;;  %v5907_v52 = vld [vmem:[%s21281_s10 + $0x318] sm:$0xff] }
0x15f1   :  { %v5915_v3 = vld [vmem:[%s21281_s10 + $0x358] sm:$0xff]  ;;  %v14176_v5 = vcombine.high %v5906_v2, %v5914_v45  ;;  %v14175_v19 = vcombine.low %v5906_v2, %v5914_v45 }
0x15f2   :  { %9040 = vmatmul.mubr.bf16.vlgmr.msra.gmra.mrb[32].mxu1 %v19779_v22  ;;  %9126 = vmatmul.mubr.bf16.vlgmr.msra.gmra.mrb[32].mxu0 %v19779_v22  ;;  %v14178_v15 = vcombine.high %v5907_v52, %v5915_v3  ;;  %v14177_v43 = vcombine.low %v5907_v52, %v5915_v3 }
0x15f3   :  { %9137 = vmatpush1.bf16.msra.mxu1 %v14079_v1  ;;  %9168 = vmatprep.mubr.bf16.mxu1 %v19772_v24  ;;  %v5922_v1 = vld [vmem:[%s21281_s10 + $0x390] sm:$0xff] }
0x15f4   :  { %9223 = vmatpush1.bf16.msra.mxu0 %v14081_v23  ;;  %9254 = vmatprep.mubr.bf16.mxu0 %v19772_v24  ;;  %v5930_v23 = vld [vmem:[%s21281_s10 + $0x3d0] sm:$0xff] }
0x15f5   :  { %9138 = vmatprep.subr.bf16.mxu1 %v14096_v55  ;;  %9224 = vmatprep.subr.bf16.mxu0 %v14098_v30  ;;  %v5923_v55 = vld [vmem:[%s21281_s10 + $0x398] sm:$0xff]  ;;  %v14192_v26 = vcombine.high %v5922_v1, %v5930_v23  ;;  %v14191_v31 = vcombine.low %v5922_v1, %v5930_v23 }
0x15f6   :  { %v5931_v30 = vld [vmem:[%s21281_s10 + $0x3d8] sm:$0xff] }
0x15f7   :  { %9139 = vmatpush1.bf16.msra.mxu1 %v14095_v56  ;;  %v14194_v42 = vcombine.high %v5923_v55, %v5931_v30  ;;  %v5938_v56 = vld [vmem:[%s21281_s10 + $0x410] sm:$0xff]  ;;  %v14193_v14 = vcombine.low %v5923_v55, %v5931_v30 }
0x15f8   :  { %9225 = vmatpush1.bf16.msra.mxu0 %v14097_v9  ;;  %9140 = vmatprep.subr.bf16.mxu1 %v14112_v49  ;;  %v5946_v9 = vld [vmem:[%s21281_s10 + $0x450] sm:$0xff]  ;;  %v5939_v49 = vld [vmem:[%s21281_s10 + $0x418] sm:$0xff] }
0x15f9   :  { %9226 = vmatprep.subr.bf16.mxu0 %v14114_v47  ;;  %v5947_v47 = vld [vmem:[%s21281_s10 + $0x458] sm:$0xff]  ;;  %v14208_v58 = vcombine.high %v5938_v56, %v5946_v9  ;;  %v14207_v53 = vcombine.low %v5938_v56, %v5946_v9 }
0x15fa   :  { %v14210_v13 = vcombine.high %v5939_v49, %v5947_v47  ;;  %v14209_v11 = vcombine.low %v5939_v49, %v5947_v47 }
0x15fb   :  { %9141 = vmatpush1.bf16.msra.mxu1 %v14111_v0  ;;  %v5954_v0 = vld [vmem:[%s21281_s10 + $0x490] sm:$0xff] }
0x15fc   :  { %9227 = vmatpush1.bf16.msra.mxu0 %v14113_v61  ;;  %9142 = vmatprep.subr.bf16.mxu1 %v14128_v28  ;;  %v5962_v61 = vld [vmem:[%s21281_s10 + $0x4d0] sm:$0xff]  ;;  %v5955_v28 = vld [vmem:[%s21281_s10 + $0x498] sm:$0xff] }
0x15fd   :  { %9228 = vmatprep.subr.bf16.mxu0 %v14130_v16  ;;  %v5963_v16 = vld [vmem:[%s21281_s10 + $0x4d8] sm:$0xff]  ;;  %v14224_v18 = vcombine.high %v5954_v0, %v5962_v61  ;;  %v14223_v48 = vcombine.low %v5954_v0, %v5962_v61 }
0x15fe   :  { %v14226_v35 = vcombine.high %v5955_v28, %v5963_v16  ;;  %v14225_v46 = vcombine.low %v5955_v28, %v5963_v16 }
0x15ff   :  { %9143 = vmatpush1.bf16.msra.mxu1 %v14127_v20  ;;  %v5970_v20 = vld [vmem:[%s21281_s10 + $0x510] sm:$0xff] }
0x1600   :  { %9229 = vmatpush1.bf16.msra.mxu0 %v14129_v32  ;;  %9144 = vmatprep.subr.bf16.mxu1 %v14144_v27  ;;  %v5978_v32 = vld [vmem:[%s21281_s10 + $0x550] sm:$0xff]  ;;  %v5971_v27 = vld [vmem:[%s21281_s10 + $0x518] sm:$0xff] }
0x1601   :  { %9230 = vmatprep.subr.bf16.mxu0 %v14146_v6  ;;  %v5979_v6 = vld [vmem:[%s21281_s10 + $0x558] sm:$0xff]  ;;  %v14240_v34 = vcombine.high %v5970_v20, %v5978_v32  ;;  %v14239_v2 = vcombine.low %v5970_v20, %v5978_v32 }
0x1602   :  { %v14242_v54 = vcombine.high %v5971_v27, %v5979_v6  ;;  %v14241_v45 = vcombine.low %v5971_v27, %v5979_v6 }
0x1603   :  { %9145 = vmatpush1.bf16.msra.mxu1 %v14143_v50  ;;  %v5986_v50 = vld [vmem:[%s21281_s10 + $0x590] sm:$0xff] }
0x1604   :  { %9231 = vmatpush1.bf16.msra.mxu0 %v14145_v8  ;;  %9146 = vmatprep.subr.bf16.mxu1 %v14160_v59  ;;  %v5994_v8 = vld [vmem:[%s21281_s10 + $0x5d0] sm:$0xff]  ;;  %v5987_v59 = vld [vmem:[%s21281_s10 + $0x598] sm:$0xff] }
0x1605   :  { %9232 = vmatprep.subr.bf16.mxu0 %v14162_v21  ;;  %v5995_v21 = vld [vmem:[%s21281_s10 + $0x5d8] sm:$0xff]  ;;  %v14256_v52 = vcombine.high %v5986_v50, %v5994_v8  ;;  %v14255_v1 = vcombine.low %v5986_v50, %v5994_v8 }
0x1606   :  { %v14258_v3 = vcombine.high %v5987_v59, %v5995_v21  ;;  %v14257_v23 = vcombine.low %v5987_v59, %v5995_v21 }
0x1607   :  { %9147 = vmatpush1.bf16.msra.mxu1 %v14159_v33  ;;  %v6002_v33 = vld [vmem:[%s21281_s10 + $0x610] sm:$0xff] }
0x1608   :  { %9233 = vmatpush1.bf16.msra.mxu0 %v14161_v39  ;;  %9148 = vmatprep.subr.bf16.mxu1 %v14176_v5  ;;  %v6010_v39 = vld [vmem:[%s21281_s10 + $0x650] sm:$0xff]  ;;  %v6003_v5 = vld [vmem:[%s21281_s10 + $0x618] sm:$0xff] }
0x1609   :  { %9234 = vmatprep.subr.bf16.mxu0 %v14178_v15  ;;  %v6011_v15 = vld [vmem:[%s21281_s10 + $0x658] sm:$0xff]  ;;  %v14272_v55 = vcombine.high %v6002_v33, %v6010_v39  ;;  %v14271_v56 = vcombine.low %v6002_v33, %v6010_v39 }
0x160a   :  { %v14274_v30 = vcombine.high %v6003_v5, %v6011_v15  ;;  %v14273_v9 = vcombine.low %v6003_v5, %v6011_v15  ;;  %v6091_v33 = vld [vmem:[%s21281_s10 + $0x8d8] sm:$0xff]  ;;  %v6098_v15 = vld [vmem:[%s21281_s10 + $0x910] sm:$0xff] }
0x160b   :  { %9149 = vmatpush1.bf16.msra.mxu1 %v14175_v19  ;;  %v6018_v19 = vld [vmem:[%s21281_s10 + $0x690] sm:$0xff] }
0x160c   :  { %9235 = vmatpush1.bf16.msra.mxu0 %v14177_v43  ;;  %9150 = vmatprep.subr.bf16.mxu1 %v14192_v26  ;;  %v6026_v43 = vld [vmem:[%s21281_s10 + $0x6d0] sm:$0xff]  ;;  %v6019_v26 = vld [vmem:[%s21281_s10 + $0x698] sm:$0xff] }
0x160d   :  { %9236 = vmatprep.subr.bf16.mxu0 %v14194_v42  ;;  %v6027_v42 = vld [vmem:[%s21281_s10 + $0x6d8] sm:$0xff]  ;;  %v14288_v49 = vcombine.high %v6018_v19, %v6026_v43  ;;  %v14287_v0 = vcombine.low %v6018_v19, %v6026_v43 }
0x160e   :  { %v14290_v47 = vcombine.high %v6019_v26, %v6027_v42  ;;  %v14289_v61 = vcombine.low %v6019_v26, %v6027_v42 }
0x160f   :  { %9151 = vmatpush1.bf16.msra.mxu1 %v14191_v31  ;;  %v6034_v31 = vld [vmem:[%s21281_s10 + $0x710] sm:$0xff] }
0x1610   :  { %9237 = vmatpush1.bf16.msra.mxu0 %v14193_v14  ;;  %9152 = vmatprep.subr.bf16.mxu1 %v14208_v58  ;;  %v6042_v14 = vld [vmem:[%s21281_s10 + $0x750] sm:$0xff]  ;;  %v6035_v58 = vld [vmem:[%s21281_s10 + $0x718] sm:$0xff] }
0x1611   :  { %9238 = vmatprep.subr.bf16.mxu0 %v14210_v13  ;;  %v6043_v13 = vld [vmem:[%s21281_s10 + $0x758] sm:$0xff]  ;;  %v14304_v28 = vcombine.high %v6034_v31, %v6042_v14  ;;  %v14303_v20 = vcombine.low %v6034_v31, %v6042_v14 }
0x1612   :  { %v14306_v16 = vcombine.high %v6035_v58, %v6043_v13  ;;  %v14305_v32 = vcombine.low %v6035_v58, %v6043_v13 }
0x1613   :  { %9153 = vmatpush1.bf16.msra.mxu1 %v14207_v53  ;;  %v6050_v53 = vld [vmem:[%s21281_s10 + $0x790] sm:$0xff] }
0x1614   :  { %9239 = vmatpush1.bf16.msra.mxu0 %v14209_v11  ;;  %9154 = vmatprep.subr.bf16.mxu1 %v14224_v18  ;;  %v6058_v11 = vld [vmem:[%s21281_s10 + $0x7d0] sm:$0xff]  ;;  %v6051_v18 = vld [vmem:[%s21281_s10 + $0x798] sm:$0xff] }
0x1615   :  { %9240 = vmatprep.subr.bf16.mxu0 %v14226_v35  ;;  %v6059_v35 = vld [vmem:[%s21281_s10 + $0x7d8] sm:$0xff]  ;;  %v14320_v27 = vcombine.high %v6050_v53, %v6058_v11  ;;  %v14319_v50 = vcombine.low %v6050_v53, %v6058_v11 }
0x1616   :  { %v14322_v6 = vcombine.high %v6051_v18, %v6059_v35  ;;  %v14321_v8 = vcombine.low %v6051_v18, %v6059_v35 }
0x1617   :  { %9155 = vmatpush1.bf16.msra.mxu1 %v14223_v48  ;;  %v6066_v48 = vld [vmem:[%s21281_s10 + $0x810] sm:$0xff] }
0x1618   :  { %9241 = vmatpush1.bf16.msra.mxu0 %v14225_v46  ;;  %9156 = vmatprep.subr.bf16.mxu1 %v14240_v34  ;;  %v6074_v46 = vld [vmem:[%s21281_s10 + $0x850] sm:$0xff]  ;;  %v6067_v34 = vld [vmem:[%s21281_s10 + $0x818] sm:$0xff] }
0x1619   :  { %9242 = vmatprep.subr.bf16.mxu0 %v14242_v54  ;;  %v6075_v54 = vld [vmem:[%s21281_s10 + $0x858] sm:$0xff]  ;;  %v14336_v59 = vcombine.high %v6066_v48, %v6074_v46 }
0x161a   :  { %v14338_v21 = vcombine.high %v6067_v34, %v6075_v54  ;;  %v14337_v39 = vcombine.low %v6067_v34, %v6075_v54 }
0x161b   :  { %9157 = vmatpush1.bf16.msra.mxu1 %v14239_v2  ;;  %v6082_v2 = vld [vmem:[%s21281_s10 + $0x890] sm:$0xff] }
0x161c   :  { %9243 = vmatpush1.bf16.msra.mxu0 %v14241_v45  ;;  %9158 = vmatprep.subr.bf16.mxu1 %v14256_v52  ;;  %v6090_v45 = vld [vmem:[%s21281_s10 + $0x8d0] sm:$0xff]  ;;  %v14335_v52 = vcombine.low %v6066_v48, %v6074_v46 }
0x161d   :  { %9244 = vmatprep.subr.bf16.mxu0 %v14258_v3  ;;  %v6083_v3 = vld [vmem:[%s21281_s10 + $0x898] sm:$0xff]  ;;  %v14352_v5 = vcombine.high %v6082_v2, %v6090_v45  ;;  %v14351_v19 = vcombine.low %v6082_v2, %v6090_v45 }
0x161e   :  { %v14353_v43 = vcombine.low %v6083_v3, %v6091_v33 }
0x161f   :  { %9159 = vmatpush1.bf16.msra.mxu1 %v14255_v1  ;;  %v6106_v1 = vld [vmem:[%s21281_s10 + $0x950] sm:$0xff] }
0x1620   :  { %9245 = vmatpush1.bf16.msra.mxu0 %v14257_v23  ;;  %9160 = vmatprep.subr.bf16.mxu1 %v14272_v55  ;;  %v14354_v23 = vcombine.high %v6083_v3, %v6091_v33  ;;  %v6099_v55 = vld [vmem:[%s21281_s10 + $0x918] sm:$0xff]  ;;  %v14368_v26 = vcombine.high %v6098_v15, %v6106_v1  ;;  %v14367_v31 = vcombine.low %v6098_v15, %v6106_v1  ;;  %v6178_v33 = vld [vmem:[%s21281_s10 + $0xb90] sm:$0xff] }
0x1621   :  { %9246 = vmatprep.subr.bf16.mxu0 %v14274_v30  ;;  %v6107_v30 = vld [vmem:[%s21281_s10 + $0x958] sm:$0xff] }
0x1622   :  { %v14370_v42 = vcombine.high %v6099_v55, %v6107_v30  ;;  %v14369_v14 = vcombine.low %v6099_v55, %v6107_v30  ;;  %v6187_v15 = vld [vmem:[%s21281_s10 + $0xbd8] sm:$0xff] }
0x1623   :  { %9161 = vmatpush1.bf16.msra.mxu1 %v14271_v56  ;;  %v6114_v56 = vld [vmem:[%s21281_s10 + $0x990] sm:$0xff] }
0x1624   :  { %9247 = vmatpush1.bf16.msra.mxu0 %v14273_v9  ;;  %9162 = vmatprep.subr.bf16.mxu1 %v14288_v49  ;;  %v6122_v9 = vld [vmem:[%s21281_s10 + $0x9d0] sm:$0xff]  ;;  %v6115_v49 = vld [vmem:[%s21281_s10 + $0x998] sm:$0xff] }
0x1625   :  { %9248 = vmatprep.subr.bf16.mxu0 %v14290_v47  ;;  %v6123_v47 = vld [vmem:[%s21281_s10 + $0x9d8] sm:$0xff]  ;;  %v14384_v58 = vcombine.high %v6114_v56, %v6122_v9  ;;  %v14383_v53 = vcombine.low %v6114_v56, %v6122_v9 }
0x1626   :  { %v14386_v13 = vcombine.high %v6115_v49, %v6123_v47  ;;  %v14385_v11 = vcombine.low %v6115_v49, %v6123_v47 }
0x1627   :  { %9163 = vmatpush1.bf16.msra.mxu1 %v14287_v0  ;;  %v6130_v0 = vld [vmem:[%s21281_s10 + $0xa10] sm:$0xff] }
0x1628   :  { %9249 = vmatpush1.bf16.msra.mxu0 %v14289_v61  ;;  %9164 = vmatprep.subr.bf16.mxu1 %v14304_v28  ;;  %v6138_v61 = vld [vmem:[%s21281_s10 + $0xa50] sm:$0xff]  ;;  %v6131_v28 = vld [vmem:[%s21281_s10 + $0xa18] sm:$0xff] }
0x1629   :  { %9250 = vmatprep.subr.bf16.mxu0 %v14306_v16  ;;  %v6139_v16 = vld [vmem:[%s21281_s10 + $0xa58] sm:$0xff]  ;;  %v14400_v18 = vcombine.high %v6130_v0, %v6138_v61  ;;  %v14399_v48 = vcombine.low %v6130_v0, %v6138_v61 }
0x162a   :  { %v14402_v35 = vcombine.high %v6131_v28, %v6139_v16  ;;  %v14401_v46 = vcombine.low %v6131_v28, %v6139_v16 }
0x162b   :  { %9165 = vmatpush1.bf16.msra.mxu1 %v14303_v20  ;;  %v6146_v20 = vld [vmem:[%s21281_s10 + $0xa90] sm:$0xff] }
0x162c   :  { %9251 = vmatpush1.bf16.msra.mxu0 %v14305_v32  ;;  %9166 = vmatprep.subr.bf16.mxu1 %v14320_v27  ;;  %v6154_v32 = vld [vmem:[%s21281_s10 + $0xad0] sm:$0xff]  ;;  %v6147_v27 = vld [vmem:[%s21281_s10 + $0xa98] sm:$0xff] }
0x162d   :  { %9252 = vmatprep.subr.bf16.mxu0 %v14322_v6  ;;  %v6155_v6 = vld [vmem:[%s21281_s10 + $0xad8] sm:$0xff]  ;;  %v14416_v34 = vcombine.high %v6146_v20, %v6154_v32  ;;  %v14415_v2 = vcombine.low %v6146_v20, %v6154_v32 }
0x162e   :  { %v14418_v54 = vcombine.high %v6147_v27, %v6155_v6  ;;  %v14417_v45 = vcombine.low %v6147_v27, %v6155_v6 }
0x162f   :  { %9167 = vmatpush1.bf16.msra.mxu1 %v14319_v50  ;;  %v6162_v50 = vld [vmem:[%s21281_s10 + $0xb10] sm:$0xff] }
0x1630   :  { %9253 = vmatpush1.bf16.msra.mxu0 %v14321_v8  ;;  %9179 = vmatprep.subr.bf16.mxu1 %v14336_v59  ;;  %v6170_v8 = vld [vmem:[%s21281_s10 + $0xb50] sm:$0xff]  ;;  %v6163_v59 = vld [vmem:[%s21281_s10 + $0xb18] sm:$0xff] }
0x1631   :  { %9265 = vmatprep.subr.bf16.mxu0 %v14338_v21  ;;  %v6171_v21 = vld [vmem:[%s21281_s10 + $0xb58] sm:$0xff]  ;;  %v14431_v1 = vcombine.low %v6162_v50, %v6170_v8 }
0x1632   :  { %9169 = vmatmul.mubr.bf16.vlgmr.msra.gmra.mrb[36].mxu1 %v19774_v25  ;;  %v14434_v3 = vcombine.high %v6163_v59, %v6171_v21 }
0x1633   :  { %9255 = vmatmul.mubr.bf16.vlgmr.msra.gmra.mrb[36].mxu0 %v19774_v25  ;;  %9180 = vmatpush1.bf16.msra.mxu1 %v14335_v52  ;;  %v14432_v52 = vcombine.high %v6162_v50, %v6170_v8 }
0x1634   :  { %9211 = vmatprep.mubr.bf16.mxu1 %v19794_v44  ;;  %9266 = vmatpush1.bf16.msra.mxu0 %v14337_v39  ;;  %v6186_v39 = vld [vmem:[%s21281_s10 + $0xbd0] sm:$0xff] }
0x1635   :  { %9297 = vmatprep.mubr.bf16.mxu0 %v19794_v44  ;;  %9181 = vmatprep.subr.bf16.mxu1 %v14352_v5  ;;  %v6179_v5 = vld [vmem:[%s21281_s10 + $0xb98] sm:$0xff]  ;;  %v14448_v55 = vcombine.high %v6178_v33, %v6186_v39  ;;  %v14447_v56 = vcombine.low %v6178_v33, %v6186_v39 }
0x1636   :  { %9267 = vmatprep.subr.bf16.mxu0 %v14354_v23  ;;  %v14433_v23 = vcombine.low %v6163_v59, %v6171_v21  ;;  %v14450_v30 = vcombine.high %v6179_v5, %v6187_v15  ;;  %v14449_v9 = vcombine.low %v6179_v5, %v6187_v15 }
0x1637   :  { %9182 = vmatpush1.bf16.msra.mxu1 %v14351_v19  ;;  %v6194_v19 = vld [vmem:[%s21281_s10 + $0xc10] sm:$0xff] }
0x1638   :  { %9268 = vmatpush1.bf16.msra.mxu0 %v14353_v43  ;;  %9183 = vmatprep.subr.bf16.mxu1 %v14368_v26  ;;  %v6202_v43 = vld [vmem:[%s21281_s10 + $0xc50] sm:$0xff]  ;;  %v6195_v26 = vld [vmem:[%s21281_s10 + $0xc18] sm:$0xff] }
0x1639   :  { %9269 = vmatprep.subr.bf16.mxu0 %v14370_v42  ;;  %v6203_v42 = vld [vmem:[%s21281_s10 + $0xc58] sm:$0xff]  ;;  %v14464_v49 = vcombine.high %v6194_v19, %v6202_v43  ;;  %v14463_v0 = vcombine.low %v6194_v19, %v6202_v43 }
0x163a   :  { %v14466_v47 = vcombine.high %v6195_v26, %v6203_v42  ;;  %v14465_v61 = vcombine.low %v6195_v26, %v6203_v42 }
0x163b   :  { %9184 = vmatpush1.bf16.msra.mxu1 %v14367_v31  ;;  %v6210_v31 = vld [vmem:[%s21281_s10 + $0xc90] sm:$0xff] }
0x163c   :  { %9270 = vmatpush1.bf16.msra.mxu0 %v14369_v14  ;;  %9185 = vmatprep.subr.bf16.mxu1 %v14384_v58  ;;  %v6218_v14 = vld [vmem:[%s21281_s10 + $0xcd0] sm:$0xff]  ;;  %v6211_v58 = vld [vmem:[%s21281_s10 + $0xc98] sm:$0xff] }
0x163d   :  { %9271 = vmatprep.subr.bf16.mxu0 %v14386_v13  ;;  %v6219_v13 = vld [vmem:[%s21281_s10 + $0xcd8] sm:$0xff]  ;;  %v14480_v28 = vcombine.high %v6210_v31, %v6218_v14  ;;  %v14479_v20 = vcombine.low %v6210_v31, %v6218_v14 }
0x163e   :  { %v14482_v16 = vcombine.high %v6211_v58, %v6219_v13  ;;  %v14481_v32 = vcombine.low %v6211_v58, %v6219_v13 }
0x163f   :  { %9186 = vmatpush1.bf16.msra.mxu1 %v14383_v53  ;;  %v6226_v53 = vld [vmem:[%s21281_s10 + $0xd10] sm:$0xff] }
0x1640   :  { %9272 = vmatpush1.bf16.msra.mxu0 %v14385_v11  ;;  %9187 = vmatprep.subr.bf16.mxu1 %v14400_v18  ;;  %v6234_v11 = vld [vmem:[%s21281_s10 + $0xd50] sm:$0xff]  ;;  %v6227_v18 = vld [vmem:[%s21281_s10 + $0xd18] sm:$0xff] }
0x1641   :  { %9273 = vmatprep.subr.bf16.mxu0 %v14402_v35  ;;  %v6235_v35 = vld [vmem:[%s21281_s10 + $0xd58] sm:$0xff]  ;;  %v14496_v27 = vcombine.high %v6226_v53, %v6234_v11  ;;  %v14495_v50 = vcombine.low %v6226_v53, %v6234_v11 }
0x1642   :  { %v14498_v6 = vcombine.high %v6227_v18, %v6235_v35  ;;  %v14497_v8 = vcombine.low %v6227_v18, %v6235_v35 }
0x1643   :  { %9188 = vmatpush1.bf16.msra.mxu1 %v14399_v48  ;;  %v6242_v48 = vld [vmem:[%s21281_s10 + $0xd90] sm:$0xff] }
0x1644   :  { %9274 = vmatpush1.bf16.msra.mxu0 %v14401_v46  ;;  %9189 = vmatprep.subr.bf16.mxu1 %v14416_v34  ;;  %v6250_v46 = vld [vmem:[%s21281_s10 + $0xdd0] sm:$0xff]  ;;  %v6243_v34 = vld [vmem:[%s21281_s10 + $0xd98] sm:$0xff] }
0x1645   :  { %9275 = vmatprep.subr.bf16.mxu0 %v14418_v54  ;;  %v6251_v54 = vld [vmem:[%s21281_s10 + $0xdd8] sm:$0xff]  ;;  %v14512_v59 = vcombine.high %v6242_v48, %v6250_v46  ;;  %v14511_v33 = vcombine.low %v6242_v48, %v6250_v46 }
0x1646   :  { %v14514_v21 = vcombine.high %v6243_v34, %v6251_v54  ;;  %v14513_v39 = vcombine.low %v6243_v34, %v6251_v54 }
0x1647   :  { %9190 = vmatpush1.bf16.msra.mxu1 %v14415_v2  ;;  %v6258_v2 = vld [vmem:[%s21281_s10 + $0xe10] sm:$0xff] }
0x1648   :  { %9276 = vmatpush1.bf16.msra.mxu0 %v14417_v45  ;;  %9191 = vmatprep.subr.bf16.mxu1 %v14432_v52  ;;  %v6266_v45 = vld [vmem:[%s21281_s10 + $0xe50] sm:$0xff]  ;;  %v6259_v52 = vld [vmem:[%s21281_s10 + $0xe18] sm:$0xff] }
0x1649   :  { %9277 = vmatprep.subr.bf16.mxu0 %v14434_v3  ;;  %v6267_v3 = vld [vmem:[%s21281_s10 + $0xe58] sm:$0xff]  ;;  %v14528_v5 = vcombine.high %v6258_v2, %v6266_v45  ;;  %v14527_v19 = vcombine.low %v6258_v2, %v6266_v45  ;;  %v5837_v2 = vld [vmem:[%s21281_s10 + $0xe8] sm:$0xff] }
0x164a   :  { %v14530_v15 = vcombine.high %v6259_v52, %v6267_v3  ;;  %v14529_v43 = vcombine.low %v6259_v52, %v6267_v3  ;;  %v5844_v3 = vld [vmem:[%s21281_s10 + $0x120] sm:$0xff] }
0x164b   :  { %9192 = vmatpush1.bf16.msra.mxu1 %v14431_v1  ;;  %v6274_v1 = vld [vmem:[%s21281_s10 + $0xe90] sm:$0xff] }
0x164c   :  { %9278 = vmatpush1.bf16.msra.mxu0 %v14433_v23  ;;  %9193 = vmatprep.subr.bf16.mxu1 %v14448_v55  ;;  %v6282_v23 = vld [vmem:[%s21281_s10 + $0xed0] sm:$0xff]  ;;  %v6275_v55 = vld [vmem:[%s21281_s10 + $0xe98] sm:$0xff] }
0x164d   :  { %9279 = vmatprep.subr.bf16.mxu0 %v14450_v30  ;;  %v6283_v30 = vld [vmem:[%s21281_s10 + $0xed8] sm:$0xff]  ;;  %v14544_v26 = vcombine.high %v6274_v1, %v6282_v23  ;;  %v14543_v31 = vcombine.low %v6274_v1, %v6282_v23 }
0x164e   :  { %v14546_v42 = vcombine.high %v6275_v55, %v6283_v30  ;;  %v14545_v14 = vcombine.low %v6275_v55, %v6283_v30 }
0x164f   :  { %9194 = vmatpush1.bf16.msra.mxu1 %v14447_v56  ;;  %v6290_v56 = vld [vmem:[%s21281_s10 + $0xf10] sm:$0xff] }
0x1650   :  { %9280 = vmatpush1.bf16.msra.mxu0 %v14449_v9  ;;  %9195 = vmatprep.subr.bf16.mxu1 %v14464_v49  ;;  %v6298_v9 = vld [vmem:[%s21281_s10 + $0xf50] sm:$0xff]  ;;  %v6291_v49 = vld [vmem:[%s21281_s10 + $0xf18] sm:$0xff] }
0x1651   :  { %9281 = vmatprep.subr.bf16.mxu0 %v14466_v47  ;;  %v6299_v47 = vld [vmem:[%s21281_s10 + $0xf58] sm:$0xff]  ;;  %v14560_v58 = vcombine.high %v6290_v56, %v6298_v9  ;;  %v14559_v53 = vcombine.low %v6290_v56, %v6298_v9 }
0x1652   :  { %v14562_v13 = vcombine.high %v6291_v49, %v6299_v47  ;;  %v14561_v11 = vcombine.low %v6291_v49, %v6299_v47 }
0x1653   :  { %9196 = vmatpush1.bf16.msra.mxu1 %v14463_v0  ;;  %v6306_v0 = vld [vmem:[%s21281_s10 + $0xf90] sm:$0xff] }
0x1654   :  { %9282 = vmatpush1.bf16.msra.mxu0 %v14465_v61  ;;  %9197 = vmatprep.subr.bf16.mxu1 %v14480_v28  ;;  %v6314_v61 = vld [vmem:[%s21281_s10 + $0xfd0] sm:$0xff]  ;;  %v6307_v28 = vld [vmem:[%s21281_s10 + $0xf98] sm:$0xff] }
0x1655   :  { %9283 = vmatprep.subr.bf16.mxu0 %v14482_v16  ;;  %v6315_v16 = vld [vmem:[%s21281_s10 + $0xfd8] sm:$0xff]  ;;  %v14576_v18 = vcombine.high %v6306_v0, %v6314_v61  ;;  %v14575_v48 = vcombine.low %v6306_v0, %v6314_v61 }
0x1656   :  { %v14578_v35 = vcombine.high %v6307_v28, %v6315_v16  ;;  %v14577_v46 = vcombine.low %v6307_v28, %v6315_v16 }
0x1657   :  { %9198 = vmatpush1.bf16.msra.mxu1 %v14479_v20  ;;  %v5812_v20 = vld [vmem:[%s21281_s10 + $0x20] sm:$0xff] }
0x1658   :  { %9284 = vmatpush1.bf16.msra.mxu0 %v14481_v32  ;;  %9199 = vmatprep.subr.bf16.mxu1 %v14496_v27  ;;  %v5820_v32 = vld [vmem:[%s21281_s10 + $0x60] sm:$0xff]  ;;  %v5813_v27 = vld [vmem:[%s21281_s10 + $0x28] sm:$0xff] }
0x1659   :  { %9285 = vmatprep.subr.bf16.mxu0 %v14498_v6  ;;  %v5821_v6 = vld [vmem:[%s21281_s10 + $0x68] sm:$0xff]  ;;  %v14084_v34 = vcombine.high %v5812_v20, %v5820_v32 }
0x165a   :  { %v14086_v54 = vcombine.high %v5813_v27, %v5821_v6  ;;  %v14085_v45 = vcombine.low %v5813_v27, %v5821_v6 }
0x165b   :  { %9200 = vmatpush1.bf16.msra.mxu1 %v14495_v50  ;;  %v5828_v50 = vld [vmem:[%s21281_s10 + $0xa0] sm:$0xff] }
0x165c   :  { %9286 = vmatpush1.bf16.msra.mxu0 %v14497_v8  ;;  %9201 = vmatprep.subr.bf16.mxu1 %v14512_v59  ;;  %v5836_v8 = vld [vmem:[%s21281_s10 + $0xe0] sm:$0xff]  ;;  %v14083_v59 = vcombine.low %v5812_v20, %v5820_v32 }
0x165d   :  { %9287 = vmatprep.subr.bf16.mxu0 %v14514_v21  ;;  %v5829_v21 = vld [vmem:[%s21281_s10 + $0xa8] sm:$0xff]  ;;  %v14100_v52 = vcombine.high %v5828_v50, %v5836_v8  ;;  %v14099_v1 = vcombine.low %v5828_v50, %v5836_v8 }
0x165e   :  { %v14101_v23 = vcombine.low %v5829_v21, %v5837_v2 }
0x165f   :  { %9202 = vmatpush1.bf16.msra.mxu1 %v14511_v33  ;;  %v5852_v33 = vld [vmem:[%s21281_s10 + $0x160] sm:$0xff] }
0x1660   :  { %9288 = vmatpush1.bf16.msra.mxu0 %v14513_v39  ;;  %9203 = vmatprep.subr.bf16.mxu1 %v14528_v5  ;;  %v14102_v39 = vcombine.high %v5829_v21, %v5837_v2  ;;  %v5845_v5 = vld [vmem:[%s21281_s10 + $0x128] sm:$0xff]  ;;  %v14116_v55 = vcombine.high %v5844_v3, %v5852_v33  ;;  %v14115_v56 = vcombine.low %v5844_v3, %v5852_v33  ;;  %v5924_v2 = vld [vmem:[%s21281_s10 + $0x3a0] sm:$0xff] }
0x1661   :  { %9289 = vmatprep.subr.bf16.mxu0 %v14530_v15  ;;  %v5853_v15 = vld [vmem:[%s21281_s10 + $0x168] sm:$0xff] }
0x1662   :  { %v14118_v30 = vcombine.high %v5845_v5, %v5853_v15  ;;  %v14117_v9 = vcombine.low %v5845_v5, %v5853_v15  ;;  %v5933_v3 = vld [vmem:[%s21281_s10 + $0x3e8] sm:$0xff] }
0x1663   :  { %9204 = vmatpush1.bf16.msra.mxu1 %v14527_v19  ;;  %v5860_v19 = vld [vmem:[%s21281_s10 + $0x1a0] sm:$0xff] }
0x1664   :  { %9290 = vmatpush1.bf16.msra.mxu0 %v14529_v43  ;;  %9205 = vmatprep.subr.bf16.mxu1 %v14544_v26  ;;  %v5868_v43 = vld [vmem:[%s21281_s10 + $0x1e0] sm:$0xff]  ;;  %v5861_v26 = vld [vmem:[%s21281_s10 + $0x1a8] sm:$0xff] }
0x1665   :  { %9291 = vmatprep.subr.bf16.mxu0 %v14546_v42  ;;  %v5869_v42 = vld [vmem:[%s21281_s10 + $0x1e8] sm:$0xff]  ;;  %v14132_v49 = vcombine.high %v5860_v19, %v5868_v43  ;;  %v14131_v0 = vcombine.low %v5860_v19, %v5868_v43 }
0x1666   :  { %v14134_v47 = vcombine.high %v5861_v26, %v5869_v42  ;;  %v14133_v61 = vcombine.low %v5861_v26, %v5869_v42 }
0x1667   :  { %9206 = vmatpush1.bf16.msra.mxu1 %v14543_v31  ;;  %v5876_v31 = vld [vmem:[%s21281_s10 + $0x220] sm:$0xff] }
0x1668   :  { %9292 = vmatpush1.bf16.msra.mxu0 %v14545_v14  ;;  %9207 = vmatprep.subr.bf16.mxu1 %v14560_v58  ;;  %v5884_v14 = vld [vmem:[%s21281_s10 + $0x260] sm:$0xff]  ;;  %v5877_v58 = vld [vmem:[%s21281_s10 + $0x228] sm:$0xff] }
0x1669   :  { %9293 = vmatprep.subr.bf16.mxu0 %v14562_v13  ;;  %v5885_v13 = vld [vmem:[%s21281_s10 + $0x268] sm:$0xff]  ;;  %v14148_v28 = vcombine.high %v5876_v31, %v5884_v14  ;;  %v14147_v20 = vcombine.low %v5876_v31, %v5884_v14 }
0x166a   :  { %v14150_v16 = vcombine.high %v5877_v58, %v5885_v13  ;;  %v14149_v32 = vcombine.low %v5877_v58, %v5885_v13 }
0x166b   :  { %9208 = vmatpush1.bf16.msra.mxu1 %v14559_v53  ;;  %v5892_v53 = vld [vmem:[%s21281_s10 + $0x2a0] sm:$0xff] }
0x166c   :  { %9294 = vmatpush1.bf16.msra.mxu0 %v14561_v11  ;;  %9209 = vmatprep.subr.bf16.mxu1 %v14576_v18  ;;  %v5900_v11 = vld [vmem:[%s21281_s10 + $0x2e0] sm:$0xff]  ;;  %v5893_v18 = vld [vmem:[%s21281_s10 + $0x2a8] sm:$0xff] }
0x166d   :  { %9295 = vmatprep.subr.bf16.mxu0 %v14578_v35  ;;  %v5901_v35 = vld [vmem:[%s21281_s10 + $0x2e8] sm:$0xff]  ;;  %v14164_v27 = vcombine.high %v5892_v53, %v5900_v11  ;;  %v14163_v50 = vcombine.low %v5892_v53, %v5900_v11 }
0x166e   :  { %v14166_v6 = vcombine.high %v5893_v18, %v5901_v35  ;;  %v14165_v8 = vcombine.low %v5893_v18, %v5901_v35 }
0x166f   :  { %9210 = vmatpush1.bf16.msra.mxu1 %v14575_v48  ;;  %v5908_v48 = vld [vmem:[%s21281_s10 + $0x320] sm:$0xff] }
0x1670   :  { %9296 = vmatpush1.bf16.msra.mxu0 %v14577_v46  ;;  %9308 = vmatprep.subr.bf16.mxu1 %v14084_v34  ;;  %v5916_v46 = vld [vmem:[%s21281_s10 + $0x360] sm:$0xff]  ;;  %v5909_v34 = vld [vmem:[%s21281_s10 + $0x328] sm:$0xff] }
0x1671   :  { %9394 = vmatprep.subr.bf16.mxu0 %v14086_v54  ;;  %v5917_v54 = vld [vmem:[%s21281_s10 + $0x368] sm:$0xff]  ;;  %v14179_v33 = vcombine.low %v5908_v48, %v5916_v46 }
0x1672   :  { %9212 = vmatmul.mubr.bf16.vlgmr.msra.gmra.mrb[36].mxu1 %v19779_v22  ;;  %v14182_v21 = vcombine.high %v5909_v34, %v5917_v54 }
0x1673   :  { %9298 = vmatmul.mubr.bf16.vlgmr.msra.gmra.mrb[36].mxu0 %v19779_v22  ;;  %9309 = vmatpush1.bf16.msra.mxu1 %v14083_v59  ;;  %v14180_v59 = vcombine.high %v5908_v48, %v5916_v46 }
0x1674   :  { %9340 = vmatprep.mubr.bf16.mxu1 %v19772_v24  ;;  %9395 = vmatpush1.bf16.msra.mxu0 %v14085_v45  ;;  %v5932_v45 = vld [vmem:[%s21281_s10 + $0x3e0] sm:$0xff] }
0x1675   :  { %9426 = vmatprep.mubr.bf16.mxu0 %v19772_v24  ;;  %9310 = vmatprep.subr.bf16.mxu1 %v14100_v52  ;;  %v5925_v52 = vld [vmem:[%s21281_s10 + $0x3a8] sm:$0xff]  ;;  %v14196_v5 = vcombine.high %v5924_v2, %v5932_v45  ;;  %v14195_v19 = vcombine.low %v5924_v2, %v5932_v45 }
0x1676   :  { %9396 = vmatprep.subr.bf16.mxu0 %v14102_v39  ;;  %v14181_v39 = vcombine.low %v5909_v34, %v5917_v54  ;;  %v14198_v15 = vcombine.high %v5925_v52, %v5933_v3  ;;  %v14197_v43 = vcombine.low %v5925_v52, %v5933_v3 }
0x1677   :  { %9311 = vmatpush1.bf16.msra.mxu1 %v14099_v1  ;;  %v5940_v1 = vld [vmem:[%s21281_s10 + $0x420] sm:$0xff] }
0x1678   :  { %9397 = vmatpush1.bf16.msra.mxu0 %v14101_v23  ;;  %9312 = vmatprep.subr.bf16.mxu1 %v14116_v55  ;;  %v5948_v23 = vld [vmem:[%s21281_s10 + $0x460] sm:$0xff]  ;;  %v5941_v55 = vld [vmem:[%s21281_s10 + $0x428] sm:$0xff] }
0x1679   :  { %9398 = vmatprep.subr.bf16.mxu0 %v14118_v30  ;;  %v5949_v30 = vld [vmem:[%s21281_s10 + $0x468] sm:$0xff]  ;;  %v14212_v26 = vcombine.high %v5940_v1, %v5948_v23  ;;  %v14211_v31 = vcombine.low %v5940_v1, %v5948_v23 }
0x167a   :  { %v14214_v42 = vcombine.high %v5941_v55, %v5949_v30  ;;  %v14213_v14 = vcombine.low %v5941_v55, %v5949_v30 }
0x167b   :  { %9313 = vmatpush1.bf16.msra.mxu1 %v14115_v56  ;;  %v5956_v56 = vld [vmem:[%s21281_s10 + $0x4a0] sm:$0xff] }
0x167c   :  { %9399 = vmatpush1.bf16.msra.mxu0 %v14117_v9  ;;  %9314 = vmatprep.subr.bf16.mxu1 %v14132_v49  ;;  %v5964_v9 = vld [vmem:[%s21281_s10 + $0x4e0] sm:$0xff]  ;;  %v5957_v49 = vld [vmem:[%s21281_s10 + $0x4a8] sm:$0xff] }
0x167d   :  { %9400 = vmatprep.subr.bf16.mxu0 %v14134_v47  ;;  %v5965_v47 = vld [vmem:[%s21281_s10 + $0x4e8] sm:$0xff]  ;;  %v14228_v58 = vcombine.high %v5956_v56, %v5964_v9  ;;  %v14227_v53 = vcombine.low %v5956_v56, %v5964_v9 }
0x167e   :  { %v14230_v13 = vcombine.high %v5957_v49, %v5965_v47  ;;  %v14229_v11 = vcombine.low %v5957_v49, %v5965_v47 }
0x167f   :  { %9315 = vmatpush1.bf16.msra.mxu1 %v14131_v0  ;;  %v5972_v0 = vld [vmem:[%s21281_s10 + $0x520] sm:$0xff] }
0x1680   :  { %9401 = vmatpush1.bf16.msra.mxu0 %v14133_v61  ;;  %9316 = vmatprep.subr.bf16.mxu1 %v14148_v28  ;;  %v5980_v61 = vld [vmem:[%s21281_s10 + $0x560] sm:$0xff]  ;;  %v5973_v28 = vld [vmem:[%s21281_s10 + $0x528] sm:$0xff] }
0x1681   :  { %9402 = vmatprep.subr.bf16.mxu0 %v14150_v16  ;;  %v5981_v16 = vld [vmem:[%s21281_s10 + $0x568] sm:$0xff]  ;;  %v14244_v18 = vcombine.high %v5972_v0, %v5980_v61  ;;  %v14243_v48 = vcombine.low %v5972_v0, %v5980_v61 }
0x1682   :  { %v14246_v35 = vcombine.high %v5973_v28, %v5981_v16  ;;  %v14245_v46 = vcombine.low %v5973_v28, %v5981_v16 }
0x1683   :  { %9317 = vmatpush1.bf16.msra.mxu1 %v14147_v20  ;;  %v5988_v20 = vld [vmem:[%s21281_s10 + $0x5a0] sm:$0xff] }
0x1684   :  { %9403 = vmatpush1.bf16.msra.mxu0 %v14149_v32  ;;  %9318 = vmatprep.subr.bf16.mxu1 %v14164_v27  ;;  %v5996_v32 = vld [vmem:[%s21281_s10 + $0x5e0] sm:$0xff]  ;;  %v5989_v27 = vld [vmem:[%s21281_s10 + $0x5a8] sm:$0xff] }
0x1685   :  { %9404 = vmatprep.subr.bf16.mxu0 %v14166_v6  ;;  %v5997_v6 = vld [vmem:[%s21281_s10 + $0x5e8] sm:$0xff]  ;;  %v14260_v34 = vcombine.high %v5988_v20, %v5996_v32  ;;  %v14259_v2 = vcombine.low %v5988_v20, %v5996_v32 }
0x1686   :  { %v14262_v54 = vcombine.high %v5989_v27, %v5997_v6  ;;  %v14261_v45 = vcombine.low %v5989_v27, %v5997_v6 }
0x1687   :  { %9319 = vmatpush1.bf16.msra.mxu1 %v14163_v50  ;;  %v6004_v50 = vld [vmem:[%s21281_s10 + $0x620] sm:$0xff] }
0x1688   :  { %9405 = vmatpush1.bf16.msra.mxu0 %v14165_v8  ;;  %9320 = vmatprep.subr.bf16.mxu1 %v14180_v59  ;;  %v6012_v8 = vld [vmem:[%s21281_s10 + $0x660] sm:$0xff]  ;;  %v6005_v59 = vld [vmem:[%s21281_s10 + $0x628] sm:$0xff] }
0x1689   :  { %9406 = vmatprep.subr.bf16.mxu0 %v14182_v21  ;;  %v6013_v21 = vld [vmem:[%s21281_s10 + $0x668] sm:$0xff]  ;;  %v14276_v52 = vcombine.high %v6004_v50, %v6012_v8  ;;  %v14275_v1 = vcombine.low %v6004_v50, %v6012_v8 }
0x168a   :  { %v14278_v3 = vcombine.high %v6005_v59, %v6013_v21  ;;  %v14277_v23 = vcombine.low %v6005_v59, %v6013_v21  ;;  %v6093_v50 = vld [vmem:[%s21281_s10 + $0x8e8] sm:$0xff]  ;;  %v6100_v21 = vld [vmem:[%s21281_s10 + $0x920] sm:$0xff] }
0x168b   :  { %9321 = vmatpush1.bf16.msra.mxu1 %v14179_v33  ;;  %v6020_v33 = vld [vmem:[%s21281_s10 + $0x6a0] sm:$0xff] }
0x168c   :  { %9407 = vmatpush1.bf16.msra.mxu0 %v14181_v39  ;;  %9322 = vmatprep.subr.bf16.mxu1 %v14196_v5  ;;  %v6028_v39 = vld [vmem:[%s21281_s10 + $0x6e0] sm:$0xff]  ;;  %v6021_v5 = vld [vmem:[%s21281_s10 + $0x6a8] sm:$0xff] }
0x168d   :  { %9408 = vmatprep.subr.bf16.mxu0 %v14198_v15  ;;  %v6029_v15 = vld [vmem:[%s21281_s10 + $0x6e8] sm:$0xff]  ;;  %v14292_v55 = vcombine.high %v6020_v33, %v6028_v39  ;;  %v14291_v56 = vcombine.low %v6020_v33, %v6028_v39 }
0x168e   :  { %v14294_v30 = vcombine.high %v6021_v5, %v6029_v15  ;;  %v14293_v9 = vcombine.low %v6021_v5, %v6029_v15 }
0x168f   :  { %9323 = vmatpush1.bf16.msra.mxu1 %v14195_v19  ;;  %v6036_v19 = vld [vmem:[%s21281_s10 + $0x720] sm:$0xff] }
0x1690   :  { %9409 = vmatpush1.bf16.msra.mxu0 %v14197_v43  ;;  %9324 = vmatprep.subr.bf16.mxu1 %v14212_v26  ;;  %v6044_v43 = vld [vmem:[%s21281_s10 + $0x760] sm:$0xff]  ;;  %v6037_v26 = vld [vmem:[%s21281_s10 + $0x728] sm:$0xff] }
0x1691   :  { %9410 = vmatprep.subr.bf16.mxu0 %v14214_v42  ;;  %v6045_v42 = vld [vmem:[%s21281_s10 + $0x768] sm:$0xff]  ;;  %v14308_v49 = vcombine.high %v6036_v19, %v6044_v43  ;;  %v14307_v0 = vcombine.low %v6036_v19, %v6044_v43 }
0x1692   :  { %v14310_v47 = vcombine.high %v6037_v26, %v6045_v42  ;;  %v14309_v61 = vcombine.low %v6037_v26, %v6045_v42 }
0x1693   :  { %9325 = vmatpush1.bf16.msra.mxu1 %v14211_v31  ;;  %v6052_v31 = vld [vmem:[%s21281_s10 + $0x7a0] sm:$0xff] }
0x1694   :  { %9411 = vmatpush1.bf16.msra.mxu0 %v14213_v14  ;;  %9326 = vmatprep.subr.bf16.mxu1 %v14228_v58  ;;  %v6060_v14 = vld [vmem:[%s21281_s10 + $0x7e0] sm:$0xff]  ;;  %v6053_v58 = vld [vmem:[%s21281_s10 + $0x7a8] sm:$0xff] }
0x1695   :  { %9412 = vmatprep.subr.bf16.mxu0 %v14230_v13  ;;  %v6061_v13 = vld [vmem:[%s21281_s10 + $0x7e8] sm:$0xff]  ;;  %v14324_v28 = vcombine.high %v6052_v31, %v6060_v14  ;;  %v14323_v20 = vcombine.low %v6052_v31, %v6060_v14 }
0x1696   :  { %v14326_v16 = vcombine.high %v6053_v58, %v6061_v13  ;;  %v14325_v32 = vcombine.low %v6053_v58, %v6061_v13 }
0x1697   :  { %9327 = vmatpush1.bf16.msra.mxu1 %v14227_v53  ;;  %v6068_v53 = vld [vmem:[%s21281_s10 + $0x820] sm:$0xff] }
0x1698   :  { %9413 = vmatpush1.bf16.msra.mxu0 %v14229_v11  ;;  %9328 = vmatprep.subr.bf16.mxu1 %v14244_v18  ;;  %v6076_v11 = vld [vmem:[%s21281_s10 + $0x860] sm:$0xff]  ;;  %v6069_v18 = vld [vmem:[%s21281_s10 + $0x828] sm:$0xff] }
0x1699   :  { %9414 = vmatprep.subr.bf16.mxu0 %v14246_v35  ;;  %v6077_v35 = vld [vmem:[%s21281_s10 + $0x868] sm:$0xff]  ;;  %v14340_v27 = vcombine.high %v6068_v53, %v6076_v11 }
0x169a   :  { %v14342_v6 = vcombine.high %v6069_v18, %v6077_v35  ;;  %v14341_v8 = vcombine.low %v6069_v18, %v6077_v35 }
0x169b   :  { %9329 = vmatpush1.bf16.msra.mxu1 %v14243_v48  ;;  %v6084_v48 = vld [vmem:[%s21281_s10 + $0x8a0] sm:$0xff] }
0x169c   :  { %9415 = vmatpush1.bf16.msra.mxu0 %v14245_v46  ;;  %9330 = vmatprep.subr.bf16.mxu1 %v14260_v34  ;;  %v6092_v46 = vld [vmem:[%s21281_s10 + $0x8e0] sm:$0xff]  ;;  %v14339_v34 = vcombine.low %v6068_v53, %v6076_v11 }
0x169d   :  { %9416 = vmatprep.subr.bf16.mxu0 %v14262_v54  ;;  %v6085_v54 = vld [vmem:[%s21281_s10 + $0x8a8] sm:$0xff]  ;;  %v14356_v59 = vcombine.high %v6084_v48, %v6092_v46  ;;  %v14355_v33 = vcombine.low %v6084_v48, %v6092_v46  ;;  %v20627_v11 = vld [vmem:[%s21282_s11] sm:$0xff] }
0x169e   :  { %v14357_v39 = vcombine.low %v6085_v54, %v6093_v50  ;;  %v6335_v48 = vrot.slane %v20627_v11, %v17641_v57  ;;  %v6165_v46 = vld [vmem:[%s21281_s10 + $0xb28] sm:$0xff] }
0x169f   :  { %9331 = vmatpush1.bf16.msra.mxu1 %v14259_v2  ;;  %v6108_v2 = vld [vmem:[%s21281_s10 + $0x960] sm:$0xff] }
0x16a0   :  { %9417 = vmatpush1.bf16.msra.mxu0 %v14261_v45  ;;  %9332 = vmatprep.subr.bf16.mxu1 %v14276_v52  ;;  %v14358_v45 = vcombine.high %v6085_v54, %v6093_v50  ;;  %v6101_v52 = vld [vmem:[%s21281_s10 + $0x928] sm:$0xff]  ;;  %v14372_v5 = vcombine.high %v6100_v21, %v6108_v2  ;;  %v14371_v19 = vcombine.low %v6100_v21, %v6108_v2  ;;  %v6180_v2 = vld [vmem:[%s21281_s10 + $0xba0] sm:$0xff] }
0x16a1   :  { %9418 = vmatprep.subr.bf16.mxu0 %v14278_v3  ;;  %v6109_v3 = vld [vmem:[%s21281_s10 + $0x968] sm:$0xff]  ;;  %v6331_v54 = vrot.slane %v20627_v11, %v17647_v60  ;;  %v6339_v50 = vrot.slane %v20627_v11, %v17658_v4 }
0x16a2   :  { %v14374_v15 = vcombine.high %v6101_v52, %v6109_v3  ;;  %v14373_v43 = vcombine.low %v6101_v52, %v6109_v3 }
0x16a3   :  { %9333 = vmatpush1.bf16.msra.mxu1 %v14275_v1  ;;  %v6116_v1 = vld [vmem:[%s21281_s10 + $0x9a0] sm:$0xff] }
0x16a4   :  { %9419 = vmatpush1.bf16.msra.mxu0 %v14277_v23  ;;  %9334 = vmatprep.subr.bf16.mxu1 %v14292_v55  ;;  %v6124_v23 = vld [vmem:[%s21281_s10 + $0x9e0] sm:$0xff]  ;;  %v6117_v55 = vld [vmem:[%s21281_s10 + $0x9a8] sm:$0xff] }
0x16a5   :  { %9420 = vmatprep.subr.bf16.mxu0 %v14294_v30  ;;  %v6125_v30 = vld [vmem:[%s21281_s10 + $0x9e8] sm:$0xff]  ;;  %v14388_v26 = vcombine.high %v6116_v1, %v6124_v23  ;;  %v14387_v31 = vcombine.low %v6116_v1, %v6124_v23 }
0x16a6   :  { %v14390_v42 = vcombine.high %v6117_v55, %v6125_v30  ;;  %v14389_v14 = vcombine.low %v6117_v55, %v6125_v30  ;;  %v6181_v55 = vld [vmem:[%s21281_s10 + $0xba8] sm:$0xff] }
0x16a7   :  { %9335 = vmatpush1.bf16.msra.mxu1 %v14291_v56  ;;  %v6132_v56 = vld [vmem:[%s21281_s10 + $0xa20] sm:$0xff]  ;;  %v6189_v30 = vld [vmem:[%s21281_s10 + $0xbe8] sm:$0xff] }
0x16a8   :  { %9421 = vmatpush1.bf16.msra.mxu0 %v14293_v9  ;;  %9336 = vmatprep.subr.bf16.mxu1 %v14308_v49  ;;  %v6140_v9 = vld [vmem:[%s21281_s10 + $0xa60] sm:$0xff]  ;;  %v6133_v49 = vld [vmem:[%s21281_s10 + $0xa28] sm:$0xff] }
0x16a9   :  { %9422 = vmatprep.subr.bf16.mxu0 %v14310_v47  ;;  %v6141_v47 = vld [vmem:[%s21281_s10 + $0xa68] sm:$0xff]  ;;  %v14404_v58 = vcombine.high %v6132_v56, %v6140_v9  ;;  %v14403_v53 = vcombine.low %v6132_v56, %v6140_v9 }
0x16aa   :  { %v14406_v13 = vcombine.high %v6133_v49, %v6141_v47  ;;  %v14405_v18 = vcombine.low %v6133_v49, %v6141_v47 }
0x16ab   :  { %9337 = vmatpush1.bf16.msra.mxu1 %v14307_v0  ;;  %v6148_v0 = vld [vmem:[%s21281_s10 + $0xaa0] sm:$0xff] }
0x16ac   :  { %9423 = vmatpush1.bf16.msra.mxu0 %v14309_v61  ;;  %9338 = vmatprep.subr.bf16.mxu1 %v14324_v28  ;;  %v6156_v61 = vld [vmem:[%s21281_s10 + $0xae0] sm:$0xff]  ;;  %v6149_v28 = vld [vmem:[%s21281_s10 + $0xaa8] sm:$0xff] }
0x16ad   :  { %9424 = vmatprep.subr.bf16.mxu0 %v14326_v16  ;;  %v6157_v16 = vld [vmem:[%s21281_s10 + $0xae8] sm:$0xff]  ;;  %v14420_v35 = vcombine.high %v6148_v0, %v6156_v61 }
0x16af   :  { %9339 = vmatpush1.bf16.msra.mxu1 %v14323_v20  ;;  %v14422_v20 = vcombine.high %v6149_v28, %v6157_v16 }
0x16b0   :  { %9425 = vmatpush1.bf16.msra.mxu0 %v14325_v32  ;;  %9351 = vmatprep.subr.bf16.mxu1 %v14340_v27  ;;  %v6164_v32 = vld [vmem:[%s21281_s10 + $0xb20] sm:$0xff] }
0x16b1   :  { %9437 = vmatprep.subr.bf16.mxu0 %v14342_v6  ;;  %v6172_v27 = vld [vmem:[%s21281_s10 + $0xb60] sm:$0xff]  ;;  %v6327_v6 = vrot.slane %v20627_v11, %v17653_v62 }
0x16b2   :  { %9341 = vmatmul.mubr.bf16.vlgmr.msra.gmra.mrb[40].mxu1 %v19774_v25  ;;  %v14436_v21 = vcombine.high %v6164_v32, %v6172_v27  ;;  %v14435_v23 = vcombine.low %v6164_v32, %v6172_v27  ;;  %v6197_v27 = vld [vmem:[%s21281_s10 + $0xc28] sm:$0xff] }
0x16b3   :  { %9427 = vmatmul.mubr.bf16.vlgmr.msra.gmra.mrb[40].mxu0 %v19774_v25  ;;  %9352 = vmatpush1.bf16.msra.mxu1 %v14339_v34  ;;  %v6173_v34 = vld [vmem:[%s21281_s10 + $0xb68] sm:$0xff] }
0x16b4   :  { %9383 = vmatprep.mubr.bf16.mxu1 %v19794_v44  ;;  %9438 = vmatpush1.bf16.msra.mxu0 %v14341_v8  ;;  %v14419_v8 = vcombine.low %v6148_v0, %v6156_v61  ;;  %v14437_v56 = vcombine.low %v6165_v46, %v6173_v34  ;;  %v14453_v61 = vcombine.low %v6181_v55, %v6189_v30 }
0x16b5   :  { %9469 = vmatprep.mubr.bf16.mxu0 %v19794_v44  ;;  %9353 = vmatprep.subr.bf16.mxu1 %v14356_v59  ;;  %v14421_v59 = vcombine.low %v6149_v28, %v6157_v16  ;;  %v14454_v28 = vcombine.high %v6181_v55, %v6189_v30  ;;  %v6196_v16 = vld [vmem:[%s21281_s10 + $0xc20] sm:$0xff] }
0x16b6   :  { %9439 = vmatprep.subr.bf16.mxu0 %v14358_v45  ;;  %v6188_v45 = vld [vmem:[%s21281_s10 + $0xbe0] sm:$0xff] }
0x16b7   :  { %9354 = vmatpush1.bf16.msra.mxu1 %v14355_v33  ;;  %v14438_v33 = vcombine.high %v6165_v46, %v6173_v34  ;;  %v14451_v9 = vcombine.low %v6180_v2, %v6188_v45  ;;  %v6228_v55 = vld [vmem:[%s21281_s10 + $0xd20] sm:$0xff] }
0x16b8   :  { %9440 = vmatpush1.bf16.msra.mxu0 %v14357_v39  ;;  %9355 = vmatprep.subr.bf16.mxu1 %v14372_v5  ;;  %v6236_v30 = vld [vmem:[%s21281_s10 + $0xd60] sm:$0xff] }
0x16b9   :  { %9441 = vmatprep.subr.bf16.mxu0 %v14374_v15 }
0x16bb   :  { %9356 = vmatpush1.bf16.msra.mxu1 %v14371_v19 }
0x16bc   :  { %9442 = vmatpush1.bf16.msra.mxu0 %v14373_v43  ;;  %9357 = vmatprep.subr.bf16.mxu1 %v14388_v26 }
0x16bd   :  { %9443 = vmatprep.subr.bf16.mxu0 %v14390_v42 }
0x16bf   :  { %9358 = vmatpush1.bf16.msra.mxu1 %v14387_v31 }
0x16c0   :  { %9444 = vmatpush1.bf16.msra.mxu0 %v14389_v14  ;;  %9359 = vmatprep.subr.bf16.mxu1 %v14404_v58  ;;  %v14452_v58 = vcombine.high %v6180_v2, %v6188_v45 }
0x16c1   :  { %9445 = vmatprep.subr.bf16.mxu0 %v14406_v13 }
0x16c3   :  { %9360 = vmatpush1.bf16.msra.mxu1 %v14403_v53  ;;  %v6204_v53 = vld [vmem:[%s21281_s10 + $0xc60] sm:$0xff] }
0x16c4   :  { %9446 = vmatpush1.bf16.msra.mxu0 %v14405_v18  ;;  %9361 = vmatprep.subr.bf16.mxu1 %v14420_v35 }
0x16c5   :  { %v9041_v52 = vpop.f32.mrb[32].mxu1  ;;  %v9127_v3 = vpop.f32.mrb[32].mxu0  ;;  %9447 = vmatprep.subr.bf16.mxu0 %v14422_v20 }
0x16c6   :  { %v15387_v39 = vadd.f32 %v9041_v52, %v6327_v6  ;;  %v15391_v5 = vadd.f32 %v9127_v3, %v6335_v48  ;;  %v9043_v15 = vpop.f32.mrb[33].mxu1  ;;  %v9129_v1 = vpop.f32.mrb[33].mxu0  ;;  %v6212_v52 = vld [vmem:[%s21281_s10 + $0xca0] sm:$0xff] }
0x16c7   :  { %v15388_v19 = vadd.f32 %v9043_v15, %v6331_v54  ;;  %v15392_v43 = vadd.f32 %v9129_v1, %v6339_v50  ;;  %v9045_v26 = vpop.f32.mrb[34].mxu1  ;;  %v9131_v42 = vpop.f32.mrb[34].mxu0  ;;  %9362 = vmatpush1.bf16.msra.mxu1 %v14419_v8  ;;  %v6220_v3 = vld [vmem:[%s21281_s10 + $0xce0] sm:$0xff] }
0x16c8   :  { %v15389_v49 = vadd.f32 %v9045_v26, %v6327_v6  ;;  %v15393_v47 = vadd.f32 %v9131_v42, %v6335_v48  ;;  %9448 = vmatpush1.bf16.msra.mxu0 %v14421_v59  ;;  %v9047_v31 = vpop.f32.mrb[35].mxu1  ;;  %v9133_v14 = vpop.f32.mrb[35].mxu0  ;;  %9363 = vmatprep.subr.bf16.mxu1 %v14436_v21  ;;  %v9652_v18 = vmax.f32 %v15387_v39, 0.0  ;;  %v9654_v35 = vmax.f32 %v15391_v5, 0.0  ;;  %v6205_v6 = vld [vmem:[%s21281_s10 + $0xc68] sm:$0xff] }
0x16c9   :  { %v15390_v13 = vadd.f32 %v9047_v31, %v6331_v54  ;;  %v15394_v0 = vadd.f32 %v9133_v14, %v6339_v50  ;;  %9449 = vmatprep.subr.bf16.mxu0 %v14438_v33  ;;  %v9653_v48 = vmax.f32 %v15388_v19, 0.0  ;;  %v9655_v46 = vmax.f32 %v15392_v43, 0.0  ;;  %v6213_v33 = vld [vmem:[%s21281_s10 + $0xca8] sm:$0xff] }
0x16ca   :  { %v9668_v20 = vmax.f32 %v15389_v49, 0.0  ;;  %v9670_v32 = vmax.f32 %v15393_v47, 0.0  ;;  %v14468_v59 = vcombine.high %v6196_v16, %v6204_v53  ;;  %v14470_v45 = vcombine.high %v6197_v27, %v6205_v6  ;;  %v6221_v39 = vld [vmem:[%s21281_s10 + $0xce8] sm:$0xff]  ;;  %v6244_v49 = vld [vmem:[%s21281_s10 + $0xda0] sm:$0xff] }
0x16cb   :  { %v9669_v34 = vmax.f32 %v15390_v13, 0.0  ;;  %v9671_v54 = vmax.f32 %v15394_v0, 0.0  ;;  %9364 = vmatpush1.bf16.msra.mxu1 %v14435_v23  ;;  %v14467_v5 = vcombine.low %v6196_v16, %v6204_v53  ;;  %v14469_v15 = vcombine.low %v6197_v27, %v6205_v6  ;;  %v6229_v19 = vld [vmem:[%s21281_s10 + $0xd28] sm:$0xff]  ;;  %v6252_v47 = vld [vmem:[%s21281_s10 + $0xde0] sm:$0xff] }
0x16cc   :  { %v20673_v50 = vpack.c.bf16 %v9668_v20, %v9652_v18  ;;  %v20675_v8 = vpack.c.bf16 %v9670_v32, %v9654_v35  ;;  %9450 = vmatpush1.bf16.msra.mxu0 %v14437_v56  ;;  %9365 = vmatprep.subr.bf16.mxu1 %v14452_v58  ;;  %v14484_v1 = vcombine.high %v6212_v52, %v6220_v3  ;;  %v6237_v43 = vld [vmem:[%s21281_s10 + $0xd68] sm:$0xff]  ;;  %v6268_v16 = vld [vmem:[%s21281_s10 + $0xe60] sm:$0xff] }
0x16cd   :  { %v20677_v21 = vpack.c.bf16 %v9669_v34, %v9653_v48  ;;  %v20679_v2 = vpack.c.bf16 %v9671_v54, %v9655_v46  ;;  %9451 = vmatprep.subr.bf16.mxu0 %v14454_v28  ;;  %v14486_v23 = vcombine.high %v6213_v33, %v6221_v39  ;;  %v14483_v26 = vcombine.low %v6212_v52, %v6220_v3  ;;  %v6245_v31 = vld [vmem:[%s21281_s10 + $0xda8] sm:$0xff]  ;;  %v6260_v28 = vld [vmem:[%s21281_s10 + $0xe20] sm:$0xff] }
0x16ce   :  { %v14485_v42 = vcombine.low %v6213_v33, %v6221_v39  ;;  %v14500_v56 = vcombine.high %v6228_v55, %v6236_v30  ;;  %v6253_v14 = vld [vmem:[%s21281_s10 + $0xde8] sm:$0xff]  ;;  %v14499_v58 = vcombine.low %v6228_v55, %v6236_v30  ;;  %v14501_v13 = vcombine.low %v6229_v19, %v6237_v43  ;;  %v6276_v6 = vld [vmem:[%s21281_s10 + $0xea0] sm:$0xff] }
0x16cf   :  { %9366 = vmatpush1.bf16.msra.mxu1 %v14451_v9  ;;  %v14502_v9 = vcombine.high %v6229_v19, %v6237_v43  ;;  %v14516_v0 = vcombine.high %v6244_v49, %v6252_v47  ;;  %v6261_v53 = vld [vmem:[%s21281_s10 + $0xe28] sm:$0xff]  ;;  %v14515_v35 = vcombine.low %v6244_v49, %v6252_v47  ;;  %v14517_v20 = vcombine.low %v6245_v31, %v6253_v14  ;;  %v6284_v48 = vld [vmem:[%s21281_s10 + $0xee0] sm:$0xff]  ;;  %v5814_v47 = vld [vmem:[%s21281_s10 + $0x30] sm:$0xff] }
0x16d0   :  { %9452 = vmatpush1.bf16.msra.mxu0 %v14453_v61  ;;  %9367 = vmatprep.subr.bf16.mxu1 %v14468_v59  ;;  %v14518_v61 = vcombine.high %v6245_v31, %v6253_v14  ;;  %v6269_v18 = vld [vmem:[%s21281_s10 + $0xe68] sm:$0xff]  ;;  %v14532_v32 = vcombine.high %v6260_v28, %v6268_v16  ;;  %v14531_v54 = vcombine.low %v6260_v28, %v6268_v16  ;;  %v6292_v3 = vld [vmem:[%s21281_s10 + $0xf20] sm:$0xff]  ;;  %v5822_v31 = vld [vmem:[%s21281_s10 + $0x70] sm:$0xff] }
0x16d1   :  { %9453 = vmatprep.subr.bf16.mxu0 %v14470_v45  ;;  %v14534_v27 = vcombine.high %v6261_v53, %v6269_v18  ;;  %v6277_v46 = vld [vmem:[%s21281_s10 + $0xea8] sm:$0xff]  ;;  %v14533_v59 = vcombine.low %v6261_v53, %v6269_v18  ;;  %v14548_v45 = vcombine.high %v6276_v6, %v6284_v48  ;;  %v6300_v33 = vld [vmem:[%s21281_s10 + $0xf60] sm:$0xff]  ;;  %v5815_v14 = vld [vmem:[%s21281_s10 + $0x38] sm:$0xff]  ;;  %v14087_v18 = vcombine.low %v5814_v47, %v5822_v31 }
0x16d2   :  { %v6285_v34 = vld [vmem:[%s21281_s10 + $0xee8] sm:$0xff]  ;;  %v6308_v30 = vld [vmem:[%s21281_s10 + $0xfa0] sm:$0xff]  ;;  %v5830_v16 = vld [vmem:[%s21281_s10 + $0xb0] sm:$0xff] }
0x16d3   :  { %9368 = vmatpush1.bf16.msra.mxu1 %v14467_v5  ;;  %v14550_v52 = vcombine.high %v6277_v46, %v6285_v34  ;;  %v6293_v39 = vld [vmem:[%s21281_s10 + $0xf28] sm:$0xff]  ;;  %v6316_v19 = vld [vmem:[%s21281_s10 + $0xfe0] sm:$0xff]  ;;  %v5838_v53 = vld [vmem:[%s21281_s10 + $0xf0] sm:$0xff] }
0x16d4   :  { %9454 = vmatpush1.bf16.msra.mxu0 %v14469_v15  ;;  %9369 = vmatprep.subr.bf16.mxu1 %v14484_v1  ;;  %v6301_v5 = vld [vmem:[%s21281_s10 + $0xf68] sm:$0xff]  ;;  %v14547_v15 = vcombine.low %v6276_v6, %v6284_v48  ;;  %v14549_v1 = vcombine.low %v6277_v46, %v6285_v34  ;;  %v5846_v6 = vld [vmem:[%s21281_s10 + $0x130] sm:$0xff]  ;;  %v5847_v34 = vld [vmem:[%s21281_s10 + $0x138] sm:$0xff] }
0x16d5   :  { %9455 = vmatprep.subr.bf16.mxu0 %v14486_v23  ;;  %v14564_v23 = vcombine.high %v6292_v3, %v6300_v33  ;;  %v14566_v55 = vcombine.high %v6293_v39, %v6301_v5  ;;  %v6309_v43 = vld [vmem:[%s21281_s10 + $0xfa8] sm:$0xff]  ;;  %v5854_v48 = vld [vmem:[%s21281_s10 + $0x170] sm:$0xff] }
0x16d7   :  { %9370 = vmatpush1.bf16.msra.mxu1 %v14483_v26  ;;  %v6317_v26 = vld [vmem:[%s21281_s10 + $0xfe8] sm:$0xff] }
0x16d8   :  { %9456 = vmatpush1.bf16.msra.mxu0 %v14485_v42  ;;  %9371 = vmatprep.subr.bf16.mxu1 %v14500_v56  ;;  %v14563_v42 = vcombine.low %v6292_v3, %v6300_v33  ;;  %v14565_v56 = vcombine.low %v6293_v39, %v6301_v5  ;;  %v14582_v49 = vcombine.high %v6309_v43, %v6317_v26  ;;  %v5862_v33 = vld [vmem:[%s21281_s10 + $0x1b0] sm:$0xff]  ;;  %v5863_v5 = vld [vmem:[%s21281_s10 + $0x1b8] sm:$0xff] }
0x16d9   :  { %9457 = vmatprep.subr.bf16.mxu0 %v14502_v9  ;;  %v14580_v9 = vcombine.high %v6308_v30, %v6316_v19  ;;  %v5870_v39 = vld [vmem:[%s21281_s10 + $0x1f0] sm:$0xff] }
0x16db   :  { %9372 = vmatpush1.bf16.msra.mxu1 %v14499_v58  ;;  %v5823_v58 = vld [vmem:[%s21281_s10 + $0x78] sm:$0xff] }
0x16dc   :  { %9458 = vmatpush1.bf16.msra.mxu0 %v14501_v13  ;;  %9373 = vmatprep.subr.bf16.mxu1 %v14516_v0  ;;  %v14579_v13 = vcombine.low %v6308_v30, %v6316_v19  ;;  %v14581_v0 = vcombine.low %v6309_v43, %v6317_v26  ;;  %v14090_v28 = vcombine.high %v5815_v14, %v5823_v58  ;;  %v5878_v30 = vld [vmem:[%s21281_s10 + $0x230] sm:$0xff]  ;;  %v5879_v43 = vld [vmem:[%s21281_s10 + $0x238] sm:$0xff] }
0x16dd   :  { %9459 = vmatprep.subr.bf16.mxu0 %v14518_v61  ;;  %v14088_v61 = vcombine.high %v5814_v47, %v5822_v31  ;;  %v5886_v19 = vld [vmem:[%s21281_s10 + $0x270] sm:$0xff]  ;;  %v5887_v26 = vld [vmem:[%s21281_s10 + $0x278] sm:$0xff] }
0x16de   :  { %v5894_v47 = vld [vmem:[%s21281_s10 + $0x2b0] sm:$0xff] }
0x16df   :  { %9374 = vmatpush1.bf16.msra.mxu1 %v14515_v35  ;;  %v5831_v35 = vld [vmem:[%s21281_s10 + $0xb8] sm:$0xff]  ;;  %v5902_v31 = vld [vmem:[%s21281_s10 + $0x2f0] sm:$0xff] }
0x16e0   :  { %9460 = vmatpush1.bf16.msra.mxu0 %v14517_v20  ;;  %9375 = vmatprep.subr.bf16.mxu1 %v14532_v32  ;;  %v5839_v20 = vld [vmem:[%s21281_s10 + $0xf8] sm:$0xff]  ;;  %v14089_v32 = vcombine.low %v5815_v14, %v5823_v58 }
0x16e1   :  { %9461 = vmatprep.subr.bf16.mxu0 %v14534_v27  ;;  %v14104_v27 = vcombine.high %v5830_v16, %v5838_v53  ;;  %v14106_v46 = vcombine.high %v5831_v35, %v5839_v20  ;;  %v5895_v14 = vld [vmem:[%s21281_s10 + $0x2b8] sm:$0xff] }
0x16e2   :  { %v5903_v58 = vld [vmem:[%s21281_s10 + $0x2f8] sm:$0xff] }
0x16e3   :  { %9376 = vmatpush1.bf16.msra.mxu1 %v14531_v54  ;;  %v5855_v54 = vld [vmem:[%s21281_s10 + $0x178] sm:$0xff] }
0x16e4   :  { %9462 = vmatpush1.bf16.msra.mxu0 %v14533_v59  ;;  %9377 = vmatprep.subr.bf16.mxu1 %v14548_v45  ;;  %v14103_v59 = vcombine.low %v5830_v16, %v5838_v53  ;;  %v14105_v45 = vcombine.low %v5831_v35, %v5839_v20  ;;  %v14122_v3 = vcombine.high %v5847_v34, %v5855_v54  ;;  %v5910_v16 = vld [vmem:[%s21281_s10 + $0x330] sm:$0xff]  ;;  %v5919_v35 = vld [vmem:[%s21281_s10 + $0x378] sm:$0xff] }
0x16e5   :  { %9463 = vmatprep.subr.bf16.mxu0 %v14550_v52  ;;  %v14120_v52 = vcombine.high %v5846_v6, %v5854_v48  ;;  %v5918_v53 = vld [vmem:[%s21281_s10 + $0x370] sm:$0xff]  ;;  %v14167_v20 = vcombine.low %v5894_v47, %v5902_v31 }
0x16e7   :  { %9378 = vmatpush1.bf16.msra.mxu1 %v14547_v15  ;;  %v5871_v15 = vld [vmem:[%s21281_s10 + $0x1f8] sm:$0xff] }
0x16e8   :  { %9464 = vmatpush1.bf16.msra.mxu0 %v14549_v1  ;;  %9379 = vmatprep.subr.bf16.mxu1 %v14564_v23  ;;  %v14121_v1 = vcombine.low %v5847_v34, %v5855_v54  ;;  %v14136_v23 = vcombine.high %v5862_v33, %v5870_v39  ;;  %v5927_v34 = vld [vmem:[%s21281_s10 + $0x3b8] sm:$0xff] }
0x16e9   :  { %9465 = vmatprep.subr.bf16.mxu0 %v14566_v55  ;;  %v14138_v55 = vcombine.high %v5863_v5, %v5871_v15  ;;  %v5935_v54 = vld [vmem:[%s21281_s10 + $0x3f8] sm:$0xff] }
0x16eb   :  { %9380 = vmatpush1.bf16.msra.mxu1 %v14563_v42  ;;  %v14135_v42 = vcombine.low %v5862_v33, %v5870_v39  ;;  %v5942_v33 = vld [vmem:[%s21281_s10 + $0x430] sm:$0xff] }
0x16ec   :  { %9466 = vmatpush1.bf16.msra.mxu0 %v14565_v56  ;;  %9381 = vmatprep.subr.bf16.mxu1 %v14580_v9  ;;  %v14137_v56 = vcombine.low %v5863_v5, %v5871_v15  ;;  %v14152_v9 = vcombine.high %v5878_v30, %v5886_v19  ;;  %v5950_v39 = vld [vmem:[%s21281_s10 + $0x470] sm:$0xff]  ;;  %v5943_v5 = vld [vmem:[%s21281_s10 + $0x438] sm:$0xff] }
0x16ed   :  { %9467 = vmatprep.subr.bf16.mxu0 %v14582_v49  ;;  %v14154_v49 = vcombine.high %v5879_v43, %v5887_v26  ;;  %v5951_v15 = vld [vmem:[%s21281_s10 + $0x478] sm:$0xff] }
0x16ef   :  { %9382 = vmatpush1.bf16.msra.mxu1 %v14579_v13  ;;  %v14151_v13 = vcombine.low %v5878_v30, %v5886_v19  ;;  %v5958_v30 = vld [vmem:[%s21281_s10 + $0x4b0] sm:$0xff] }
0x16f0   :  { %9468 = vmatpush1.bf16.msra.mxu0 %v14581_v0  ;;  %9480 = vmatprep.subr.bf16.mxu1 %v14088_v61  ;;  %v14153_v0 = vcombine.low %v5879_v43, %v5887_v26  ;;  %v14168_v61 = vcombine.high %v5894_v47, %v5902_v31  ;;  %v5966_v19 = vld [vmem:[%s21281_s10 + $0x4f0] sm:$0xff]  ;;  %v5959_v43 = vld [vmem:[%s21281_s10 + $0x4b8] sm:$0xff] }
0x16f1   :  { %9566 = vmatprep.subr.bf16.mxu0 %v14090_v28  ;;  %v14170_v28 = vcombine.high %v5895_v14, %v5903_v58  ;;  %v5967_v26 = vld [vmem:[%s21281_s10 + $0x4f8] sm:$0xff]  ;;  %v5974_v47 = vld [vmem:[%s21281_s10 + $0x530] sm:$0xff] }
0x16f2   :  { %9384 = vmatmul.mubr.bf16.vlgmr.msra.gmra.mrb[40].mxu1 %v19779_v22  ;;  %v5982_v31 = vld [vmem:[%s21281_s10 + $0x570] sm:$0xff] }
0x16f3   :  { %9470 = vmatmul.mubr.bf16.vlgmr.msra.gmra.mrb[40].mxu0 %v19779_v22  ;;  %9481 = vmatpush1.bf16.msra.mxu1 %v14087_v18  ;;  %v5911_v18 = vld [vmem:[%s21281_s10 + $0x338] sm:$0xff] }
0x16f4   :  { %9512 = vmatprep.mubr.bf16.mxu1 %v19772_v24  ;;  %9567 = vmatpush1.bf16.msra.mxu0 %v14089_v32  ;;  %v14169_v32 = vcombine.low %v5895_v14, %v5903_v58  ;;  %v5975_v14 = vld [vmem:[%s21281_s10 + $0x538] sm:$0xff] }
0x16f5   :  { %9598 = vmatprep.mubr.bf16.mxu0 %v19772_v24  ;;  %9482 = vmatprep.subr.bf16.mxu1 %v14104_v27  ;;  %v14119_v24 = vcombine.low %v5846_v6, %v5854_v48  ;;  %v14184_v27 = vcombine.high %v5910_v16, %v5918_v53  ;;  %v14186_v6 = vcombine.high %v5911_v18, %v5919_v35  ;;  %v5926_v48 = vld [vmem:[%s21281_s10 + $0x3b0] sm:$0xff]  ;;  %v5983_v58 = vld [vmem:[%s21281_s10 + $0x578] sm:$0xff] }
0x16f6   :  { %9568 = vmatprep.subr.bf16.mxu0 %v14106_v46  ;;  %v5934_v46 = vld [vmem:[%s21281_s10 + $0x3f0] sm:$0xff] }
0x16f7   :  { %9483 = vmatpush1.bf16.msra.mxu1 %v14103_v59  ;;  %v14183_v59 = vcombine.low %v5910_v16, %v5918_v53  ;;  %v5990_v16 = vld [vmem:[%s21281_s10 + $0x5b0] sm:$0xff] }
0x16f8   :  { %9569 = vmatpush1.bf16.msra.mxu0 %v14105_v45  ;;  %9484 = vmatprep.subr.bf16.mxu1 %v14120_v52  ;;  %v14185_v45 = vcombine.low %v5911_v18, %v5919_v35  ;;  %v14200_v52 = vcombine.high %v5926_v48, %v5934_v46  ;;  %v5998_v53 = vld [vmem:[%s21281_s10 + $0x5f0] sm:$0xff]  ;;  %v5991_v18 = vld [vmem:[%s21281_s10 + $0x5b8] sm:$0xff] }
0x16f9   :  { %9570 = vmatprep.subr.bf16.mxu0 %v14122_v3  ;;  %v14202_v3 = vcombine.high %v5927_v34, %v5935_v54  ;;  %v5999_v35 = vld [vmem:[%s21281_s10 + $0x5f8] sm:$0xff] }
0x16fb   :  { %9485 = vmatpush1.bf16.msra.mxu1 %v14119_v24  ;;  %v14199_v24 = vcombine.low %v5926_v48, %v5934_v46  ;;  %v6006_v48 = vld [vmem:[%s21281_s10 + $0x630] sm:$0xff] }
0x16fc   :  { %9571 = vmatpush1.bf16.msra.mxu0 %v14121_v1  ;;  %9486 = vmatprep.subr.bf16.mxu1 %v14136_v23  ;;  %v14201_v1 = vcombine.low %v5927_v34, %v5935_v54  ;;  %v14216_v23 = vcombine.high %v5942_v33, %v5950_v39  ;;  %v6014_v46 = vld [vmem:[%s21281_s10 + $0x670] sm:$0xff]  ;;  %v6007_v34 = vld [vmem:[%s21281_s10 + $0x638] sm:$0xff] }
0x16fd   :  { %9572 = vmatprep.subr.bf16.mxu0 %v14138_v55  ;;  %v14218_v55 = vcombine.high %v5943_v5, %v5951_v15  ;;  %v6015_v54 = vld [vmem:[%s21281_s10 + $0x678] sm:$0xff] }
0x16ff   :  { %9487 = vmatpush1.bf16.msra.mxu1 %v14135_v42  ;;  %v14215_v42 = vcombine.low %v5942_v33, %v5950_v39  ;;  %v6022_v33 = vld [vmem:[%s21281_s10 + $0x6b0] sm:$0xff] }
0x1700   :  { %9573 = vmatpush1.bf16.msra.mxu0 %v14137_v56  ;;  %9488 = vmatprep.subr.bf16.mxu1 %v14152_v9  ;;  %v14217_v56 = vcombine.low %v5943_v5, %v5951_v15  ;;  %v14232_v9 = vcombine.high %v5958_v30, %v5966_v19  ;;  %v6030_v39 = vld [vmem:[%s21281_s10 + $0x6f0] sm:$0xff]  ;;  %v6023_v5 = vld [vmem:[%s21281_s10 + $0x6b8] sm:$0xff] }
0x1701   :  { %9574 = vmatprep.subr.bf16.mxu0 %v14154_v49  ;;  %v14234_v49 = vcombine.high %v5959_v43, %v5967_v26  ;;  %v6031_v15 = vld [vmem:[%s21281_s10 + $0x6f8] sm:$0xff] }
0x1703   :  { %9489 = vmatpush1.bf16.msra.mxu1 %v14151_v13  ;;  %v14231_v13 = vcombine.low %v5958_v30, %v5966_v19  ;;  %v6038_v30 = vld [vmem:[%s21281_s10 + $0x730] sm:$0xff] }
0x1704   :  { %9575 = vmatpush1.bf16.msra.mxu0 %v14153_v0  ;;  %9490 = vmatprep.subr.bf16.mxu1 %v14168_v61  ;;  %v14233_v0 = vcombine.low %v5959_v43, %v5967_v26  ;;  %v14248_v61 = vcombine.high %v5974_v47, %v5982_v31  ;;  %v6046_v19 = vld [vmem:[%s21281_s10 + $0x770] sm:$0xff]  ;;  %v6039_v43 = vld [vmem:[%s21281_s10 + $0x738] sm:$0xff] }
0x1705   :  { %9576 = vmatprep.subr.bf16.mxu0 %v14170_v28  ;;  %v14250_v28 = vcombine.high %v5975_v14, %v5983_v58  ;;  %v6047_v26 = vld [vmem:[%s21281_s10 + $0x778] sm:$0xff] }
0x1707   :  { %9491 = vmatpush1.bf16.msra.mxu1 %v14167_v20  ;;  %v14247_v20 = vcombine.low %v5974_v47, %v5982_v31  ;;  %v6054_v47 = vld [vmem:[%s21281_s10 + $0x7b0] sm:$0xff] }
0x1708   :  { %9577 = vmatpush1.bf16.msra.mxu0 %v14169_v32  ;;  %9492 = vmatprep.subr.bf16.mxu1 %v14184_v27  ;;  %v14249_v32 = vcombine.low %v5975_v14, %v5983_v58  ;;  %v14264_v27 = vcombine.high %v5990_v16, %v5998_v53  ;;  %v6062_v31 = vld [vmem:[%s21281_s10 + $0x7f0] sm:$0xff]  ;;  %v6055_v14 = vld [vmem:[%s21281_s10 + $0x7b8] sm:$0xff] }
0x1709   :  { %9578 = vmatprep.subr.bf16.mxu0 %v14186_v6  ;;  %v14266_v6 = vcombine.high %v5991_v18, %v5999_v35  ;;  %v6063_v58 = vld [vmem:[%s21281_s10 + $0x7f8] sm:$0xff] }
0x170b   :  { %9493 = vmatpush1.bf16.msra.mxu1 %v14183_v59  ;;  %v14263_v59 = vcombine.low %v5990_v16, %v5998_v53  ;;  %v6070_v16 = vld [vmem:[%s21281_s10 + $0x830] sm:$0xff] }
0x170c   :  { %9579 = vmatpush1.bf16.msra.mxu0 %v14185_v45  ;;  %9494 = vmatprep.subr.bf16.mxu1 %v14200_v52  ;;  %v14265_v45 = vcombine.low %v5991_v18, %v5999_v35  ;;  %v14280_v52 = vcombine.high %v6006_v48, %v6014_v46  ;;  %v6078_v53 = vld [vmem:[%s21281_s10 + $0x870] sm:$0xff]  ;;  %v6071_v18 = vld [vmem:[%s21281_s10 + $0x838] sm:$0xff] }
0x170d   :  { %9580 = vmatprep.subr.bf16.mxu0 %v14202_v3  ;;  %v14282_v3 = vcombine.high %v6007_v34, %v6015_v54  ;;  %v6079_v35 = vld [vmem:[%s21281_s10 + $0x878] sm:$0xff] }
0x170f   :  { %9495 = vmatpush1.bf16.msra.mxu1 %v14199_v24  ;;  %v14279_v24 = vcombine.low %v6006_v48, %v6014_v46  ;;  %v6086_v48 = vld [vmem:[%s21281_s10 + $0x8b0] sm:$0xff] }
0x1710   :  { %9581 = vmatpush1.bf16.msra.mxu0 %v14201_v1  ;;  %9496 = vmatprep.subr.bf16.mxu1 %v14216_v23  ;;  %v14281_v1 = vcombine.low %v6007_v34, %v6015_v54  ;;  %v14296_v23 = vcombine.high %v6022_v33, %v6030_v39  ;;  %v6094_v46 = vld [vmem:[%s21281_s10 + $0x8f0] sm:$0xff]  ;;  %v14343_v34 = vcombine.low %v6070_v16, %v6078_v53  ;;  %v6087_v54 = vld [vmem:[%s21281_s10 + $0x8b8] sm:$0xff] }
0x1711   :  { %9582 = vmatprep.subr.bf16.mxu0 %v14218_v55  ;;  %v14298_v55 = vcombine.high %v6023_v5, %v6031_v15 }
0x1713   :  { %9497 = vmatpush1.bf16.msra.mxu1 %v14215_v42  ;;  %v14295_v42 = vcombine.low %v6022_v33, %v6030_v39  ;;  %v6110_v33 = vld [vmem:[%s21281_s10 + $0x970] sm:$0xff] }
0x1714   :  { %9583 = vmatpush1.bf16.msra.mxu0 %v14217_v56  ;;  %9498 = vmatprep.subr.bf16.mxu1 %v14232_v9  ;;  %v14297_v56 = vcombine.low %v6023_v5, %v6031_v15  ;;  %v14312_v9 = vcombine.high %v6038_v30, %v6046_v19  ;;  %v6103_v5 = vld [vmem:[%s21281_s10 + $0x938] sm:$0xff] }
0x1715   :  { %9584 = vmatprep.subr.bf16.mxu0 %v14234_v49  ;;  %v14314_v49 = vcombine.high %v6039_v43, %v6047_v26  ;;  %v6111_v15 = vld [vmem:[%s21281_s10 + $0x978] sm:$0xff] }
0x1717   :  { %9499 = vmatpush1.bf16.msra.mxu1 %v14231_v13  ;;  %v14311_v13 = vcombine.low %v6038_v30, %v6046_v19  ;;  %v6118_v30 = vld [vmem:[%s21281_s10 + $0x9b0] sm:$0xff] }
0x1718   :  { %9585 = vmatpush1.bf16.msra.mxu0 %v14233_v0  ;;  %9500 = vmatprep.subr.bf16.mxu1 %v14248_v61  ;;  %v14313_v0 = vcombine.low %v6039_v43, %v6047_v26  ;;  %v14328_v61 = vcombine.high %v6054_v47, %v6062_v31  ;;  %v6126_v19 = vld [vmem:[%s21281_s10 + $0x9f0] sm:$0xff]  ;;  %v6127_v43 = vld [vmem:[%s21281_s10 + $0x9f8] sm:$0xff]  ;;  %v14377_v26 = vcombine.low %v6103_v5, %v6111_v15 }
0x1719   :  { %9586 = vmatprep.subr.bf16.mxu0 %v14250_v28  ;;  %v14330_v28 = vcombine.high %v6055_v14, %v6063_v58 }
0x171b   :  { %9501 = vmatpush1.bf16.msra.mxu1 %v14247_v20  ;;  %v14327_v20 = vcombine.low %v6054_v47, %v6062_v31  ;;  %v6135_v47 = vld [vmem:[%s21281_s10 + $0xa38] sm:$0xff] }
0x171c   :  { %9587 = vmatpush1.bf16.msra.mxu0 %v14249_v32  ;;  %9502 = vmatprep.subr.bf16.mxu1 %v14264_v27  ;;  %v14329_v32 = vcombine.low %v6055_v14, %v6063_v58  ;;  %v14344_v27 = vcombine.high %v6070_v16, %v6078_v53  ;;  %v6143_v31 = vld [vmem:[%s21281_s10 + $0xa78] sm:$0xff]  ;;  %v14391_v14 = vcombine.low %v6118_v30, %v6126_v19 }
0x171d   :  { %9588 = vmatprep.subr.bf16.mxu0 %v14266_v6  ;;  %v14346_v6 = vcombine.high %v6071_v18, %v6079_v35  ;;  %v6151_v16 = vld [vmem:[%s21281_s10 + $0xab8] sm:$0xff] }
0x171e   :  { %v6159_v53 = vld [vmem:[%s21281_s10 + $0xaf8] sm:$0xff] }
0x171f   :  { %9503 = vmatpush1.bf16.msra.mxu1 %v14263_v59  ;;  %v6095_v59 = vld [vmem:[%s21281_s10 + $0x8f8] sm:$0xff] }
0x1720   :  { %9589 = vmatpush1.bf16.msra.mxu0 %v14265_v45  ;;  %9504 = vmatprep.subr.bf16.mxu1 %v14280_v52  ;;  %v14345_v45 = vcombine.low %v6071_v18, %v6079_v35  ;;  %v14360_v52 = vcombine.high %v6086_v48, %v6094_v46  ;;  %v14362_v39 = vcombine.high %v6087_v54, %v6095_v59 }
0x1721   :  { %9590 = vmatprep.subr.bf16.mxu0 %v14282_v3  ;;  %v6102_v3 = vld [vmem:[%s21281_s10 + $0x930] sm:$0xff]  ;;  %v14409_v35 = vcombine.low %v6135_v47, %v6143_v31 }
0x1723   :  { %9505 = vmatpush1.bf16.msra.mxu1 %v14279_v24  ;;  %v14359_v24 = vcombine.low %v6086_v48, %v6094_v46  ;;  %v6343_v48 = vrot.slane %v20627_v11, %v18705_v36  ;;  %v6167_v46 = vld [vmem:[%s21281_s10 + $0xb38] sm:$0xff] }
0x1724   :  { %9591 = vmatpush1.bf16.msra.mxu0 %v14281_v1  ;;  %9506 = vmatprep.subr.bf16.mxu1 %v14296_v23  ;;  %v14361_v1 = vcombine.low %v6087_v54, %v6095_v59  ;;  %v14376_v23 = vcombine.high %v6102_v3, %v6110_v33  ;;  %v6351_v54 = vrot.slane %v20627_v11, %v18708_v37 }
0x1725   :  { %9592 = vmatprep.subr.bf16.mxu0 %v14298_v55  ;;  %v14378_v55 = vcombine.high %v6103_v5, %v6111_v15  ;;  %v6347_v59 = vrot.slane %v20627_v11, %v18711_v38  ;;  %v6182_v15 = vld [vmem:[%s21281_s10 + $0xbb0] sm:$0xff] }
0x1727   :  { %9507 = vmatpush1.bf16.msra.mxu1 %v14295_v42  ;;  %v14392_v42 = vcombine.high %v6118_v30, %v6126_v19  ;;  %v6191_v30 = vld [vmem:[%s21281_s10 + $0xbf8] sm:$0xff] }
0x1728   :  { %9593 = vmatpush1.bf16.msra.mxu0 %v14297_v56  ;;  %9508 = vmatprep.subr.bf16.mxu1 %v14312_v9  ;;  %v6134_v9 = vld [vmem:[%s21281_s10 + $0xa30] sm:$0xff] }
0x1729   :  { %9594 = vmatprep.subr.bf16.mxu0 %v14314_v49  ;;  %v6142_v49 = vld [vmem:[%s21281_s10 + $0xa70] sm:$0xff] }
0x172a   :  { %v14407_v18 = vcombine.low %v6134_v9, %v6142_v49 }
0x172b   :  { %9509 = vmatpush1.bf16.msra.mxu1 %v14311_v13  ;;  %v14408_v13 = vcombine.high %v6134_v9, %v6142_v49 }
0x172c   :  { %9595 = vmatpush1.bf16.msra.mxu0 %v14313_v0  ;;  %9510 = vmatprep.subr.bf16.mxu1 %v14328_v61  ;;  %v14410_v0 = vcombine.high %v6135_v47, %v6143_v31  ;;  %v6150_v61 = vld [vmem:[%s21281_s10 + $0xab0] sm:$0xff] }
0x172d   :  { %9596 = vmatprep.subr.bf16.mxu0 %v14330_v28  ;;  %v6158_v28 = vld [vmem:[%s21281_s10 + $0xaf0] sm:$0xff] }
0x172f   :  { %9511 = vmatpush1.bf16.msra.mxu1 %v14327_v20  ;;  %v14424_v20 = vcombine.high %v6150_v61, %v6158_v28 }
0x1730   :  { %9597 = vmatpush1.bf16.msra.mxu0 %v14329_v32  ;;  %9523 = vmatprep.subr.bf16.mxu1 %v14344_v27  ;;  %v14426_v32 = vcombine.high %v6151_v16, %v6159_v53  ;;  %v6166_v27 = vld [vmem:[%s21281_s10 + $0xb30] sm:$0xff] }
0x1731   :  { %9609 = vmatprep.subr.bf16.mxu0 %v14346_v6  ;;  %v6174_v6 = vld [vmem:[%s21281_s10 + $0xb70] sm:$0xff] }
0x1732   :  { %9513 = vmatmul.mubr.bf16.vlgmr.msra.gmra.mrb[44].mxu1 %v19774_v25 }
0x1733   :  { %9599 = vmatmul.mubr.bf16.vlgmr.msra.gmra.mrb[44].mxu0 %v19774_v25  ;;  %9524 = vmatpush1.bf16.msra.mxu1 %v14343_v34  ;;  %v6119_v25 = vld [vmem:[%s21281_s10 + $0x9b8] sm:$0xff] }
0x1734   :  { %9555 = vmatprep.mubr.bf16.mxu1 %v19794_v44  ;;  %9610 = vmatpush1.bf16.msra.mxu0 %v14345_v45  ;;  %v14394_v56 = vcombine.high %v6119_v25, %v6127_v43  ;;  %v14393_v58 = vcombine.low %v6119_v25, %v6127_v43  ;;  %v6175_v34 = vld [vmem:[%s21281_s10 + $0xb78] sm:$0xff]  ;;  %v14423_v45 = vcombine.low %v6150_v61, %v6158_v28  ;;  %v6198_v28 = vld [vmem:[%s21281_s10 + $0xc30] sm:$0xff] }
0x1735   :  { %9641 = vmatprep.mubr.bf16.mxu0 %v19794_v44  ;;  %9525 = vmatprep.subr.bf16.mxu1 %v14360_v52  ;;  %v14375_v44 = vcombine.low %v6102_v3, %v6110_v33  ;;  %v6355_v52 = vrot.slane %v20627_v11, %v18714_v40  ;;  %v14425_v3 = vcombine.low %v6151_v16, %v6159_v53  ;;  %v6183_v11 = vld [vmem:[%s21281_s10 + $0xbb8] sm:$0xff]  ;;  %v6206_v16 = vld [vmem:[%s21281_s10 + $0xc70] sm:$0xff] }
0x1736   :  { %9611 = vmatprep.subr.bf16.mxu0 %v14362_v39  ;;  %v14440_v33 = vcombine.high %v6166_v27, %v6174_v6  ;;  %v14442_v5 = vcombine.high %v6167_v46, %v6175_v34  ;;  %v14458_v61 = vcombine.high %v6183_v11, %v6191_v30 }
0x1737   :  { %9526 = vmatpush1.bf16.msra.mxu1 %v14359_v24  ;;  %v6190_v24 = vld [vmem:[%s21281_s10 + $0xbf0] sm:$0xff] }
0x1738   :  { %9612 = vmatpush1.bf16.msra.mxu0 %v14361_v1  ;;  %9527 = vmatprep.subr.bf16.mxu1 %v14376_v23  ;;  %v14456_v31 = vcombine.high %v6182_v15, %v6190_v24 }
0x1739   :  { %9613 = vmatprep.subr.bf16.mxu0 %v14378_v55 }
0x173b   :  { %9528 = vmatpush1.bf16.msra.mxu1 %v14375_v44 }
0x173c   :  { %9614 = vmatpush1.bf16.msra.mxu0 %v14377_v26  ;;  %9529 = vmatprep.subr.bf16.mxu1 %v14392_v42  ;;  %v14439_v26 = vcombine.low %v6166_v27, %v6174_v6  ;;  %v14441_v42 = vcombine.low %v6167_v46, %v6175_v34  ;;  %v6207_v27 = vld [vmem:[%s21281_s10 + $0xc78] sm:$0xff] }
0x173d   :  { %9615 = vmatprep.subr.bf16.mxu0 %v14394_v56 }
0x173f   :  { %9530 = vmatpush1.bf16.msra.mxu1 %v14391_v14 }
0x1740   :  { %9616 = vmatpush1.bf16.msra.mxu0 %v14393_v58  ;;  %9531 = vmatprep.subr.bf16.mxu1 %v14408_v13 }
0x1741   :  { %9617 = vmatprep.subr.bf16.mxu0 %v14410_v0  ;;  %v14455_v0 = vcombine.low %v6182_v15, %v6190_v24  ;;  %v6222_v15 = vld [vmem:[%s21281_s10 + $0xcf0] sm:$0xff] }
0x1743   :  { %9532 = vmatpush1.bf16.msra.mxu1 %v14407_v18 }
0x1744   :  { %9618 = vmatpush1.bf16.msra.mxu0 %v14409_v35  ;;  %9533 = vmatprep.subr.bf16.mxu1 %v14424_v20  ;;  %v14457_v20 = vcombine.low %v6183_v11, %v6191_v30 }
0x1745   :  { %v9213_v39 = vpop.f32.mrb[36].mxu1  ;;  %9619 = vmatprep.subr.bf16.mxu0 %v14426_v32  ;;  %v6199_v32 = vld [vmem:[%s21281_s10 + $0xc38] sm:$0xff] }
0x1746   :  { %v15395_v1 = vadd.f32 %v9213_v39, %v6343_v48  ;;  %v9299_v23 = vpop.f32.mrb[36].mxu0  ;;  %v9215_v55 = vpop.f32.mrb[37].mxu1  ;;  %v14474_v39 = vcombine.high %v6199_v32, %v6207_v27  ;;  %v14473_v11 = vcombine.low %v6199_v32, %v6207_v27 }
0x1747   :  { %v15399_v19 = vadd.f32 %v9299_v23, %v6351_v54  ;;  %v15396_v25 = vadd.f32 %v9215_v55, %v6347_v59  ;;  %v9301_v43 = vpop.f32.mrb[37].mxu0  ;;  %v9217_v44 = vpop.f32.mrb[38].mxu1  ;;  %9534 = vmatpush1.bf16.msra.mxu1 %v14423_v45  ;;  %v6223_v23 = vld [vmem:[%s21281_s10 + $0xcf8] sm:$0xff]  ;;  %v14471_v55 = vcombine.low %v6198_v28, %v6206_v16 }
0x1748   :  { %v15400_v56 = vadd.f32 %v9301_v43, %v6355_v52  ;;  %v15397_v9 = vadd.f32 %v9217_v44, %v6343_v48  ;;  %v9303_v49 = vpop.f32.mrb[38].mxu0  ;;  %9620 = vmatpush1.bf16.msra.mxu0 %v14425_v3  ;;  %v9219_v47 = vpop.f32.mrb[39].mxu1  ;;  %9535 = vmatprep.subr.bf16.mxu1 %v14440_v33  ;;  %v9656_v53 = vmax.f32 %v15395_v1, 0.0  ;;  %v6215_v1 = vld [vmem:[%s21281_s10 + $0xcb8] sm:$0xff]  ;;  %v6238_v43 = vld [vmem:[%s21281_s10 + $0xd70] sm:$0xff] }
0x1749   :  { %v15401_v14 = vadd.f32 %v9303_v49, %v6351_v54  ;;  %v15398_v58 = vadd.f32 %v9219_v47, %v6347_v59  ;;  %v9305_v13 = vpop.f32.mrb[39].mxu0  ;;  %9621 = vmatprep.subr.bf16.mxu0 %v14442_v5  ;;  %v9658_v6 = vmax.f32 %v15399_v19, 0.0  ;;  %v9657_v48 = vmax.f32 %v15396_v25, 0.0  ;;  %v6214_v5 = vld [vmem:[%s21281_s10 + $0xcb0] sm:$0xff]  ;;  %v6231_v44 = vld [vmem:[%s21281_s10 + $0xd38] sm:$0xff] }
0x174a   :  { %v9672_v18 = vmax.f32 %v15397_v9, 0.0  ;;  %v15402_v35 = vadd.f32 %v9305_v13, %v6355_v52  ;;  %v9659_v54 = vmax.f32 %v15400_v56, 0.0  ;;  %v14472_v52 = vcombine.high %v6198_v28, %v6206_v16  ;;  %v6230_v25 = vld [vmem:[%s21281_s10 + $0xd30] sm:$0xff] }
0x174b   :  { %v9674_v46 = vmax.f32 %v15401_v14, 0.0  ;;  %v9673_v34 = vmax.f32 %v15398_v58, 0.0  ;;  %9536 = vmatpush1.bf16.msra.mxu1 %v14439_v26  ;;  %v14488_v30 = vcombine.high %v6214_v5, %v6222_v15  ;;  %v14490_v19 = vcombine.high %v6215_v1, %v6223_v23  ;;  %v6239_v26 = vld [vmem:[%s21281_s10 + $0xd78] sm:$0xff]  ;;  %v6246_v47 = vld [vmem:[%s21281_s10 + $0xdb0] sm:$0xff] }
0x174c   :  { %v21081_v59 = vpack.c.bf16 %v9672_v18, %v9656_v53  ;;  %v9675_v45 = vmax.f32 %v15402_v35, 0.0  ;;  %9622 = vmatpush1.bf16.msra.mxu0 %v14441_v42  ;;  %9537 = vmatprep.subr.bf16.mxu1 %v14456_v31  ;;  %v14487_v42 = vcombine.low %v6214_v5, %v6222_v15  ;;  %v14489_v56 = vcombine.low %v6215_v1, %v6223_v23  ;;  %v6254_v31 = vld [vmem:[%s21281_s10 + $0xdf0] sm:$0xff]  ;;  %v6247_v14 = vld [vmem:[%s21281_s10 + $0xdb8] sm:$0xff] }
0x174d   :  { %v21083_v3 = vpack.c.bf16 %v9674_v46, %v9658_v6  ;;  %v21085_v33 = vpack.c.bf16 %v9673_v34, %v9657_v48  ;;  %9623 = vmatprep.subr.bf16.mxu0 %v14458_v61  ;;  %v14504_v9 = vcombine.high %v6230_v25, %v6238_v43  ;;  %v14506_v49 = vcombine.high %v6231_v44, %v6239_v26  ;;  %v6255_v58 = vld [vmem:[%s21281_s10 + $0xdf8] sm:$0xff]  ;;  %v6262_v16 = vld [vmem:[%s21281_s10 + $0xe30] sm:$0xff] }
0x174e   :  { %v21093_v24 = vpack.c.bf16 %v9675_v45, %v9659_v54  ;;  %v14503_v13 = vcombine.low %v6230_v25, %v6238_v43  ;;  %v14520_v61 = vcombine.high %v6246_v47, %v6254_v31  ;;  %v14522_v28 = vcombine.high %v6247_v14, %v6255_v58  ;;  %v6270_v53 = vld [vmem:[%s21281_s10 + $0xe70] sm:$0xff]  ;;  %v6263_v18 = vld [vmem:[%s21281_s10 + $0xe38] sm:$0xff] }
0x174f   :  { %9538 = vmatpush1.bf16.msra.mxu1 %v14455_v0  ;;  %v14505_v0 = vcombine.low %v6231_v44, %v6239_v26  ;;  %v6271_v35 = vld [vmem:[%s21281_s10 + $0xe78] sm:$0xff]  ;;  %v14521_v32 = vcombine.low %v6247_v14, %v6255_v58  ;;  %v14536_v27 = vcombine.high %v6262_v16, %v6270_v53  ;;  %v6278_v48 = vld [vmem:[%s21281_s10 + $0xeb0] sm:$0xff]  ;;  %v14535_v45 = vcombine.low %v6262_v16, %v6270_v53 }
0x1750   :  { %9624 = vmatpush1.bf16.msra.mxu0 %v14457_v20  ;;  %9539 = vmatprep.subr.bf16.mxu1 %v14472_v52  ;;  %v14519_v20 = vcombine.low %v6246_v47, %v6254_v31  ;;  %v14538_v6 = vcombine.high %v6263_v18, %v6271_v35  ;;  %v6286_v46 = vld [vmem:[%s21281_s10 + $0xef0] sm:$0xff]  ;;  %v6279_v34 = vld [vmem:[%s21281_s10 + $0xeb8] sm:$0xff]  ;;  %v14537_v52 = vcombine.low %v6263_v18, %v6271_v35 }
0x1751   :  { %9625 = vmatprep.subr.bf16.mxu0 %v14474_v39  ;;  %v6287_v54 = vld [vmem:[%s21281_s10 + $0xef8] sm:$0xff]  ;;  %v14552_v39 = vcombine.high %v6278_v48, %v6286_v46  ;;  %v6294_v15 = vld [vmem:[%s21281_s10 + $0xf30] sm:$0xff] }
0x1752   :  { %v14554_v5 = vcombine.high %v6279_v34, %v6287_v54  ;;  %v6302_v1 = vld [vmem:[%s21281_s10 + $0xf70] sm:$0xff]  ;;  %v6295_v23 = vld [vmem:[%s21281_s10 + $0xf38] sm:$0xff] }
0x1753   :  { %9540 = vmatpush1.bf16.msra.mxu1 %v14471_v55  ;;  %v6303_v55 = vld [vmem:[%s21281_s10 + $0xf78] sm:$0xff]  ;;  %v6310_v43 = vld [vmem:[%s21281_s10 + $0xfb0] sm:$0xff] }
0x1754   :  { %9626 = vmatpush1.bf16.msra.mxu0 %v14473_v11  ;;  %9541 = vmatprep.subr.bf16.mxu1 %v14488_v30  ;;  %v14551_v11 = vcombine.low %v6278_v48, %v6286_v46  ;;  %v14553_v30 = vcombine.low %v6279_v34, %v6287_v54  ;;  %v14570_v25 = vcombine.high %v6295_v23, %v6303_v55  ;;  %v6318_v44 = vld [vmem:[%s21281_s10 + $0xff0] sm:$0xff]  ;;  %v6311_v26 = vld [vmem:[%s21281_s10 + $0xfb8] sm:$0xff] }
0x1755   :  { %9627 = vmatprep.subr.bf16.mxu0 %v14490_v19  ;;  %v14568_v19 = vcombine.high %v6294_v15, %v6302_v1  ;;  %v14583_v31 = vcombine.low %v6310_v43, %v6318_v44  ;;  %v16364_v58 = vld [vmem:[#allocation3 + $0x4] ss:$16 sps:$4 sm:$0xff]   ;;  %v16373_v16 = vld [vmem:[#allocation3 + $0x2c] ss:$16 sps:$4 sm:$0xff]   ;;  %v16368_v53 = vld [vmem:[#allocation3 + $0x20] ss:$16 sps:$4 sm:$0xff]  }
0x1756   :  { %v16371_v18 = vld [vmem:[#allocation3 + $0x28] ss:$16 sps:$4 sm:$0xff]   ;;  %v16376_v35 = vld [vmem:[#allocation3 + $0x44] ss:$16 sps:$4 sm:$0xff]   ;;  %v16380_v48 = vld [vmem:[#allocation3 + $0x60] ss:$16 sps:$4 sm:$0xff]  }
0x1757   :  { %9542 = vmatpush1.bf16.msra.mxu1 %v14487_v42  ;;  %v6319_v42 = vld [vmem:[%s21281_s10 + $0xff8] sm:$0xff]  ;;  %v16388_v34 = vld [vmem:[#allocation3 + $0x84] ss:$16 sps:$4 sm:$0xff]  }
0x1758   :  { %9628 = vmatpush1.bf16.msra.mxu0 %v14489_v56  ;;  %9543 = vmatprep.subr.bf16.mxu1 %v14504_v9  ;;  %v14567_v56 = vcombine.low %v6294_v15, %v6302_v1  ;;  %v14569_v9 = vcombine.low %v6295_v23, %v6303_v55  ;;  %v14586_v47 = vcombine.high %v6311_v26, %v6319_v42  ;;  %v16383_v46 = vld [vmem:[#allocation3 + $0x68] ss:$16 sps:$4 sm:$0xff]   ;;  %v16391_v54 = vld [vmem:[#allocation3 + $0x8c] ss:$16 sps:$4 sm:$0xff]   ;;  %v16400_v1 = vld [vmem:[#allocation3 + $0xc4] ss:$16 sps:$4 sm:$0xff]  }
0x1759   :  { %9629 = vmatprep.subr.bf16.mxu0 %v14506_v49  ;;  %v14584_v49 = vcombine.high %v6310_v43, %v6318_v44  ;;  %v14585_v14 = vcombine.low %v6311_v26, %v6319_v42  ;;  %v16395_v15 = vld [vmem:[#allocation3 + $0xa8] ss:$16 sps:$4 sm:$0xff]   ;;  %v16403_v23 = vld [vmem:[#allocation3 + $0xcc] ss:$16 sps:$4 sm:$0xff]   ;;  %v16398_v55 = vld [vmem:[#allocation3 + $0xc0] ss:$16 sps:$4 sm:$0xff]  }
0x175a   :  { %v16407_v43 = vld [vmem:[#allocation3 + $0xe8] ss:$16 sps:$4 sm:$0xff]   ;;  %v16412_v44 = vld [vmem:[#allocation3 + $0x104] ss:$16 sps:$4 sm:$0xff]   ;;  %v16415_v26 = vld [vmem:[#allocation3 + $0x10c] ss:$16 sps:$4 sm:$0xff]  }
0x175b   :  { %9544 = vmatpush1.bf16.msra.mxu1 %v14503_v13  ;;  %v16367_v13 = vld [vmem:[#allocation3 + $0xc] ss:$16 sps:$4 sm:$0xff]   ;;  %v16410_v42 = vld [vmem:[#allocation3 + $0x100] ss:$16 sps:$4 sm:$0xff]  }
0x175c   :  { %9630 = vmatpush1.bf16.msra.mxu0 %v14505_v0  ;;  %9545 = vmatprep.subr.bf16.mxu1 %v14520_v61  ;;  %v16362_v0 = vld [vmem:[#allocation3] ss:$16 sps:$4 sm:$0xff]   ;;  %v16365_v61 = vld [vmem:[#allocation3 + $0x8] ss:$16 sps:$4 sm:$0xff]  }
0x175d   :  { %9631 = vmatprep.subr.bf16.mxu0 %v14522_v28  ;;  %v16370_v28 = vld [vmem:[#allocation3 + $0x24] ss:$16 sps:$4 sm:$0xff]  }
0x175f   :  { %9546 = vmatpush1.bf16.msra.mxu1 %v14519_v20  ;;  %v16379_v20 = vld [vmem:[#allocation3 + $0x4c] ss:$16 sps:$4 sm:$0xff]  }
0x1760   :  { %9632 = vmatpush1.bf16.msra.mxu0 %v14521_v32  ;;  %9547 = vmatprep.subr.bf16.mxu1 %v14536_v27  ;;  %v16374_v32 = vld [vmem:[#allocation3 + $0x40] ss:$16 sps:$4 sm:$0xff]   ;;  %v16377_v27 = vld [vmem:[#allocation3 + $0x48] ss:$16 sps:$4 sm:$0xff]  }
0x1761   :  { %9633 = vmatprep.subr.bf16.mxu0 %v14538_v6  ;;  %v16382_v6 = vld [vmem:[#allocation3 + $0x64] ss:$16 sps:$4 sm:$0xff]  }
0x1763   :  { %9548 = vmatpush1.bf16.msra.mxu1 %v14535_v45  ;;  %v16389_v45 = vld [vmem:[#allocation3 + $0x88] ss:$16 sps:$4 sm:$0xff]  }
0x1764   :  { %9634 = vmatpush1.bf16.msra.mxu0 %v14537_v52  ;;  %9549 = vmatprep.subr.bf16.mxu1 %v14552_v39  ;;  %v16394_v52 = vld [vmem:[#allocation3 + $0xa4] ss:$16 sps:$4 sm:$0xff]   ;;  %v16397_v39 = vld [vmem:[#allocation3 + $0xac] ss:$16 sps:$4 sm:$0xff]  }
0x1765   :  { %9635 = vmatprep.subr.bf16.mxu0 %v14554_v5  ;;  %v16392_v5 = vld [vmem:[#allocation3 + $0xa0] ss:$16 sps:$4 sm:$0xff]  }
0x1767   :  { %9550 = vmatpush1.bf16.msra.mxu1 %v14551_v11  ;;  %v16401_v11 = vld [vmem:[#allocation3 + $0xc8] ss:$16 sps:$4 sm:$0xff]  }
0x1768   :  { %9636 = vmatpush1.bf16.msra.mxu0 %v14553_v30  ;;  %9551 = vmatprep.subr.bf16.mxu1 %v14568_v19  ;;  %v16406_v30 = vld [vmem:[#allocation3 + $0xe4] ss:$16 sps:$4 sm:$0xff]   ;;  %v16409_v19 = vld [vmem:[#allocation3 + $0xec] ss:$16 sps:$4 sm:$0xff]  }
0x1769   :  { %9637 = vmatprep.subr.bf16.mxu0 %v14570_v25  ;;  %v16404_v25 = vld [vmem:[#allocation3 + $0xe0] ss:$16 sps:$4 sm:$0xff]  }
0x176b   :  { %9552 = vmatpush1.bf16.msra.mxu1 %v14567_v56  ;;  %v16413_v56 = vld [vmem:[#allocation3 + $0x108] ss:$16 sps:$4 sm:$0xff]  }
0x176c   :  { %9638 = vmatpush1.bf16.msra.mxu0 %v14569_v9  ;;  %9553 = vmatprep.subr.bf16.mxu1 %v14584_v49  ;;  %v16418_v9 = vld [vmem:[#allocation3 + $0x124] ss:$16 sps:$4 sm:$0xff]   ;;  %v16421_v49 = vld [vmem:[#allocation3 + $0x12c] ss:$16 sps:$4 sm:$0xff]  }
0x176d   :  { %9639 = vmatprep.subr.bf16.mxu0 %v14586_v47  ;;  %v16416_v47 = vld [vmem:[#allocation3 + $0x120] ss:$16 sps:$4 sm:$0xff]  }
0x176f   :  { %9554 = vmatpush1.bf16.msra.mxu1 %v14583_v31  ;;  %v16419_v31 = vld [vmem:[#allocation3 + $0x128] ss:$16 sps:$4 sm:$0xff]  }
0x1770   :  { %9640 = vmatpush1.bf16.msra.mxu0 %v14585_v14  ;;  %12794 = vmatprep.subr.bf16.mxu1 %v16364_v58  ;;  %v16424_v14 = vld [vmem:[#allocation3 + $0x144] ss:$16 sps:$4 sm:$0xff]   ;;  %v16427_v58 = vld [vmem:[#allocation3 + $0x14c] ss:$16 sps:$4 sm:$0xff]  }
0x1771   :  { %13138 = vmatprep.subr.bf16.mxu0 %v16367_v13  ;;  %v16422_v13 = vld [vmem:[#allocation3 + $0x140] ss:$16 sps:$4 sm:$0xff]  }
0x1772   :  { %9556 = vmatmul.mubr.bf16.vlgmr.msra.gmra.mrb[44].mxu1 %v19779_v22 }
0x1773   :  { %9642 = vmatmul.mubr.bf16.vlgmr.msra.gmra.mrb[44].mxu0 %v19779_v22  ;;  %12795 = vmatpush1.bf16.msra.mxu1 %v16362_v0  ;;  %v16385_v22 = vld [vmem:[#allocation3 + $0x6c] ss:$16 sps:$4 sm:$0xff]   ;;  %v16425_v0 = vld [vmem:[#allocation3 + $0x148] ss:$16 sps:$4 sm:$0xff]  }
0x1774   :  { %12826 = vmatprep.mubr.bf16.mxu1 %v20677_v21  ;;  %13139 = vmatpush1.bf16.msra.mxu0 %v16365_v61  ;;  %v16430_v61 = vld [vmem:[#allocation3 + $0x164] ss:$16 sps:$4 sm:$0xff]  }
0x1775   :  { %13170 = vmatprep.mubr.bf16.mxu0 %v20677_v21  ;;  %12796 = vmatprep.subr.bf16.mxu1 %v16370_v28  ;;  %v16386_v21 = vld [vmem:[#allocation3 + $0x80] ss:$16 sps:$4 sm:$0xff]   ;;  %v16433_v28 = vld [vmem:[#allocation3 + $0x16c] ss:$16 sps:$4 sm:$0xff]  }
0x1776   :  { %13140 = vmatprep.subr.bf16.mxu0 %v16373_v16  ;;  %v16428_v16 = vld [vmem:[#allocation3 + $0x160] ss:$16 sps:$4 sm:$0xff]  }
0x1777   :  { %12797 = vmatpush1.bf16.msra.mxu1 %v16368_v53  ;;  %v16431_v53 = vld [vmem:[#allocation3 + $0x168] ss:$16 sps:$4 sm:$0xff]  }
0x1778   :  { %13141 = vmatpush1.bf16.msra.mxu0 %v16371_v18  ;;  %12798 = vmatprep.subr.bf16.mxu1 %v16376_v35  ;;  %v16436_v18 = vld [vmem:[#allocation3 + $0x184] ss:$16 sps:$4 sm:$0xff]   ;;  %v16439_v35 = vld [vmem:[#allocation3 + $0x18c] ss:$16 sps:$4 sm:$0xff]  }
0x1779   :  { %13142 = vmatprep.subr.bf16.mxu0 %v16379_v20  ;;  %v16434_v20 = vld [vmem:[#allocation3 + $0x180] ss:$16 sps:$4 sm:$0xff]  }
0x177b   :  { %12799 = vmatpush1.bf16.msra.mxu1 %v16374_v32  ;;  %v16437_v32 = vld [vmem:[#allocation3 + $0x188] ss:$16 sps:$4 sm:$0xff]  }
0x177c   :  { %13143 = vmatpush1.bf16.msra.mxu0 %v16377_v27  ;;  %12800 = vmatprep.subr.bf16.mxu1 %v16382_v6  ;;  %v16442_v27 = vld [vmem:[#allocation3 + $0x1a4] ss:$16 sps:$4 sm:$0xff]   ;;  %v16445_v6 = vld [vmem:[#allocation3 + $0x1ac] ss:$16 sps:$4 sm:$0xff]  }
0x177d   :  { %13144 = vmatprep.subr.bf16.mxu0 %v16385_v22  ;;  %v16440_v22 = vld [vmem:[#allocation3 + $0x1a0] ss:$16 sps:$4 sm:$0xff]  }
0x177f   :  { %12801 = vmatpush1.bf16.msra.mxu1 %v16380_v48  ;;  %v16443_v48 = vld [vmem:[#allocation3 + $0x1a8] ss:$16 sps:$4 sm:$0xff]  }
0x1780   :  { %13145 = vmatpush1.bf16.msra.mxu0 %v16383_v46  ;;  %12802 = vmatprep.subr.bf16.mxu1 %v16388_v34  ;;  %v16448_v46 = vld [vmem:[#allocation3 + $0x1c4] ss:$16 sps:$4 sm:$0xff]   ;;  %v16451_v34 = vld [vmem:[#allocation3 + $0x1cc] ss:$16 sps:$4 sm:$0xff]  }
0x1781   :  { %13146 = vmatprep.subr.bf16.mxu0 %v16391_v54  ;;  %v16446_v54 = vld [vmem:[#allocation3 + $0x1c0] ss:$16 sps:$4 sm:$0xff]  }
0x1783   :  { %12803 = vmatpush1.bf16.msra.mxu1 %v16386_v21  ;;  %v16449_v21 = vld [vmem:[#allocation3 + $0x1c8] ss:$16 sps:$4 sm:$0xff]  }
0x1784   :  { %13147 = vmatpush1.bf16.msra.mxu0 %v16389_v45  ;;  %12804 = vmatprep.subr.bf16.mxu1 %v16394_v52  ;;  %v16454_v45 = vld [vmem:[#allocation3 + $0x1e4] ss:$16 sps:$4 sm:$0xff]   ;;  %v16457_v52 = vld [vmem:[#allocation3 + $0x1ec] ss:$16 sps:$4 sm:$0xff]  }
0x1785   :  { %13148 = vmatprep.subr.bf16.mxu0 %v16397_v39  ;;  %v16452_v39 = vld [vmem:[#allocation3 + $0x1e0] ss:$16 sps:$4 sm:$0xff]  }
0x1787   :  { %12805 = vmatpush1.bf16.msra.mxu1 %v16392_v5  ;;  %v16455_v5 = vld [vmem:[#allocation3 + $0x1e8] ss:$16 sps:$4 sm:$0xff]  }
0x1788   :  { %13149 = vmatpush1.bf16.msra.mxu0 %v16395_v15  ;;  %12806 = vmatprep.subr.bf16.mxu1 %v16400_v1  ;;  %v16460_v15 = vld [vmem:[#allocation3 + $0x204] ss:$16 sps:$4 sm:$0xff]   ;;  %v16463_v1 = vld [vmem:[#allocation3 + $0x20c] ss:$16 sps:$4 sm:$0xff]  }
0x1789   :  { %13150 = vmatprep.subr.bf16.mxu0 %v16403_v23  ;;  %v16458_v23 = vld [vmem:[#allocation3 + $0x200] ss:$16 sps:$4 sm:$0xff]  }
0x178b   :  { %12807 = vmatpush1.bf16.msra.mxu1 %v16398_v55  ;;  %v16461_v55 = vld [vmem:[#allocation3 + $0x208] ss:$16 sps:$4 sm:$0xff]  }
0x178c   :  { %13151 = vmatpush1.bf16.msra.mxu0 %v16401_v11  ;;  %12808 = vmatprep.subr.bf16.mxu1 %v16406_v30  ;;  %v16466_v11 = vld [vmem:[#allocation3 + $0x224] ss:$16 sps:$4 sm:$0xff]   ;;  %v16469_v30 = vld [vmem:[#allocation3 + $0x22c] ss:$16 sps:$4 sm:$0xff]  }
0x178d   :  { %13152 = vmatprep.subr.bf16.mxu0 %v16409_v19  ;;  %v16464_v19 = vld [vmem:[#allocation3 + $0x220] ss:$16 sps:$4 sm:$0xff]  }
0x178f   :  { %12809 = vmatpush1.bf16.msra.mxu1 %v16404_v25  ;;  %v16467_v25 = vld [vmem:[#allocation3 + $0x228] ss:$16 sps:$4 sm:$0xff]  }
0x1790   :  { %13153 = vmatpush1.bf16.msra.mxu0 %v16407_v43  ;;  %12810 = vmatprep.subr.bf16.mxu1 %v16412_v44  ;;  %v16472_v43 = vld [vmem:[#allocation3 + $0x244] ss:$16 sps:$4 sm:$0xff]   ;;  %v16475_v44 = vld [vmem:[#allocation3 + $0x24c] ss:$16 sps:$4 sm:$0xff]  }
0x1791   :  { %13154 = vmatprep.subr.bf16.mxu0 %v16415_v26  ;;  %v16470_v26 = vld [vmem:[#allocation3 + $0x240] ss:$16 sps:$4 sm:$0xff]  }
0x1793   :  { %12811 = vmatpush1.bf16.msra.mxu1 %v16410_v42  ;;  %v16473_v42 = vld [vmem:[#allocation3 + $0x248] ss:$16 sps:$4 sm:$0xff]  }
0x1794   :  { %13155 = vmatpush1.bf16.msra.mxu0 %v16413_v56  ;;  %12812 = vmatprep.subr.bf16.mxu1 %v16418_v9  ;;  %v16478_v56 = vld [vmem:[#allocation3 + $0x264] ss:$16 sps:$4 sm:$0xff]   ;;  %v16476_v9 = vld [vmem:[#allocation3 + $0x260] ss:$16 sps:$4 sm:$0xff]  }
0x1795   :  { %13156 = vmatprep.subr.bf16.mxu0 %v16421_v49  ;;  %v16479_v49 = vld [vmem:[#allocation3 + $0x268] ss:$16 sps:$4 sm:$0xff]  }
0x1797   :  { %12813 = vmatpush1.bf16.msra.mxu1 %v16416_v47  ;;  %v16484_v47 = vld [vmem:[#allocation3 + $0x284] ss:$16 sps:$4 sm:$0xff]  }
0x1798   :  { %13157 = vmatpush1.bf16.msra.mxu0 %v16419_v31  ;;  %12814 = vmatprep.subr.bf16.mxu1 %v16424_v14  ;;  %v16487_v31 = vld [vmem:[#allocation3 + $0x28c] ss:$16 sps:$4 sm:$0xff]  }
0x1799   :  { %13158 = vmatprep.subr.bf16.mxu0 %v16427_v58  ;;  %v21184_v14 = vld [vmem:[%s21282_s11 + $0x8] sm:$0xff] }
0x179a   :  { %v16485_v58 = vld [vmem:[#allocation3 + $0x288] ss:$16 sps:$4 sm:$0xff]  }
0x179b   :  { %12815 = vmatpush1.bf16.msra.mxu1 %v16422_v13  ;;  %v16490_v13 = vld [vmem:[#allocation3 + $0x2a4] ss:$16 sps:$4 sm:$0xff]  }
0x179c   :  { %13159 = vmatpush1.bf16.msra.mxu0 %v16425_v0  ;;  %12816 = vmatprep.subr.bf16.mxu1 %v16430_v61  ;;  %v16493_v0 = vld [vmem:[#allocation3 + $0x2ac] ss:$16 sps:$4 sm:$0xff]   ;;  %v6359_v61 = vrot.slane %v21184_v14, %v17653_v62 }
0x179d   :  { %13160 = vmatprep.subr.bf16.mxu0 %v16433_v28  ;;  %v6367_v28 = vrot.slane %v21184_v14, %v17641_v57 }
0x179f   :  { %12817 = vmatpush1.bf16.msra.mxu1 %v16428_v16  ;;  %v6363_v16 = vrot.slane %v21184_v14, %v17647_v60 }
0x17a0   :  { %13161 = vmatpush1.bf16.msra.mxu0 %v16431_v53  ;;  %12818 = vmatprep.subr.bf16.mxu1 %v16436_v18  ;;  %v16488_v53 = vld [vmem:[#allocation3 + $0x2a0] ss:$16 sps:$4 sm:$0xff]   ;;  %v6371_v18 = vrot.slane %v21184_v14, %v17658_v4 }
0x17a1   :  { %13162 = vmatprep.subr.bf16.mxu0 %v16439_v35  ;;  %v16491_v35 = vld [vmem:[#allocation3 + $0x2a8] ss:$16 sps:$4 sm:$0xff]  }
0x17a3   :  { %12819 = vmatpush1.bf16.msra.mxu1 %v16434_v20  ;;  %v16496_v20 = vld [vmem:[#allocation3 + $0x2c4] ss:$16 sps:$4 sm:$0xff]  }
0x17a4   :  { %13163 = vmatpush1.bf16.msra.mxu0 %v16437_v32  ;;  %12820 = vmatprep.subr.bf16.mxu1 %v16442_v27  ;;  %v16499_v27 = vld [vmem:[#allocation3 + $0x2cc] ss:$16 sps:$4 sm:$0xff]  }
0x17a5   :  { %13164 = vmatprep.subr.bf16.mxu0 %v16445_v6 }
0x17a7   :  { %12821 = vmatpush1.bf16.msra.mxu1 %v16440_v22 }
0x17a8   :  { %13165 = vmatpush1.bf16.msra.mxu0 %v16443_v48  ;;  %12822 = vmatprep.subr.bf16.mxu1 %v16448_v46 }
0x17a9   :  { %13166 = vmatprep.subr.bf16.mxu0 %v16451_v34 }
0x17ab   :  { %12823 = vmatpush1.bf16.msra.mxu1 %v16446_v54 }
0x17ac   :  { %13167 = vmatpush1.bf16.msra.mxu0 %v16449_v21  ;;  %12824 = vmatprep.subr.bf16.mxu1 %v16454_v45  ;;  %v16494_v45 = vld [vmem:[#allocation3 + $0x2c0] ss:$16 sps:$4 sm:$0xff]  }
0x17ad   :  { %13168 = vmatprep.subr.bf16.mxu0 %v16457_v52 }
0x17af   :  { %12825 = vmatpush1.bf16.msra.mxu1 %v16452_v39 }
0x17b0   :  { %13169 = vmatpush1.bf16.msra.mxu0 %v16455_v5  ;;  %12837 = vmatprep.subr.bf16.mxu1 %v16460_v15 }
0x17b1   :  { %13181 = vmatprep.subr.bf16.mxu0 %v16463_v1  ;;  %v16497_v1 = vld [vmem:[#allocation3 + $0x2c8] ss:$16 sps:$4 sm:$0xff]  }
0x17b2   :  { %12827 = vmatmul.mubr.bf16.vlgmr.msra.gmra.mrb[48].mxu1 %v20673_v50 }
0x17b3   :  { %13171 = vmatmul.mubr.bf16.vlgmr.msra.gmra.mrb[48].mxu0 %v20673_v50  ;;  %12838 = vmatpush1.bf16.msra.mxu1 %v16458_v23  ;;  %v16481_v50 = vld [vmem:[#allocation3 + $0x26c] ss:$16 sps:$4 sm:$0xff]   ;;  %v16502_v23 = vld [vmem:[#allocation3 + $0x2e4] ss:$16 sps:$4 sm:$0xff]  }
0x17b4   :  { %12869 = vmatprep.mubr.bf16.mxu1 %v20679_v2  ;;  %13182 = vmatpush1.bf16.msra.mxu0 %v16461_v55 }
0x17b5   :  { %13213 = vmatprep.mubr.bf16.mxu0 %v20679_v2  ;;  %12839 = vmatprep.subr.bf16.mxu1 %v16466_v11  ;;  %v16482_v2 = vld [vmem:[#allocation3 + $0x280] ss:$16 sps:$4 sm:$0xff]  }
0x17b6   :  { %13183 = vmatprep.subr.bf16.mxu0 %v16469_v30 }
0x17b7   :  { %12840 = vmatpush1.bf16.msra.mxu1 %v16464_v19  ;;  %v16505_v19 = vld [vmem:[#allocation3 + $0x2ec] ss:$16 sps:$4 sm:$0xff]  }
0x17b8   :  { %13184 = vmatpush1.bf16.msra.mxu0 %v16467_v25  ;;  %12841 = vmatprep.subr.bf16.mxu1 %v16472_v43 }
0x17b9   :  { %13185 = vmatprep.subr.bf16.mxu0 %v16475_v44 }
0x17bb   :  { %12842 = vmatpush1.bf16.msra.mxu1 %v16470_v26 }
0x17bc   :  { %13186 = vmatpush1.bf16.msra.mxu0 %v16473_v42  ;;  %12843 = vmatprep.subr.bf16.mxu1 %v16478_v56 }
0x17bd   :  { %13187 = vmatprep.subr.bf16.mxu0 %v16481_v50 }
0x17bf   :  { %12844 = vmatpush1.bf16.msra.mxu1 %v16476_v9  ;;  %v16500_v9 = vld [vmem:[#allocation3 + $0x2e0] ss:$16 sps:$4 sm:$0xff]  }
0x17c0   :  { %13188 = vmatpush1.bf16.msra.mxu0 %v16479_v49  ;;  %12845 = vmatprep.subr.bf16.mxu1 %v16484_v47 }
0x17c1   :  { %13189 = vmatprep.subr.bf16.mxu0 %v16487_v31 }
0x17c3   :  { %12846 = vmatpush1.bf16.msra.mxu1 %v16482_v2  ;;  %v16503_v2 = vld [vmem:[#allocation3 + $0x2e8] ss:$16 sps:$4 sm:$0xff]  }
0x17c4   :  { %13190 = vmatpush1.bf16.msra.mxu0 %v16485_v58  ;;  %12847 = vmatprep.subr.bf16.mxu1 %v16490_v13  ;;  %v16508_v58 = vld [vmem:[#allocation3 + $0x304] ss:$16 sps:$4 sm:$0xff]  }
0x17c5   :  { %v9385_v32 = vpop.f32.mrb[40].mxu1  ;;  %13191 = vmatprep.subr.bf16.mxu0 %v16493_v0 }
0x17c6   :  { %v15403_v6 = vadd.f32 %v9385_v32, %v6359_v61  ;;  %v9471_v22 = vpop.f32.mrb[40].mxu0  ;;  %v9387_v48 = vpop.f32.mrb[41].mxu1  ;;  %v16515_v32 = vld [vmem:[#allocation3 + $0x328] ss:$16 sps:$4 sm:$0xff]  }
0x17c7   :  { %v15407_v46 = vadd.f32 %v9471_v22, %v6367_v28  ;;  %v15404_v34 = vadd.f32 %v9387_v48, %v6363_v16  ;;  %v9473_v54 = vpop.f32.mrb[41].mxu0  ;;  %v9389_v21 = vpop.f32.mrb[42].mxu1  ;;  %12848 = vmatpush1.bf16.msra.mxu1 %v16488_v53  ;;  %v16509_v53 = vld [vmem:[#allocation3 + $0x308] ss:$16 sps:$4 sm:$0xff]   ;;  %v16518_v22 = vld [vmem:[#allocation3 + $0x340] ss:$16 sps:$4 sm:$0xff]  }
0x17c8   :  { %v15408_v52 = vadd.f32 %v9473_v54, %v6371_v18  ;;  %v15405_v39 = vadd.f32 %v9389_v21, %v6359_v61  ;;  %v9475_v5 = vpop.f32.mrb[42].mxu0  ;;  %13192 = vmatpush1.bf16.msra.mxu0 %v16491_v35  ;;  %v9391_v15 = vpop.f32.mrb[43].mxu1  ;;  %12849 = vmatprep.subr.bf16.mxu1 %v16496_v20  ;;  %v9660_v25 = vmax.f32 %v15403_v6, 0.0  ;;  %v16511_v61 = vld [vmem:[#allocation3 + $0x30c] ss:$16 sps:$4 sm:$0xff]  }
0x17c9   :  { %v15409_v55 = vadd.f32 %v9475_v5, %v6367_v28  ;;  %v15406_v11 = vadd.f32 %v9391_v15, %v6363_v16  ;;  %v9477_v30 = vpop.f32.mrb[43].mxu0  ;;  %13193 = vmatprep.subr.bf16.mxu0 %v16499_v27  ;;  %v9662_v26 = vmax.f32 %v15407_v46, 0.0  ;;  %v9661_v42 = vmax.f32 %v15404_v34, 0.0  ;;  %v16506_v16 = vld [vmem:[#allocation3 + $0x300] ss:$16 sps:$4 sm:$0xff]  }
0x17ca   :  { %v9676_v43 = vmax.f32 %v15405_v39, 0.0  ;;  %v15410_v44 = vadd.f32 %v9477_v30, %v6371_v18  ;;  %v9663_v49 = vmax.f32 %v15408_v52, 0.0  ;;  %v16514_v18 = vld [vmem:[#allocation3 + $0x324] ss:$16 sps:$4 sm:$0xff]   ;;  %v16517_v35 = vld [vmem:[#allocation3 + $0x32c] ss:$16 sps:$4 sm:$0xff]  }
0x17cb   :  { %v9678_v56 = vmax.f32 %v15409_v55, 0.0  ;;  %v9677_v50 = vmax.f32 %v15406_v11, 0.0  ;;  %12850 = vmatpush1.bf16.msra.mxu1 %v16494_v45  ;;  %v16512_v20 = vld [vmem:[#allocation3 + $0x320] ss:$16 sps:$4 sm:$0xff]   ;;  %v16520_v27 = vld [vmem:[#allocation3 + $0x344] ss:$16 sps:$4 sm:$0xff]  }
0x17cc   :  { %v21194_v47 = vpack.c.bf16 %v9676_v43, %v9660_v25  ;;  %v9679_v31 = vmax.f32 %v15410_v44, 0.0  ;;  %13194 = vmatpush1.bf16.msra.mxu0 %v16497_v1  ;;  %12851 = vmatprep.subr.bf16.mxu1 %v16502_v23  ;;  %v16523_v6 = vld [vmem:[#allocation3 + $0x34c] ss:$16 sps:$4 sm:$0xff]   ;;  %v16521_v48 = vld [vmem:[#allocation3 + $0x348] ss:$16 sps:$4 sm:$0xff]  }
0x17cd   :  { %v21196_v13 = vpack.c.bf16 %v9678_v56, %v9662_v26  ;;  %v21198_v0 = vpack.c.bf16 %v9677_v50, %v9661_v42  ;;  %13195 = vmatprep.subr.bf16.mxu0 %v16505_v19  ;;  %v16526_v46 = vld [vmem:[#allocation3 + $0x364] ss:$16 sps:$4 sm:$0xff]   ;;  %v16529_v34 = vld [vmem:[#allocation3 + $0x36c] ss:$16 sps:$4 sm:$0xff]   ;;  %v16524_v54 = vld [vmem:[#allocation3 + $0x360] ss:$16 sps:$4 sm:$0xff]  }
0x17ce   :  { %v21200_v28 = vpack.c.bf16 %v9679_v31, %v9663_v49  ;;  %v16527_v21 = vld [vmem:[#allocation3 + $0x368] ss:$16 sps:$4 sm:$0xff]   ;;  %v16532_v45 = vld [vmem:[#allocation3 + $0x384] ss:$16 sps:$4 sm:$0xff]   ;;  %v16535_v52 = vld [vmem:[#allocation3 + $0x38c] ss:$16 sps:$4 sm:$0xff]  }
0x17cf   :  { %12852 = vmatpush1.bf16.msra.mxu1 %v16500_v9  ;;  %v16530_v39 = vld [vmem:[#allocation3 + $0x380] ss:$16 sps:$4 sm:$0xff]   ;;  %v16533_v5 = vld [vmem:[#allocation3 + $0x388] ss:$16 sps:$4 sm:$0xff]   ;;  %v16538_v15 = vld [vmem:[#allocation3 + $0x3a4] ss:$16 sps:$4 sm:$0xff]  }
0x17d0   :  { %13196 = vmatpush1.bf16.msra.mxu0 %v16503_v2  ;;  %12853 = vmatprep.subr.bf16.mxu1 %v16508_v58  ;;  %v16541_v1 = vld [vmem:[#allocation3 + $0x3ac] ss:$16 sps:$4 sm:$0xff]   ;;  %v16536_v23 = vld [vmem:[#allocation3 + $0x3a0] ss:$16 sps:$4 sm:$0xff]   ;;  %v16539_v55 = vld [vmem:[#allocation3 + $0x3a8] ss:$16 sps:$4 sm:$0xff]  }
0x17d1   :  { %13197 = vmatprep.subr.bf16.mxu0 %v16511_v61  ;;  %v16544_v11 = vld [vmem:[#allocation3 + $0x3c4] ss:$16 sps:$4 sm:$0xff]   ;;  %v16547_v30 = vld [vmem:[#allocation3 + $0x3cc] ss:$16 sps:$4 sm:$0xff]   ;;  %v16542_v19 = vld [vmem:[#allocation3 + $0x3c0] ss:$16 sps:$4 sm:$0xff]  }
0x17d2   :  { %v16545_v25 = vld [vmem:[#allocation3 + $0x3c8] ss:$16 sps:$4 sm:$0xff]   ;;  %v16550_v43 = vld [vmem:[#allocation3 + $0x3e4] ss:$16 sps:$4 sm:$0xff]   ;;  %v16553_v44 = vld [vmem:[#allocation3 + $0x3ec] ss:$16 sps:$4 sm:$0xff]  }
0x17d3   :  { %12854 = vmatpush1.bf16.msra.mxu1 %v16506_v16  ;;  %v16548_v26 = vld [vmem:[#allocation3 + $0x3e0] ss:$16 sps:$4 sm:$0xff]   ;;  %v16551_v42 = vld [vmem:[#allocation3 + $0x3e8] ss:$16 sps:$4 sm:$0xff]   ;;  %v16556_v56 = vld [vmem:[#allocation3 + $0x404] ss:$16 sps:$4 sm:$0xff]  }
0x17d4   :  { %13198 = vmatpush1.bf16.msra.mxu0 %v16509_v53  ;;  %12855 = vmatprep.subr.bf16.mxu1 %v16514_v18  ;;  %v16559_v50 = vld [vmem:[#allocation3 + $0x40c] ss:$16 sps:$4 sm:$0xff]   ;;  %v16554_v9 = vld [vmem:[#allocation3 + $0x400] ss:$16 sps:$4 sm:$0xff]   ;;  %v16557_v49 = vld [vmem:[#allocation3 + $0x408] ss:$16 sps:$4 sm:$0xff]  }
0x17d5   :  { %13199 = vmatprep.subr.bf16.mxu0 %v16517_v35  ;;  %v16562_v31 = vld [vmem:[#allocation3 + $0x424] ss:$16 sps:$4 sm:$0xff]   ;;  %v16565_v2 = vld [vmem:[#allocation3 + $0x42c] ss:$16 sps:$4 sm:$0xff]   ;;  %v16560_v58 = vld [vmem:[#allocation3 + $0x420] ss:$16 sps:$4 sm:$0xff]  }
0x17d6   :  { %v16563_v61 = vld [vmem:[#allocation3 + $0x428] ss:$16 sps:$4 sm:$0xff]   ;;  %v16568_v16 = vld [vmem:[#allocation3 + $0x444] ss:$16 sps:$4 sm:$0xff]   ;;  %v16571_v53 = vld [vmem:[#allocation3 + $0x44c] ss:$16 sps:$4 sm:$0xff]  }
0x17d7   :  { %12856 = vmatpush1.bf16.msra.mxu1 %v16512_v20  ;;  %v16566_v18 = vld [vmem:[#allocation3 + $0x440] ss:$16 sps:$4 sm:$0xff]   ;;  %v16569_v35 = vld [vmem:[#allocation3 + $0x448] ss:$16 sps:$4 sm:$0xff]   ;;  %v16574_v20 = vld [vmem:[#allocation3 + $0x464] ss:$16 sps:$4 sm:$0xff]  }
0x17d8   :  { %13200 = vmatpush1.bf16.msra.mxu0 %v16515_v32  ;;  %12857 = vmatprep.subr.bf16.mxu1 %v16520_v27  ;;  %v16572_v32 = vld [vmem:[#allocation3 + $0x460] ss:$16 sps:$4 sm:$0xff]   ;;  %v16575_v27 = vld [vmem:[#allocation3 + $0x468] ss:$16 sps:$4 sm:$0xff]  }
0x17d9   :  { %13201 = vmatprep.subr.bf16.mxu0 %v16523_v6  ;;  %v16580_v6 = vld [vmem:[#allocation3 + $0x484] ss:$16 sps:$4 sm:$0xff]  }
0x17db   :  { %12858 = vmatpush1.bf16.msra.mxu1 %v16518_v22  ;;  %v16583_v22 = vld [vmem:[#allocation3 + $0x48c] ss:$16 sps:$4 sm:$0xff]  }
0x17dc   :  { %13202 = vmatpush1.bf16.msra.mxu0 %v16521_v48  ;;  %12859 = vmatprep.subr.bf16.mxu1 %v16526_v46  ;;  %v16581_v48 = vld [vmem:[#allocation3 + $0x488] ss:$16 sps:$4 sm:$0xff]   ;;  %v16586_v46 = vld [vmem:[#allocation3 + $0x4a4] ss:$16 sps:$4 sm:$0xff]  }
0x17dd   :  { %13203 = vmatprep.subr.bf16.mxu0 %v16529_v34  ;;  %v16589_v34 = vld [vmem:[#allocation3 + $0x4ac] ss:$16 sps:$4 sm:$0xff]  }
0x17df   :  { %12860 = vmatpush1.bf16.msra.mxu1 %v16524_v54  ;;  %v16584_v54 = vld [vmem:[#allocation3 + $0x4a0] ss:$16 sps:$4 sm:$0xff]  }
0x17e0   :  { %13204 = vmatpush1.bf16.msra.mxu0 %v16527_v21  ;;  %12861 = vmatprep.subr.bf16.mxu1 %v16532_v45  ;;  %v16587_v21 = vld [vmem:[#allocation3 + $0x4a8] ss:$16 sps:$4 sm:$0xff]   ;;  %v16592_v45 = vld [vmem:[#allocation3 + $0x4c4] ss:$16 sps:$4 sm:$0xff]  }
0x17e1   :  { %13205 = vmatprep.subr.bf16.mxu0 %v16535_v52  ;;  %v16595_v52 = vld [vmem:[#allocation3 + $0x4cc] ss:$16 sps:$4 sm:$0xff]  }
0x17e3   :  { %12862 = vmatpush1.bf16.msra.mxu1 %v16530_v39  ;;  %v16590_v39 = vld [vmem:[#allocation3 + $0x4c0] ss:$16 sps:$4 sm:$0xff]  }
0x17e4   :  { %13206 = vmatpush1.bf16.msra.mxu0 %v16533_v5  ;;  %12863 = vmatprep.subr.bf16.mxu1 %v16538_v15  ;;  %v16593_v5 = vld [vmem:[#allocation3 + $0x4c8] ss:$16 sps:$4 sm:$0xff]   ;;  %v16598_v15 = vld [vmem:[#allocation3 + $0x4e4] ss:$16 sps:$4 sm:$0xff]  }
0x17e5   :  { %13207 = vmatprep.subr.bf16.mxu0 %v16541_v1  ;;  %v16601_v1 = vld [vmem:[#allocation3 + $0x4ec] ss:$16 sps:$4 sm:$0xff]  }
0x17e7   :  { %12864 = vmatpush1.bf16.msra.mxu1 %v16536_v23  ;;  %v16596_v23 = vld [vmem:[#allocation3 + $0x4e0] ss:$16 sps:$4 sm:$0xff]  }
0x17e8   :  { %13208 = vmatpush1.bf16.msra.mxu0 %v16539_v55  ;;  %12865 = vmatprep.subr.bf16.mxu1 %v16544_v11  ;;  %v16599_v55 = vld [vmem:[#allocation3 + $0x4e8] ss:$16 sps:$4 sm:$0xff]   ;;  %v16604_v11 = vld [vmem:[#allocation3 + $0x504] ss:$16 sps:$4 sm:$0xff]  }
0x17e9   :  { %13209 = vmatprep.subr.bf16.mxu0 %v16547_v30  ;;  %v16607_v30 = vld [vmem:[#allocation3 + $0x50c] ss:$16 sps:$4 sm:$0xff]  }
0x17eb   :  { %12866 = vmatpush1.bf16.msra.mxu1 %v16542_v19  ;;  %v16602_v19 = vld [vmem:[#allocation3 + $0x500] ss:$16 sps:$4 sm:$0xff]  }
0x17ec   :  { %13210 = vmatpush1.bf16.msra.mxu0 %v16545_v25  ;;  %12867 = vmatprep.subr.bf16.mxu1 %v16550_v43  ;;  %v16605_v25 = vld [vmem:[#allocation3 + $0x508] ss:$16 sps:$4 sm:$0xff]   ;;  %v16610_v43 = vld [vmem:[#allocation3 + $0x524] ss:$16 sps:$4 sm:$0xff]  }
0x17ed   :  { %13211 = vmatprep.subr.bf16.mxu0 %v16553_v44  ;;  %v16613_v44 = vld [vmem:[#allocation3 + $0x52c] ss:$16 sps:$4 sm:$0xff]  }
0x17ef   :  { %12868 = vmatpush1.bf16.msra.mxu1 %v16548_v26  ;;  %v16608_v26 = vld [vmem:[#allocation3 + $0x520] ss:$16 sps:$4 sm:$0xff]  }
0x17f0   :  { %13212 = vmatpush1.bf16.msra.mxu0 %v16551_v42  ;;  %12880 = vmatprep.subr.bf16.mxu1 %v16556_v56  ;;  %v16611_v42 = vld [vmem:[#allocation3 + $0x528] ss:$16 sps:$4 sm:$0xff]   ;;  %v16616_v56 = vld [vmem:[#allocation3 + $0x544] ss:$16 sps:$4 sm:$0xff]  }
0x17f1   :  { %13224 = vmatprep.subr.bf16.mxu0 %v16559_v50  ;;  %v16619_v50 = vld [vmem:[#allocation3 + $0x54c] ss:$16 sps:$4 sm:$0xff]  }
0x17f2   :  { %12870 = vmatmul.mubr.bf16.vlgmr.msra.gmra.mrb[48].mxu1 %v20675_v8 }
0x17f3   :  { %13214 = vmatmul.mubr.bf16.vlgmr.msra.gmra.mrb[48].mxu0 %v20675_v8  ;;  %12881 = vmatpush1.bf16.msra.mxu1 %v16554_v9  ;;  %v16577_v8 = vld [vmem:[#allocation3 + $0x46c] ss:$16 sps:$4 sm:$0xff]   ;;  %v16614_v9 = vld [vmem:[#allocation3 + $0x540] ss:$16 sps:$4 sm:$0xff]  }
0x17f4   :  { %12912 = vmatprep.mubr.bf16.mxu1 %v21085_v33  ;;  %13225 = vmatpush1.bf16.msra.mxu0 %v16557_v49  ;;  %v16617_v49 = vld [vmem:[#allocation3 + $0x548] ss:$16 sps:$4 sm:$0xff]  }
0x17f5   :  { %13256 = vmatprep.mubr.bf16.mxu0 %v21085_v33  ;;  %12882 = vmatprep.subr.bf16.mxu1 %v16562_v31  ;;  %v16578_v33 = vld [vmem:[#allocation3 + $0x480] ss:$16 sps:$4 sm:$0xff]   ;;  %v16622_v31 = vld [vmem:[#allocation3 + $0x564] ss:$16 sps:$4 sm:$0xff]  }
0x17f6   :  { %13226 = vmatprep.subr.bf16.mxu0 %v16565_v2  ;;  %v16625_v2 = vld [vmem:[#allocation3 + $0x56c] ss:$16 sps:$4 sm:$0xff]  }
0x17f7   :  { %12883 = vmatpush1.bf16.msra.mxu1 %v16560_v58  ;;  %v16620_v58 = vld [vmem:[#allocation3 + $0x560] ss:$16 sps:$4 sm:$0xff]  }
0x17f8   :  { %13227 = vmatpush1.bf16.msra.mxu0 %v16563_v61  ;;  %12884 = vmatprep.subr.bf16.mxu1 %v16568_v16  ;;  %v16623_v61 = vld [vmem:[#allocation3 + $0x568] ss:$16 sps:$4 sm:$0xff]   ;;  %v16628_v16 = vld [vmem:[#allocation3 + $0x584] ss:$16 sps:$4 sm:$0xff]  }
0x17f9   :  { %13228 = vmatprep.subr.bf16.mxu0 %v16571_v53  ;;  %v16631_v53 = vld [vmem:[#allocation3 + $0x58c] ss:$16 sps:$4 sm:$0xff]  }
0x17fb   :  { %12885 = vmatpush1.bf16.msra.mxu1 %v16566_v18  ;;  %v16626_v18 = vld [vmem:[#allocation3 + $0x580] ss:$16 sps:$4 sm:$0xff]  }
0x17fc   :  { %13229 = vmatpush1.bf16.msra.mxu0 %v16569_v35  ;;  %12886 = vmatprep.subr.bf16.mxu1 %v16574_v20  ;;  %v16629_v35 = vld [vmem:[#allocation3 + $0x588] ss:$16 sps:$4 sm:$0xff]   ;;  %v16634_v20 = vld [vmem:[#allocation3 + $0x5a4] ss:$16 sps:$4 sm:$0xff]  }
0x17fd   :  { %13230 = vmatprep.subr.bf16.mxu0 %v16577_v8  ;;  %v16637_v8 = vld [vmem:[#allocation3 + $0x5ac] ss:$16 sps:$4 sm:$0xff]  }
0x17ff   :  { %12887 = vmatpush1.bf16.msra.mxu1 %v16572_v32  ;;  %v16632_v32 = vld [vmem:[#allocation3 + $0x5a0] ss:$16 sps:$4 sm:$0xff]  }
0x1800   :  { %13231 = vmatpush1.bf16.msra.mxu0 %v16575_v27  ;;  %12888 = vmatprep.subr.bf16.mxu1 %v16580_v6  ;;  %v16635_v27 = vld [vmem:[#allocation3 + $0x5a8] ss:$16 sps:$4 sm:$0xff]   ;;  %v16640_v6 = vld [vmem:[#allocation3 + $0x5c4] ss:$16 sps:$4 sm:$0xff]  }
0x1801   :  { %13232 = vmatprep.subr.bf16.mxu0 %v16583_v22  ;;  %v16643_v22 = vld [vmem:[#allocation3 + $0x5cc] ss:$16 sps:$4 sm:$0xff]  }
0x1803   :  { %12889 = vmatpush1.bf16.msra.mxu1 %v16578_v33  ;;  %v16638_v33 = vld [vmem:[#allocation3 + $0x5c0] ss:$16 sps:$4 sm:$0xff]  }
0x1804   :  { %13233 = vmatpush1.bf16.msra.mxu0 %v16581_v48  ;;  %12890 = vmatprep.subr.bf16.mxu1 %v16586_v46  ;;  %v16641_v48 = vld [vmem:[#allocation3 + $0x5c8] ss:$16 sps:$4 sm:$0xff]   ;;  %v16646_v46 = vld [vmem:[#allocation3 + $0x5e4] ss:$16 sps:$4 sm:$0xff]  }
0x1805   :  { %13234 = vmatprep.subr.bf16.mxu0 %v16589_v34  ;;  %v16649_v34 = vld [vmem:[#allocation3 + $0x5ec] ss:$16 sps:$4 sm:$0xff]  }
0x1807   :  { %12891 = vmatpush1.bf16.msra.mxu1 %v16584_v54  ;;  %v16644_v54 = vld [vmem:[#allocation3 + $0x5e0] ss:$16 sps:$4 sm:$0xff]  }
0x1808   :  { %13235 = vmatpush1.bf16.msra.mxu0 %v16587_v21  ;;  %12892 = vmatprep.subr.bf16.mxu1 %v16592_v45  ;;  %v16647_v21 = vld [vmem:[#allocation3 + $0x5e8] ss:$16 sps:$4 sm:$0xff]   ;;  %v16652_v45 = vld [vmem:[#allocation3 + $0x604] ss:$16 sps:$4 sm:$0xff]  }
0x1809   :  { %13236 = vmatprep.subr.bf16.mxu0 %v16595_v52  ;;  %v16655_v52 = vld [vmem:[#allocation3 + $0x60c] ss:$16 sps:$4 sm:$0xff]  }
0x180b   :  { %12893 = vmatpush1.bf16.msra.mxu1 %v16590_v39  ;;  %v16650_v39 = vld [vmem:[#allocation3 + $0x600] ss:$16 sps:$4 sm:$0xff]  }
0x180c   :  { %13237 = vmatpush1.bf16.msra.mxu0 %v16593_v5  ;;  %12894 = vmatprep.subr.bf16.mxu1 %v16598_v15  ;;  %v16653_v5 = vld [vmem:[#allocation3 + $0x608] ss:$16 sps:$4 sm:$0xff]   ;;  %v16658_v15 = vld [vmem:[#allocation3 + $0x624] ss:$16 sps:$4 sm:$0xff]  }
0x180d   :  { %13238 = vmatprep.subr.bf16.mxu0 %v16601_v1  ;;  %v16661_v1 = vld [vmem:[#allocation3 + $0x62c] ss:$16 sps:$4 sm:$0xff]  }
0x180f   :  { %12895 = vmatpush1.bf16.msra.mxu1 %v16596_v23  ;;  %v16656_v23 = vld [vmem:[#allocation3 + $0x620] ss:$16 sps:$4 sm:$0xff]  }
0x1810   :  { %13239 = vmatpush1.bf16.msra.mxu0 %v16599_v55  ;;  %12896 = vmatprep.subr.bf16.mxu1 %v16604_v11  ;;  %v16659_v55 = vld [vmem:[#allocation3 + $0x628] ss:$16 sps:$4 sm:$0xff]   ;;  %v16664_v11 = vld [vmem:[#allocation3 + $0x644] ss:$16 sps:$4 sm:$0xff]  }
0x1811   :  { %13240 = vmatprep.subr.bf16.mxu0 %v16607_v30  ;;  %v16667_v30 = vld [vmem:[#allocation3 + $0x64c] ss:$16 sps:$4 sm:$0xff]  }
0x1813   :  { %12897 = vmatpush1.bf16.msra.mxu1 %v16602_v19  ;;  %v16662_v19 = vld [vmem:[#allocation3 + $0x640] ss:$16 sps:$4 sm:$0xff]  }
0x1814   :  { %13241 = vmatpush1.bf16.msra.mxu0 %v16605_v25  ;;  %12898 = vmatprep.subr.bf16.mxu1 %v16610_v43  ;;  %v16665_v25 = vld [vmem:[#allocation3 + $0x648] ss:$16 sps:$4 sm:$0xff]   ;;  %v16670_v43 = vld [vmem:[#allocation3 + $0x664] ss:$16 sps:$4 sm:$0xff]  }
0x1815   :  { %13242 = vmatprep.subr.bf16.mxu0 %v16613_v44  ;;  %v16668_v44 = vld [vmem:[#allocation3 + $0x660] ss:$16 sps:$4 sm:$0xff]  }
0x1817   :  { %12899 = vmatpush1.bf16.msra.mxu1 %v16608_v26  ;;  %v16671_v26 = vld [vmem:[#allocation3 + $0x668] ss:$16 sps:$4 sm:$0xff]  }
0x1818   :  { %13243 = vmatpush1.bf16.msra.mxu0 %v16611_v42  ;;  %12900 = vmatprep.subr.bf16.mxu1 %v16616_v56  ;;  %v16676_v42 = vld [vmem:[#allocation3 + $0x684] ss:$16 sps:$4 sm:$0xff]   ;;  %v16679_v56 = vld [vmem:[#allocation3 + $0x68c] ss:$16 sps:$4 sm:$0xff]  }
0x1819   :  { %13244 = vmatprep.subr.bf16.mxu0 %v16619_v50  ;;  %v16677_v50 = vld [vmem:[#allocation3 + $0x688] ss:$16 sps:$4 sm:$0xff]  }
0x181b   :  { %12901 = vmatpush1.bf16.msra.mxu1 %v16614_v9  ;;  %v16682_v9 = vld [vmem:[#allocation3 + $0x6a4] ss:$16 sps:$4 sm:$0xff]  }
0x181c   :  { %13245 = vmatpush1.bf16.msra.mxu0 %v16617_v49  ;;  %12902 = vmatprep.subr.bf16.mxu1 %v16622_v31  ;;  %v16685_v49 = vld [vmem:[#allocation3 + $0x6ac] ss:$16 sps:$4 sm:$0xff]   ;;  %v6375_v31 = vrot.slane %v21184_v14, %v18705_v36 }
0x181d   :  { %13246 = vmatprep.subr.bf16.mxu0 %v16625_v2  ;;  %v6383_v2 = vrot.slane %v21184_v14, %v18708_v37 }
0x181f   :  { %12903 = vmatpush1.bf16.msra.mxu1 %v16620_v58  ;;  %v6379_v58 = vrot.slane %v21184_v14, %v18711_v38  ;;  %v16686_v38 = vld [vmem:[#allocation3 + $0x6c0] ss:$16 sps:$4 sm:$0xff]  }
0x1820   :  { %13247 = vmatpush1.bf16.msra.mxu0 %v16623_v61  ;;  %12904 = vmatprep.subr.bf16.mxu1 %v16628_v16  ;;  %v16680_v61 = vld [vmem:[#allocation3 + $0x6a0] ss:$16 sps:$4 sm:$0xff]   ;;  %v6387_v16 = vrot.slane %v21184_v14, %v18714_v40  ;;  %v16689_v14 = vld [vmem:[#allocation3 + $0x6c8] ss:$16 sps:$4 sm:$0xff]  }
0x1821   :  { %13248 = vmatprep.subr.bf16.mxu0 %v16631_v53  ;;  %v16683_v53 = vld [vmem:[#allocation3 + $0x6a8] ss:$16 sps:$4 sm:$0xff]  }
0x1823   :  { %12905 = vmatpush1.bf16.msra.mxu1 %v16626_v18  ;;  %v16688_v18 = vld [vmem:[#allocation3 + $0x6c4] ss:$16 sps:$4 sm:$0xff]  }
0x1824   :  { %13249 = vmatpush1.bf16.msra.mxu0 %v16629_v35  ;;  %12906 = vmatprep.subr.bf16.mxu1 %v16634_v20  ;;  %v16691_v20 = vld [vmem:[#allocation3 + $0x6cc] ss:$16 sps:$4 sm:$0xff]  }
0x1825   :  { %13250 = vmatprep.subr.bf16.mxu0 %v16637_v8 }
0x1827   :  { %12907 = vmatpush1.bf16.msra.mxu1 %v16632_v32 }
0x1828   :  { %13251 = vmatpush1.bf16.msra.mxu0 %v16635_v27  ;;  %12908 = vmatprep.subr.bf16.mxu1 %v16640_v6 }
0x1829   :  { %13252 = vmatprep.subr.bf16.mxu0 %v16643_v22 }
0x182b   :  { %12909 = vmatpush1.bf16.msra.mxu1 %v16638_v33 }
0x182c   :  { %13253 = vmatpush1.bf16.msra.mxu0 %v16641_v48  ;;  %12910 = vmatprep.subr.bf16.mxu1 %v16646_v46 }
0x182d   :  { %13254 = vmatprep.subr.bf16.mxu0 %v16649_v34  ;;  %v16694_v34 = vld [vmem:[#allocation3 + $0x6e4] ss:$16 sps:$4 sm:$0xff]  }
0x182f   :  { %12911 = vmatpush1.bf16.msra.mxu1 %v16644_v54 }
0x1830   :  { %13255 = vmatpush1.bf16.msra.mxu0 %v16647_v21  ;;  %12923 = vmatprep.subr.bf16.mxu1 %v16652_v45 }
0x1831   :  { %13267 = vmatprep.subr.bf16.mxu0 %v16655_v52  ;;  %v16697_v52 = vld [vmem:[#allocation3 + $0x6ec] ss:$16 sps:$4 sm:$0xff]  }
0x1832   :  { %12913 = vmatmul.mubr.bf16.vlgmr.msra.gmra.mrb[48].mxu1 %v21081_v59 }
0x1833   :  { %13257 = vmatmul.mubr.bf16.vlgmr.msra.gmra.mrb[48].mxu0 %v21081_v59  ;;  %12924 = vmatpush1.bf16.msra.mxu1 %v16650_v39  ;;  %v16673_v59 = vld [vmem:[#allocation3 + $0x66c] ss:$16 sps:$4 sm:$0xff]  }
0x1834   :  { %12955 = vmatprep.mubr.bf16.mxu1 %v21093_v24  ;;  %13268 = vmatpush1.bf16.msra.mxu0 %v16653_v5 }
0x1835   :  { %13299 = vmatprep.mubr.bf16.mxu0 %v21093_v24  ;;  %12925 = vmatprep.subr.bf16.mxu1 %v16658_v15  ;;  %v16674_v24 = vld [vmem:[#allocation3 + $0x680] ss:$16 sps:$4 sm:$0xff]  }
0x1836   :  { %13269 = vmatprep.subr.bf16.mxu0 %v16661_v1 }
0x1837   :  { %12926 = vmatpush1.bf16.msra.mxu1 %v16656_v23 }
0x1838   :  { %13270 = vmatpush1.bf16.msra.mxu0 %v16659_v55  ;;  %12927 = vmatprep.subr.bf16.mxu1 %v16664_v11 }
0x1839   :  { %13271 = vmatprep.subr.bf16.mxu0 %v16667_v30  ;;  %v16692_v30 = vld [vmem:[#allocation3 + $0x6e0] ss:$16 sps:$4 sm:$0xff]  }
0x183b   :  { %12928 = vmatpush1.bf16.msra.mxu1 %v16662_v19 }
0x183c   :  { %13272 = vmatpush1.bf16.msra.mxu0 %v16665_v25  ;;  %12929 = vmatprep.subr.bf16.mxu1 %v16670_v43 }
0x183d   :  { %13273 = vmatprep.subr.bf16.mxu0 %v16673_v59  ;;  %v16695_v59 = vld [vmem:[#allocation3 + $0x6e8] ss:$16 sps:$4 sm:$0xff]  }
0x183f   :  { %12930 = vmatpush1.bf16.msra.mxu1 %v16668_v44  ;;  %v16700_v44 = vld [vmem:[#allocation3 + $0x704] ss:$16 sps:$4 sm:$0xff]  }
0x1840   :  { %13274 = vmatpush1.bf16.msra.mxu0 %v16671_v26  ;;  %12931 = vmatprep.subr.bf16.mxu1 %v16676_v42 }
0x1841   :  { %13275 = vmatprep.subr.bf16.mxu0 %v16679_v56  ;;  %v16703_v56 = vld [vmem:[#allocation3 + $0x70c] ss:$16 sps:$4 sm:$0xff]  }
0x1843   :  { %12932 = vmatpush1.bf16.msra.mxu1 %v16674_v24 }
0x1844   :  { %13276 = vmatpush1.bf16.msra.mxu0 %v16677_v50  ;;  %12933 = vmatprep.subr.bf16.mxu1 %v16682_v9  ;;  %v16698_v50 = vld [vmem:[#allocation3 + $0x700] ss:$16 sps:$4 sm:$0xff]   ;;  %v16701_v9 = vld [vmem:[#allocation3 + $0x708] ss:$16 sps:$4 sm:$0xff]  }
0x1845   :  { %v9557_v35 = vpop.f32.mrb[44].mxu1  ;;  %13277 = vmatprep.subr.bf16.mxu0 %v16685_v49  ;;  %v16706_v49 = vld [vmem:[#allocation3 + $0x724] ss:$16 sps:$4 sm:$0xff]  }
0x1846   :  { %v15411_v8 = vadd.f32 %v9557_v35, %v6375_v31  ;;  %v9643_v36 = vpop.f32.mrb[44].mxu0  ;;  %v9559_v32 = vpop.f32.mrb[45].mxu1  ;;  %v16718_v35 = vld [vmem:[#allocation3 + $0x764] ss:$16 sps:$4 sm:$0xff]  }
0x1847   :  { %v15415_v27 = vadd.f32 %v9643_v36, %v6383_v2  ;;  %v15412_v6 = vadd.f32 %v9559_v32, %v6379_v58  ;;  %v9645_v37 = vpop.f32.mrb[45].mxu0  ;;  %v9561_v22 = vpop.f32.mrb[46].mxu1  ;;  %12934 = vmatpush1.bf16.msra.mxu1 %v16680_v61  ;;  %v16712_v61 = vld [vmem:[#allocation3 + $0x744] ss:$16 sps:$4 sm:$0xff]   ;;  %v16719_v36 = vld [vmem:[#allocation3 + $0x768] ss:$16 sps:$4 sm:$0xff]  }
0x1848   :  { %v15416_v33 = vadd.f32 %v9645_v37, %v6387_v16  ;;  %v15413_v48 = vadd.f32 %v9561_v22, %v6375_v31  ;;  %v9647_v46 = vpop.f32.mrb[46].mxu0  ;;  %13278 = vmatpush1.bf16.msra.mxu0 %v16683_v53  ;;  %v9563_v40 = vpop.f32.mrb[47].mxu1  ;;  %12935 = vmatprep.subr.bf16.mxu1 %v16688_v18  ;;  %v9664_v39 = vmax.f32 %v15411_v8, 0.0  ;;  %v16709_v31 = vld [vmem:[#allocation3 + $0x72c] ss:$16 sps:$4 sm:$0xff]  }
0x1849   :  { %v15417_v54 = vadd.f32 %v9647_v46, %v6383_v2  ;;  %v15414_v21 = vadd.f32 %v9563_v40, %v6379_v58  ;;  %v9649_v45 = vpop.f32.mrb[47].mxu0  ;;  %13279 = vmatprep.subr.bf16.mxu0 %v16691_v20  ;;  %v9666_v1 = vmax.f32 %v15415_v27, 0.0  ;;  %v9665_v23 = vmax.f32 %v15412_v6, 0.0  ;;  %v16704_v2 = vld [vmem:[#allocation3 + $0x720] ss:$16 sps:$4 sm:$0xff]  }
0x184a   :  { %v9680_v5 = vmax.f32 %v15413_v48, 0.0  ;;  %v15418_v15 = vadd.f32 %v9649_v45, %v6387_v16  ;;  %v9667_v19 = vmax.f32 %v15416_v33, 0.0  ;;  %v16707_v58 = vld [vmem:[#allocation3 + $0x728] ss:$16 sps:$4 sm:$0xff]   ;;  %v16715_v16 = vld [vmem:[#allocation3 + $0x74c] ss:$16 sps:$4 sm:$0xff]  }
0x184b   :  { %v9682_v55 = vmax.f32 %v15417_v54, 0.0  ;;  %v9681_v11 = vmax.f32 %v15414_v21, 0.0  ;;  %12936 = vmatpush1.bf16.msra.mxu1 %v16686_v38  ;;  %v16710_v53 = vld [vmem:[#allocation3 + $0x740] ss:$16 sps:$4 sm:$0xff]   ;;  %v16713_v18 = vld [vmem:[#allocation3 + $0x748] ss:$16 sps:$4 sm:$0xff]  }
0x184c   :  { %v21218_v25 = vpack.c.bf16 %v9680_v5, %v9664_v39  ;;  %v9683_v43 = vmax.f32 %v15418_v15, 0.0  ;;  %13280 = vmatpush1.bf16.msra.mxu0 %v16689_v14  ;;  %12937 = vmatprep.subr.bf16.mxu1 %v16694_v34  ;;  %v16721_v20 = vld [vmem:[#allocation3 + $0x76c] ss:$16 sps:$4 sm:$0xff]   ;;  %v16716_v8 = vld [vmem:[#allocation3 + $0x760] ss:$16 sps:$4 sm:$0xff]  }
0x184d   :  { %v21220_v26 = vpack.c.bf16 %v9682_v55, %v9666_v1  ;;  %v21222_v42 = vpack.c.bf16 %v9681_v11, %v9665_v23  ;;  %13281 = vmatprep.subr.bf16.mxu0 %v16697_v52  ;;  %v16724_v32 = vld [vmem:[#allocation3 + $0x784] ss:$16 sps:$4 sm:$0xff]   ;;  %v16727_v27 = vld [vmem:[#allocation3 + $0x78c] ss:$16 sps:$4 sm:$0xff]   ;;  %v16722_v6 = vld [vmem:[#allocation3 + $0x780] ss:$16 sps:$4 sm:$0xff]  }
0x184e   :  { %v21224_v24 = vpack.c.bf16 %v9683_v43, %v9667_v19  ;;  %v16725_v37 = vld [vmem:[#allocation3 + $0x788] ss:$16 sps:$4 sm:$0xff]   ;;  %v16730_v22 = vld [vmem:[#allocation3 + $0x7a4] ss:$16 sps:$4 sm:$0xff]   ;;  %v16733_v38 = vld [vmem:[#allocation3 + $0x7ac] ss:$16 sps:$4 sm:$0xff]  }
0x184f   :  { %12938 = vmatpush1.bf16.msra.mxu1 %v16692_v30  ;;  %v16728_v33 = vld [vmem:[#allocation3 + $0x7a0] ss:$16 sps:$4 sm:$0xff]   ;;  %v16731_v48 = vld [vmem:[#allocation3 + $0x7a8] ss:$16 sps:$4 sm:$0xff]   ;;  %v16736_v46 = vld [vmem:[#allocation3 + $0x7c4] ss:$16 sps:$4 sm:$0xff]  }
0x1850   :  { %13282 = vmatpush1.bf16.msra.mxu0 %v16695_v59  ;;  %12939 = vmatprep.subr.bf16.mxu1 %v16700_v44  ;;  %v16739_v40 = vld [vmem:[#allocation3 + $0x7cc] ss:$16 sps:$4 sm:$0xff]   ;;  %v16734_v14 = vld [vmem:[#allocation3 + $0x7c0] ss:$16 sps:$4 sm:$0xff]   ;;  %v16737_v34 = vld [vmem:[#allocation3 + $0x7c8] ss:$16 sps:$4 sm:$0xff]  }
0x1851   :  { %13283 = vmatprep.subr.bf16.mxu0 %v16703_v56  ;;  %v16742_v54 = vld [vmem:[#allocation3 + $0x7e4] ss:$16 sps:$4 sm:$0xff]   ;;  %v16745_v21 = vld [vmem:[#allocation3 + $0x7ec] ss:$16 sps:$4 sm:$0xff]   ;;  %v16740_v45 = vld [vmem:[#allocation3 + $0x7e0] ss:$16 sps:$4 sm:$0xff]  }
0x1852   :  { %v16743_v52 = vld [vmem:[#allocation3 + $0x7e8] ss:$16 sps:$4 sm:$0xff]   ;;  %v16748_v39 = vld [vmem:[#allocation3 + $0x804] ss:$16 sps:$4 sm:$0xff]   ;;  %v16751_v5 = vld [vmem:[#allocation3 + $0x80c] ss:$16 sps:$4 sm:$0xff]  }
0x1853   :  { %12940 = vmatpush1.bf16.msra.mxu1 %v16698_v50  ;;  %v16746_v15 = vld [vmem:[#allocation3 + $0x800] ss:$16 sps:$4 sm:$0xff]   ;;  %v16749_v1 = vld [vmem:[#allocation3 + $0x808] ss:$16 sps:$4 sm:$0xff]   ;;  %v16754_v23 = vld [vmem:[#allocation3 + $0x824] ss:$16 sps:$4 sm:$0xff]  }
0x1854   :  { %13284 = vmatpush1.bf16.msra.mxu0 %v16701_v9  ;;  %12941 = vmatprep.subr.bf16.mxu1 %v16706_v49  ;;  %v16757_v55 = vld [vmem:[#allocation3 + $0x82c] ss:$16 sps:$4 sm:$0xff]   ;;  %v16752_v11 = vld [vmem:[#allocation3 + $0x820] ss:$16 sps:$4 sm:$0xff]   ;;  %v16755_v30 = vld [vmem:[#allocation3 + $0x828] ss:$16 sps:$4 sm:$0xff]  }
0x1855   :  { %13285 = vmatprep.subr.bf16.mxu0 %v16709_v31  ;;  %v16760_v19 = vld [vmem:[#allocation3 + $0x844] ss:$16 sps:$4 sm:$0xff]   ;;  %v16763_v43 = vld [vmem:[#allocation3 + $0x84c] ss:$16 sps:$4 sm:$0xff]   ;;  %v16758_v59 = vld [vmem:[#allocation3 + $0x840] ss:$16 sps:$4 sm:$0xff]  }
0x1856   :  { %v16761_v44 = vld [vmem:[#allocation3 + $0x848] ss:$16 sps:$4 sm:$0xff]   ;;  %v16766_v56 = vld [vmem:[#allocation3 + $0x864] ss:$16 sps:$4 sm:$0xff]   ;;  %v16764_v50 = vld [vmem:[#allocation3 + $0x860] ss:$16 sps:$4 sm:$0xff]  }
0x1857   :  { %12942 = vmatpush1.bf16.msra.mxu1 %v16704_v2  ;;  %v16767_v9 = vld [vmem:[#allocation3 + $0x868] ss:$16 sps:$4 sm:$0xff]   ;;  %v16772_v49 = vld [vmem:[#allocation3 + $0x884] ss:$16 sps:$4 sm:$0xff]   ;;  %v16775_v31 = vld [vmem:[#allocation3 + $0x88c] ss:$16 sps:$4 sm:$0xff]  }
0x1858   :  { %13286 = vmatpush1.bf16.msra.mxu0 %v16707_v58  ;;  %12943 = vmatprep.subr.bf16.mxu1 %v16712_v61  ;;  %v16773_v2 = vld [vmem:[#allocation3 + $0x888] ss:$16 sps:$4 sm:$0xff]   ;;  %v16778_v58 = vld [vmem:[#allocation3 + $0x8a4] ss:$16 sps:$4 sm:$0xff]   ;;  %v16781_v61 = vld [vmem:[#allocation3 + $0x8ac] ss:$16 sps:$4 sm:$0xff]  }
0x1859   :  { %13287 = vmatprep.subr.bf16.mxu0 %v16715_v16  ;;  %v16776_v16 = vld [vmem:[#allocation3 + $0x8a0] ss:$16 sps:$4 sm:$0xff]  }
0x185b   :  { %12944 = vmatpush1.bf16.msra.mxu1 %v16710_v53  ;;  %v16779_v53 = vld [vmem:[#allocation3 + $0x8a8] ss:$16 sps:$4 sm:$0xff]  }
0x185c   :  { %13288 = vmatpush1.bf16.msra.mxu0 %v16713_v18  ;;  %12945 = vmatprep.subr.bf16.mxu1 %v16718_v35  ;;  %v16784_v18 = vld [vmem:[#allocation3 + $0x8c4] ss:$16 sps:$4 sm:$0xff]   ;;  %v16787_v35 = vld [vmem:[#allocation3 + $0x8cc] ss:$16 sps:$4 sm:$0xff]  }
0x185d   :  { %13289 = vmatprep.subr.bf16.mxu0 %v16721_v20  ;;  %v16782_v20 = vld [vmem:[#allocation3 + $0x8c0] ss:$16 sps:$4 sm:$0xff]  }
0x185f   :  { %12946 = vmatpush1.bf16.msra.mxu1 %v16716_v8  ;;  %v16785_v8 = vld [vmem:[#allocation3 + $0x8c8] ss:$16 sps:$4 sm:$0xff]  }
0x1860   :  { %13290 = vmatpush1.bf16.msra.mxu0 %v16719_v36  ;;  %12947 = vmatprep.subr.bf16.mxu1 %v16724_v32  ;;  %v16790_v36 = vld [vmem:[#allocation3 + $0x8e4] ss:$16 sps:$4 sm:$0xff]   ;;  %v16793_v32 = vld [vmem:[#allocation3 + $0x8ec] ss:$16 sps:$4 sm:$0xff]  }
0x1861   :  { %13291 = vmatprep.subr.bf16.mxu0 %v16727_v27  ;;  %v16788_v27 = vld [vmem:[#allocation3 + $0x8e0] ss:$16 sps:$4 sm:$0xff]  }
0x1863   :  { %12948 = vmatpush1.bf16.msra.mxu1 %v16722_v6  ;;  %v16791_v6 = vld [vmem:[#allocation3 + $0x8e8] ss:$16 sps:$4 sm:$0xff]  }
0x1864   :  { %13292 = vmatpush1.bf16.msra.mxu0 %v16725_v37  ;;  %12949 = vmatprep.subr.bf16.mxu1 %v16730_v22  ;;  %v16796_v37 = vld [vmem:[#allocation3 + $0x904] ss:$16 sps:$4 sm:$0xff]   ;;  %v16799_v22 = vld [vmem:[#allocation3 + $0x90c] ss:$16 sps:$4 sm:$0xff]  }
0x1865   :  { %13293 = vmatprep.subr.bf16.mxu0 %v16733_v38  ;;  %v16794_v38 = vld [vmem:[#allocation3 + $0x900] ss:$16 sps:$4 sm:$0xff]  }
0x1867   :  { %12950 = vmatpush1.bf16.msra.mxu1 %v16728_v33  ;;  %v16797_v33 = vld [vmem:[#allocation3 + $0x908] ss:$16 sps:$4 sm:$0xff]  }
0x1868   :  { %13294 = vmatpush1.bf16.msra.mxu0 %v16731_v48  ;;  %12951 = vmatprep.subr.bf16.mxu1 %v16736_v46  ;;  %v16802_v48 = vld [vmem:[#allocation3 + $0x924] ss:$16 sps:$4 sm:$0xff]   ;;  %v16805_v46 = vld [vmem:[#allocation3 + $0x92c] ss:$16 sps:$4 sm:$0xff]  }
0x1869   :  { %13295 = vmatprep.subr.bf16.mxu0 %v16739_v40  ;;  %v16800_v40 = vld [vmem:[#allocation3 + $0x920] ss:$16 sps:$4 sm:$0xff]  }
0x186b   :  { %12952 = vmatpush1.bf16.msra.mxu1 %v16734_v14  ;;  %v16803_v14 = vld [vmem:[#allocation3 + $0x928] ss:$16 sps:$4 sm:$0xff]  }
0x186c   :  { %13296 = vmatpush1.bf16.msra.mxu0 %v16737_v34  ;;  %12953 = vmatprep.subr.bf16.mxu1 %v16742_v54  ;;  %v16808_v34 = vld [vmem:[#allocation3 + $0x944] ss:$16 sps:$4 sm:$0xff]   ;;  %v16811_v54 = vld [vmem:[#allocation3 + $0x94c] ss:$16 sps:$4 sm:$0xff]  }
0x186d   :  { %13297 = vmatprep.subr.bf16.mxu0 %v16745_v21  ;;  %v16806_v21 = vld [vmem:[#allocation3 + $0x940] ss:$16 sps:$4 sm:$0xff]  }
0x186f   :  { %12954 = vmatpush1.bf16.msra.mxu1 %v16740_v45  ;;  %v16809_v45 = vld [vmem:[#allocation3 + $0x948] ss:$16 sps:$4 sm:$0xff]  }
0x1870   :  { %13298 = vmatpush1.bf16.msra.mxu0 %v16743_v52  ;;  %12966 = vmatprep.subr.bf16.mxu1 %v16748_v39  ;;  %v16814_v52 = vld [vmem:[#allocation3 + $0x964] ss:$16 sps:$4 sm:$0xff]   ;;  %v16817_v39 = vld [vmem:[#allocation3 + $0x96c] ss:$16 sps:$4 sm:$0xff]  }
0x1871   :  { %13310 = vmatprep.subr.bf16.mxu0 %v16751_v5  ;;  %v16812_v5 = vld [vmem:[#allocation3 + $0x960] ss:$16 sps:$4 sm:$0xff]  }
0x1872   :  { %12956 = vmatmul.mubr.bf16.vlgmr.msra.gmra.mrb[48].mxu1 %v21083_v3 }
0x1873   :  { %13300 = vmatmul.mubr.bf16.vlgmr.msra.gmra.mrb[48].mxu0 %v21083_v3  ;;  %12967 = vmatpush1.bf16.msra.mxu1 %v16746_v15  ;;  %v16769_v3 = vld [vmem:[#allocation3 + $0x86c] ss:$16 sps:$4 sm:$0xff]   ;;  %v16815_v15 = vld [vmem:[#allocation3 + $0x968] ss:$16 sps:$4 sm:$0xff]  }
0x1874   :  { %12998 = vmatprep.mubr.bf16.mxu1 %v21198_v0  ;;  %13311 = vmatpush1.bf16.msra.mxu0 %v16749_v1  ;;  %v16820_v1 = vld [vmem:[#allocation3 + $0x984] ss:$16 sps:$4 sm:$0xff]  }
0x1875   :  { %13342 = vmatprep.mubr.bf16.mxu0 %v21198_v0  ;;  %12968 = vmatprep.subr.bf16.mxu1 %v16754_v23  ;;  %v16770_v0 = vld [vmem:[#allocation3 + $0x880] ss:$16 sps:$4 sm:$0xff]   ;;  %v16823_v23 = vld [vmem:[#allocation3 + $0x98c] ss:$16 sps:$4 sm:$0xff]  }
0x1876   :  { %13312 = vmatprep.subr.bf16.mxu0 %v16757_v55  ;;  %v16818_v55 = vld [vmem:[#allocation3 + $0x980] ss:$16 sps:$4 sm:$0xff]  }
0x1877   :  { %12969 = vmatpush1.bf16.msra.mxu1 %v16752_v11  ;;  %v16821_v11 = vld [vmem:[#allocation3 + $0x988] ss:$16 sps:$4 sm:$0xff]  }
0x1878   :  { %13313 = vmatpush1.bf16.msra.mxu0 %v16755_v30  ;;  %12970 = vmatprep.subr.bf16.mxu1 %v16760_v19  ;;  %v16826_v30 = vld [vmem:[#allocation3 + $0x9a4] ss:$16 sps:$4 sm:$0xff]   ;;  %v16829_v19 = vld [vmem:[#allocation3 + $0x9ac] ss:$16 sps:$4 sm:$0xff]  }
0x1879   :  { %13314 = vmatprep.subr.bf16.mxu0 %v16763_v43  ;;  %v16824_v43 = vld [vmem:[#allocation3 + $0x9a0] ss:$16 sps:$4 sm:$0xff]  }
0x187b   :  { %12971 = vmatpush1.bf16.msra.mxu1 %v16758_v59  ;;  %v16827_v59 = vld [vmem:[#allocation3 + $0x9a8] ss:$16 sps:$4 sm:$0xff]  }
0x187c   :  { %13315 = vmatpush1.bf16.msra.mxu0 %v16761_v44  ;;  %12972 = vmatprep.subr.bf16.mxu1 %v16766_v56  ;;  %v16832_v44 = vld [vmem:[#allocation3 + $0x9c4] ss:$16 sps:$4 sm:$0xff]   ;;  %v16835_v56 = vld [vmem:[#allocation3 + $0x9cc] ss:$16 sps:$4 sm:$0xff]  }
0x187d   :  { %13316 = vmatprep.subr.bf16.mxu0 %v16769_v3  ;;  %v16830_v3 = vld [vmem:[#allocation3 + $0x9c0] ss:$16 sps:$4 sm:$0xff]  }
0x187f   :  { %12973 = vmatpush1.bf16.msra.mxu1 %v16764_v50  ;;  %v16833_v50 = vld [vmem:[#allocation3 + $0x9c8] ss:$16 sps:$4 sm:$0xff]  }
0x1880   :  { %13317 = vmatpush1.bf16.msra.mxu0 %v16767_v9  ;;  %12974 = vmatprep.subr.bf16.mxu1 %v16772_v49  ;;  %v16838_v9 = vld [vmem:[#allocation3 + $0x9e4] ss:$16 sps:$4 sm:$0xff]   ;;  %v16841_v49 = vld [vmem:[#allocation3 + $0x9ec] ss:$16 sps:$4 sm:$0xff]  }
0x1881   :  { %13318 = vmatprep.subr.bf16.mxu0 %v16775_v31  ;;  %v16836_v31 = vld [vmem:[#allocation3 + $0x9e0] ss:$16 sps:$4 sm:$0xff]  }
0x1883   :  { %12975 = vmatpush1.bf16.msra.mxu1 %v16770_v0  ;;  %v16839_v0 = vld [vmem:[#allocation3 + $0x9e8] ss:$16 sps:$4 sm:$0xff]  }
0x1884   :  { %13319 = vmatpush1.bf16.msra.mxu0 %v16773_v2  ;;  %12976 = vmatprep.subr.bf16.mxu1 %v16778_v58  ;;  %v16844_v2 = vld [vmem:[#allocation3 + $0xa04] ss:$16 sps:$4 sm:$0xff]   ;;  %v16847_v58 = vld [vmem:[#allocation3 + $0xa0c] ss:$16 sps:$4 sm:$0xff]  }
0x1885   :  { %13320 = vmatprep.subr.bf16.mxu0 %v16781_v61  ;;  %v16842_v61 = vld [vmem:[#allocation3 + $0xa00] ss:$16 sps:$4 sm:$0xff]  }
0x1887   :  { %12977 = vmatpush1.bf16.msra.mxu1 %v16776_v16  ;;  %v16845_v16 = vld [vmem:[#allocation3 + $0xa08] ss:$16 sps:$4 sm:$0xff]  }
0x1888   :  { %13321 = vmatpush1.bf16.msra.mxu0 %v16779_v53  ;;  %12978 = vmatprep.subr.bf16.mxu1 %v16784_v18  ;;  %v16850_v53 = vld [vmem:[#allocation3 + $0xa24] ss:$16 sps:$4 sm:$0xff]   ;;  %v16853_v18 = vld [vmem:[#allocation3 + $0xa2c] ss:$16 sps:$4 sm:$0xff]  }
0x1889   :  { %13322 = vmatprep.subr.bf16.mxu0 %v16787_v35  ;;  %v16848_v35 = vld [vmem:[#allocation3 + $0xa20] ss:$16 sps:$4 sm:$0xff]  }
0x188b   :  { %12979 = vmatpush1.bf16.msra.mxu1 %v16782_v20  ;;  %v16851_v20 = vld [vmem:[#allocation3 + $0xa28] ss:$16 sps:$4 sm:$0xff]  }
0x188c   :  { %13323 = vmatpush1.bf16.msra.mxu0 %v16785_v8  ;;  %12980 = vmatprep.subr.bf16.mxu1 %v16790_v36  ;;  %v16856_v8 = vld [vmem:[#allocation3 + $0xa44] ss:$16 sps:$4 sm:$0xff]   ;;  %v16859_v36 = vld [vmem:[#allocation3 + $0xa4c] ss:$16 sps:$4 sm:$0xff]  }
0x188d   :  { %13324 = vmatprep.subr.bf16.mxu0 %v16793_v32  ;;  %v16854_v32 = vld [vmem:[#allocation3 + $0xa40] ss:$16 sps:$4 sm:$0xff]  }
0x188f   :  { %12981 = vmatpush1.bf16.msra.mxu1 %v16788_v27  ;;  %v16857_v27 = vld [vmem:[#allocation3 + $0xa48] ss:$16 sps:$4 sm:$0xff]  }
0x1890   :  { %13325 = vmatpush1.bf16.msra.mxu0 %v16791_v6  ;;  %12982 = vmatprep.subr.bf16.mxu1 %v16796_v37  ;;  %v16862_v6 = vld [vmem:[#allocation3 + $0xa64] ss:$16 sps:$4 sm:$0xff]   ;;  %v16860_v37 = vld [vmem:[#allocation3 + $0xa60] ss:$16 sps:$4 sm:$0xff]  }
0x1891   :  { %13326 = vmatprep.subr.bf16.mxu0 %v16799_v22  ;;  %v16863_v22 = vld [vmem:[#allocation3 + $0xa68] ss:$16 sps:$4 sm:$0xff]  }
0x1893   :  { %12983 = vmatpush1.bf16.msra.mxu1 %v16794_v38  ;;  %v16868_v38 = vld [vmem:[#allocation3 + $0xa84] ss:$16 sps:$4 sm:$0xff]  }
0x1894   :  { %13327 = vmatpush1.bf16.msra.mxu0 %v16797_v33  ;;  %12984 = vmatprep.subr.bf16.mxu1 %v16802_v48  ;;  %v16871_v33 = vld [vmem:[#allocation3 + $0xa8c] ss:$16 sps:$4 sm:$0xff]   ;;  %v16869_v48 = vld [vmem:[#allocation3 + $0xa88] ss:$16 sps:$4 sm:$0xff]  }
0x1895   :  { %13328 = vmatprep.subr.bf16.mxu0 %v16805_v46  ;;  %v16874_v46 = vld [vmem:[#allocation3 + $0xaa4] ss:$16 sps:$4 sm:$0xff]  }
0x1897   :  { %12985 = vmatpush1.bf16.msra.mxu1 %v16800_v40  ;;  %v16877_v40 = vld [vmem:[#allocation3 + $0xaac] ss:$16 sps:$4 sm:$0xff]  }
0x1898   :  { %13329 = vmatpush1.bf16.msra.mxu0 %v16803_v14  ;;  %12986 = vmatprep.subr.bf16.mxu1 %v16808_v34  ;;  %v16872_v14 = vld [vmem:[#allocation3 + $0xaa0] ss:$16 sps:$4 sm:$0xff]   ;;  %v16875_v34 = vld [vmem:[#allocation3 + $0xaa8] ss:$16 sps:$4 sm:$0xff]  }
0x1899   :  { %13330 = vmatprep.subr.bf16.mxu0 %v16811_v54  ;;  %v16880_v54 = vld [vmem:[#allocation3 + $0xac4] ss:$16 sps:$4 sm:$0xff]  }
0x189b   :  { %12987 = vmatpush1.bf16.msra.mxu1 %v16806_v21  ;;  %v16883_v21 = vld [vmem:[#allocation3 + $0xacc] ss:$16 sps:$4 sm:$0xff]  }
0x189c   :  { %13331 = vmatpush1.bf16.msra.mxu0 %v16809_v45  ;;  %12988 = vmatprep.subr.bf16.mxu1 %v16814_v52  ;;  %v16878_v45 = vld [vmem:[#allocation3 + $0xac0] ss:$16 sps:$4 sm:$0xff]   ;;  %v16881_v52 = vld [vmem:[#allocation3 + $0xac8] ss:$16 sps:$4 sm:$0xff]  }
0x189d   :  { %13332 = vmatprep.subr.bf16.mxu0 %v16817_v39  ;;  %v16886_v39 = vld [vmem:[#allocation3 + $0xae4] ss:$16 sps:$4 sm:$0xff]  }
0x189f   :  { %12989 = vmatpush1.bf16.msra.mxu1 %v16812_v5  ;;  %v16889_v5 = vld [vmem:[#allocation3 + $0xaec] ss:$16 sps:$4 sm:$0xff]  }
0x18a0   :  { %13333 = vmatpush1.bf16.msra.mxu0 %v16815_v15  ;;  %12990 = vmatprep.subr.bf16.mxu1 %v16820_v1  ;;  %v16884_v15 = vld [vmem:[#allocation3 + $0xae0] ss:$16 sps:$4 sm:$0xff]   ;;  %v16887_v1 = vld [vmem:[#allocation3 + $0xae8] ss:$16 sps:$4 sm:$0xff]  }
0x18a1   :  { %13334 = vmatprep.subr.bf16.mxu0 %v16823_v23  ;;  %v16892_v23 = vld [vmem:[#allocation3 + $0xb04] ss:$16 sps:$4 sm:$0xff]  }
0x18a3   :  { %12991 = vmatpush1.bf16.msra.mxu1 %v16818_v55  ;;  %v16895_v55 = vld [vmem:[#allocation3 + $0xb0c] ss:$16 sps:$4 sm:$0xff]  }
0x18a4   :  { %13335 = vmatpush1.bf16.msra.mxu0 %v16821_v11  ;;  %12992 = vmatprep.subr.bf16.mxu1 %v16826_v30  ;;  %v16890_v11 = vld [vmem:[#allocation3 + $0xb00] ss:$16 sps:$4 sm:$0xff]   ;;  %v16893_v30 = vld [vmem:[#allocation3 + $0xb08] ss:$16 sps:$4 sm:$0xff]  }
0x18a5   :  { %13336 = vmatprep.subr.bf16.mxu0 %v16829_v19  ;;  %v16898_v19 = vld [vmem:[#allocation3 + $0xb24] ss:$16 sps:$4 sm:$0xff]  }
0x18a7   :  { %12993 = vmatpush1.bf16.msra.mxu1 %v16824_v43  ;;  %v16901_v43 = vld [vmem:[#allocation3 + $0xb2c] ss:$16 sps:$4 sm:$0xff]  }
0x18a8   :  { %13337 = vmatpush1.bf16.msra.mxu0 %v16827_v59  ;;  %12994 = vmatprep.subr.bf16.mxu1 %v16832_v44  ;;  %v16896_v59 = vld [vmem:[#allocation3 + $0xb20] ss:$16 sps:$4 sm:$0xff]   ;;  %v16899_v44 = vld [vmem:[#allocation3 + $0xb28] ss:$16 sps:$4 sm:$0xff]  }
0x18a9   :  { %13338 = vmatprep.subr.bf16.mxu0 %v16835_v56  ;;  %v16904_v56 = vld [vmem:[#allocation3 + $0xb44] ss:$16 sps:$4 sm:$0xff]  }
0x18ab   :  { %12995 = vmatpush1.bf16.msra.mxu1 %v16830_v3  ;;  %v16907_v3 = vld [vmem:[#allocation3 + $0xb4c] ss:$16 sps:$4 sm:$0xff]  }
0x18ac   :  { %13339 = vmatpush1.bf16.msra.mxu0 %v16833_v50  ;;  %12996 = vmatprep.subr.bf16.mxu1 %v16838_v9  ;;  %v16902_v50 = vld [vmem:[#allocation3 + $0xb40] ss:$16 sps:$4 sm:$0xff]   ;;  %v16905_v9 = vld [vmem:[#allocation3 + $0xb48] ss:$16 sps:$4 sm:$0xff]  }
0x18ad   :  { %13340 = vmatprep.subr.bf16.mxu0 %v16841_v49  ;;  %v16910_v49 = vld [vmem:[#allocation3 + $0xb64] ss:$16 sps:$4 sm:$0xff]  }
0x18af   :  { %12997 = vmatpush1.bf16.msra.mxu1 %v16836_v31  ;;  %v16913_v31 = vld [vmem:[#allocation3 + $0xb6c] ss:$16 sps:$4 sm:$0xff]  }
0x18b0   :  { %13341 = vmatpush1.bf16.msra.mxu0 %v16839_v0  ;;  %13009 = vmatprep.subr.bf16.mxu1 %v16844_v2  ;;  %v16908_v0 = vld [vmem:[#allocation3 + $0xb60] ss:$16 sps:$4 sm:$0xff]   ;;  %v16911_v2 = vld [vmem:[#allocation3 + $0xb68] ss:$16 sps:$4 sm:$0xff]  }
0x18b1   :  { %13353 = vmatprep.subr.bf16.mxu0 %v16847_v58  ;;  %v16916_v58 = vld [vmem:[#allocation3 + $0xb84] ss:$16 sps:$4 sm:$0xff]  }
0x18b2   :  { %12999 = vmatmul.mubr.bf16.vlgmr.msra.gmra.mrb[48].mxu1 %v21194_v47 }
0x18b3   :  { %13343 = vmatmul.mubr.bf16.vlgmr.msra.gmra.mrb[48].mxu0 %v21194_v47  ;;  %13010 = vmatpush1.bf16.msra.mxu1 %v16842_v61  ;;  %v16865_v47 = vld [vmem:[#allocation3 + $0xa6c] ss:$16 sps:$4 sm:$0xff]  }
0x18b4   :  { %13041 = vmatprep.mubr.bf16.mxu1 %v21200_v28  ;;  %13354 = vmatpush1.bf16.msra.mxu0 %v16845_v16  ;;  %v16919_v61 = vld [vmem:[#allocation3 + $0xb8c] ss:$16 sps:$4 sm:$0xff]   ;;  %v16914_v16 = vld [vmem:[#allocation3 + $0xb80] ss:$16 sps:$4 sm:$0xff]  }
0x18b5   :  { %13385 = vmatprep.mubr.bf16.mxu0 %v21200_v28  ;;  %13011 = vmatprep.subr.bf16.mxu1 %v16850_v53  ;;  %v16866_v28 = vld [vmem:[#allocation3 + $0xa80] ss:$16 sps:$4 sm:$0xff]   ;;  %v16917_v53 = vld [vmem:[#allocation3 + $0xb88] ss:$16 sps:$4 sm:$0xff]  }
0x18b6   :  { %13355 = vmatprep.subr.bf16.mxu0 %v16853_v18  ;;  %v16922_v18 = vld [vmem:[#allocation3 + $0xba4] ss:$16 sps:$4 sm:$0xff]  }
0x18b7   :  { %13012 = vmatpush1.bf16.msra.mxu1 %v16848_v35  ;;  %v16925_v35 = vld [vmem:[#allocation3 + $0xbac] ss:$16 sps:$4 sm:$0xff]  }
0x18b8   :  { %13356 = vmatpush1.bf16.msra.mxu0 %v16851_v20  ;;  %13013 = vmatprep.subr.bf16.mxu1 %v16856_v8  ;;  %v16920_v20 = vld [vmem:[#allocation3 + $0xba0] ss:$16 sps:$4 sm:$0xff]   ;;  %v16923_v8 = vld [vmem:[#allocation3 + $0xba8] ss:$16 sps:$4 sm:$0xff]  }
0x18b9   :  { %13357 = vmatprep.subr.bf16.mxu0 %v16859_v36  ;;  %v16928_v36 = vld [vmem:[#allocation3 + $0xbc4] ss:$16 sps:$4 sm:$0xff]  }
0x18bb   :  { %13014 = vmatpush1.bf16.msra.mxu1 %v16854_v32  ;;  %v16931_v32 = vld [vmem:[#allocation3 + $0xbcc] ss:$16 sps:$4 sm:$0xff]  }
0x18bc   :  { %13358 = vmatpush1.bf16.msra.mxu0 %v16857_v27  ;;  %13015 = vmatprep.subr.bf16.mxu1 %v16862_v6  ;;  %v16926_v27 = vld [vmem:[#allocation3 + $0xbc0] ss:$16 sps:$4 sm:$0xff]   ;;  %v16929_v6 = vld [vmem:[#allocation3 + $0xbc8] ss:$16 sps:$4 sm:$0xff]  }
0x18bd   :  { %13359 = vmatprep.subr.bf16.mxu0 %v16865_v47  ;;  %v16934_v47 = vld [vmem:[#allocation3 + $0xbe4] ss:$16 sps:$4 sm:$0xff]  }
0x18bf   :  { %13016 = vmatpush1.bf16.msra.mxu1 %v16860_v37  ;;  %v16937_v37 = vld [vmem:[#allocation3 + $0xbec] ss:$16 sps:$4 sm:$0xff]  }
0x18c0   :  { %13360 = vmatpush1.bf16.msra.mxu0 %v16863_v22  ;;  %13017 = vmatprep.subr.bf16.mxu1 %v16868_v38  ;;  %v16932_v22 = vld [vmem:[#allocation3 + $0xbe0] ss:$16 sps:$4 sm:$0xff]   ;;  %v16935_v38 = vld [vmem:[#allocation3 + $0xbe8] ss:$16 sps:$4 sm:$0xff]  }
0x18c1   :  { %13361 = vmatprep.subr.bf16.mxu0 %v16871_v33  ;;  %v16940_v33 = vld [vmem:[#allocation3 + $0xc04] ss:$16 sps:$4 sm:$0xff]  }
0x18c3   :  { %13018 = vmatpush1.bf16.msra.mxu1 %v16866_v28  ;;  %v16943_v28 = vld [vmem:[#allocation3 + $0xc0c] ss:$16 sps:$4 sm:$0xff]  }
0x18c4   :  { %13362 = vmatpush1.bf16.msra.mxu0 %v16869_v48  ;;  %13019 = vmatprep.subr.bf16.mxu1 %v16874_v46  ;;  %v16938_v48 = vld [vmem:[#allocation3 + $0xc00] ss:$16 sps:$4 sm:$0xff]   ;;  %v16941_v46 = vld [vmem:[#allocation3 + $0xc08] ss:$16 sps:$4 sm:$0xff]  }
0x18c5   :  { %13363 = vmatprep.subr.bf16.mxu0 %v16877_v40  ;;  %v16946_v40 = vld [vmem:[#allocation3 + $0xc24] ss:$16 sps:$4 sm:$0xff]  }
0x18c7   :  { %13020 = vmatpush1.bf16.msra.mxu1 %v16872_v14  ;;  %v16949_v14 = vld [vmem:[#allocation3 + $0xc2c] ss:$16 sps:$4 sm:$0xff]  }
0x18c8   :  { %13364 = vmatpush1.bf16.msra.mxu0 %v16875_v34  ;;  %13021 = vmatprep.subr.bf16.mxu1 %v16880_v54  ;;  %v16944_v34 = vld [vmem:[#allocation3 + $0xc20] ss:$16 sps:$4 sm:$0xff]   ;;  %v16947_v54 = vld [vmem:[#allocation3 + $0xc28] ss:$16 sps:$4 sm:$0xff]  }
0x18c9   :  { %13365 = vmatprep.subr.bf16.mxu0 %v16883_v21  ;;  %v16952_v21 = vld [vmem:[#allocation3 + $0xc44] ss:$16 sps:$4 sm:$0xff]  }
0x18cb   :  { %13022 = vmatpush1.bf16.msra.mxu1 %v16878_v45  ;;  %v16955_v45 = vld [vmem:[#allocation3 + $0xc4c] ss:$16 sps:$4 sm:$0xff]  }
0x18cc   :  { %13366 = vmatpush1.bf16.msra.mxu0 %v16881_v52  ;;  %13023 = vmatprep.subr.bf16.mxu1 %v16886_v39  ;;  %v16950_v52 = vld [vmem:[#allocation3 + $0xc40] ss:$16 sps:$4 sm:$0xff]   ;;  %v16953_v39 = vld [vmem:[#allocation3 + $0xc48] ss:$16 sps:$4 sm:$0xff]  }
0x18cd   :  { %13367 = vmatprep.subr.bf16.mxu0 %v16889_v5  ;;  %v16958_v5 = vld [vmem:[#allocation3 + $0xc64] ss:$16 sps:$4 sm:$0xff]  }
0x18cf   :  { %13024 = vmatpush1.bf16.msra.mxu1 %v16884_v15  ;;  %v16956_v15 = vld [vmem:[#allocation3 + $0xc60] ss:$16 sps:$4 sm:$0xff]  }
0x18d0   :  { %13368 = vmatpush1.bf16.msra.mxu0 %v16887_v1  ;;  %13025 = vmatprep.subr.bf16.mxu1 %v16892_v23  ;;  %v16959_v1 = vld [vmem:[#allocation3 + $0xc68] ss:$16 sps:$4 sm:$0xff]   ;;  %v16964_v23 = vld [vmem:[#allocation3 + $0xc84] ss:$16 sps:$4 sm:$0xff]  }
0x18d1   :  { %13369 = vmatprep.subr.bf16.mxu0 %v16895_v55  ;;  %v16967_v55 = vld [vmem:[#allocation3 + $0xc8c] ss:$16 sps:$4 sm:$0xff]  }
0x18d3   :  { %13026 = vmatpush1.bf16.msra.mxu1 %v16890_v11  ;;  %v16965_v11 = vld [vmem:[#allocation3 + $0xc88] ss:$16 sps:$4 sm:$0xff]  }
0x18d4   :  { %13370 = vmatpush1.bf16.msra.mxu0 %v16893_v30  ;;  %13027 = vmatprep.subr.bf16.mxu1 %v16898_v19  ;;  %v16970_v30 = vld [vmem:[#allocation3 + $0xca4] ss:$16 sps:$4 sm:$0xff]   ;;  %v16973_v19 = vld [vmem:[#allocation3 + $0xcac] ss:$16 sps:$4 sm:$0xff]  }
0x18d5   :  { %13371 = vmatprep.subr.bf16.mxu0 %v16901_v43  ;;  %v16968_v43 = vld [vmem:[#allocation3 + $0xca0] ss:$16 sps:$4 sm:$0xff]  }
0x18d7   :  { %13028 = vmatpush1.bf16.msra.mxu1 %v16896_v59  ;;  %v16971_v59 = vld [vmem:[#allocation3 + $0xca8] ss:$16 sps:$4 sm:$0xff]  }
0x18d8   :  { %13372 = vmatpush1.bf16.msra.mxu0 %v16899_v44  ;;  %13029 = vmatprep.subr.bf16.mxu1 %v16904_v56  ;;  %v16976_v44 = vld [vmem:[#allocation3 + $0xcc4] ss:$16 sps:$4 sm:$0xff]   ;;  %v16979_v56 = vld [vmem:[#allocation3 + $0xccc] ss:$16 sps:$4 sm:$0xff]  }
0x18d9   :  { %13373 = vmatprep.subr.bf16.mxu0 %v16907_v3  ;;  %v16974_v3 = vld [vmem:[#allocation3 + $0xcc0] ss:$16 sps:$4 sm:$0xff]  }
0x18db   :  { %13030 = vmatpush1.bf16.msra.mxu1 %v16902_v50  ;;  %v16977_v50 = vld [vmem:[#allocation3 + $0xcc8] ss:$16 sps:$4 sm:$0xff]  }
0x18dc   :  { %13374 = vmatpush1.bf16.msra.mxu0 %v16905_v9  ;;  %13031 = vmatprep.subr.bf16.mxu1 %v16910_v49  ;;  %v16982_v9 = vld [vmem:[#allocation3 + $0xce4] ss:$16 sps:$4 sm:$0xff]   ;;  %v16985_v49 = vld [vmem:[#allocation3 + $0xcec] ss:$16 sps:$4 sm:$0xff]  }
0x18dd   :  { %13375 = vmatprep.subr.bf16.mxu0 %v16913_v31  ;;  %v16980_v31 = vld [vmem:[#allocation3 + $0xce0] ss:$16 sps:$4 sm:$0xff]  }
0x18df   :  { %13032 = vmatpush1.bf16.msra.mxu1 %v16908_v0  ;;  %v16983_v0 = vld [vmem:[#allocation3 + $0xce8] ss:$16 sps:$4 sm:$0xff]  }
0x18e0   :  { %13376 = vmatpush1.bf16.msra.mxu0 %v16911_v2  ;;  %13033 = vmatprep.subr.bf16.mxu1 %v16916_v58  ;;  %v16988_v2 = vld [vmem:[#allocation3 + $0xd04] ss:$16 sps:$4 sm:$0xff]   ;;  %v16991_v58 = vld [vmem:[#allocation3 + $0xd0c] ss:$16 sps:$4 sm:$0xff]  }
0x18e1   :  { %13377 = vmatprep.subr.bf16.mxu0 %v16919_v61  ;;  %v16986_v61 = vld [vmem:[#allocation3 + $0xd00] ss:$16 sps:$4 sm:$0xff]  }
0x18e3   :  { %13034 = vmatpush1.bf16.msra.mxu1 %v16914_v16  ;;  %v16989_v16 = vld [vmem:[#allocation3 + $0xd08] ss:$16 sps:$4 sm:$0xff]  }
0x18e4   :  { %13378 = vmatpush1.bf16.msra.mxu0 %v16917_v53  ;;  %13035 = vmatprep.subr.bf16.mxu1 %v16922_v18  ;;  %v16994_v53 = vld [vmem:[#allocation3 + $0xd24] ss:$16 sps:$4 sm:$0xff]   ;;  %v16997_v18 = vld [vmem:[#allocation3 + $0xd2c] ss:$16 sps:$4 sm:$0xff]  }
0x18e5   :  { %13379 = vmatprep.subr.bf16.mxu0 %v16925_v35  ;;  %v16992_v35 = vld [vmem:[#allocation3 + $0xd20] ss:$16 sps:$4 sm:$0xff]  }
0x18e7   :  { %13036 = vmatpush1.bf16.msra.mxu1 %v16920_v20  ;;  %v16995_v20 = vld [vmem:[#allocation3 + $0xd28] ss:$16 sps:$4 sm:$0xff]  }
0x18e8   :  { %13380 = vmatpush1.bf16.msra.mxu0 %v16923_v8  ;;  %13037 = vmatprep.subr.bf16.mxu1 %v16928_v36  ;;  %v17000_v8 = vld [vmem:[#allocation3 + $0xd44] ss:$16 sps:$4 sm:$0xff]   ;;  %v17003_v36 = vld [vmem:[#allocation3 + $0xd4c] ss:$16 sps:$4 sm:$0xff]  }
0x18e9   :  { %13381 = vmatprep.subr.bf16.mxu0 %v16931_v32  ;;  %v16998_v32 = vld [vmem:[#allocation3 + $0xd40] ss:$16 sps:$4 sm:$0xff]  }
0x18eb   :  { %13038 = vmatpush1.bf16.msra.mxu1 %v16926_v27  ;;  %v17001_v27 = vld [vmem:[#allocation3 + $0xd48] ss:$16 sps:$4 sm:$0xff]  }
0x18ec   :  { %13382 = vmatpush1.bf16.msra.mxu0 %v16929_v6  ;;  %13039 = vmatprep.subr.bf16.mxu1 %v16934_v47  ;;  %v17006_v6 = vld [vmem:[#allocation3 + $0xd64] ss:$16 sps:$4 sm:$0xff]   ;;  %v17009_v47 = vld [vmem:[#allocation3 + $0xd6c] ss:$16 sps:$4 sm:$0xff]  }
0x18ed   :  { %13383 = vmatprep.subr.bf16.mxu0 %v16937_v37  ;;  %v17004_v37 = vld [vmem:[#allocation3 + $0xd60] ss:$16 sps:$4 sm:$0xff]  }
0x18ef   :  { %13040 = vmatpush1.bf16.msra.mxu1 %v16932_v22  ;;  %v17007_v22 = vld [vmem:[#allocation3 + $0xd68] ss:$16 sps:$4 sm:$0xff]  }
0x18f0   :  { %13384 = vmatpush1.bf16.msra.mxu0 %v16935_v38  ;;  %13052 = vmatprep.subr.bf16.mxu1 %v16940_v33  ;;  %v17012_v38 = vld [vmem:[#allocation3 + $0xd84] ss:$16 sps:$4 sm:$0xff]   ;;  %v17015_v33 = vld [vmem:[#allocation3 + $0xd8c] ss:$16 sps:$4 sm:$0xff]  }
0x18f1   :  { %13396 = vmatprep.subr.bf16.mxu0 %v16943_v28  ;;  %v17010_v28 = vld [vmem:[#allocation3 + $0xd80] ss:$16 sps:$4 sm:$0xff]  }
0x18f2   :  { %13042 = vmatmul.mubr.bf16.vlgmr.msra.gmra.mrb[48].mxu1 %v21196_v13 }
0x18f3   :  { %13386 = vmatmul.mubr.bf16.vlgmr.msra.gmra.mrb[48].mxu0 %v21196_v13  ;;  %13053 = vmatpush1.bf16.msra.mxu1 %v16938_v48  ;;  %v16961_v13 = vld [vmem:[#allocation3 + $0xc6c] ss:$16 sps:$4 sm:$0xff]   ;;  %v17013_v48 = vld [vmem:[#allocation3 + $0xd88] ss:$16 sps:$4 sm:$0xff]  }
0x18f4   :  { %13084 = vmatprep.mubr.bf16.mxu1 %v21222_v42  ;;  %13397 = vmatpush1.bf16.msra.mxu0 %v16941_v46  ;;  %v17018_v46 = vld [vmem:[#allocation3 + $0xda4] ss:$16 sps:$4 sm:$0xff]  }
0x18f5   :  { %13428 = vmatprep.mubr.bf16.mxu0 %v21222_v42  ;;  %13054 = vmatprep.subr.bf16.mxu1 %v16946_v40  ;;  %v16962_v42 = vld [vmem:[#allocation3 + $0xc80] ss:$16 sps:$4 sm:$0xff]   ;;  %v17021_v40 = vld [vmem:[#allocation3 + $0xdac] ss:$16 sps:$4 sm:$0xff]  }
0x18f6   :  { %13398 = vmatprep.subr.bf16.mxu0 %v16949_v14  ;;  %v17016_v14 = vld [vmem:[#allocation3 + $0xda0] ss:$16 sps:$4 sm:$0xff]  }
0x18f7   :  { %13055 = vmatpush1.bf16.msra.mxu1 %v16944_v34  ;;  %v17019_v34 = vld [vmem:[#allocation3 + $0xda8] ss:$16 sps:$4 sm:$0xff]  }
0x18f8   :  { %13399 = vmatpush1.bf16.msra.mxu0 %v16947_v54  ;;  %13056 = vmatprep.subr.bf16.mxu1 %v16952_v21  ;;  %v17024_v54 = vld [vmem:[#allocation3 + $0xdc4] ss:$16 sps:$4 sm:$0xff]   ;;  %v17027_v21 = vld [vmem:[#allocation3 + $0xdcc] ss:$16 sps:$4 sm:$0xff]  }
0x18f9   :  { %13400 = vmatprep.subr.bf16.mxu0 %v16955_v45  ;;  %v17022_v45 = vld [vmem:[#allocation3 + $0xdc0] ss:$16 sps:$4 sm:$0xff]  }
0x18fb   :  { %13057 = vmatpush1.bf16.msra.mxu1 %v16950_v52  ;;  %v17025_v52 = vld [vmem:[#allocation3 + $0xdc8] ss:$16 sps:$4 sm:$0xff]  }
0x18fc   :  { %13401 = vmatpush1.bf16.msra.mxu0 %v16953_v39  ;;  %13058 = vmatprep.subr.bf16.mxu1 %v16958_v5  ;;  %v17030_v39 = vld [vmem:[#allocation3 + $0xde4] ss:$16 sps:$4 sm:$0xff]   ;;  %v17033_v5 = vld [vmem:[#allocation3 + $0xdec] ss:$16 sps:$4 sm:$0xff]  }
0x18fd   :  { %13402 = vmatprep.subr.bf16.mxu0 %v16961_v13  ;;  %v17028_v13 = vld [vmem:[#allocation3 + $0xde0] ss:$16 sps:$4 sm:$0xff]  }
0x18ff   :  { %13059 = vmatpush1.bf16.msra.mxu1 %v16956_v15  ;;  %v17031_v15 = vld [vmem:[#allocation3 + $0xde8] ss:$16 sps:$4 sm:$0xff]  }
0x1900   :  { %13403 = vmatpush1.bf16.msra.mxu0 %v16959_v1  ;;  %13060 = vmatprep.subr.bf16.mxu1 %v16964_v23  ;;  %v17036_v1 = vld [vmem:[#allocation3 + $0xe04] ss:$16 sps:$4 sm:$0xff]   ;;  %v17039_v23 = vld [vmem:[#allocation3 + $0xe0c] ss:$16 sps:$4 sm:$0xff]  }
0x1901   :  { %13404 = vmatprep.subr.bf16.mxu0 %v16967_v55  ;;  %v17034_v55 = vld [vmem:[#allocation3 + $0xe00] ss:$16 sps:$4 sm:$0xff]  }
0x1903   :  { %13061 = vmatpush1.bf16.msra.mxu1 %v16962_v42  ;;  %v17037_v42 = vld [vmem:[#allocation3 + $0xe08] ss:$16 sps:$4 sm:$0xff]  }
0x1904   :  { %13405 = vmatpush1.bf16.msra.mxu0 %v16965_v11  ;;  %13062 = vmatprep.subr.bf16.mxu1 %v16970_v30  ;;  %v17042_v11 = vld [vmem:[#allocation3 + $0xe24] ss:$16 sps:$4 sm:$0xff]   ;;  %v17045_v30 = vld [vmem:[#allocation3 + $0xe2c] ss:$16 sps:$4 sm:$0xff]  }
0x1905   :  { %13406 = vmatprep.subr.bf16.mxu0 %v16973_v19  ;;  %v17040_v19 = vld [vmem:[#allocation3 + $0xe20] ss:$16 sps:$4 sm:$0xff]  }
0x1907   :  { %13063 = vmatpush1.bf16.msra.mxu1 %v16968_v43  ;;  %v17043_v43 = vld [vmem:[#allocation3 + $0xe28] ss:$16 sps:$4 sm:$0xff]  }
0x1908   :  { %13407 = vmatpush1.bf16.msra.mxu0 %v16971_v59  ;;  %13064 = vmatprep.subr.bf16.mxu1 %v16976_v44  ;;  %v17048_v59 = vld [vmem:[#allocation3 + $0xe44] ss:$16 sps:$4 sm:$0xff]   ;;  %v17051_v44 = vld [vmem:[#allocation3 + $0xe4c] ss:$16 sps:$4 sm:$0xff]  }
0x1909   :  { %13408 = vmatprep.subr.bf16.mxu0 %v16979_v56  ;;  %v17046_v56 = vld [vmem:[#allocation3 + $0xe40] ss:$16 sps:$4 sm:$0xff]  }
0x190b   :  { %13065 = vmatpush1.bf16.msra.mxu1 %v16974_v3  ;;  %v17049_v3 = vld [vmem:[#allocation3 + $0xe48] ss:$16 sps:$4 sm:$0xff]  }
0x190c   :  { %13409 = vmatpush1.bf16.msra.mxu0 %v16977_v50  ;;  %13066 = vmatprep.subr.bf16.mxu1 %v16982_v9  ;;  %v17054_v50 = vld [vmem:[#allocation3 + $0xe64] ss:$16 sps:$4 sm:$0xff]   ;;  %v17052_v9 = vld [vmem:[#allocation3 + $0xe60] ss:$16 sps:$4 sm:$0xff]  }
0x190d   :  { %13410 = vmatprep.subr.bf16.mxu0 %v16985_v49  ;;  %v17055_v49 = vld [vmem:[#allocation3 + $0xe68] ss:$16 sps:$4 sm:$0xff]  }
0x190f   :  { %13067 = vmatpush1.bf16.msra.mxu1 %v16980_v31  ;;  %v17060_v31 = vld [vmem:[#allocation3 + $0xe84] ss:$16 sps:$4 sm:$0xff]  }
0x1910   :  { %13411 = vmatpush1.bf16.msra.mxu0 %v16983_v0  ;;  %13068 = vmatprep.subr.bf16.mxu1 %v16988_v2  ;;  %v17063_v0 = vld [vmem:[#allocation3 + $0xe8c] ss:$16 sps:$4 sm:$0xff]   ;;  %v17061_v2 = vld [vmem:[#allocation3 + $0xe88] ss:$16 sps:$4 sm:$0xff]  }
0x1911   :  { %13412 = vmatprep.subr.bf16.mxu0 %v16991_v58  ;;  %v17066_v58 = vld [vmem:[#allocation3 + $0xea4] ss:$16 sps:$4 sm:$0xff]  }
0x1913   :  { %13069 = vmatpush1.bf16.msra.mxu1 %v16986_v61  ;;  %v17069_v61 = vld [vmem:[#allocation3 + $0xeac] ss:$16 sps:$4 sm:$0xff]  }
0x1914   :  { %13413 = vmatpush1.bf16.msra.mxu0 %v16989_v16  ;;  %13070 = vmatprep.subr.bf16.mxu1 %v16994_v53  ;;  %v17064_v16 = vld [vmem:[#allocation3 + $0xea0] ss:$16 sps:$4 sm:$0xff]   ;;  %v17067_v53 = vld [vmem:[#allocation3 + $0xea8] ss:$16 sps:$4 sm:$0xff]  }
0x1915   :  { %13414 = vmatprep.subr.bf16.mxu0 %v16997_v18  ;;  %v17072_v18 = vld [vmem:[#allocation3 + $0xec4] ss:$16 sps:$4 sm:$0xff]  }
0x1917   :  { %13071 = vmatpush1.bf16.msra.mxu1 %v16992_v35  ;;  %v17075_v35 = vld [vmem:[#allocation3 + $0xecc] ss:$16 sps:$4 sm:$0xff]  }
0x1918   :  { %13415 = vmatpush1.bf16.msra.mxu0 %v16995_v20  ;;  %13072 = vmatprep.subr.bf16.mxu1 %v17000_v8  ;;  %v17070_v20 = vld [vmem:[#allocation3 + $0xec0] ss:$16 sps:$4 sm:$0xff]   ;;  %v17073_v8 = vld [vmem:[#allocation3 + $0xec8] ss:$16 sps:$4 sm:$0xff]  }
0x1919   :  { %13416 = vmatprep.subr.bf16.mxu0 %v17003_v36  ;;  %v17078_v36 = vld [vmem:[#allocation3 + $0xee4] ss:$16 sps:$4 sm:$0xff]  }
0x191b   :  { %13073 = vmatpush1.bf16.msra.mxu1 %v16998_v32  ;;  %v17081_v32 = vld [vmem:[#allocation3 + $0xeec] ss:$16 sps:$4 sm:$0xff]  }
0x191c   :  { %13417 = vmatpush1.bf16.msra.mxu0 %v17001_v27  ;;  %13074 = vmatprep.subr.bf16.mxu1 %v17006_v6  ;;  %v17076_v27 = vld [vmem:[#allocation3 + $0xee0] ss:$16 sps:$4 sm:$0xff]   ;;  %v17079_v6 = vld [vmem:[#allocation3 + $0xee8] ss:$16 sps:$4 sm:$0xff]  }
0x191d   :  { %13418 = vmatprep.subr.bf16.mxu0 %v17009_v47  ;;  %v17084_v47 = vld [vmem:[#allocation3 + $0xf04] ss:$16 sps:$4 sm:$0xff]  }
0x191f   :  { %13075 = vmatpush1.bf16.msra.mxu1 %v17004_v37  ;;  %v17087_v37 = vld [vmem:[#allocation3 + $0xf0c] ss:$16 sps:$4 sm:$0xff]  }
0x1920   :  { %13419 = vmatpush1.bf16.msra.mxu0 %v17007_v22  ;;  %13076 = vmatprep.subr.bf16.mxu1 %v17012_v38  ;;  %v17082_v22 = vld [vmem:[#allocation3 + $0xf00] ss:$16 sps:$4 sm:$0xff]   ;;  %v17085_v38 = vld [vmem:[#allocation3 + $0xf08] ss:$16 sps:$4 sm:$0xff]  }
0x1921   :  { %13420 = vmatprep.subr.bf16.mxu0 %v17015_v33  ;;  %v17090_v33 = vld [vmem:[#allocation3 + $0xf24] ss:$16 sps:$4 sm:$0xff]  }
0x1923   :  { %13077 = vmatpush1.bf16.msra.mxu1 %v17010_v28  ;;  %v17093_v28 = vld [vmem:[#allocation3 + $0xf2c] ss:$16 sps:$4 sm:$0xff]  }
0x1924   :  { %13421 = vmatpush1.bf16.msra.mxu0 %v17013_v48  ;;  %13078 = vmatprep.subr.bf16.mxu1 %v17018_v46  ;;  %v17088_v48 = vld [vmem:[#allocation3 + $0xf20] ss:$16 sps:$4 sm:$0xff]   ;;  %v17091_v46 = vld [vmem:[#allocation3 + $0xf28] ss:$16 sps:$4 sm:$0xff]  }
0x1925   :  { %13422 = vmatprep.subr.bf16.mxu0 %v17021_v40  ;;  %v17096_v40 = vld [vmem:[#allocation3 + $0xf44] ss:$16 sps:$4 sm:$0xff]  }
0x1927   :  { %13079 = vmatpush1.bf16.msra.mxu1 %v17016_v14  ;;  %v17099_v14 = vld [vmem:[#allocation3 + $0xf4c] ss:$16 sps:$4 sm:$0xff]  }
0x1928   :  { %13423 = vmatpush1.bf16.msra.mxu0 %v17019_v34  ;;  %13080 = vmatprep.subr.bf16.mxu1 %v17024_v54  ;;  %v17094_v34 = vld [vmem:[#allocation3 + $0xf40] ss:$16 sps:$4 sm:$0xff]   ;;  %v17097_v54 = vld [vmem:[#allocation3 + $0xf48] ss:$16 sps:$4 sm:$0xff]  }
0x1929   :  { %13424 = vmatprep.subr.bf16.mxu0 %v17027_v21  ;;  %v17102_v21 = vld [vmem:[#allocation3 + $0xf64] ss:$16 sps:$4 sm:$0xff]  }
0x192b   :  { %13081 = vmatpush1.bf16.msra.mxu1 %v17022_v45  ;;  %v17105_v45 = vld [vmem:[#allocation3 + $0xf6c] ss:$16 sps:$4 sm:$0xff]  }
0x192c   :  { %13425 = vmatpush1.bf16.msra.mxu0 %v17025_v52  ;;  %13082 = vmatprep.subr.bf16.mxu1 %v17030_v39  ;;  %v17100_v52 = vld [vmem:[#allocation3 + $0xf60] ss:$16 sps:$4 sm:$0xff]   ;;  %v17103_v39 = vld [vmem:[#allocation3 + $0xf68] ss:$16 sps:$4 sm:$0xff]  }
0x192d   :  { %13426 = vmatprep.subr.bf16.mxu0 %v17033_v5  ;;  %v17108_v5 = vld [vmem:[#allocation3 + $0xf84] ss:$16 sps:$4 sm:$0xff]  }
0x192f   :  { %13083 = vmatpush1.bf16.msra.mxu1 %v17028_v13  ;;  %v17111_v13 = vld [vmem:[#allocation3 + $0xf8c] ss:$16 sps:$4 sm:$0xff]  }
0x1930   :  { %13427 = vmatpush1.bf16.msra.mxu0 %v17031_v15  ;;  %13095 = vmatprep.subr.bf16.mxu1 %v17036_v1  ;;  %v17106_v15 = vld [vmem:[#allocation3 + $0xf80] ss:$16 sps:$4 sm:$0xff]   ;;  %v17109_v1 = vld [vmem:[#allocation3 + $0xf88] ss:$16 sps:$4 sm:$0xff]  }
0x1931   :  { %13439 = vmatprep.subr.bf16.mxu0 %v17039_v23  ;;  %v17114_v23 = vld [vmem:[#allocation3 + $0xfa4] ss:$16 sps:$4 sm:$0xff]  }
0x1932   :  { %13085 = vmatmul.mubr.bf16.vlgmr.msra.gmra.mrb[48].mxu1 %v21218_v25 }
0x1933   :  { %13429 = vmatmul.mubr.bf16.vlgmr.msra.gmra.mrb[48].mxu0 %v21218_v25  ;;  %13096 = vmatpush1.bf16.msra.mxu1 %v17034_v55  ;;  %v17057_v25 = vld [vmem:[#allocation3 + $0xe6c] ss:$16 sps:$4 sm:$0xff]  }
0x1934   :  { %13127 = vmatprep.mubr.bf16.mxu1 %v21224_v24  ;;  %13440 = vmatpush1.bf16.msra.mxu0 %v17037_v42  ;;  %v17117_v55 = vld [vmem:[#allocation3 + $0xfac] ss:$16 sps:$4 sm:$0xff]   ;;  %v17112_v42 = vld [vmem:[#allocation3 + $0xfa0] ss:$16 sps:$4 sm:$0xff]  }
0x1935   :  { %13471 = vmatprep.mubr.bf16.mxu0 %v21224_v24  ;;  %13097 = vmatprep.subr.bf16.mxu1 %v17042_v11  ;;  %v17058_v24 = vld [vmem:[#allocation3 + $0xe80] ss:$16 sps:$4 sm:$0xff]   ;;  %v17115_v11 = vld [vmem:[#allocation3 + $0xfa8] ss:$16 sps:$4 sm:$0xff]  }
0x1936   :  { %13441 = vmatprep.subr.bf16.mxu0 %v17045_v30  ;;  %v17120_v30 = vld [vmem:[#allocation3 + $0xfc4] ss:$16 sps:$4 sm:$0xff]  }
0x1937   :  { %13098 = vmatpush1.bf16.msra.mxu1 %v17040_v19  ;;  %v17123_v19 = vld [vmem:[#allocation3 + $0xfcc] ss:$16 sps:$4 sm:$0xff]  }
0x1938   :  { %13442 = vmatpush1.bf16.msra.mxu0 %v17043_v43  ;;  %13099 = vmatprep.subr.bf16.mxu1 %v17048_v59  ;;  %v17118_v43 = vld [vmem:[#allocation3 + $0xfc0] ss:$16 sps:$4 sm:$0xff]   ;;  %v17121_v59 = vld [vmem:[#allocation3 + $0xfc8] ss:$16 sps:$4 sm:$0xff]  }
0x1939   :  { %13443 = vmatprep.subr.bf16.mxu0 %v17051_v44  ;;  %v17126_v44 = vld [vmem:[#allocation3 + $0xfe4] ss:$16 sps:$4 sm:$0xff]  }
0x193b   :  { %13100 = vmatpush1.bf16.msra.mxu1 %v17046_v56  ;;  %v17129_v56 = vld [vmem:[#allocation3 + $0xfec] ss:$16 sps:$4 sm:$0xff]  }
0x193c   :  { %13444 = vmatpush1.bf16.msra.mxu0 %v17049_v3  ;;  %13101 = vmatprep.subr.bf16.mxu1 %v17054_v50  ;;  %v17124_v3 = vld [vmem:[#allocation3 + $0xfe0] ss:$16 sps:$4 sm:$0xff]   ;;  %v17127_v50 = vld [vmem:[#allocation3 + $0xfe8] ss:$16 sps:$4 sm:$0xff]  }
0x193d   :  { %13445 = vmatprep.subr.bf16.mxu0 %v17057_v25  ;;  %v10212_v25 = vld [vmem:[%s21284_s13] sm:$0xf]  ;;  %s17266_s13 = smov [#allocation6]  }
0x193e   :  { %s13503_s9 = sshll.u32 %s17266_s13, 4  ;;  %s13504_s9 = int_to_ptr.vmem [resolvable:$true] %s13503_s9 }
0x193f   :  { %13102 = vmatpush1.bf16.msra.mxu1 %v17052_v9  ;;  %v10217_v9 = vrot.slane %v10212_v25, %v17653_v62  ;;  %s17236_s24 = scalar_lea.vmem %s13504_s9, 1024  ;;  %p17241_p9 = scmp.lt.s32.totalorder %s13504_s9, %s13504_s9 }
0x1940   :  { %13446 = vmatpush1.bf16.msra.mxu0 %v17055_v49  ;;  %13103 = vmatprep.subr.bf16.mxu1 %v17060_v31  ;;  %v10225_v49 = vrot.slane %v10212_v25, %v17641_v57  ;;  %v10221_v31 = vrot.slane %v10212_v25, %v17647_v60  ;;  %p17237_p8 = scmp.ne.s32.totalorder %s13504_s9, %s17236_s24  ;;  %p17242_p10 = scmp.lt.s32.totalorder %s17236_s24, %s17236_s24 }
0x1941   :  { %13447 = vmatprep.subr.bf16.mxu0 %v17063_v0  ;;  %v10229_v0 = vrot.slane %v10212_v25, %v17658_v4 }
0x1942   :  { %p17243_p11 = por %p17242_p10, %p17241_p9 }
0x1943   :  { %13104 = vmatpush1.bf16.msra.mxu1 %v17058_v24 }
0x1944   :  { %13448 = vmatpush1.bf16.msra.mxu0 %v17061_v2  ;;  %13105 = vmatprep.subr.bf16.mxu1 %v17066_v58  ;;  %p17244_p12 = pnand %p17243_p11, %p17237_p8 }
0x1945   :  { %13449 = vmatprep.subr.bf16.mxu0 %v17069_v61 }
0x1947   :  { %13106 = vmatpush1.bf16.msra.mxu1 %v17064_v16 }
0x1948   :  { %13450 = vmatpush1.bf16.msra.mxu0 %v17067_v53  ;;  %13107 = vmatprep.subr.bf16.mxu1 %v17072_v18 }
0x1949   :  { %13451 = vmatprep.subr.bf16.mxu0 %v17075_v35 }
0x194b   :  { %13108 = vmatpush1.bf16.msra.mxu1 %v17070_v20 }
0x194c   :  { %13452 = vmatpush1.bf16.msra.mxu0 %v17073_v8  ;;  %13109 = vmatprep.subr.bf16.mxu1 %v17078_v36 }
0x194d   :  { %13453 = vmatprep.subr.bf16.mxu0 %v17081_v32 }
0x194f   :  { %13110 = vmatpush1.bf16.msra.mxu1 %v17076_v27 }
0x1950   :  { %13454 = vmatpush1.bf16.msra.mxu0 %v17079_v6  ;;  %13111 = vmatprep.subr.bf16.mxu1 %v17084_v47 }
0x1951   :  { %13455 = vmatprep.subr.bf16.mxu0 %v17087_v37 }
0x1953   :  { %13112 = vmatpush1.bf16.msra.mxu1 %v17082_v22 }
0x1954   :  { %13456 = vmatpush1.bf16.msra.mxu0 %v17085_v38  ;;  %13113 = vmatprep.subr.bf16.mxu1 %v17090_v33 }
0x1955   :  { %13457 = vmatprep.subr.bf16.mxu0 %v17093_v28 }
0x1957   :  { %13114 = vmatpush1.bf16.msra.mxu1 %v17088_v48 }
0x1958   :  { %13458 = vmatpush1.bf16.msra.mxu0 %v17091_v46  ;;  %13115 = vmatprep.subr.bf16.mxu1 %v17096_v40 }
0x1959   :  { %13459 = vmatprep.subr.bf16.mxu0 %v17099_v14 }
0x195b   :  { %13116 = vmatpush1.bf16.msra.mxu1 %v17094_v34 }
0x195c   :  { %13460 = vmatpush1.bf16.msra.mxu0 %v17097_v54  ;;  %13117 = vmatprep.subr.bf16.mxu1 %v17102_v21 }
0x195d   :  { %13461 = vmatprep.subr.bf16.mxu0 %v17105_v45 }
0x195f   :  { %13118 = vmatpush1.bf16.msra.mxu1 %v17100_v52 }
0x1960   :  { %13462 = vmatpush1.bf16.msra.mxu0 %v17103_v39  ;;  %13119 = vmatprep.subr.bf16.mxu1 %v17108_v5 }
0x1961   :  { %13463 = vmatprep.subr.bf16.mxu0 %v17111_v13 }
0x1963   :  { %13120 = vmatpush1.bf16.msra.mxu1 %v17106_v15 }
0x1964   :  { %13464 = vmatpush1.bf16.msra.mxu0 %v17109_v1  ;;  %13121 = vmatprep.subr.bf16.mxu1 %v17114_v23 }
0x1965   :  { %13465 = vmatprep.subr.bf16.mxu0 %v17117_v55 }
0x1967   :  { %13122 = vmatpush1.bf16.msra.mxu1 %v17112_v42 }
0x1968   :  { %13466 = vmatpush1.bf16.msra.mxu0 %v17115_v11  ;;  %13123 = vmatprep.subr.bf16.mxu1 %v17120_v30 }
0x1969   :  { %13467 = vmatprep.subr.bf16.mxu0 %v17123_v19 }
0x196b   :  { %13124 = vmatpush1.bf16.msra.mxu1 %v17118_v43 }
0x196c   :  { %13468 = vmatpush1.bf16.msra.mxu0 %v17121_v59  ;;  %13125 = vmatprep.subr.bf16.mxu1 %v17126_v44 }
0x196d   :  { %13469 = vmatprep.subr.bf16.mxu0 %v17129_v56 }
0x196f   :  { %13126 = vmatpush1.bf16.msra.mxu1 %v17124_v3 }
0x1970   :  { %13470 = vmatpush1.bf16.msra.mxu0 %v17127_v50 }
0x1972   :  { %13128 = vmatmul.mubr.bf16.vlgmr.msra.gmra.mrb[48].mxu1 %v21220_v26 }
0x1973   :  { %13472 = vmatmul.mubr.bf16.vlgmr.msra.gmra.mrb[48].mxu0 %v21220_v26 }
0x1a45   :  { %v13129_v24 = vpop.f32.mrb[48].mxu1 }
0x1a46   :  { %v15419_v2 = vadd.f32 %v13129_v24, %v10217_v9  ;;  %v13473_v58 = vpop.f32.mrb[48].mxu0  ;;  %v13131_v61 = vpop.f32.mrb[49].mxu1 }
0x1a47   :  { %v15423_v16 = vadd.f32 %v13473_v58, %v10225_v49  ;;  %v15420_v53 = vadd.f32 %v13131_v61, %v10221_v31  ;;  %v13475_v18 = vpop.f32.mrb[49].mxu0  ;;  %v13133_v26 = vpop.f32.mrb[50].mxu1 }
0x1a48   :  { %v13482_v35 = vadd.f32 %v15419_v2, %v19433_v51  ;;  %v15424_v20 = vadd.f32 %v13475_v18, %v10229_v0  ;;  %v15421_v8 = vadd.f32 %v13133_v26, %v10217_v9  ;;  %v13477_v36 = vpop.f32.mrb[50].mxu0  ;;  %v13135_v62 = vpop.f32.mrb[51].mxu1 }
0x1a49   :  { %v13484_v57 = vadd.f32 %v15423_v16, %v19448_v7  ;;  %v13483_v60 = vadd.f32 %v15420_v53, %v19438_v63  ;;  %v15425_v32 = vadd.f32 %v13477_v36, %v10225_v49  ;;  %v15422_v4 = vadd.f32 %v13135_v62, %v10221_v31  ;;  %v13479_v27 = vpop.f32.mrb[51].mxu0 }
0x1a4a   :  { %13490 = vst [vmem:[#allocation6] sm:$0xff] %v13482_v35  ;;  %v13485_v6 = vadd.f32 %v15424_v20, %v19460_v17  ;;  %v13486_v47 = vadd.f32 %v15421_v8, %v19443_v12  ;;  %v15426_v37 = vadd.f32 %v13479_v27, %v10229_v0 }
0x1a4b   :  { %13492 = vst [vmem:[#allocation6 + $0x10] sm:$0xff] %v13484_v57  ;;  %13491 = vst [vmem:[#allocation6 + $0x8] sm:$0xff] %v13483_v60  ;;  %v13488_v51 = vadd.f32 %v15425_v32, %v19465_v29  ;;  %v13487_v22 = vadd.f32 %v15422_v4, %v19453_v10 }
0x1a4c   :  { %13493 = vst [vmem:[#allocation6 + $0x18] sm:$0xff] %v13485_v6  ;;  %13494 = vst [vmem:[#allocation6 + $0x20] sm:$0xff] %v13486_v47  ;;  %v13489_v63 = vadd.f32 %v15426_v37, %v19473_v41 }
0x1a4d   :  { %13496 = vst [vmem:[#allocation6 + $0x30] sm:$0xff] %v13488_v51  ;;  %13495 = vst [vmem:[#allocation6 + $0x28] sm:$0xff] %v13487_v22 }
0x1a4e   :  { %13497 = vst [vmem:[#allocation6 + $0x38] sm:$0xff] %v13489_v63 }
0x1a4f   :  { %17247 = shalt.err (!%p17244_p12)
}
0x1a50   :  { %s17248_s27 = scalar_lea.hbm %s21285_s14, 1024 }
0x1a51   :  { %p17249_p13 = scmp.ne.s32.totalorder %s21285_s14, %s17248_s27  ;;  %p17252_p0 = scmp.lt.u32.totalorder %s17248_s27, %s21285_s14 }
0x1a53   :  { %p17254_p1 = pnand %p17252_p0, %p17249_p13 }
0x1a55   :  { %17257 = shalt.err (!%p17254_p1)
}
0x1a56   :  { %s17267_s5 = smov 512   ;;  %s17268_s17 = smov 32  }
0x1a57   :  { %13509 = dma.vmem_to_hbm [thread:$0]  %s13504_s9, 1024, %s21285_s14, [#allocation5], %s17267_s5, %s17267_s5, %s17268_s17  }
0x1a58   :  { %17260 = dma.done.wait [#allocation5], 1024  }
0x1a59   :  { %17261 = vsyncadd [#allocation5], 4294966272 }
0x1a5a   :  { %13513 = vsyncpa [#allocation4], 1 }
0x1a5b   :  { %13514 = vsyncpa [#allocation5], 1 }

</bundles_post_ra>
